<compile_context>
chip_gen: v5e
topology: v5e:2x2
jax: 0.10.0
libtpu: 0.0.40
codegen_flags: <defaults>
</compile_context>

<pallas_src>
import jax
import jax.numpy as jnp
import numpy as np
from jax.experimental import pallas as pl
from jax.experimental.pallas import tpu as pltpu


# MXU operand dtype for the conv dots.  f32 keeps the kernel bit-faithful to
# the f32 PyTorch module (passes the 1e-3 check below).  On v6e/v7x flip to
# jnp.bfloat16 for ~2x MXU rate and half the slice-copy bytes (accumulation
# stays f32 via preferred_element_type; re-verify tolerance when flipping).
# The BN scale/shift + ReLU + sigmoid epilogue is always f32 (v5e has no bf16
# VPU/EUP path).
CONV_MXU_DTYPE = jnp.float32


# ------------------------------ fused kernel --------------------------------

def _make_decoder_kernel(layer_shapes, H, W, B, img_c, c_c, msg_len):
    """Fully fused decoder kernel for one batch tile of B images.

    Ref layout:
      refs[0]            image tile  (B, img_c, Hp*Wp)  f32 (pre zero-padded)
      refs[1]            c tile      (B, c_c, 1)        f32
      refs[2]            mask        (1, B*Hp*Wp)       f32 (1 inside HxW, 0 pad)
      refs[3]            pool matrix (B*Hp*Wp, B)       f32 (per-image 1/(H*W))
      refs[4 : 4+3L]     per layer:  w9 (9, cout, cin) [MXU dtype],
                                     scale (cout, 1) f32, shift (cout, 1) f32
      refs[4+3L]         lin_w       (msg_len, msg_len) f32   (out, in)
      refs[5+3L]         lin_b       (msg_len, 1)       f32
      refs[6+3L]         output      (1, msg_len, B)    f32
    """
    n_layers = len(layer_shapes)
    Hp, Wp = H + 2, W + 2
    Sp = Hp * Wp
    Stot = B * Sp
    Mrg = Wp + 1            # zero margin so every 3x3 tap is a contiguous slice

    def kernel(*refs):
        x_ref, c_ref, mask_ref, pool_ref = refs[0:4]
        layer_refs = refs[4:4 + 3 * n_layers]
        lin_w_ref = refs[4 + 3 * n_layers]
        lin_b_ref = refs[5 + 3 * n_layers]
        o_ref = refs[6 + 3 * n_layers]

        mask = mask_ref[...]                                   # (1, Stot)

        # ---- layer-0 input assembly (channels-first, spatial on lanes) -----
        # Image channels come pre zero-padded; the c channels are a per-image
        # constant broadcast (F.interpolate of a 1x1 map) masked to the
        # interior so the pad ring stays exactly zero.
        img_cols = [x_ref[b] for b in range(B)]                # each (img_c, Sp)
        c_cols = [c_ref[b] * mask[:, b * Sp:(b + 1) * Sp] for b in range(B)]
        x = jnp.concatenate(
            [jnp.concatenate(img_cols, axis=1),
             jnp.concatenate(c_cols, axis=1)], axis=0)         # (img_c+c_c, Stot)

        for li, (cin, cout) in enumerate(layer_shapes):
            w_ref = layer_refs[3 * li]                         # (9, cout, cin)
            scale_ref = layer_refs[3 * li + 1]                 # (cout, 1)
            shift_ref = layer_refs[3 * li + 2]                 # (cout, 1)

            # Small zero margin on both ends: with it, every 3x3 tap becomes a
            # contiguous lane slice of the flattened padded activation.  Reads
            # feeding valid pixels never cross image boundaries; the junk that
            # lands on pad-ring columns is finite and masked away below.
            zpad = jnp.zeros((cin, Mrg), CONV_MXU_DTYPE)
            xpad = jnp.concatenate([zpad, x.astype(CONV_MXU_DTYPE), zpad],
                                   axis=1)                     # (cin, Stot+2*Mrg)

            # 3x3 conv = 9 accumulating K=cin MXU dots (no im2col concat).
            acc = None
            for ky in range(3):
                for kx in range(3):
                    off = ky * Wp + kx                         # static slice start
                    tap = jnp.dot(w_ref[ky * 3 + kx],
                                  xpad[:, off:off + Stot],
                                  preferred_element_type=jnp.float32)
                    acc = tap if acc is None else acc + tap    # (cout, Stot) f32

            # Folded BatchNorm(eval)+bias affine, ReLU, and interior mask
            # (keeps the zero-pad ring exactly 0 for the next layer / pooling).
            y = jnp.maximum(acc * scale_ref[...] + shift_ref[...], 0.0) * mask

            if li + 1 < n_layers:
                x = y                                          # stays in VMEM
            else:
                # Fused head: AdaptiveAvgPool2d((1,1)) as one MXU dot against
                # the per-image pooling matrix, then Linear + Sigmoid, all in
                # the channels-first orientation (no in-kernel transpose).
                pooled = jnp.dot(y, pool_ref[...],
                                 preferred_element_type=jnp.float32)  # (msg, B)
                logits = jnp.dot(lin_w_ref[...], pooled,
                                 preferred_element_type=jnp.float32)
                logits = logits + lin_b_ref[...]
                o_ref[0] = jax.nn.sigmoid(logits)              # (msg_len, B)

    return kernel


# ------------------------------ parameter setup ------------------------------

def init_params(key, in_channels, decoder_channels, decoder_blocks,
                message_length):
    """Deterministic synthetic parameters.

    Conv weights are stored as per-tap matrices (9, cout, cin) with tap index
    ky*3 + kx, matching the in-kernel shifted-slice dots.  BN (eval mode) is
    folded with the conv bias into a per-channel scale/shift.
    """
    dims = ([in_channels] + [decoder_channels] * decoder_blocks
            + [message_length])
    eps = 1e-5
    params = []
    for i in range(len(dims) - 1):
        cin, cout = dims[i], dims[i + 1]
        key, k1, k2, k3, k4, k5, k6 = jax.random.split(key, 7)
        w = 0.1 * jax.random.normal(k1, (cout, cin, 3, 3), jnp.float32)  # OIHW
        b = 0.1 * jax.random.normal(k2, (cout,), jnp.float32)
        gamma = 1.0 + 0.1 * jax.random.normal(k3, (cout,), jnp.float32)
        beta = 0.1 * jax.random.normal(k4, (cout,), jnp.float32)
        mean = 0.1 * jax.random.normal(k5, (cout,), jnp.float32)
        var = jnp.abs(jax.random.normal(k6, (cout,), jnp.float32)) + 0.5
        scale = gamma / jnp.sqrt(var + eps)
        shift = (b - mean) * scale + beta
        w9 = jnp.transpose(w, (2, 3, 0, 1)).reshape(9, cout, cin)  # (tap, co, ci)
        params.append((w9, scale.reshape(cout, 1), shift.reshape(cout, 1)))
    key, k1, k2 = jax.random.split(key, 3)
    lin_w = 0.3 * jax.random.normal(
        k1, (message_length, message_length), jnp.float32)          # (out, in)
    lin_b = 0.1 * jax.random.normal(k2, (message_length,), jnp.float32)
    return params, lin_w, lin_b


# --------------------------------- forward -----------------------------------

def decoder_forward(image_nchw, c, params, lin_w, lin_b, *, batch_block=8):
    """Single fused pallas_call over batch tiles of `batch_block` images."""
    N, img_c, H, W = image_nchw.shape
    c_c = c.shape[1]
    msg_len = lin_b.shape[0]
    Hp, Wp = H + 2, W + 2
    Sp = Hp * Wp

    layer_shapes = [(w9.shape[2], w9.shape[1]) for (w9, _, _) in params]
    assert layer_shapes[0][0] == img_c + c_c, "first conv expects image+c chans"

    # Batch tile size.  8 is safe for v5e's 16 MiB scoped VMEM default; raise
    # to 16-32 on v6e/v7x (re-derive against v7x's 64 MiB physical VMEM).
    B = min(batch_block, N)
    G = -(-N // B)                       # ceil(N / B) grid steps
    Npad = G * B
    if Npad != N:
        image_nchw = jnp.pad(image_nchw,
                             ((0, Npad - N), (0, 0), (0, 0), (0, 0)))
        c = jnp.pad(c, ((0, Npad - N), (0, 0)))

    Stot = B * Sp                        # flattened padded spatial of one tile

    # SAME zero-padding of the tiny 3-channel input once, XLA-side; the reshape
    # to (N, C, Hp*Wp) is free.  No NCHW->NHWC transpose.
    x_flat = jnp.pad(image_nchw, ((0, 0), (0, 0), (1, 1), (1, 1))).reshape(
        Npad, img_c, Sp)
    c3 = c.reshape(Npad, c_c, 1)

    # Interior mask (1 at the HxW valid pixels of each image, 0 on the pad
    # ring) and the avg-pool matrix (column b averages image b's pixels).
    j = np.arange(Stot)
    row = (j % Sp) // Wp
    col = j % Wp
    mask_np = (row >= 1) & (row <= H) & (col >= 1) & (col <= W)
    mask = jnp.asarray(mask_np.astype(np.float32).reshape(1, Stot))
    pool_np = np.zeros((Stot, B), np.float32)
    pool_np[j, j // Sp] = 1.0 / float(H * W)
    pool_mat = jnp.asarray(pool_np)

    kernel = _make_decoder_kernel(layer_shapes, H, W, B, img_c, c_c, msg_len)

    # Constant index maps => Pallas only DMAs these once across the grid (so an
    # explicit pl.Buffered(1) override is unnecessary).
    in_specs = [
        pl.BlockSpec((B, img_c, Sp), lambda i: (i, 0, 0)),
        pl.BlockSpec((B, c_c, 1), lambda i: (i, 0, 0)),
        pl.BlockSpec((1, Stot), lambda i: (0, 0)),
        pl.BlockSpec((Stot, B), lambda i: (0, 0)),
    ]
    inputs = [x_flat, c3, mask, pool_mat]
    for (w9, scale, shift) in params:
        in_specs += [
            pl.BlockSpec(w9.shape, lambda i: (0, 0, 0)),
            pl.BlockSpec(scale.shape, lambda i: (0, 0)),
            pl.BlockSpec(shift.shape, lambda i: (0, 0)),
        ]
        inputs += [w9.astype(CONV_MXU_DTYPE), scale, shift]
    in_specs += [
        pl.BlockSpec((msg_len, msg_len), lambda i: (0, 0)),
        pl.BlockSpec((msg_len, 1), lambda i: (0, 0)),
    ]
    inputs += [lin_w, lin_b.reshape(msg_len, 1)]

    out = pl.pallas_call(
        kernel,
        out_shape=jax.ShapeDtypeStruct((G, msg_len, B), jnp.float32),
        grid=(G,),
        in_specs=in_specs,
        out_specs=pl.BlockSpec((1, msg_len, B), lambda i: (i, 0, 0)),
        compiler_params=pltpu.CompilerParams(
            dimension_semantics=("parallel",),        # batch tiles -> v7x TCs
            vmem_limit_bytes=32 * 1024 * 1024),       # headroom for larger B
    )(*inputs)

    # (G, msg, B) -> (N, msg); the tiny output transpose stays XLA-side.
    return jnp.transpose(out, (0, 2, 1)).reshape(Npad, msg_len)[:N]


# ------------------------------- reference -----------------------------------

def reference_forward(image_nchw, c, params, lin_w, lin_b):
    """Pure-JAX f32 reference for the correctness check."""
    N, _, H, W = image_nchw.shape
    x = jnp.transpose(image_nchw, (0, 2, 3, 1))
    c_map = jnp.broadcast_to(c[:, None, None, :], (N, H, W, c.shape[1]))
    x = jnp.concatenate([x, c_map], axis=-1)
    for (w9, scale, shift) in params:
        cout, cin = w9.shape[1], w9.shape[2]
        w_hwio = jnp.transpose(w9.reshape(3, 3, cout, cin), (0, 1, 3, 2))
        y = jax.lax.conv_general_dilated(
            x, w_hwio.astype(jnp.float32), window_strides=(1, 1),
            padding="SAME", dimension_numbers=("NHWC", "HWIO", "NHWC"))
        x = jnp.maximum(y * scale.reshape(-1) + shift.reshape(-1), 0.0)
    pooled = jnp.mean(x, axis=(1, 2))
    return jax.nn.sigmoid(pooled @ lin_w.T + lin_b)


if __name__ == "__main__":
    key = jax.random.PRNGKey(0)
    k_img, k_c, k_params = jax.random.split(key, 3)

    # Small shapes consistent with the module: image has 3 channels, c has 1,
    # so the concatenated tensor matches in_channels=4 of the first ConvBNRelu.
    N, H, W = 2, 16, 16
    img_channels, c_channels = 3, 1
    in_channels = img_channels + c_channels
    decoder_channels, decoder_blocks, message_length = 32, 3, 8

    image = jax.random.normal(k_img, (N, img_channels, H, W), jnp.float32)
    c = jax.random.normal(k_c, (N, c_channels), jnp.float32)
    params, lin_w, lin_b = init_params(
        k_params, in_channels, decoder_channels, decoder_blocks, message_length)

    fwd = jax.jit(decoder_forward)
    out = jax.block_until_ready(fwd(image, c, params, lin_w, lin_b))
    assert out.shape == (N, message_length)

    ref = reference_forward(image, c, params, lin_w, lin_b)
    np.testing.assert_allclose(np.asarray(out), np.asarray(ref),
                               atol=1e-3, rtol=1e-3)
    print("KERNEL_OK")
</pallas_src>

<mosaic_0001>
module attributes {stable_mosaic.version = 11 : i64} {
  func.func @kernel(%arg0: i32, %arg1: memref<2x3x324xf32, #tpu.memory_space<vmem>>, %arg2: memref<2x1x1xf32, #tpu.memory_space<vmem>>, %arg3: memref<1x648xf32, #tpu.memory_space<vmem>>, %arg4: memref<648x2xf32, #tpu.memory_space<vmem>>, %arg5: memref<9x32x4xf32, #tpu.memory_space<vmem>>, %arg6: memref<32x1xf32, #tpu.memory_space<vmem>>, %arg7: memref<32x1xf32, #tpu.memory_space<vmem>>, %arg8: memref<9x32x32xf32, #tpu.memory_space<vmem>>, %arg9: memref<32x1xf32, #tpu.memory_space<vmem>>, %arg10: memref<32x1xf32, #tpu.memory_space<vmem>>, %arg11: memref<9x32x32xf32, #tpu.memory_space<vmem>>, %arg12: memref<32x1xf32, #tpu.memory_space<vmem>>, %arg13: memref<32x1xf32, #tpu.memory_space<vmem>>, %arg14: memref<9x8x32xf32, #tpu.memory_space<vmem>>, %arg15: memref<8x1xf32, #tpu.memory_space<vmem>>, %arg16: memref<8x1xf32, #tpu.memory_space<vmem>>, %arg17: memref<8x8xf32, #tpu.memory_space<vmem>>, %arg18: memref<8x1xf32, #tpu.memory_space<vmem>>, %arg19: memref<1x8x2xf32, #tpu.memory_space<vmem>>) attributes {dimension_semantics = [#tpu.dimension_semantics<parallel>], iteration_bounds = array<i64: 1>, scalar_prefetch = 0 : i64, scratch_operands = 0 : i64, tpu.core_type = #tpu.core_type<tc>, window_params = [{transform_indices = @transform_0, window_bounds = array<i64: 2, 3, 324>}, {transform_indices = @transform_1, window_bounds = array<i64: 2, 1, 1>}, {pipeline_mode = #tpu.pipeline_mode<synchronous>, transform_indices = @transform_2, window_bounds = array<i64: 1, 648>}, {pipeline_mode = #tpu.pipeline_mode<synchronous>, transform_indices = @transform_3, window_bounds = array<i64: 648, 2>}, {pipeline_mode = #tpu.pipeline_mode<synchronous>, transform_indices = @transform_4, window_bounds = array<i64: 9, 32, 4>}, {pipeline_mode = #tpu.pipeline_mode<synchronous>, transform_indices = @transform_5, window_bounds = array<i64: 32, 1>}, {pipeline_mode = #tpu.pipeline_mode<synchronous>, transform_indices = @transform_6, window_bounds = array<i64: 32, 1>}, {pipeline_mode = #tpu.pipeline_mode<synchronous>, transform_indices = @transform_7, window_bounds = array<i64: 9, 32, 32>}, {pipeline_mode = #tpu.pipeline_mode<synchronous>, transform_indices = @transform_8, window_bounds = array<i64: 32, 1>}, {pipeline_mode = #tpu.pipeline_mode<synchronous>, transform_indices = @transform_9, window_bounds = array<i64: 32, 1>}, {pipeline_mode = #tpu.pipeline_mode<synchronous>, transform_indices = @transform_10, window_bounds = array<i64: 9, 32, 32>}, {pipeline_mode = #tpu.pipeline_mode<synchronous>, transform_indices = @transform_11, window_bounds = array<i64: 32, 1>}, {pipeline_mode = #tpu.pipeline_mode<synchronous>, transform_indices = @transform_12, window_bounds = array<i64: 32, 1>}, {pipeline_mode = #tpu.pipeline_mode<synchronous>, transform_indices = @transform_13, window_bounds = array<i64: 9, 8, 32>}, {pipeline_mode = #tpu.pipeline_mode<synchronous>, transform_indices = @transform_14, window_bounds = array<i64: 8, 1>}, {pipeline_mode = #tpu.pipeline_mode<synchronous>, transform_indices = @transform_15, window_bounds = array<i64: 8, 1>}, {pipeline_mode = #tpu.pipeline_mode<synchronous>, transform_indices = @transform_16, window_bounds = array<i64: 8, 8>}, {pipeline_mode = #tpu.pipeline_mode<synchronous>, transform_indices = @transform_17, window_bounds = array<i64: 8, 1>}, {transform_indices = @transform_18, window_bounds = array<i64: 1, 8, 2>}]} {
    %c0 = arith.constant 0 : index
    %c0_0 = arith.constant 0 : index
    %0 = vector.load %arg3[%c0, %c0_0] : memref<1x648xf32, #tpu.memory_space<vmem>>, vector<1x648xf32>
    %c0_1 = arith.constant 0 : index
    %c0_2 = arith.constant 0 : index
    %c0_3 = arith.constant 0 : index
    %1 = vector.load %arg1[%c0_1, %c0_2, %c0_3] : memref<2x3x324xf32, #tpu.memory_space<vmem>>, vector<1x3x324xf32>
    %2 = vector.shape_cast %1 : vector<1x3x324xf32> to vector<3x324xf32>
    %c1 = arith.constant 1 : index
    %c0_4 = arith.constant 0 : index
    %c0_5 = arith.constant 0 : index
    %3 = vector.load %arg1[%c1, %c0_4, %c0_5] : memref<2x3x324xf32, #tpu.memory_space<vmem>>, vector<1x3x324xf32>
    %4 = vector.shape_cast %3 : vector<1x3x324xf32> to vector<3x324xf32>
    %c0_6 = arith.constant 0 : index
    %c0_7 = arith.constant 0 : index
    %c0_8 = arith.constant 0 : index
    %5 = vector.load %arg2[%c0_6, %c0_7, %c0_8] : memref<2x1x1xf32, #tpu.memory_space<vmem>>, vector<1x1x1xf32>
    %6 = vector.shape_cast %5 : vector<1x1x1xf32> to vector<1x1xf32>
    %7 = vector.extract_strided_slice %0 {offsets = [0, 0], sizes = [1, 324], strides = [1, 1]} : vector<1x648xf32> to vector<1x324xf32>
    %8 = vector.broadcast %6 : vector<1x1xf32> to vector<1x324xf32>
    %9 = arith.mulf %8, %7 : vector<1x324xf32>
    %c1_9 = arith.constant 1 : index
    %c0_10 = arith.constant 0 : index
    %c0_11 = arith.constant 0 : index
    %10 = vector.load %arg2[%c1_9, %c0_10, %c0_11] : memref<2x1x1xf32, #tpu.memory_space<vmem>>, vector<1x1x1xf32>
    %11 = vector.shape_cast %10 : vector<1x1x1xf32> to vector<1x1xf32>
    %12 = vector.extract_strided_slice %0 {offsets = [0, 324], sizes = [1, 324], strides = [1, 1]} : vector<1x648xf32> to vector<1x324xf32>
    %13 = vector.broadcast %11 : vector<1x1xf32> to vector<1x324xf32>
    %14 = arith.mulf %13, %12 : vector<1x324xf32>
    %15 = tpu.concatenate %2, %4 in 1 : vector<3x324xf32>, vector<3x324xf32> -> vector<3x648xf32>
    %16 = tpu.concatenate %9, %14 in 1 : vector<1x324xf32>, vector<1x324xf32> -> vector<1x648xf32>
    %17 = tpu.concatenate %15, %16 in 0 : vector<3x648xf32>, vector<1x648xf32> -> vector<4x648xf32>
    %cst = arith.constant 0.000000e+00 : f32
    %18 = vector.broadcast %cst : f32 to vector<4x19xf32>
    %19 = tpu.concatenate %18, %17, %18 in 1 : vector<4x19xf32>, vector<4x648xf32>, vector<4x19xf32> -> vector<4x686xf32>
    %c0_12 = arith.constant 0 : index
    %c0_13 = arith.constant 0 : index
    %c0_14 = arith.constant 0 : index
    %20 = vector.load %arg5[%c0_12, %c0_13, %c0_14] : memref<9x32x4xf32, #tpu.memory_space<vmem>>, vector<1x32x4xf32>
    %21 = vector.shape_cast %20 : vector<1x32x4xf32> to vector<32x4xf32>
    %22 = vector.extract_strided_slice %19 {offsets = [0, 0], sizes = [4, 648], strides = [1, 1]} : vector<4x686xf32> to vector<4x648xf32>
    %cst_15 = arith.constant dense<0.000000e+00> : vector<32x648xf32>
    %23 = tpu.matmul %21, %22, %cst_15 {dimension_numbers = #tpu.dot_dimension_numbers<[1], [0], [0], [1], [0, 0, 1, 1], [], []>} : vector<32x4xf32>, vector<4x648xf32>, vector<32x648xf32> -> vector<32x648xf32>
    %c1_16 = arith.constant 1 : index
    %c0_17 = arith.constant 0 : index
    %c0_18 = arith.constant 0 : index
    %24 = vector.load %arg5[%c1_16, %c0_17, %c0_18] : memref<9x32x4xf32, #tpu.memory_space<vmem>>, vector<1x32x4xf32>
    %25 = vector.shape_cast %24 : vector<1x32x4xf32> to vector<32x4xf32>
    %26 = vector.extract_strided_slice %19 {offsets = [0, 1], sizes = [4, 648], strides = [1, 1]} : vector<4x686xf32> to vector<4x648xf32>
    %cst_19 = arith.constant dense<0.000000e+00> : vector<32x648xf32>
    %27 = tpu.matmul %25, %26, %cst_19 {dimension_numbers = #tpu.dot_dimension_numbers<[1], [0], [0], [1], [0, 0, 1, 1], [], []>} : vector<32x4xf32>, vector<4x648xf32>, vector<32x648xf32> -> vector<32x648xf32>
    %28 = arith.addf %23, %27 : vector<32x648xf32>
    %c2 = arith.constant 2 : index
    %c0_20 = arith.constant 0 : index
    %c0_21 = arith.constant 0 : index
    %29 = vector.load %arg5[%c2, %c0_20, %c0_21] : memref<9x32x4xf32, #tpu.memory_space<vmem>>, vector<1x32x4xf32>
    %30 = vector.shape_cast %29 : vector<1x32x4xf32> to vector<32x4xf32>
    %31 = vector.extract_strided_slice %19 {offsets = [0, 2], sizes = [4, 648], strides = [1, 1]} : vector<4x686xf32> to vector<4x648xf32>
    %cst_22 = arith.constant dense<0.000000e+00> : vector<32x648xf32>
    %32 = tpu.matmul %30, %31, %cst_22 {dimension_numbers = #tpu.dot_dimension_numbers<[1], [0], [0], [1], [0, 0, 1, 1], [], []>} : vector<32x4xf32>, vector<4x648xf32>, vector<32x648xf32> -> vector<32x648xf32>
    %33 = arith.addf %28, %32 : vector<32x648xf32>
    %c3 = arith.constant 3 : index
    %c0_23 = arith.constant 0 : index
    %c0_24 = arith.constant 0 : index
    %34 = vector.load %arg5[%c3, %c0_23, %c0_24] : memref<9x32x4xf32, #tpu.memory_space<vmem>>, vector<1x32x4xf32>
    %35 = vector.shape_cast %34 : vector<1x32x4xf32> to vector<32x4xf32>
    %36 = vector.extract_strided_slice %19 {offsets = [0, 18], sizes = [4, 648], strides = [1, 1]} : vector<4x686xf32> to vector<4x648xf32>
    %cst_25 = arith.constant dense<0.000000e+00> : vector<32x648xf32>
    %37 = tpu.matmul %35, %36, %cst_25 {dimension_numbers = #tpu.dot_dimension_numbers<[1], [0], [0], [1], [0, 0, 1, 1], [], []>} : vector<32x4xf32>, vector<4x648xf32>, vector<32x648xf32> -> vector<32x648xf32>
    %38 = arith.addf %33, %37 : vector<32x648xf32>
    %c4 = arith.constant 4 : index
    %c0_26 = arith.constant 0 : index
    %c0_27 = arith.constant 0 : index
    %39 = vector.load %arg5[%c4, %c0_26, %c0_27] : memref<9x32x4xf32, #tpu.memory_space<vmem>>, vector<1x32x4xf32>
    %40 = vector.shape_cast %39 : vector<1x32x4xf32> to vector<32x4xf32>
    %41 = vector.extract_strided_slice %19 {offsets = [0, 19], sizes = [4, 648], strides = [1, 1]} : vector<4x686xf32> to vector<4x648xf32>
    %cst_28 = arith.constant dense<0.000000e+00> : vector<32x648xf32>
    %42 = tpu.matmul %40, %41, %cst_28 {dimension_numbers = #tpu.dot_dimension_numbers<[1], [0], [0], [1], [0, 0, 1, 1], [], []>} : vector<32x4xf32>, vector<4x648xf32>, vector<32x648xf32> -> vector<32x648xf32>
    %43 = arith.addf %38, %42 : vector<32x648xf32>
    %c5 = arith.constant 5 : index
    %c0_29 = arith.constant 0 : index
    %c0_30 = arith.constant 0 : index
    %44 = vector.load %arg5[%c5, %c0_29, %c0_30] : memref<9x32x4xf32, #tpu.memory_space<vmem>>, vector<1x32x4xf32>
    %45 = vector.shape_cast %44 : vector<1x32x4xf32> to vector<32x4xf32>
    %46 = vector.extract_strided_slice %19 {offsets = [0, 20], sizes = [4, 648], strides = [1, 1]} : vector<4x686xf32> to vector<4x648xf32>
    %cst_31 = arith.constant dense<0.000000e+00> : vector<32x648xf32>
    %47 = tpu.matmul %45, %46, %cst_31 {dimension_numbers = #tpu.dot_dimension_numbers<[1], [0], [0], [1], [0, 0, 1, 1], [], []>} : vector<32x4xf32>, vector<4x648xf32>, vector<32x648xf32> -> vector<32x648xf32>
    %48 = arith.addf %43, %47 : vector<32x648xf32>
    %c6 = arith.constant 6 : index
    %c0_32 = arith.constant 0 : index
    %c0_33 = arith.constant 0 : index
    %49 = vector.load %arg5[%c6, %c0_32, %c0_33] : memref<9x32x4xf32, #tpu.memory_space<vmem>>, vector<1x32x4xf32>
    %50 = vector.shape_cast %49 : vector<1x32x4xf32> to vector<32x4xf32>
    %51 = vector.extract_strided_slice %19 {offsets = [0, 36], sizes = [4, 648], strides = [1, 1]} : vector<4x686xf32> to vector<4x648xf32>
    %cst_34 = arith.constant dense<0.000000e+00> : vector<32x648xf32>
    %52 = tpu.matmul %50, %51, %cst_34 {dimension_numbers = #tpu.dot_dimension_numbers<[1], [0], [0], [1], [0, 0, 1, 1], [], []>} : vector<32x4xf32>, vector<4x648xf32>, vector<32x648xf32> -> vector<32x648xf32>
    %53 = arith.addf %48, %52 : vector<32x648xf32>
    %c7 = arith.constant 7 : index
    %c0_35 = arith.constant 0 : index
    %c0_36 = arith.constant 0 : index
    %54 = vector.load %arg5[%c7, %c0_35, %c0_36] : memref<9x32x4xf32, #tpu.memory_space<vmem>>, vector<1x32x4xf32>
    %55 = vector.shape_cast %54 : vector<1x32x4xf32> to vector<32x4xf32>
    %56 = vector.extract_strided_slice %19 {offsets = [0, 37], sizes = [4, 648], strides = [1, 1]} : vector<4x686xf32> to vector<4x648xf32>
    %cst_37 = arith.constant dense<0.000000e+00> : vector<32x648xf32>
    %57 = tpu.matmul %55, %56, %cst_37 {dimension_numbers = #tpu.dot_dimension_numbers<[1], [0], [0], [1], [0, 0, 1, 1], [], []>} : vector<32x4xf32>, vector<4x648xf32>, vector<32x648xf32> -> vector<32x648xf32>
    %58 = arith.addf %53, %57 : vector<32x648xf32>
    %c8 = arith.constant 8 : index
    %c0_38 = arith.constant 0 : index
    %c0_39 = arith.constant 0 : index
    %59 = vector.load %arg5[%c8, %c0_38, %c0_39] : memref<9x32x4xf32, #tpu.memory_space<vmem>>, vector<1x32x4xf32>
    %60 = vector.shape_cast %59 : vector<1x32x4xf32> to vector<32x4xf32>
    %61 = vector.extract_strided_slice %19 {offsets = [0, 38], sizes = [4, 648], strides = [1, 1]} : vector<4x686xf32> to vector<4x648xf32>
    %cst_40 = arith.constant dense<0.000000e+00> : vector<32x648xf32>
    %62 = tpu.matmul %60, %61, %cst_40 {dimension_numbers = #tpu.dot_dimension_numbers<[1], [0], [0], [1], [0, 0, 1, 1], [], []>} : vector<32x4xf32>, vector<4x648xf32>, vector<32x648xf32> -> vector<32x648xf32>
    %63 = arith.addf %58, %62 : vector<32x648xf32>
    %c0_41 = arith.constant 0 : index
    %c0_42 = arith.constant 0 : index
    %64 = vector.load %arg6[%c0_41, %c0_42] : memref<32x1xf32, #tpu.memory_space<vmem>>, vector<32x1xf32>
    %65 = vector.broadcast %64 : vector<32x1xf32> to vector<32x648xf32>
    %66 = arith.mulf %63, %65 : vector<32x648xf32>
    %c0_43 = arith.constant 0 : index
    %c0_44 = arith.constant 0 : index
    %67 = vector.load %arg7[%c0_43, %c0_44] : memref<32x1xf32, #tpu.memory_space<vmem>>, vector<32x1xf32>
    %68 = vector.broadcast %67 : vector<32x1xf32> to vector<32x648xf32>
    %69 = arith.addf %66, %68 : vector<32x648xf32>
    %cst_45 = arith.constant 0.000000e+00 : f32
    %70 = vector.broadcast %cst_45 : f32 to vector<32x648xf32>
    %71 = arith.maximumf %69, %70 : vector<32x648xf32>
    %72 = vector.broadcast %0 : vector<1x648xf32> to vector<32x648xf32>
    %73 = arith.mulf %71, %72 : vector<32x648xf32>
    %cst_46 = arith.constant 0.000000e+00 : f32
    %74 = vector.broadcast %cst_46 : f32 to vector<32x19xf32>
    %75 = tpu.concatenate %74, %73, %74 in 1 : vector<32x19xf32>, vector<32x648xf32>, vector<32x19xf32> -> vector<32x686xf32>
    %c0_47 = arith.constant 0 : index
    %c0_48 = arith.constant 0 : index
    %c0_49 = arith.constant 0 : index
    %76 = vector.load %arg8[%c0_47, %c0_48, %c0_49] : memref<9x32x32xf32, #tpu.memory_space<vmem>>, vector<1x32x32xf32>
    %77 = vector.shape_cast %76 : vector<1x32x32xf32> to vector<32x32xf32>
    %78 = vector.extract_strided_slice %75 {offsets = [0, 0], sizes = [32, 648], strides = [1, 1]} : vector<32x686xf32> to vector<32x648xf32>
    %cst_50 = arith.constant dense<0.000000e+00> : vector<32x648xf32>
    %79 = tpu.matmul %77, %78, %cst_50 {dimension_numbers = #tpu.dot_dimension_numbers<[1], [0], [0], [1], [0, 0, 1, 1], [], []>} : vector<32x32xf32>, vector<32x648xf32>, vector<32x648xf32> -> vector<32x648xf32>
    %c1_51 = arith.constant 1 : index
    %c0_52 = arith.constant 0 : index
    %c0_53 = arith.constant 0 : index
    %80 = vector.load %arg8[%c1_51, %c0_52, %c0_53] : memref<9x32x32xf32, #tpu.memory_space<vmem>>, vector<1x32x32xf32>
    %81 = vector.shape_cast %80 : vector<1x32x32xf32> to vector<32x32xf32>
    %82 = vector.extract_strided_slice %75 {offsets = [0, 1], sizes = [32, 648], strides = [1, 1]} : vector<32x686xf32> to vector<32x648xf32>
    %cst_54 = arith.constant dense<0.000000e+00> : vector<32x648xf32>
    %83 = tpu.matmul %81, %82, %cst_54 {dimension_numbers = #tpu.dot_dimension_numbers<[1], [0], [0], [1], [0, 0, 1, 1], [], []>} : vector<32x32xf32>, vector<32x648xf32>, vector<32x648xf32> -> vector<32x648xf32>
    %84 = arith.addf %79, %83 : vector<32x648xf32>
    %c2_55 = arith.constant 2 : index
    %c0_56 = arith.constant 0 : index
    %c0_57 = arith.constant 0 : index
    %85 = vector.load %arg8[%c2_55, %c0_56, %c0_57] : memref<9x32x32xf32, #tpu.memory_space<vmem>>, vector<1x32x32xf32>
    %86 = vector.shape_cast %85 : vector<1x32x32xf32> to vector<32x32xf32>
    %87 = vector.extract_strided_slice %75 {offsets = [0, 2], sizes = [32, 648], strides = [1, 1]} : vector<32x686xf32> to vector<32x648xf32>
    %cst_58 = arith.constant dense<0.000000e+00> : vector<32x648xf32>
    %88 = tpu.matmul %86, %87, %cst_58 {dimension_numbers = #tpu.dot_dimension_numbers<[1], [0], [0], [1], [0, 0, 1, 1], [], []>} : vector<32x32xf32>, vector<32x648xf32>, vector<32x648xf32> -> vector<32x648xf32>
    %89 = arith.addf %84, %88 : vector<32x648xf32>
    %c3_59 = arith.constant 3 : index
    %c0_60 = arith.constant 0 : index
    %c0_61 = arith.constant 0 : index
    %90 = vector.load %arg8[%c3_59, %c0_60, %c0_61] : memref<9x32x32xf32, #tpu.memory_space<vmem>>, vector<1x32x32xf32>
    %91 = vector.shape_cast %90 : vector<1x32x32xf32> to vector<32x32xf32>
    %92 = vector.extract_strided_slice %75 {offsets = [0, 18], sizes = [32, 648], strides = [1, 1]} : vector<32x686xf32> to vector<32x648xf32>
    %cst_62 = arith.constant dense<0.000000e+00> : vector<32x648xf32>
    %93 = tpu.matmul %91, %92, %cst_62 {dimension_numbers = #tpu.dot_dimension_numbers<[1], [0], [0], [1], [0, 0, 1, 1], [], []>} : vector<32x32xf32>, vector<32x648xf32>, vector<32x648xf32> -> vector<32x648xf32>
    %94 = arith.addf %89, %93 : vector<32x648xf32>
    %c4_63 = arith.constant 4 : index
    %c0_64 = arith.constant 0 : index
    %c0_65 = arith.constant 0 : index
    %95 = vector.load %arg8[%c4_63, %c0_64, %c0_65] : memref<9x32x32xf32, #tpu.memory_space<vmem>>, vector<1x32x32xf32>
    %96 = vector.shape_cast %95 : vector<1x32x32xf32> to vector<32x32xf32>
    %97 = vector.extract_strided_slice %75 {offsets = [0, 19], sizes = [32, 648], strides = [1, 1]} : vector<32x686xf32> to vector<32x648xf32>
    %cst_66 = arith.constant dense<0.000000e+00> : vector<32x648xf32>
    %98 = tpu.matmul %96, %97, %cst_66 {dimension_numbers = #tpu.dot_dimension_numbers<[1], [0], [0], [1], [0, 0, 1, 1], [], []>} : vector<32x32xf32>, vector<32x648xf32>, vector<32x648xf32> -> vector<32x648xf32>
    %99 = arith.addf %94, %98 : vector<32x648xf32>
    %c5_67 = arith.constant 5 : index
    %c0_68 = arith.constant 0 : index
    %c0_69 = arith.constant 0 : index
    %100 = vector.load %arg8[%c5_67, %c0_68, %c0_69] : memref<9x32x32xf32, #tpu.memory_space<vmem>>, vector<1x32x32xf32>
    %101 = vector.shape_cast %100 : vector<1x32x32xf32> to vector<32x32xf32>
    %102 = vector.extract_strided_slice %75 {offsets = [0, 20], sizes = [32, 648], strides = [1, 1]} : vector<32x686xf32> to vector<32x648xf32>
    %cst_70 = arith.constant dense<0.000000e+00> : vector<32x648xf32>
    %103 = tpu.matmul %101, %102, %cst_70 {dimension_numbers = #tpu.dot_dimension_numbers<[1], [0], [0], [1], [0, 0, 1, 1], [], []>} : vector<32x32xf32>, vector<32x648xf32>, vector<32x648xf32> -> vector<32x648xf32>
    %104 = arith.addf %99, %103 : vector<32x648xf32>
    %c6_71 = arith.constant 6 : index
    %c0_72 = arith.constant 0 : index
    %c0_73 = arith.constant 0 : index
    %105 = vector.load %arg8[%c6_71, %c0_72, %c0_73] : memref<9x32x32xf32, #tpu.memory_space<vmem>>, vector<1x32x32xf32>
    %106 = vector.shape_cast %105 : vector<1x32x32xf32> to vector<32x32xf32>
    %107 = vector.extract_strided_slice %75 {offsets = [0, 36], sizes = [32, 648], strides = [1, 1]} : vector<32x686xf32> to vector<32x648xf32>
    %cst_74 = arith.constant dense<0.000000e+00> : vector<32x648xf32>
    %108 = tpu.matmul %106, %107, %cst_74 {dimension_numbers = #tpu.dot_dimension_numbers<[1], [0], [0], [1], [0, 0, 1, 1], [], []>} : vector<32x32xf32>, vector<32x648xf32>, vector<32x648xf32> -> vector<32x648xf32>
    %109 = arith.addf %104, %108 : vector<32x648xf32>
    %c7_75 = arith.constant 7 : index
    %c0_76 = arith.constant 0 : index
    %c0_77 = arith.constant 0 : index
    %110 = vector.load %arg8[%c7_75, %c0_76, %c0_77] : memref<9x32x32xf32, #tpu.memory_space<vmem>>, vector<1x32x32xf32>
    %111 = vector.shape_cast %110 : vector<1x32x32xf32> to vector<32x32xf32>
    %112 = vector.extract_strided_slice %75 {offsets = [0, 37], sizes = [32, 648], strides = [1, 1]} : vector<32x686xf32> to vector<32x648xf32>
    %cst_78 = arith.constant dense<0.000000e+00> : vector<32x648xf32>
    %113 = tpu.matmul %111, %112, %cst_78 {dimension_numbers = #tpu.dot_dimension_numbers<[1], [0], [0], [1], [0, 0, 1, 1], [], []>} : vector<32x32xf32>, vector<32x648xf32>, vector<32x648xf32> -> vector<32x648xf32>
    %114 = arith.addf %109, %113 : vector<32x648xf32>
    %c8_79 = arith.constant 8 : index
    %c0_80 = arith.constant 0 : index
    %c0_81 = arith.constant 0 : index
    %115 = vector.load %arg8[%c8_79, %c0_80, %c0_81] : memref<9x32x32xf32, #tpu.memory_space<vmem>>, vector<1x32x32xf32>
    %116 = vector.shape_cast %115 : vector<1x32x32xf32> to vector<32x32xf32>
    %117 = vector.extract_strided_slice %75 {offsets = [0, 38], sizes = [32, 648], strides = [1, 1]} : vector<32x686xf32> to vector<32x648xf32>
    %cst_82 = arith.constant dense<0.000000e+00> : vector<32x648xf32>
    %118 = tpu.matmul %116, %117, %cst_82 {dimension_numbers = #tpu.dot_dimension_numbers<[1], [0], [0], [1], [0, 0, 1, 1], [], []>} : vector<32x32xf32>, vector<32x648xf32>, vector<32x648xf32> -> vector<32x648xf32>
    %119 = arith.addf %114, %118 : vector<32x648xf32>
    %c0_83 = arith.constant 0 : index
    %c0_84 = arith.constant 0 : index
    %120 = vector.load %arg9[%c0_83, %c0_84] : memref<32x1xf32, #tpu.memory_space<vmem>>, vector<32x1xf32>
    %121 = vector.broadcast %120 : vector<32x1xf32> to vector<32x648xf32>
    %122 = arith.mulf %119, %121 : vector<32x648xf32>
    %c0_85 = arith.constant 0 : index
    %c0_86 = arith.constant 0 : index
    %123 = vector.load %arg10[%c0_85, %c0_86] : memref<32x1xf32, #tpu.memory_space<vmem>>, vector<32x1xf32>
    %124 = vector.broadcast %123 : vector<32x1xf32> to vector<32x648xf32>
    %125 = arith.addf %122, %124 : vector<32x648xf32>
    %cst_87 = arith.constant 0.000000e+00 : f32
    %126 = vector.broadcast %cst_87 : f32 to vector<32x648xf32>
    %127 = arith.maximumf %125, %126 : vector<32x648xf32>
    %128 = vector.broadcast %0 : vector<1x648xf32> to vector<32x648xf32>
    %129 = arith.mulf %127, %128 : vector<32x648xf32>
    %cst_88 = arith.constant 0.000000e+00 : f32
    %130 = vector.broadcast %cst_88 : f32 to vector<32x19xf32>
    %131 = tpu.concatenate %130, %129, %130 in 1 : vector<32x19xf32>, vector<32x648xf32>, vector<32x19xf32> -> vector<32x686xf32>
    %c0_89 = arith.constant 0 : index
    %c0_90 = arith.constant 0 : index
    %c0_91 = arith.constant 0 : index
    %132 = vector.load %arg11[%c0_89, %c0_90, %c0_91] : memref<9x32x32xf32, #tpu.memory_space<vmem>>, vector<1x32x32xf32>
    %133 = vector.shape_cast %132 : vector<1x32x32xf32> to vector<32x32xf32>
    %134 = vector.extract_strided_slice %131 {offsets = [0, 0], sizes = [32, 648], strides = [1, 1]} : vector<32x686xf32> to vector<32x648xf32>
    %cst_92 = arith.constant dense<0.000000e+00> : vector<32x648xf32>
    %135 = tpu.matmul %133, %134, %cst_92 {dimension_numbers = #tpu.dot_dimension_numbers<[1], [0], [0], [1], [0, 0, 1, 1], [], []>} : vector<32x32xf32>, vector<32x648xf32>, vector<32x648xf32> -> vector<32x648xf32>
    %c1_93 = arith.constant 1 : index
    %c0_94 = arith.constant 0 : index
    %c0_95 = arith.constant 0 : index
    %136 = vector.load %arg11[%c1_93, %c0_94, %c0_95] : memref<9x32x32xf32, #tpu.memory_space<vmem>>, vector<1x32x32xf32>
    %137 = vector.shape_cast %136 : vector<1x32x32xf32> to vector<32x32xf32>
    %138 = vector.extract_strided_slice %131 {offsets = [0, 1], sizes = [32, 648], strides = [1, 1]} : vector<32x686xf32> to vector<32x648xf32>
    %cst_96 = arith.constant dense<0.000000e+00> : vector<32x648xf32>
    %139 = tpu.matmul %137, %138, %cst_96 {dimension_numbers = #tpu.dot_dimension_numbers<[1], [0], [0], [1], [0, 0, 1, 1], [], []>} : vector<32x32xf32>, vector<32x648xf32>, vector<32x648xf32> -> vector<32x648xf32>
    %140 = arith.addf %135, %139 : vector<32x648xf32>
    %c2_97 = arith.constant 2 : index
    %c0_98 = arith.constant 0 : index
    %c0_99 = arith.constant 0 : index
    %141 = vector.load %arg11[%c2_97, %c0_98, %c0_99] : memref<9x32x32xf32, #tpu.memory_space<vmem>>, vector<1x32x32xf32>
    %142 = vector.shape_cast %141 : vector<1x32x32xf32> to vector<32x32xf32>
    %143 = vector.extract_strided_slice %131 {offsets = [0, 2], sizes = [32, 648], strides = [1, 1]} : vector<32x686xf32> to vector<32x648xf32>
    %cst_100 = arith.constant dense<0.000000e+00> : vector<32x648xf32>
    %144 = tpu.matmul %142, %143, %cst_100 {dimension_numbers = #tpu.dot_dimension_numbers<[1], [0], [0], [1], [0, 0, 1, 1], [], []>} : vector<32x32xf32>, vector<32x648xf32>, vector<32x648xf32> -> vector<32x648xf32>
    %145 = arith.addf %140, %144 : vector<32x648xf32>
    %c3_101 = arith.constant 3 : index
    %c0_102 = arith.constant 0 : index
    %c0_103 = arith.constant 0 : index
    %146 = vector.load %arg11[%c3_101, %c0_102, %c0_103] : memref<9x32x32xf32, #tpu.memory_space<vmem>>, vector<1x32x32xf32>
    %147 = vector.shape_cast %146 : vector<1x32x32xf32> to vector<32x32xf32>
    %148 = vector.extract_strided_slice %131 {offsets = [0, 18], sizes = [32, 648], strides = [1, 1]} : vector<32x686xf32> to vector<32x648xf32>
    %cst_104 = arith.constant dense<0.000000e+00> : vector<32x648xf32>
    %149 = tpu.matmul %147, %148, %cst_104 {dimension_numbers = #tpu.dot_dimension_numbers<[1], [0], [0], [1], [0, 0, 1, 1], [], []>} : vector<32x32xf32>, vector<32x648xf32>, vector<32x648xf32> -> vector<32x648xf32>
    %150 = arith.addf %145, %149 : vector<32x648xf32>
    %c4_105 = arith.constant 4 : index
    %c0_106 = arith.constant 0 : index
    %c0_107 = arith.constant 0 : index
    %151 = vector.load %arg11[%c4_105, %c0_106, %c0_107] : memref<9x32x32xf32, #tpu.memory_space<vmem>>, vector<1x32x32xf32>
    %152 = vector.shape_cast %151 : vector<1x32x32xf32> to vector<32x32xf32>
    %153 = vector.extract_strided_slice %131 {offsets = [0, 19], sizes = [32, 648], strides = [1, 1]} : vector<32x686xf32> to vector<32x648xf32>
    %cst_108 = arith.constant dense<0.000000e+00> : vector<32x648xf32>
    %154 = tpu.matmul %152, %153, %cst_108 {dimension_numbers = #tpu.dot_dimension_numbers<[1], [0], [0], [1], [0, 0, 1, 1], [], []>} : vector<32x32xf32>, vector<32x648xf32>, vector<32x648xf32> -> vector<32x648xf32>
    %155 = arith.addf %150, %154 : vector<32x648xf32>
    %c5_109 = arith.constant 5 : index
    %c0_110 = arith.constant 0 : index
    %c0_111 = arith.constant 0 : index
    %156 = vector.load %arg11[%c5_109, %c0_110, %c0_111] : memref<9x32x32xf32, #tpu.memory_space<vmem>>, vector<1x32x32xf32>
    %157 = vector.shape_cast %156 : vector<1x32x32xf32> to vector<32x32xf32>
    %158 = vector.extract_strided_slice %131 {offsets = [0, 20], sizes = [32, 648], strides = [1, 1]} : vector<32x686xf32> to vector<32x648xf32>
    %cst_112 = arith.constant dense<0.000000e+00> : vector<32x648xf32>
    %159 = tpu.matmul %157, %158, %cst_112 {dimension_numbers = #tpu.dot_dimension_numbers<[1], [0], [0], [1], [0, 0, 1, 1], [], []>} : vector<32x32xf32>, vector<32x648xf32>, vector<32x648xf32> -> vector<32x648xf32>
    %160 = arith.addf %155, %159 : vector<32x648xf32>
    %c6_113 = arith.constant 6 : index
    %c0_114 = arith.constant 0 : index
    %c0_115 = arith.constant 0 : index
    %161 = vector.load %arg11[%c6_113, %c0_114, %c0_115] : memref<9x32x32xf32, #tpu.memory_space<vmem>>, vector<1x32x32xf32>
    %162 = vector.shape_cast %161 : vector<1x32x32xf32> to vector<32x32xf32>
    %163 = vector.extract_strided_slice %131 {offsets = [0, 36], sizes = [32, 648], strides = [1, 1]} : vector<32x686xf32> to vector<32x648xf32>
    %cst_116 = arith.constant dense<0.000000e+00> : vector<32x648xf32>
    %164 = tpu.matmul %162, %163, %cst_116 {dimension_numbers = #tpu.dot_dimension_numbers<[1], [0], [0], [1], [0, 0, 1, 1], [], []>} : vector<32x32xf32>, vector<32x648xf32>, vector<32x648xf32> -> vector<32x648xf32>
    %165 = arith.addf %160, %164 : vector<32x648xf32>
    %c7_117 = arith.constant 7 : index
    %c0_118 = arith.constant 0 : index
    %c0_119 = arith.constant 0 : index
    %166 = vector.load %arg11[%c7_117, %c0_118, %c0_119] : memref<9x32x32xf32, #tpu.memory_space<vmem>>, vector<1x32x32xf32>
    %167 = vector.shape_cast %166 : vector<1x32x32xf32> to vector<32x32xf32>
    %168 = vector.extract_strided_slice %131 {offsets = [0, 37], sizes = [32, 648], strides = [1, 1]} : vector<32x686xf32> to vector<32x648xf32>
    %cst_120 = arith.constant dense<0.000000e+00> : vector<32x648xf32>
    %169 = tpu.matmul %167, %168, %cst_120 {dimension_numbers = #tpu.dot_dimension_numbers<[1], [0], [0], [1], [0, 0, 1, 1], [], []>} : vector<32x32xf32>, vector<32x648xf32>, vector<32x648xf32> -> vector<32x648xf32>
    %170 = arith.addf %165, %169 : vector<32x648xf32>
    %c8_121 = arith.constant 8 : index
    %c0_122 = arith.constant 0 : index
    %c0_123 = arith.constant 0 : index
    %171 = vector.load %arg11[%c8_121, %c0_122, %c0_123] : memref<9x32x32xf32, #tpu.memory_space<vmem>>, vector<1x32x32xf32>
    %172 = vector.shape_cast %171 : vector<1x32x32xf32> to vector<32x32xf32>
    %173 = vector.extract_strided_slice %131 {offsets = [0, 38], sizes = [32, 648], strides = [1, 1]} : vector<32x686xf32> to vector<32x648xf32>
    %cst_124 = arith.constant dense<0.000000e+00> : vector<32x648xf32>
    %174 = tpu.matmul %172, %173, %cst_124 {dimension_numbers = #tpu.dot_dimension_numbers<[1], [0], [0], [1], [0, 0, 1, 1], [], []>} : vector<32x32xf32>, vector<32x648xf32>, vector<32x648xf32> -> vector<32x648xf32>
    %175 = arith.addf %170, %174 : vector<32x648xf32>
    %c0_125 = arith.constant 0 : index
    %c0_126 = arith.constant 0 : index
    %176 = vector.load %arg12[%c0_125, %c0_126] : memref<32x1xf32, #tpu.memory_space<vmem>>, vector<32x1xf32>
    %177 = vector.broadcast %176 : vector<32x1xf32> to vector<32x648xf32>
    %178 = arith.mulf %175, %177 : vector<32x648xf32>
    %c0_127 = arith.constant 0 : index
    %c0_128 = arith.constant 0 : index
    %179 = vector.load %arg13[%c0_127, %c0_128] : memref<32x1xf32, #tpu.memory_space<vmem>>, vector<32x1xf32>
    %180 = vector.broadcast %179 : vector<32x1xf32> to vector<32x648xf32>
    %181 = arith.addf %178, %180 : vector<32x648xf32>
    %cst_129 = arith.constant 0.000000e+00 : f32
    %182 = vector.broadcast %cst_129 : f32 to vector<32x648xf32>
    %183 = arith.maximumf %181, %182 : vector<32x648xf32>
    %184 = vector.broadcast %0 : vector<1x648xf32> to vector<32x648xf32>
    %185 = arith.mulf %183, %184 : vector<32x648xf32>
    %cst_130 = arith.constant 0.000000e+00 : f32
    %186 = vector.broadcast %cst_130 : f32 to vector<32x19xf32>
    %187 = tpu.concatenate %186, %185, %186 in 1 : vector<32x19xf32>, vector<32x648xf32>, vector<32x19xf32> -> vector<32x686xf32>
    %c0_131 = arith.constant 0 : index
    %c0_132 = arith.constant 0 : index
    %c0_133 = arith.constant 0 : index
    %188 = vector.load %arg14[%c0_131, %c0_132, %c0_133] : memref<9x8x32xf32, #tpu.memory_space<vmem>>, vector<1x8x32xf32>
    %189 = vector.shape_cast %188 : vector<1x8x32xf32> to vector<8x32xf32>
    %190 = vector.extract_strided_slice %187 {offsets = [0, 0], sizes = [32, 648], strides = [1, 1]} : vector<32x686xf32> to vector<32x648xf32>
    %cst_134 = arith.constant dense<0.000000e+00> : vector<8x648xf32>
    %191 = tpu.matmul %189, %190, %cst_134 {dimension_numbers = #tpu.dot_dimension_numbers<[1], [0], [0], [1], [0, 0, 1, 1], [], []>} : vector<8x32xf32>, vector<32x648xf32>, vector<8x648xf32> -> vector<8x648xf32>
    %c1_135 = arith.constant 1 : index
    %c0_136 = arith.constant 0 : index
    %c0_137 = arith.constant 0 : index
    %192 = vector.load %arg14[%c1_135, %c0_136, %c0_137] : memref<9x8x32xf32, #tpu.memory_space<vmem>>, vector<1x8x32xf32>
    %193 = vector.shape_cast %192 : vector<1x8x32xf32> to vector<8x32xf32>
    %194 = vector.extract_strided_slice %187 {offsets = [0, 1], sizes = [32, 648], strides = [1, 1]} : vector<32x686xf32> to vector<32x648xf32>
    %cst_138 = arith.constant dense<0.000000e+00> : vector<8x648xf32>
    %195 = tpu.matmul %193, %194, %cst_138 {dimension_numbers = #tpu.dot_dimension_numbers<[1], [0], [0], [1], [0, 0, 1, 1], [], []>} : vector<8x32xf32>, vector<32x648xf32>, vector<8x648xf32> -> vector<8x648xf32>
    %196 = arith.addf %191, %195 : vector<8x648xf32>
    %c2_139 = arith.constant 2 : index
    %c0_140 = arith.constant 0 : index
    %c0_141 = arith.constant 0 : index
    %197 = vector.load %arg14[%c2_139, %c0_140, %c0_141] : memref<9x8x32xf32, #tpu.memory_space<vmem>>, vector<1x8x32xf32>
    %198 = vector.shape_cast %197 : vector<1x8x32xf32> to vector<8x32xf32>
    %199 = vector.extract_strided_slice %187 {offsets = [0, 2], sizes = [32, 648], strides = [1, 1]} : vector<32x686xf32> to vector<32x648xf32>
    %cst_142 = arith.constant dense<0.000000e+00> : vector<8x648xf32>
    %200 = tpu.matmul %198, %199, %cst_142 {dimension_numbers = #tpu.dot_dimension_numbers<[1], [0], [0], [1], [0, 0, 1, 1], [], []>} : vector<8x32xf32>, vector<32x648xf32>, vector<8x648xf32> -> vector<8x648xf32>
    %201 = arith.addf %196, %200 : vector<8x648xf32>
    %c3_143 = arith.constant 3 : index
    %c0_144 = arith.constant 0 : index
    %c0_145 = arith.constant 0 : index
    %202 = vector.load %arg14[%c3_143, %c0_144, %c0_145] : memref<9x8x32xf32, #tpu.memory_space<vmem>>, vector<1x8x32xf32>
    %203 = vector.shape_cast %202 : vector<1x8x32xf32> to vector<8x32xf32>
    %204 = vector.extract_strided_slice %187 {offsets = [0, 18], sizes = [32, 648], strides = [1, 1]} : vector<32x686xf32> to vector<32x648xf32>
    %cst_146 = arith.constant dense<0.000000e+00> : vector<8x648xf32>
    %205 = tpu.matmul %203, %204, %cst_146 {dimension_numbers = #tpu.dot_dimension_numbers<[1], [0], [0], [1], [0, 0, 1, 1], [], []>} : vector<8x32xf32>, vector<32x648xf32>, vector<8x648xf32> -> vector<8x648xf32>
    %206 = arith.addf %201, %205 : vector<8x648xf32>
    %c4_147 = arith.constant 4 : index
    %c0_148 = arith.constant 0 : index
    %c0_149 = arith.constant 0 : index
    %207 = vector.load %arg14[%c4_147, %c0_148, %c0_149] : memref<9x8x32xf32, #tpu.memory_space<vmem>>, vector<1x8x32xf32>
    %208 = vector.shape_cast %207 : vector<1x8x32xf32> to vector<8x32xf32>
    %209 = vector.extract_strided_slice %187 {offsets = [0, 19], sizes = [32, 648], strides = [1, 1]} : vector<32x686xf32> to vector<32x648xf32>
    %cst_150 = arith.constant dense<0.000000e+00> : vector<8x648xf32>
    %210 = tpu.matmul %208, %209, %cst_150 {dimension_numbers = #tpu.dot_dimension_numbers<[1], [0], [0], [1], [0, 0, 1, 1], [], []>} : vector<8x32xf32>, vector<32x648xf32>, vector<8x648xf32> -> vector<8x648xf32>
    %211 = arith.addf %206, %210 : vector<8x648xf32>
    %c5_151 = arith.constant 5 : index
    %c0_152 = arith.constant 0 : index
    %c0_153 = arith.constant 0 : index
    %212 = vector.load %arg14[%c5_151, %c0_152, %c0_153] : memref<9x8x32xf32, #tpu.memory_space<vmem>>, vector<1x8x32xf32>
    %213 = vector.shape_cast %212 : vector<1x8x32xf32> to vector<8x32xf32>
    %214 = vector.extract_strided_slice %187 {offsets = [0, 20], sizes = [32, 648], strides = [1, 1]} : vector<32x686xf32> to vector<32x648xf32>
    %cst_154 = arith.constant dense<0.000000e+00> : vector<8x648xf32>
    %215 = tpu.matmul %213, %214, %cst_154 {dimension_numbers = #tpu.dot_dimension_numbers<[1], [0], [0], [1], [0, 0, 1, 1], [], []>} : vector<8x32xf32>, vector<32x648xf32>, vector<8x648xf32> -> vector<8x648xf32>
    %216 = arith.addf %211, %215 : vector<8x648xf32>
    %c6_155 = arith.constant 6 : index
    %c0_156 = arith.constant 0 : index
    %c0_157 = arith.constant 0 : index
    %217 = vector.load %arg14[%c6_155, %c0_156, %c0_157] : memref<9x8x32xf32, #tpu.memory_space<vmem>>, vector<1x8x32xf32>
    %218 = vector.shape_cast %217 : vector<1x8x32xf32> to vector<8x32xf32>
    %219 = vector.extract_strided_slice %187 {offsets = [0, 36], sizes = [32, 648], strides = [1, 1]} : vector<32x686xf32> to vector<32x648xf32>
    %cst_158 = arith.constant dense<0.000000e+00> : vector<8x648xf32>
    %220 = tpu.matmul %218, %219, %cst_158 {dimension_numbers = #tpu.dot_dimension_numbers<[1], [0], [0], [1], [0, 0, 1, 1], [], []>} : vector<8x32xf32>, vector<32x648xf32>, vector<8x648xf32> -> vector<8x648xf32>
    %221 = arith.addf %216, %220 : vector<8x648xf32>
    %c7_159 = arith.constant 7 : index
    %c0_160 = arith.constant 0 : index
    %c0_161 = arith.constant 0 : index
    %222 = vector.load %arg14[%c7_159, %c0_160, %c0_161] : memref<9x8x32xf32, #tpu.memory_space<vmem>>, vector<1x8x32xf32>
    %223 = vector.shape_cast %222 : vector<1x8x32xf32> to vector<8x32xf32>
    %224 = vector.extract_strided_slice %187 {offsets = [0, 37], sizes = [32, 648], strides = [1, 1]} : vector<32x686xf32> to vector<32x648xf32>
    %cst_162 = arith.constant dense<0.000000e+00> : vector<8x648xf32>
    %225 = tpu.matmul %223, %224, %cst_162 {dimension_numbers = #tpu.dot_dimension_numbers<[1], [0], [0], [1], [0, 0, 1, 1], [], []>} : vector<8x32xf32>, vector<32x648xf32>, vector<8x648xf32> -> vector<8x648xf32>
    %226 = arith.addf %221, %225 : vector<8x648xf32>
    %c8_163 = arith.constant 8 : index
    %c0_164 = arith.constant 0 : index
    %c0_165 = arith.constant 0 : index
    %227 = vector.load %arg14[%c8_163, %c0_164, %c0_165] : memref<9x8x32xf32, #tpu.memory_space<vmem>>, vector<1x8x32xf32>
    %228 = vector.shape_cast %227 : vector<1x8x32xf32> to vector<8x32xf32>
    %229 = vector.extract_strided_slice %187 {offsets = [0, 38], sizes = [32, 648], strides = [1, 1]} : vector<32x686xf32> to vector<32x648xf32>
    %cst_166 = arith.constant dense<0.000000e+00> : vector<8x648xf32>
    %230 = tpu.matmul %228, %229, %cst_166 {dimension_numbers = #tpu.dot_dimension_numbers<[1], [0], [0], [1], [0, 0, 1, 1], [], []>} : vector<8x32xf32>, vector<32x648xf32>, vector<8x648xf32> -> vector<8x648xf32>
    %231 = arith.addf %226, %230 : vector<8x648xf32>
    %c0_167 = arith.constant 0 : index
    %c0_168 = arith.constant 0 : index
    %232 = vector.load %arg15[%c0_167, %c0_168] : memref<8x1xf32, #tpu.memory_space<vmem>>, vector<8x1xf32>
    %233 = vector.broadcast %232 : vector<8x1xf32> to vector<8x648xf32>
    %234 = arith.mulf %231, %233 : vector<8x648xf32>
    %c0_169 = arith.constant 0 : index
    %c0_170 = arith.constant 0 : index
    %235 = vector.load %arg16[%c0_169, %c0_170] : memref<8x1xf32, #tpu.memory_space<vmem>>, vector<8x1xf32>
    %236 = vector.broadcast %235 : vector<8x1xf32> to vector<8x648xf32>
    %237 = arith.addf %234, %236 : vector<8x648xf32>
    %cst_171 = arith.constant 0.000000e+00 : f32
    %238 = vector.broadcast %cst_171 : f32 to vector<8x648xf32>
    %239 = arith.maximumf %237, %238 : vector<8x648xf32>
    %240 = vector.broadcast %0 : vector<1x648xf32> to vector<8x648xf32>
    %241 = arith.mulf %239, %240 : vector<8x648xf32>
    %c0_172 = arith.constant 0 : index
    %c0_173 = arith.constant 0 : index
    %242 = vector.load %arg4[%c0_172, %c0_173] : memref<648x2xf32, #tpu.memory_space<vmem>>, vector<648x2xf32>
    %cst_174 = arith.constant dense<0.000000e+00> : vector<8x2xf32>
    %243 = tpu.matmul %241, %242, %cst_174 {dimension_numbers = #tpu.dot_dimension_numbers<[1], [0], [0], [1], [0, 0, 1, 1], [], []>} : vector<8x648xf32>, vector<648x2xf32>, vector<8x2xf32> -> vector<8x2xf32>
    %c0_175 = arith.constant 0 : index
    %c0_176 = arith.constant 0 : index
    %244 = vector.load %arg17[%c0_175, %c0_176] : memref<8x8xf32, #tpu.memory_space<vmem>>, vector<8x8xf32>
    %cst_177 = arith.constant dense<0.000000e+00> : vector<8x2xf32>
    %245 = tpu.matmul %244, %243, %cst_177 {dimension_numbers = #tpu.dot_dimension_numbers<[1], [0], [0], [1], [0, 0, 1, 1], [], []>} : vector<8x8xf32>, vector<8x2xf32>, vector<8x2xf32> -> vector<8x2xf32>
    %c0_178 = arith.constant 0 : index
    %c0_179 = arith.constant 0 : index
    %246 = vector.load %arg18[%c0_178, %c0_179] : memref<8x1xf32, #tpu.memory_space<vmem>>, vector<8x1xf32>
    %247 = vector.broadcast %246 : vector<8x1xf32> to vector<8x2xf32>
    %248 = arith.addf %245, %247 : vector<8x2xf32>
    %249 = arith.negf %248 : vector<8x2xf32>
    %250 = math.exp %249 : vector<8x2xf32>
    %cst_180 = arith.constant 1.000000e+00 : f32
    %251 = vector.broadcast %cst_180 : f32 to vector<8x2xf32>
    %252 = arith.addf %251, %250 : vector<8x2xf32>
    %253 = arith.divf %251, %252 : vector<8x2xf32>
    %c0_181 = arith.constant 0 : index
    %c0_182 = arith.constant 0 : index
    %c0_183 = arith.constant 0 : index
    %254 = vector.load %arg19[%c0_181, %c0_182, %c0_183] : memref<1x8x2xf32, #tpu.memory_space<vmem>>, vector<1x8x2xf32>
    %255 = vector.shape_cast %254 : vector<1x8x2xf32> to vector<8x2xf32>
    %256 = vector.shape_cast %253 : vector<8x2xf32> to vector<1x8x2xf32>
    tpu.vector_store %arg19[%c0_181, %c0_182, %c0_183], %256 {strides = array<i32>} : memref<1x8x2xf32, #tpu.memory_space<vmem>>, vector<1x8x2xf32>,
    return
  }
  func.func @transform_0(%arg0: i32) -> (i32, i32, i32) {
    %c0_i32 = arith.constant 0 : i32
    %c0_i32_0 = arith.constant 0 : i32
    %c0_i32_1 = arith.constant 0 : i32
    return %arg0, %c0_i32, %c0_i32_0 : i32, i32, i32
  }
  func.func @transform_1(%arg0: i32) -> (i32, i32, i32) {
    %c0_i32 = arith.constant 0 : i32
    %c0_i32_0 = arith.constant 0 : i32
    %c0_i32_1 = arith.constant 0 : i32
    return %arg0, %c0_i32, %c0_i32_0 : i32, i32, i32
  }
  func.func @transform_2(%arg0: i32) -> (i32, i32) {
    %c0_i32 = arith.constant 0 : i32
    %c0_i32_0 = arith.constant 0 : i32
    %c0_i32_1 = arith.constant 0 : i32
    return %c0_i32, %c0_i32_0 : i32, i32
  }
  func.func @transform_3(%arg0: i32) -> (i32, i32) {
    %c0_i32 = arith.constant 0 : i32
    %c0_i32_0 = arith.constant 0 : i32
    %c0_i32_1 = arith.constant 0 : i32
    return %c0_i32, %c0_i32_0 : i32, i32
  }
  func.func @transform_4(%arg0: i32) -> (i32, i32, i32) {
    %c0_i32 = arith.constant 0 : i32
    %c0_i32_0 = arith.constant 0 : i32
    %c0_i32_1 = arith.constant 0 : i32
    %c0_i32_2 = arith.constant 0 : i32
    return %c0_i32, %c0_i32_0, %c0_i32_1 : i32, i32, i32
  }
  func.func @transform_5(%arg0: i32) -> (i32, i32) {
    %c0_i32 = arith.constant 0 : i32
    %c0_i32_0 = arith.constant 0 : i32
    %c0_i32_1 = arith.constant 0 : i32
    return %c0_i32, %c0_i32_0 : i32, i32
  }
  func.func @transform_6(%arg0: i32) -> (i32, i32) {
    %c0_i32 = arith.constant 0 : i32
    %c0_i32_0 = arith.constant 0 : i32
    %c0_i32_1 = arith.constant 0 : i32
    return %c0_i32, %c0_i32_0 : i32, i32
  }
  func.func @transform_7(%arg0: i32) -> (i32, i32, i32) {
    %c0_i32 = arith.constant 0 : i32
    %c0_i32_0 = arith.constant 0 : i32
    %c0_i32_1 = arith.constant 0 : i32
    %c0_i32_2 = arith.constant 0 : i32
    return %c0_i32, %c0_i32_0, %c0_i32_1 : i32, i32, i32
  }
  func.func @transform_8(%arg0: i32) -> (i32, i32) {
    %c0_i32 = arith.constant 0 : i32
    %c0_i32_0 = arith.constant 0 : i32
    %c0_i32_1 = arith.constant 0 : i32
    return %c0_i32, %c0_i32_0 : i32, i32
  }
  func.func @transform_9(%arg0: i32) -> (i32, i32) {
    %c0_i32 = arith.constant 0 : i32
    %c0_i32_0 = arith.constant 0 : i32
    %c0_i32_1 = arith.constant 0 : i32
    return %c0_i32, %c0_i32_0 : i32, i32
  }
  func.func @transform_10(%arg0: i32) -> (i32, i32, i32) {
    %c0_i32 = arith.constant 0 : i32
    %c0_i32_0 = arith.constant 0 : i32
    %c0_i32_1 = arith.constant 0 : i32
    %c0_i32_2 = arith.constant 0 : i32
    return %c0_i32, %c0_i32_0, %c0_i32_1 : i32, i32, i32
  }
  func.func @transform_11(%arg0: i32) -> (i32, i32) {
    %c0_i32 = arith.constant 0 : i32
    %c0_i32_0 = arith.constant 0 : i32
    %c0_i32_1 = arith.constant 0 : i32
    return %c0_i32, %c0_i32_0 : i32, i32
  }
  func.func @transform_12(%arg0: i32) -> (i32, i32) {
    %c0_i32 = arith.constant 0 : i32
    %c0_i32_0 = arith.constant 0 : i32
    %c0_i32_1 = arith.constant 0 : i32
    return %c0_i32, %c0_i32_0 : i32, i32
  }
  func.func @transform_13(%arg0: i32) -> (i32, i32, i32) {
    %c0_i32 = arith.constant 0 : i32
    %c0_i32_0 = arith.constant 0 : i32
    %c0_i32_1 = arith.constant 0 : i32
    %c0_i32_2 = arith.constant 0 : i32
    return %c0_i32, %c0_i32_0, %c0_i32_1 : i32, i32, i32
  }
  func.func @transform_14(%arg0: i32) -> (i32, i32) {
    %c0_i32 = arith.constant 0 : i32
    %c0_i32_0 = arith.constant 0 : i32
    %c0_i32_1 = arith.constant 0 : i32
    return %c0_i32, %c0_i32_0 : i32, i32
  }
  func.func @transform_15(%arg0: i32) -> (i32, i32) {
    %c0_i32 = arith.constant 0 : i32
    %c0_i32_0 = arith.constant 0 : i32
    %c0_i32_1 = arith.constant 0 : i32
    return %c0_i32, %c0_i32_0 : i32, i32
  }
  func.func @transform_16(%arg0: i32) -> (i32, i32) {
    %c0_i32 = arith.constant 0 : i32
    %c0_i32_0 = arith.constant 0 : i32
    %c0_i32_1 = arith.constant 0 : i32
    return %c0_i32, %c0_i32_0 : i32, i32
  }
  func.func @transform_17(%arg0: i32) -> (i32, i32) {
    %c0_i32 = arith.constant 0 : i32
    %c0_i32_0 = arith.constant 0 : i32
    %c0_i32_1 = arith.constant 0 : i32
    return %c0_i32, %c0_i32_0 : i32, i32
  }
  func.func @transform_18(%arg0: i32) -> (i32, i32, i32) {
    %c0_i32 = arith.constant 0 : i32
    %c0_i32_0 = arith.constant 0 : i32
    %c0_i32_1 = arith.constant 0 : i32
    return %arg0, %c0_i32, %c0_i32_0 : i32, i32, i32
  }
}

</mosaic_0001>

<bundles_post_ra>
// kernel: decoder_forward.1
= control target key start
LH: loop header
LB: loop body
LE: loop exit
PB: predicated region body
PF: predicated region fallthrough
CT: control target
= control target key end

     0   :  { %s20506_s0 = inlined_call_operand.vmem [shape: f32[2,3,324], index: 0, kind: input, shape index: {}]   ;;  %s20507_s1 = inlined_call_operand.vmem [shape: f32[2,1,1], index: 1, kind: input, shape index: {}]   ;;  %s20508_s2 = inlined_call_operand.vmem [shape: f32[1,648], index: 2, kind: input, shape index: {}]   ;;  %s20509_s3 = inlined_call_operand.hbm [shape: f32[648,2], index: 3, kind: input, shape index: {}]   ;;  %s20510_s4 = inlined_call_operand.vmem [shape: f32[9,32,4], index: 4, kind: input, shape index: {}]   ;;  %s20511_s5 = inlined_call_operand.vmem [shape: f32[32,1], index: 5, kind: input, shape index: {}]   ;;  %s20512_s6 = inlined_call_operand.vmem [shape: f32[32,1], index: 6, kind: input, shape index: {}]   ;;  %s20513_s7 = inlined_call_operand.vmem [shape: f32[9,32,32], index: 7, kind: input, shape index: {}]   ;;  %s20514_s8 = inlined_call_operand.vmem [shape: f32[32,1], index: 8, kind: input, shape index: {}]   ;;  %s20515_s9 = inlined_call_operand.vmem [shape: f32[32,1], index: 9, kind: input, shape index: {}]   ;;  %s20516_s10 = inlined_call_operand.vmem [shape: f32[9,32,32], index: 10, kind: input, shape index: {}]   ;;  %s20517_s11 = inlined_call_operand.vmem [shape: f32[32,1], index: 11, kind: input, shape index: {}]   ;;  %s20518_s12 = inlined_call_operand.vmem [shape: f32[32,1], index: 12, kind: input, shape index: {}]   ;;  %s20519_s13 = inlined_call_operand.vmem [shape: f32[9,8,32], index: 13, kind: input, shape index: {}]   ;;  %s20520_s14 = inlined_call_operand.vmem [shape: f32[8,1], index: 14, kind: input, shape index: {}]   ;;  %s20521_s15 = inlined_call_operand.vmem [shape: f32[8,1], index: 15, kind: input, shape index: {}]   ;;  %s20522_s16 = inlined_call_operand.vmem [shape: f32[8,8], index: 16, kind: input, shape index: {}]   ;;  %s20523_s17 = inlined_call_operand.vmem [shape: f32[8,1], index: 17, kind: input, shape index: {}]   ;;  %s20524_s18 = inlined_call_operand.vmem [shape: f32[1,8,2], index: 18, kind: output, shape index: {}]  }
   0x1   :  { %20639 = sst [smem:[#allocation113_spill]] %s20506_s0 }
   0x2   :  { %20640 = sst [smem:[#allocation114_spill]] %s20507_s1 }
   0x3   :  { %20641 = sst [smem:[#allocation115_spill]] %s20508_s2 }
   0x4   :  { %23 = vsyncpa [#allocation3], 0  ;;  %s34_s29 = sshll.u32 %s20509_s3, 4  ;;  %s13116_s30 = smov [#allocation2]   ;;  %s35_s29 = int_to_ptr.hbm [resolvable:$true] %s34_s29 }
   0x5   :  { %s36_s0 = sshll.u32 %s13116_s30, 4  ;;  %s13117_s19 = smov 128   ;;  %s37_s0 = int_to_ptr.vmem [resolvable:$true] %s36_s0 }
   0x6   :  { %s13118_s1 = smov 8  }
   0x7   :  { %42 = dma.hbm_to_vmem [thread:$0]  %s35_s29, 10368, %s37_s0, [#allocation3], %s13117_s19, %s13117_s19, %s13118_s1  }
   0x8   :  { %13114 = dma.done.wait [#allocation3], 10368  }
   0x9   :  { %13115 = vsyncadd [#allocation3], 4294956928  ;;  %v13119_v0 = vmov 0   ;;  %s20642_s22 = sld [smem:[#allocation115_spill]]  ;;  %s13120_s24 = smov 60   ;;  %vm102_vm0 = vcmask 490496  }
   0xa   :  { %11552 = vset.pattern.permute.xlu0 %v13119_v0  ;;  %11553 = vset.pattern.permute.xlu1 %v13119_v0  ;;  %s20643_s3 = sld [smem:[#allocation114_spill]]  ;;  %s13121_s19 = smov 68   ;;  %vm171_vm1 = vcmask 1042432   ;;  %vm131_vm2 = vcmask 556032   ;;  %vm196_vm3 = vcmask 154624   ;;  %vm205_vm4 = vcmask 220160  }
   0xb   :  { %11554 = vset.pattern.permute.xlu2 %v13119_v0  ;;  %s20644_s29 = sld [smem:[#allocation113_spill]]  ;;  %s13122_s23 = smov 19   ;;  %vm230_vm5 = vcmask 1039360   ;;  %vm249_vm6 = vcmask 1043456   ;;  %vm236_vm7 = vcmask 31744   ;;  %vm651_vm8 = vcmask 1031168  }
   0xc   :  { %s13125_s25 = smov 110   ;;  %s13126_s26 = smov 109   ;;  %vm896_vm9 = vcmask 900096   ;;  %vm1141_vm10 = vcmask 891904   ;;  %vm1386_vm11 = vcmask 883712   ;;  %vm1631_vm12 = vcmask 752640  }
   0xd   :  { %s13127_s27 = smov 108   ;;  %s13129_s28 = smov 91   ;;  %vm1876_vm13 = vcmask 744448   ;;  %vm2121_vm14 = vcmask 736256   ;;  %vm2738_vm15 = vcmask 261120  }
   0xf   :  { %v75_v1 = vld [vmem:[%s20642_s22] sm:$0x3f] }
  0x10   :  { %v81_v2 = vld [vmem:[%s20643_s3] sm:$0x1]  ;;  %98 = vrot.lane.b32.xlu0 %v75_v1, %s13120_s24  ;;  %v10635_v3 = vld [vmem:[%s20643_s3 + $0x1] sm:$0x1]  ;;  %s13123_s3 = smov 127   ;;  %s13124_s24 = smov 126  }
  0x11   :  { %84 = vperm.xlu1 %11553, %v81_v2   ;;  %v76_v4 = vld [vmem:[%s20644_s29] sm:$0x77]  ;;  %v10633_v5 = vld [vmem:[%s20644_s29 + $0xc] sm:$0x77]  ;;  %v77_v9 = vld [vmem:[%s20644_s29 + $0x8] sm:$0x7] }
  0x12   :  { %108 = vst [vmem:[#allocation1] ss:$2 sm:$0xff] %v76_v4  ;;  %v10634_v10 = vld [vmem:[%s20644_s29 + $0x14] sm:$0x7]  ;;  %s13130_s29 = smov 90  }
  0x13   :  { %110 = vst [vmem:[#allocation1 + $0x10] ss:$2 sm:$0xff] %v77_v9  ;;  %v13381_v9 = vld [vmem:[%s20510_s4 + $0x38] sm:$0xff] }
  0x18   :  { %93 = vperm.xlu0 %11552, %v10635_v3  }
  0x19   :  { %v111_v6 = vld.sshfl [vmem:[#allocation1] sm:$0xff pattern:$0x75316420]  ;;  %v112_v7 = vld.sshfl [vmem:[#allocation1 + $0x8] sm:$0xff pattern:$0x75316420] }
  0x1a   :  { %119 = vst [vmem:[#allocation1] ss:$2 sm:$0xff] %v10633_v5  ;;  %v113_v11 = vld.sshfl [vmem:[#allocation1 + $0x10] sm:$0xff pattern:$0x75316420] }
  0x1b   :  { %121 = vst [vmem:[#allocation1 + $0x10] ss:$2 sm:$0xff] %v10634_v10 }
  0x21   :  { %v122_v8 = vld.sshfl [vmem:[#allocation1] sm:$0xff pattern:$0x75316420]  ;;  %v123_v25 = vld.sshfl [vmem:[#allocation1 + $0x8] sm:$0xff pattern:$0x75316420] }
  0x22   :  { %125 = vrot.lane.b32.xlu2 %v122_v8, %s13121_s19  ;;  %v124_v12 = vld.sshfl [vmem:[#allocation1 + $0x10] sm:$0xff pattern:$0x75316420] }
  0x23   :  { %129 = vrot.lane.b32.xlu0 %v124_v12, %s13121_s19  ;;  %v13368_v8 = vld [vmem:[%s20510_s4 + $0x30] sm:$0xff] }
  0x7c   :  { %v126_v33 = vpop.permute.xlu2 %125 }
  0x7d   :  { %v138_v38 = vsel %vm131_vm2, %v113_v11, %v126_v33 }
  0x82   :  { %v99_v13 = vpop.permute.xlu0 %98 }
  0x83   :  { %v100_v14 = vrot.slane %v99_v13, 2  ;;  %v101_v15 = vrot.slane %v99_v13, 3  ;;  %v85_v18 = vpop.permute.xlu1 %84 }
  0x84   :  { %v87_v21 = vperm.slane %v85_v18, 0 }
  0x85   :  { %v103_v19 = vsel %vm102_vm0, %v100_v14, %v101_v15  ;;  %vm15114_vm0 = vmneg %vm196_vm3 }
  0x86   :  { %v88_v24 = vmul.f32 %v87_v21, %v75_v1 }
  0x88   :  { %v140_v26 = vperm.slane %v88_v24, 0  ;;  %v141_v30 = vperm.slane %v88_v24, 1  ;;  %v142_v36 = vperm.slane %v88_v24, 2 }
  0x8a   :  { %v94_v16 = vpop.permute.xlu0 %93  ;;  %v159_v28 = vrot.slane %v140_v26, 5  ;;  %v160_v31 = vrot.slane %v141_v30, 5  ;;  %v207_v26 = vld [vmem:[%s20510_s4] sm:$0xff]  ;;  %v2398_v30 = vld [vmem:[%s20512_s6 + $0x8] sm:$0xff] }
  0x8b   :  { %v96_v17 = vperm.slane %v94_v16, 0  ;;  %v2349_v16 = vld [vmem:[%s20511_s5] sm:$0xff] }
  0x8c   :  { %v172_v29 = vsel %vm171_vm1, %v111_v6, %v159_v28  ;;  %v173_v32 = vsel %vm171_vm1, %v112_v7, %v160_v31  ;;  %v13342_v6 = vld [vmem:[%s20510_s4 + $0x20] sm:$0xff]  ;;  %v13355_v7 = vld [vmem:[%s20510_s4 + $0x28] sm:$0xff] }
  0x8d   :  { %v105_v20 = vmul.f32 %v103_v19, %v96_v17  ;;  %v208_v31 = vld [vmem:[%s20510_s4 + $0x8] sm:$0xff] }
  0x8f   :  { %v146_v22 = vperm.slane %v105_v20, 1  ;;  %v145_v23 = vperm.slane %v105_v20, 0  ;;  %v147_v27 = vperm.slane %v105_v20, 2  ;;  %v2352_v20 = vld [vmem:[%s20511_s5 + $0x18] sm:$0xff] }
  0x91   :  { %150 = vrot.lane.b32.xlu2 %v146_v22, %s13121_s19  ;;  %148 = vrot.lane.b32.xlu1 %v145_v23, %s13121_s19  ;;  %v2351_v22 = vld [vmem:[%s20511_s5 + $0x10] sm:$0xff] }
  0x95   :  { %v130_v46 = vpop.permute.xlu0 %129 }
  0x99   :  { %152 = vrot.lane.b32.xlu1 %v147_v27, %s13121_s19  ;;  %127 = vrot.lane.b32.xlu2 %v123_v25, %s13121_s19  ;;  %s13128_s19 = smov 92  }
  0xa1   :  { %184 = vrot.lane.b32.xlu1 %v172_v29, %s13122_s23  ;;  %186 = vrot.lane.b32.xlu2 %v173_v32, %s13122_s23  ;;  %v2399_v29 = vld [vmem:[%s20512_s6 + $0x10] sm:$0xff] }
  0xa2   :  { %v209_v32 = vld [vmem:[%s20510_s4 + $0x10] sm:$0xff] }
  0xeb   :  { %v151_v34 = vpop.permute.xlu2 %150 }
  0xf3   :  { %v128_v35 = vpop.permute.xlu2 %127 }
  0xf4   :  { %v132_v41 = vsel %vm131_vm2, %v126_v33, %v128_v35  ;;  %v133_v50 = vsel %vm131_vm2, %v128_v35, %v130_v46  ;;  %v210_v35 = vld [vmem:[%s20510_s4 + $0x18] sm:$0xff] }
  0xfb   :  { %v187_v56 = vpop.permute.xlu2 %186 }
 0x103   :  { %v149_v37 = vpop.permute.xlu1 %148 }
 0x104   :  { %v154_v39 = vsel %vm131_vm2, %v149_v37, %v151_v34  ;;  %v157_v40 = vsel %vm131_vm2, %v142_v36, %v149_v37 }
 0x105   :  { %v161_v42 = vrot.slane %v157_v40, 5  ;;  %v162_v43 = vrot.slane %v154_v39, 5 }
 0x107   :  { %v174_v44 = vsel %vm171_vm1, %v138_v38, %v161_v42  ;;  %v175_v45 = vsel %vm171_vm1, %v132_v41, %v162_v43 }
 0x108   :  { %188 = vrot.lane.b32.xlu0 %v174_v44, %s13122_s23  ;;  %190 = vrot.lane.b32.xlu1 %v175_v45, %s13122_s23  ;;  %v10700_v44 = vld [vmem:[%s20510_s4 + $0x40] sm:$0xff] }
 0x10b   :  { %v153_v47 = vpop.permute.xlu1 %152 }
 0x10c   :  { %v155_v48 = vsel %vm131_vm2, %v151_v34, %v153_v47  ;;  %v164_v49 = vrot.slane %v153_v47, 5 }
 0x10d   :  { %v163_v51 = vrot.slane %v155_v48, 5  ;;  %v10701_v48 = vld [vmem:[%s20510_s4 + $0x48] sm:$0xff] }
 0x10e   :  { %v177_v52 = vsel %vm171_vm1, %v130_v46, %v164_v49 }
 0x10f   :  { %v176_v53 = vsel %vm171_vm1, %v133_v50, %v163_v51  ;;  %v10702_v51 = vld [vmem:[%s20510_s4 + $0x50] sm:$0xff]  ;;  %vm10453_vm1 = vcmask 64512  }
 0x110   :  { %194 = vrot.lane.b32.xlu0 %v177_v52, %s13122_s23  ;;  %192 = vrot.lane.b32.xlu2 %v176_v53, %s13122_s23  ;;  %v10703_v53 = vld [vmem:[%s20510_s4 + $0x58] sm:$0xff] }
 0x113   :  { %v185_v54 = vpop.permute.xlu1 %184 }
 0x114   :  { %v13269_v55 = vsel %vm196_vm3, 0.0, %v185_v54  ;;  %v13274_v57 = vsel %vm196_vm3, %v185_v54, %v187_v56 }
 0x115   :  { %220 = vrot.lane.b32.xlu1 %v13274_v57, %s13123_s3 }
 0x118   :  { %218 = vrot.lane.b32.xlu0 %v13269_v55, %s13123_s3 }
 0x16a   :  { %v193_v62 = vpop.permute.xlu2 %192 }
 0x17a   :  { %v189_v58 = vpop.permute.xlu0 %188  ;;  %v191_v59 = vpop.permute.xlu1 %190 }
 0x17b   :  { %v13279_v60 = vsel %vm196_vm3, %v187_v56, %v189_v58  ;;  %v13282_v61 = vsel %vm196_vm3, %v189_v58, %v191_v59  ;;  %v13289_v0 = vsel %vm196_vm3, %v191_v59, %v193_v62 }
 0x17c   :  { %222 = vrot.lane.b32.xlu2 %v13279_v60, %s13123_s3  ;;  %224 = vrot.lane.b32.xlu1 %v13282_v61, %s13123_s3 }
 0x182   :  { %v195_v63 = vpop.permute.xlu0 %194 }
 0x183   :  { %v201_v1 = vsel %vm196_vm3, %v193_v62, %v195_v63  ;;  %v13589_v62 = vld [vmem:[%s20510_s4 + $0x60] sm:$0xff] }
 0x184   :  { %v13293_v2 = vsel %vm205_vm4, %v201_v1, 0.0  ;;  %226 = vrot.lane.b32.xlu2 %v13289_v0, %s13123_s3  ;;  %639 = vrot.lane.b32.xlu1 %v13269_v55, %s13124_s24 }
 0x185   :  { %228 = vrot.lane.b32.xlu0 %v13293_v2, %s13123_s3 }
 0x187   :  { %v221_v4 = vpop.permute.xlu1 %220 }
 0x18a   :  { %v219_v3 = vpop.permute.xlu0 %218 }
 0x18b   :  { %v231_v5 = vsel %vm230_vm5, %v219_v3, %v221_v4  ;;  %v13607_v3 = vld [vmem:[%s20510_s4 + $0x68] sm:$0xff] }
 0x18c   :  { %641 = vrot.lane.b32.xlu2 %v13274_v57, %s13124_s24  ;;  %645 = vrot.lane.b32.xlu1 %v13282_v61, %s13124_s24 }
 0x18d   :  { %643 = vrot.lane.b32.xlu0 %v13279_v60, %s13124_s24  ;;  %10640 = vmatpush.msk.msra.mxu0 %vm249_vm6, %v231_v5 }
 0x18e   :  { %10641 = vmatmul.msk.f32.vlgmr.msra.gmra.mxu0 %vm236_vm7, %v13342_v6 }
 0x194   :  { %647 = vrot.lane.b32.xlu2 %v13289_v0, %s13124_s24  ;;  %884 = vrot.lane.b32.xlu1 %v13269_v55, %s13125_s25 }
 0x195   :  { %649 = vrot.lane.b32.xlu0 %v13293_v2, %s13124_s24 }
 0x196   :  { %10642 = vmatmul.msk.f32.gmra.mxu0 %vm236_vm7, %v13355_v7 }
 0x19c   :  { %886 = vrot.lane.b32.xlu2 %v13274_v57, %s13125_s25  ;;  %890 = vrot.lane.b32.xlu1 %v13282_v61, %s13125_s25 }
 0x19d   :  { %888 = vrot.lane.b32.xlu0 %v13279_v60, %s13125_s25 }
 0x19e   :  { %10643 = vmatmul.msk.f32.gmra.mxu0 %vm236_vm7, %v13368_v8 }
 0x1a4   :  { %892 = vrot.lane.b32.xlu2 %v13289_v0, %s13125_s25  ;;  %1129 = vrot.lane.b32.xlu1 %v13269_v55, %s13126_s26 }
 0x1a5   :  { %894 = vrot.lane.b32.xlu0 %v13293_v2, %s13125_s25 }
 0x1a6   :  { %10644 = vmatmul.msk.f32.gmra.mxu0 %vm236_vm7, %v13381_v9 }
 0x1ac   :  { %1131 = vrot.lane.b32.xlu2 %v13274_v57, %s13126_s26  ;;  %1135 = vrot.lane.b32.xlu1 %v13282_v61, %s13126_s26 }
 0x1ad   :  { %1133 = vrot.lane.b32.xlu0 %v13279_v60, %s13126_s26 }
 0x1b4   :  { %1137 = vrot.lane.b32.xlu2 %v13289_v0, %s13126_s26  ;;  %1374 = vrot.lane.b32.xlu1 %v13269_v55, %s13127_s27 }
 0x1b5   :  { %1139 = vrot.lane.b32.xlu0 %v13293_v2, %s13126_s26 }
 0x1bc   :  { %1376 = vrot.lane.b32.xlu2 %v13274_v57, %s13127_s27  ;;  %1380 = vrot.lane.b32.xlu1 %v13282_v61, %s13127_s27 }
 0x1bd   :  { %1378 = vrot.lane.b32.xlu0 %v13279_v60, %s13127_s27 }
 0x1c4   :  { %1382 = vrot.lane.b32.xlu2 %v13289_v0, %s13127_s27  ;;  %1619 = vrot.lane.b32.xlu1 %v13269_v55, %s13128_s19 }
 0x1c5   :  { %1384 = vrot.lane.b32.xlu0 %v13293_v2, %s13127_s27 }
 0x1cc   :  { %1621 = vrot.lane.b32.xlu2 %v13274_v57, %s13128_s19  ;;  %1625 = vrot.lane.b32.xlu1 %v13282_v61, %s13128_s19 }
 0x1cd   :  { %1623 = vrot.lane.b32.xlu0 %v13279_v60, %s13128_s19 }
 0x1d4   :  { %1627 = vrot.lane.b32.xlu2 %v13289_v0, %s13128_s19  ;;  %1864 = vrot.lane.b32.xlu1 %v13269_v55, %s13129_s28 }
 0x1d5   :  { %1629 = vrot.lane.b32.xlu0 %v13293_v2, %s13128_s19 }
 0x1d6   :  { %v223_v10 = vpop.permute.xlu2 %222 }
 0x1d7   :  { %v232_v11 = vsel %vm230_vm5, %v221_v4, %v223_v10 }
 0x1d8   :  { %10645 = vmatpush.msk.msra.mxu1 %vm249_vm6, %v232_v11  ;;  %11535 = vmatpush.msk.msra.mxu3 %vm249_vm6, %v232_v11 }
 0x1d9   :  { %10646 = vmatmul.msk.f32.vlgmr.msra.gmra.mxu1 %vm236_vm7, %v13342_v6  ;;  %10649 = vmatmul.msk.f32.vlgmr.msra.gmra.mxu3 %vm236_vm7, %v13381_v9 }
 0x1dc   :  { %1866 = vrot.lane.b32.xlu2 %v13274_v57, %s13129_s28  ;;  %1870 = vrot.lane.b32.xlu1 %v13282_v61, %s13129_s28 }
 0x1dd   :  { %1868 = vrot.lane.b32.xlu0 %v13279_v60, %s13129_s28 }
 0x1de   :  { %v227_v12 = vpop.permute.xlu2 %226 }
 0x1e1   :  { %10647 = vmatmul.msk.f32.gmra.mxu1 %vm236_vm7, %v13355_v7 }
 0x1e4   :  { %1872 = vrot.lane.b32.xlu2 %v13289_v0, %s13129_s28  ;;  %2109 = vrot.lane.b32.xlu1 %v13269_v55, %s13130_s29 }
 0x1e5   :  { %1874 = vrot.lane.b32.xlu0 %v13293_v2, %s13129_s28 }
 0x1e6   :  { %v642_v21 = vpop.permute.xlu2 %641 }
 0x1e9   :  { %10648 = vmatmul.msk.f32.gmra.mxu1 %vm236_vm7, %v13368_v8 }
 0x1ec   :  { %2111 = vrot.lane.b32.xlu2 %v13274_v57, %s13130_s29  ;;  %2115 = vrot.lane.b32.xlu1 %v13282_v61, %s13130_s29 }
 0x1ed   :  { %2113 = vrot.lane.b32.xlu0 %v13279_v60, %s13130_s29 }
 0x1ee   :  { %v225_v13 = vpop.permute.xlu1 %224  ;;  %v648_v33 = vpop.permute.xlu2 %647 }
 0x1ef   :  { %v233_v14 = vsel %vm230_vm5, %v223_v10, %v225_v13  ;;  %v234_v15 = vsel %vm230_vm5, %v225_v13, %v227_v12  ;;  %v13642_v13 = vld [vmem:[%s20510_s4 + $0x78] sm:$0xff] }
 0x1f0   :  { %10650 = vmatpush.msk.msrb.mxu1 %vm249_vm6, %v233_v14  ;;  %11536 = vmatpush.msk.msra.mxu2 %vm249_vm6, %v233_v14 }
 0x1f1   :  { %10655 = vmatpush.msk.msrb.mxu3 %vm249_vm6, %v234_v15  ;;  %10651 = vmatmul.msk.f32.vlgmr.msrb.gmra.mxu1 %vm236_vm7, %v13342_v6 }
 0x1f2   :  { %10653 = vmatmul.msk.f32.vlgmr.msra.gmra.mxu2 %vm236_vm7, %v13368_v8  ;;  %10656 = vmatmul.msk.f32.vlgmr.msrb.gmra.mxu3 %vm236_vm7, %v13342_v6 }
 0x1f3   :  { %10670 = vmatpush.msk.msrb.mxu2 %vm249_vm6, %v13269_v55  ;;  %10675 = vmatpush.msk.msra.mxu3 %vm249_vm6, %v13274_v57 }
 0x1f4   :  { %2117 = vrot.lane.b32.xlu2 %v13289_v0, %s13130_s29  ;;  %2355 = vperm.xlu1 %11553, %v2349_v16  }
 0x1f5   :  { %10690 = vmatpush.msk.msra.mxu2 %vm249_vm6, %v13289_v0  ;;  %10695 = vmatpush.msk.msrb.mxu3 %vm249_vm6, %v13293_v2 }
 0x1f6   :  { %2119 = vrot.lane.b32.xlu0 %v13293_v2, %s13130_s29  ;;  %v640_v17 = vpop.permute.xlu1 %639  ;;  %v887_v39 = vpop.permute.xlu2 %886 }
 0x1f7   :  { %v229_v18 = vpop.permute.xlu0 %228  ;;  %v652_v23 = vsel %vm651_vm8, %v640_v17, %v642_v21 }
 0x1f8   :  { %10665 = vmatpush.msk.msra.mxu1 %vm249_vm6, %v229_v18  ;;  %v235_v19 = vsel %vm230_vm5, %v227_v12, %v229_v18 }
 0x1f9   :  { %10652 = vmatmul.msk.f32.gmra.mxu1 %vm236_vm7, %v13355_v7  ;;  %10660 = vmatpush.msk.msrb.mxu0 %vm249_vm6, %v235_v19 }
 0x1fa   :  { %10654 = vmatmul.msk.f32.gmra.mxu2 %vm236_vm7, %v13381_v9  ;;  %10657 = vmatmul.msk.f32.gmra.mxu3 %vm236_vm7, %v13355_v7 }
 0x1fb   :  { %10685 = vmatpush.msk.msrb.mxu1 %vm249_vm6, %v13282_v61  ;;  %10661 = vmatmul.msk.f32.vlgmr.msrb.gmra.mxu0 %vm236_vm7, %v13342_v6 }
 0x1fc   :  { %10680 = vmatpush.msk.msra.mxu0 %vm249_vm6, %v13279_v60  ;;  %2370 = vperm.xlu1 %11553, %v2352_v20  }
 0x1fe   :  { %10704 = vmatpush.msk.msrb.mxu0 %vm249_vm6, %v652_v23  ;;  %2365 = vperm.xlu0 %11552, %v2351_v22   ;;  %v646_v24 = vpop.permute.xlu1 %645  ;;  %v893_v47 = vpop.permute.xlu2 %892 }
 0x1ff   :  { %v644_v25 = vpop.permute.xlu0 %643  ;;  %v655_v34 = vsel %vm651_vm8, %v646_v24, %v648_v33 }
 0x200   :  { %v653_v27 = vsel %vm651_vm8, %v642_v21, %v644_v25  ;;  %v654_v28 = vsel %vm651_vm8, %v644_v25, %v646_v24 }
 0x201   :  { %10666 = vmatmul.msk.f32.vlgmr.msra.gmra.mxu1 %vm236_vm7, %v13342_v6 }
 0x202   :  { %10658 = vmatmul.msk.f32.gmra.mxu3 %vm236_vm7, %v13368_v8  ;;  %10671 = vmatmul.msk.f32.vlgmr.msrb.gmra.mxu2 %vm236_vm7, %v207_v26 }
 0x203   :  { %10709 = vmatpush.msk.msra.mxu1 %vm249_vm6, %v653_v27  ;;  %10714 = vmatpush.msk.msrb.mxu2 %vm249_vm6, %v654_v28 }
 0x204   :  { %10662 = vmatmul.msk.f32.gmra.mxu0 %vm236_vm7, %v13355_v7  ;;  %2413 = vperm.xlu1 %11553, %v2399_v29  }
 0x206   :  { %2408 = vperm.xlu0 %11552, %v2398_v30   ;;  %v885_v38 = vpop.permute.xlu1 %884  ;;  %v1132_v57 = vpop.permute.xlu2 %1131 }
 0x207   :  { %v650_v36 = vpop.permute.xlu0 %649  ;;  %v897_v40 = vsel %vm896_vm9, %v885_v38, %v887_v39 }
 0x208   :  { %v656_v37 = vsel %vm651_vm8, %v648_v33, %v650_v36 }
 0x209   :  { %10667 = vmatmul.msk.f32.gmra.mxu1 %vm236_vm7, %v13355_v7  ;;  %v13623_v7 = vld [vmem:[%s20510_s4 + $0x70] sm:$0xff] }
 0x20a   :  { %10659 = vmatmul.msk.f32.gmra.mxu3 %vm236_vm7, %v13381_v9  ;;  %10672 = vmatmul.msk.f32.gmra.mxu2 %vm236_vm7, %v208_v31 }
 0x20b   :  { %v13564_v52 = vpop.f32.mrf.mxu0 }
 0x20c   :  { %10663 = vmatmul.msk.f32.gmra.mxu0 %vm236_vm7, %v13368_v8 }
 0x20e   :  { %v891_v43 = vpop.permute.xlu1 %890 }
 0x20f   :  { %v889_v41 = vpop.permute.xlu0 %888  ;;  %v900_v49 = vsel %vm896_vm9, %v891_v43, %v893_v47 }
 0x210   :  { %v898_v42 = vsel %vm896_vm9, %v887_v39, %v889_v41  ;;  %v899_v45 = vsel %vm896_vm9, %v889_v41, %v891_v43 }
 0x211   :  { %10668 = vmatmul.msk.f32.gmra.mxu1 %vm236_vm7, %v13368_v8  ;;  %v1138_v8 = vpop.permute.xlu2 %1137 }
 0x212   :  { %10673 = vmatmul.msk.f32.gmra.mxu2 %vm236_vm7, %v209_v32  ;;  %10676 = vmatmul.msk.f32.vlgmr.msra.gmra.mxu3 %vm236_vm7, %v207_v26 }
 0x213   :  { %10719 = vmatpush.msk.msra.mxu3 %vm249_vm6, %v655_v34  ;;  %v13579_v56 = vpop.f32.mrf.mxu0 }
 0x214   :  { %10664 = vmatmul.msk.f32.gmra.mxu0 %vm236_vm7, %v13381_v9 }
 0x216   :  { %v1130_v54 = vpop.permute.xlu1 %1129 }
 0x217   :  { %v895_v46 = vpop.permute.xlu0 %894  ;;  %v1142_v58 = vsel %vm1141_vm10, %v1130_v54, %v1132_v57 }
 0x218   :  { %v901_v50 = vsel %vm896_vm9, %v893_v47, %v895_v46 }
 0x219   :  { %10669 = vmatmul.msk.f32.gmra.mxu1 %vm236_vm7, %v13381_v9  ;;  %v1377_v21 = vpop.permute.xlu2 %1376 }
 0x21a   :  { %10674 = vmatmul.msk.f32.gmra.mxu2 %vm236_vm7, %v210_v35  ;;  %10677 = vmatmul.msk.f32.gmra.mxu3 %vm236_vm7, %v208_v31 }
 0x21b   :  { %v13600_v1 = vpop.f32.mrf.mxu0 }
 0x21c   :  { %10681 = vmatmul.msk.f32.vlgmr.msra.gmra.mxu0 %vm236_vm7, %v207_v26 }
 0x21d   :  { %10724 = vmatpush.msk.msra.mxu0 %vm249_vm6, %v656_v37 }
 0x21e   :  { %v1136_v60 = vpop.permute.xlu1 %1135 }
 0x21f   :  { %v1134_v61 = vpop.permute.xlu0 %1133  ;;  %v1145_v9 = vsel %vm1141_vm10, %v1136_v60, %v1138_v8 }
 0x220   :  { %v1143_v63 = vsel %vm1141_vm10, %v1132_v57, %v1134_v61  ;;  %v1144_v0 = vsel %vm1141_vm10, %v1134_v61, %v1136_v60  ;;  %v13774_v61 = vld [vmem:[%s20510_s4 + $0x90] sm:$0xff] }
 0x221   :  { %10686 = vmatmul.msk.f32.vlgmr.msrb.gmra.mxu1 %vm236_vm7, %v207_v26 }
 0x222   :  { %10678 = vmatmul.msk.f32.gmra.mxu3 %vm236_vm7, %v209_v32  ;;  %10691 = vmatmul.msk.f32.vlgmr.msra.gmra.mxu2 %vm236_vm7, %v207_v26 }
 0x223   :  { %10729 = vmatpush.msk.msrb.mxu1 %vm249_vm6, %v650_v36  ;;  %10738 = vmatpush.msk.msra.mxu2 %vm249_vm6, %v897_v40  ;;  %v13618_v6 = vpop.f32.mrf.mxu0  ;;  %v13722_v40 = vld [vmem:[%s20510_s4 + $0x80] sm:$0xff] }
 0x224   :  { %10682 = vmatmul.msk.f32.gmra.mxu0 %vm236_vm7, %v208_v31 }
 0x226   :  { %v1375_v20 = vpop.permute.xlu1 %1374 }
 0x227   :  { %v1140_v15 = vpop.permute.xlu0 %1139  ;;  %v1387_v23 = vsel %vm1386_vm11, %v1375_v20, %v1377_v21 }
 0x228   :  { %v1146_v16 = vsel %vm1141_vm10, %v1138_v8, %v1140_v15 }
 0x229   :  { %10687 = vmatmul.msk.f32.gmra.mxu1 %vm236_vm7, %v208_v31 }
 0x22a   :  { %10679 = vmatmul.msk.f32.gmra.mxu3 %vm236_vm7, %v210_v35  ;;  %10692 = vmatmul.msk.f32.gmra.mxu2 %vm236_vm7, %v208_v31 }
 0x22c   :  { %10683 = vmatmul.msk.f32.gmra.mxu0 %vm236_vm7, %v209_v32 }
 0x22e   :  { %v1381_v38 = vpop.permute.xlu1 %1380 }
 0x231   :  { %10688 = vmatmul.msk.f32.gmra.mxu1 %vm236_vm7, %v209_v32 }
 0x232   :  { %10693 = vmatmul.msk.f32.gmra.mxu2 %vm236_vm7, %v209_v32  ;;  %10696 = vmatmul.msk.f32.vlgmr.msrb.gmra.mxu3 %vm236_vm7, %v207_v26 }
 0x233   :  { %10743 = vmatpush.msk.msrb.mxu3 %vm249_vm6, %v898_v42 }
 0x234   :  { %10684 = vmatmul.msk.f32.gmra.mxu0 %vm236_vm7, %v210_v35 }
 0x239   :  { %10689 = vmatmul.msk.f32.gmra.mxu1 %vm236_vm7, %v210_v35 }
 0x23a   :  { %10694 = vmatmul.msk.f32.gmra.mxu2 %vm236_vm7, %v210_v35  ;;  %10697 = vmatmul.msk.f32.gmra.mxu3 %vm236_vm7, %v208_v31  ;;  %v1379_v31 = vpop.permute.xlu0 %1378 }
 0x23b   :  { %v1388_v33 = vsel %vm1386_vm11, %v1377_v21, %v1379_v31  ;;  %v1389_v41 = vsel %vm1386_vm11, %v1379_v31, %v1381_v38 }
 0x23c   :  { %10705 = vmatmul.msk.f32.vlgmr.msrb.gmra.mxu0 %vm236_vm7, %v10700_v44 }
 0x23d   :  { %10748 = vmatpush.msk.msrb.mxu0 %vm249_vm6, %v899_v45 }
 0x241   :  { %10710 = vmatmul.msk.f32.vlgmr.msra.gmra.mxu1 %vm236_vm7, %v10700_v44 }
 0x242   :  { %10698 = vmatmul.msk.f32.gmra.mxu3 %vm236_vm7, %v209_v32  ;;  %10715 = vmatmul.msk.f32.vlgmr.msrb.gmra.mxu2 %vm236_vm7, %v10700_v44  ;;  %v1385_v47 = vpop.permute.xlu0 %1384 }
 0x243   :  { %10753 = vmatpush.msk.msra.mxu1 %vm249_vm6, %v900_v49  ;;  %10758 = vmatpush.msk.msrb.mxu2 %vm249_vm6, %v901_v50  ;;  %v13747_v50 = vld [vmem:[%s20510_s4 + $0x88] sm:$0xff] }
 0x244   :  { %10706 = vmatmul.msk.f32.gmra.mxu0 %vm236_vm7, %v10701_v48 }
 0x249   :  { %10711 = vmatmul.msk.f32.gmra.mxu1 %vm236_vm7, %v10701_v48 }
 0x24a   :  { %10699 = vmatmul.msk.f32.gmra.mxu3 %vm236_vm7, %v210_v35  ;;  %10716 = vmatmul.msk.f32.gmra.mxu2 %vm236_vm7, %v10701_v48 }
 0x24c   :  { %10707 = vmatmul.msk.f32.gmra.mxu0 %vm236_vm7, %v10702_v51 }
 0x251   :  { %10712 = vmatmul.msk.f32.gmra.mxu1 %vm236_vm7, %v10702_v51 }
 0x252   :  { %10717 = vmatmul.msk.f32.gmra.mxu2 %vm236_vm7, %v10702_v51  ;;  %10720 = vmatmul.msk.f32.vlgmr.msra.gmra.mxu3 %vm236_vm7, %v10700_v44 }
 0x253   :  { %10763 = vmatpush.msk.msra.mxu3 %vm249_vm6, %v895_v46 }
 0x254   :  { %10708 = vmatmul.msk.f32.gmra.mxu0 %vm236_vm7, %v10703_v53 }
 0x256   :  { %v13574_v55 = vpop.f32.mrf.mxu1 }
 0x259   :  { %10713 = vmatmul.msk.f32.gmra.mxu1 %vm236_vm7, %v10703_v53 }
 0x25a   :  { %10718 = vmatmul.msk.f32.gmra.mxu2 %vm236_vm7, %v10703_v53  ;;  %10721 = vmatmul.msk.f32.gmra.mxu3 %vm236_vm7, %v10701_v48 }
 0x25c   :  { %10725 = vmatmul.msk.f32.vlgmr.msra.gmra.mxu0 %vm236_vm7, %v10700_v44  ;;  %v13613_v4 = vpop.f32.mrf.mxu3 }
 0x25d   :  { %10772 = vmatpush.msk.msra.mxu0 %vm249_vm6, %v1142_v58 }
 0x25e   :  { %v13584_v59 = vpop.f32.mrf.mxu1 }
 0x261   :  { %10730 = vmatmul.msk.f32.vlgmr.msrb.gmra.mxu1 %vm236_vm7, %v10700_v44 }
 0x262   :  { %10722 = vmatmul.msk.f32.gmra.mxu3 %vm236_vm7, %v10702_v51  ;;  %10739 = vmatmul.msk.f32.vlgmr.msra.gmra.mxu2 %vm236_vm7, %v13589_v62 }
 0x263   :  { %10777 = vmatpush.msk.msrb.mxu1 %vm249_vm6, %v1143_v63  ;;  %10782 = vmatpush.msk.msra.mxu2 %vm249_vm6, %v1144_v0 }
 0x264   :  { %10726 = vmatmul.msk.f32.gmra.mxu0 %vm236_vm7, %v10701_v48 }
 0x266   :  { %v13602_v2 = vpop.f32.mrf.mxu1 }
 0x269   :  { %10731 = vmatmul.msk.f32.gmra.mxu1 %vm236_vm7, %v10701_v48  ;;  %v1383_v48 = vpop.permute.xlu2 %1382 }
 0x26a   :  { %10723 = vmatmul.msk.f32.gmra.mxu3 %vm236_vm7, %v10703_v53  ;;  %10740 = vmatmul.msk.f32.gmra.mxu2 %vm236_vm7, %v13607_v3 }
 0x26c   :  { %10727 = vmatmul.msk.f32.gmra.mxu0 %vm236_vm7, %v10702_v51 }
 0x26e   :  { %v13616_v5 = vpop.f32.mrf.mxu1 }
 0x271   :  { %10732 = vmatmul.msk.f32.gmra.mxu1 %vm236_vm7, %v10702_v51  ;;  %v1390_v51 = vsel %vm1386_vm11, %v1381_v38, %v1383_v48  ;;  %v1622_v20 = vpop.permute.xlu2 %1621  ;;  %v13837_v38 = vld [vmem:[%s20510_s4 + $0xa0] sm:$0xff] }
 0x272   :  { %10741 = vmatmul.msk.f32.gmra.mxu2 %vm236_vm7, %v13623_v7  ;;  %10744 = vmatmul.msk.f32.vlgmr.msrb.gmra.mxu3 %vm236_vm7, %v13589_v62 }
 0x273   :  { %10787 = vmatpush.msk.msrb.mxu3 %vm249_vm6, %v1145_v9 }
 0x274   :  { %10728 = vmatmul.msk.f32.gmra.mxu0 %vm236_vm7, %v10703_v53 }
 0x275   :  { %v13633_v10 = vpop.f32.mrf.mxu2  ;;  %v13635_v11 = vpop.f32.mrf.mxu3 }
 0x276   :  { %v13637_v12 = vpop.f32.mrf.mxu1 }
 0x278   :  { %v13644_v14 = vpop.f32.mrf.mxu0 }
 0x279   :  { %10733 = vmatmul.msk.f32.gmra.mxu1 %vm236_vm7, %v10703_v53  ;;  %v1391_v53 = vsel %vm1386_vm11, %v1383_v48, %v1385_v47 }
 0x27a   :  { %10742 = vmatmul.msk.f32.gmra.mxu2 %vm236_vm7, %v13642_v13  ;;  %10745 = vmatmul.msk.f32.gmra.mxu3 %vm236_vm7, %v13607_v3 }
 0x27c   :  { %10749 = vmatmul.msk.f32.vlgmr.msrb.gmra.mxu0 %vm236_vm7, %v13589_v62 }
 0x27d   :  { %10792 = vmatpush.msk.msrb.mxu0 %vm249_vm6, %v1146_v16  ;;  %v13655_v17 = vpop.f32.mrf.mxu2  ;;  %v13657_v18 = vpop.f32.mrf.mxu3 }
 0x27e   :  { %v13659_v19 = vpop.f32.mrf.mxu1 }
 0x281   :  { %v13661_v22 = vpop.f32.mrf.mxu0  ;;  %10754 = vmatmul.msk.f32.vlgmr.msra.gmra.mxu1 %vm236_vm7, %v13589_v62 }
 0x282   :  { %10746 = vmatmul.msk.f32.gmra.mxu3 %vm236_vm7, %v13623_v7  ;;  %10759 = vmatmul.msk.f32.vlgmr.msrb.gmra.mxu2 %vm236_vm7, %v13589_v62 }
 0x283   :  { %10797 = vmatpush.msk.msra.mxu1 %vm249_vm6, %v1140_v15  ;;  %10806 = vmatpush.msk.msrb.mxu2 %vm249_vm6, %v1387_v23 }
 0x284   :  { %10750 = vmatmul.msk.f32.gmra.mxu0 %vm236_vm7, %v13607_v3 }
 0x285   :  { %v13674_v24 = vpop.f32.mrf.mxu3  ;;  %v13676_v25 = vpop.f32.mrf.mxu2 }
 0x286   :  { %v13678_v26 = vpop.f32.mrf.mxu1 }
 0x289   :  { %v13680_v27 = vpop.f32.mrf.mxu0  ;;  %10755 = vmatmul.msk.f32.gmra.mxu1 %vm236_vm7, %v13607_v3 }
 0x28a   :  { %10747 = vmatmul.msk.f32.gmra.mxu3 %vm236_vm7, %v13642_v13  ;;  %10760 = vmatmul.msk.f32.gmra.mxu2 %vm236_vm7, %v13607_v3 }
 0x28c   :  { %10751 = vmatmul.msk.f32.gmra.mxu0 %vm236_vm7, %v13623_v7 }
 0x28d   :  { %v13690_v28 = vpop.f32.mrf.mxu3  ;;  %v13692_v29 = vpop.f32.mrf.mxu2 }
 0x28e   :  { %v13694_v30 = vpop.f32.mrf.mxu1 }
 0x291   :  { %v13696_v32 = vpop.f32.mrf.mxu0  ;;  %10756 = vmatmul.msk.f32.gmra.mxu1 %vm236_vm7, %v13623_v7 }
 0x292   :  { %10761 = vmatmul.msk.f32.gmra.mxu2 %vm236_vm7, %v13623_v7  ;;  %10764 = vmatmul.msk.f32.vlgmr.msra.gmra.mxu3 %vm236_vm7, %v13589_v62 }
 0x293   :  { %10811 = vmatpush.msk.msra.mxu3 %vm249_vm6, %v1388_v33 }
 0x294   :  { %10752 = vmatmul.msk.f32.gmra.mxu0 %vm236_vm7, %v13642_v13 }
 0x295   :  { %v13708_v34 = vpop.f32.mrf.mxu2  ;;  %v506_v35 = vpop.f32.mrf.mxu3 }
 0x296   :  { %v13711_v36 = vadd.f32 %v506_v35, %v13574_v55  ;;  %v13713_v37 = vpop.f32.mrf.mxu1  ;;  %v1624_v35 = vpop.permute.xlu0 %1623 }
 0x299   :  { %v13715_v39 = vpop.f32.mrf.mxu0  ;;  %10757 = vmatmul.msk.f32.gmra.mxu1 %vm236_vm7, %v13642_v13 }
 0x29a   :  { %10762 = vmatmul.msk.f32.gmra.mxu2 %vm236_vm7, %v13642_v13  ;;  %10765 = vmatmul.msk.f32.gmra.mxu3 %vm236_vm7, %v13607_v3 }
 0x29c   :  { %10773 = vmatmul.msk.f32.vlgmr.msra.gmra.mxu0 %vm236_vm7, %v13722_v40 }
 0x29d   :  { %10816 = vmatpush.msk.msra.mxu0 %vm249_vm6, %v1389_v41  ;;  %v486_v42 = vpop.f32.mrf.mxu2  ;;  %v509_v43 = vpop.f32.mrf.mxu3 }
 0x29e   :  { %v13733_v44 = vadd.f32 %v486_v42, %v13618_v6  ;;  %v13736_v45 = vadd.f32 %v509_v43, %v13584_v59  ;;  %v13738_v46 = vpop.f32.mrf.mxu1 }
 0x2a1   :  { %v13740_v49 = vpop.f32.mrf.mxu0  ;;  %10778 = vmatmul.msk.f32.vlgmr.msrb.gmra.mxu1 %vm236_vm7, %v13722_v40 }
 0x2a2   :  { %10766 = vmatmul.msk.f32.gmra.mxu3 %vm236_vm7, %v13623_v7  ;;  %10783 = vmatmul.msk.f32.vlgmr.msra.gmra.mxu2 %vm236_vm7, %v13722_v40  ;;  %v13797_v7 = vld [vmem:[%s20510_s4 + $0x98] sm:$0xff] }
 0x2a3   :  { %10821 = vmatpush.msk.msrb.mxu1 %vm249_vm6, %v1390_v51  ;;  %10826 = vmatpush.msk.msra.mxu2 %vm249_vm6, %v1391_v53  ;;  %v13865_v53 = vld [vmem:[%s20510_s4 + $0xa8] sm:$0xff] }
 0x2a4   :  { %10774 = vmatmul.msk.f32.gmra.mxu0 %vm236_vm7, %v13747_v50 }
 0x2a5   :  { %v512_v54 = vpop.f32.mrf.mxu3  ;;  %v593_v55 = vpop.f32.mrf.mxu2 }
 0x2a6   :  { %v13760_v57 = vadd.f32 %v512_v54, %v13602_v2  ;;  %v13763_v58 = vadd.f32 %v593_v55, %v13644_v14  ;;  %v13765_v59 = vpop.f32.mrf.mxu1 }
 0x2a9   :  { %v13767_v60 = vpop.f32.mrf.mxu0  ;;  %10779 = vmatmul.msk.f32.gmra.mxu1 %vm236_vm7, %v13747_v50 }
 0x2aa   :  { %10767 = vmatmul.msk.f32.gmra.mxu3 %vm236_vm7, %v13642_v13  ;;  %10784 = vmatmul.msk.f32.gmra.mxu2 %vm236_vm7, %v13747_v50 }
 0x2ac   :  { %10775 = vmatmul.msk.f32.gmra.mxu0 %vm236_vm7, %v13774_v61 }
 0x2ad   :  { %v515_v62 = vpop.f32.mrf.mxu3  ;;  %v596_v63 = vpop.f32.mrf.mxu2 }
 0x2ae   :  { %v13783_v0 = vadd.f32 %v515_v62, %v13613_v4  ;;  %v13786_v2 = vadd.f32 %v596_v63, %v13661_v22  ;;  %v13788_v3 = vpop.f32.mrf.mxu1  ;;  %v1620_v4 = vpop.permute.xlu1 %1619  ;;  %v13889_v63 = vld [vmem:[%s20510_s4 + $0xb0] sm:$0xff] }
 0x2af   :  { %v1632_v21 = vsel %vm1631_vm12, %v1620_v4, %v1622_v20  ;;  %v1628_v4 = vpop.permute.xlu2 %1627 }
 0x2b1   :  { %v13790_v6 = vpop.f32.mrf.mxu0  ;;  %10780 = vmatmul.msk.f32.gmra.mxu1 %vm236_vm7, %v13774_v61 }
 0x2b2   :  { %10785 = vmatmul.msk.f32.gmra.mxu2 %vm236_vm7, %v13774_v61  ;;  %10788 = vmatmul.msk.f32.vlgmr.msrb.gmra.mxu3 %vm236_vm7, %v13722_v40 }
 0x2b3   :  { %10831 = vmatpush.msk.msrb.mxu3 %vm249_vm6, %v1385_v47 }
 0x2b4   :  { %10776 = vmatmul.msk.f32.gmra.mxu0 %vm236_vm7, %v13797_v7 }
 0x2b5   :  { %v599_v8 = vpop.f32.mrf.mxu2  ;;  %v622_v9 = vpop.f32.mrf.mxu3 }
 0x2b6   :  { %v13807_v13 = vadd.f32 %v599_v8, %v13680_v27  ;;  %v13810_v14 = vadd.f32 %v622_v9, %v13659_v19  ;;  %v13812_v15 = vpop.f32.mrf.mxu1  ;;  %v1626_v33 = vpop.permute.xlu1 %1625 }
 0x2b7   :  { %v1634_v42 = vsel %vm1631_vm12, %v1624_v35, %v1626_v33 }
 0x2b9   :  { %v13814_v16 = vpop.f32.mrf.mxu0  ;;  %10781 = vmatmul.msk.f32.gmra.mxu1 %vm236_vm7, %v13797_v7 }
 0x2ba   :  { %10786 = vmatmul.msk.f32.gmra.mxu2 %vm236_vm7, %v13797_v7  ;;  %10789 = vmatmul.msk.f32.gmra.mxu3 %vm236_vm7, %v13747_v50 }
 0x2bc   :  { %10793 = vmatmul.msk.f32.vlgmr.msrb.gmra.mxu0 %vm236_vm7, %v13722_v40 }
 0x2bd   :  { %10840 = vmatpush.msk.msrb.mxu0 %vm249_vm6, %v1632_v21  ;;  %v602_v19 = vpop.f32.mrf.mxu2  ;;  %v625_v22 = vpop.f32.mrf.mxu3 }
 0x2be   :  { %v13827_v23 = vadd.f32 %v602_v19, %v13696_v32  ;;  %v13830_v27 = vadd.f32 %v625_v22, %v13678_v26  ;;  %v13832_v31 = vpop.f32.mrf.mxu1  ;;  %v1633_v32 = vsel %vm1631_vm12, %v1622_v20, %v1624_v35  ;;  %v536_v26 = vadd.f32 %v13715_v39, %v13616_v5  ;;  %v13916_v22 = vld [vmem:[%s20510_s4 + $0xb8] sm:$0xff] }
 0x2bf   :  { %v539_v5 = vadd.f32 %v13740_v49, %v13637_v12  ;;  %v1635_v12 = vsel %vm1631_vm12, %v1626_v33, %v1628_v4  ;;  %v542_v49 = vadd.f32 %v13767_v60, %v13633_v10  ;;  %v568_v60 = vadd.f32 %v13765_v59, %v13657_v18 }
 0x2c0   :  { %v545_v33 = vadd.f32 %v13790_v6, %v13655_v17  ;;  %v478_v59 = vadd.f32 %v13676_v25, %v13564_v52  ;;  %v571_v6 = vadd.f32 %v13788_v3, %v13674_v24  ;;  %v481_v24 = vadd.f32 %v13692_v29, %v13579_v56 }
 0x2c1   :  { %v13839_v41 = vpop.f32.mrf.mxu0  ;;  %10798 = vmatmul.msk.f32.vlgmr.msra.gmra.mxu1 %vm236_vm7, %v13722_v40  ;;  %v574_v3 = vadd.f32 %v13812_v15, %v13690_v28  ;;  %v484_v15 = vadd.f32 %v13708_v34, %v13600_v1 }
 0x2c2   :  { %10790 = vmatmul.msk.f32.gmra.mxu3 %vm236_vm7, %v13774_v61  ;;  %10807 = vmatmul.msk.f32.vlgmr.msrb.gmra.mxu2 %vm236_vm7, %v13837_v38 }
 0x2c3   :  { %10845 = vmatpush.msk.msra.mxu1 %vm249_vm6, %v1633_v32  ;;  %10850 = vmatpush.msk.msrb.mxu2 %vm249_vm6, %v1634_v42 }
 0x2c4   :  { %10794 = vmatmul.msk.f32.gmra.mxu0 %vm236_vm7, %v13747_v50 }
 0x2c5   :  { %v628_v40 = vpop.f32.mrf.mxu3  ;;  %v756_v43 = vpop.f32.mrf.mxu2 }
 0x2c6   :  { %v13856_v47 = vadd.f32 %v628_v40, %v13694_v30  ;;  %v13858_v48 = vadd.f32 %v756_v43, %v536_v26  ;;  %v13860_v51 = vpop.f32.mrf.mxu1  ;;  %v1865_v40 = vpop.permute.xlu1 %1864 }
 0x2c7   :  { %v1867_v43 = vpop.permute.xlu2 %1866 }
 0x2c8   :  { %v1877_v17 = vsel %vm1876_vm13, %v1865_v40, %v1867_v43 }
 0x2c9   :  { %v13867_v54 = vpop.f32.mrf.mxu0  ;;  %10799 = vmatmul.msk.f32.gmra.mxu1 %vm236_vm7, %v13747_v50 }
 0x2ca   :  { %10791 = vmatmul.msk.f32.gmra.mxu3 %vm236_vm7, %v13797_v7  ;;  %10808 = vmatmul.msk.f32.gmra.mxu2 %vm236_vm7, %v13865_v53 }
 0x2cc   :  { %10795 = vmatmul.msk.f32.gmra.mxu0 %vm236_vm7, %v13774_v61 }
 0x2cd   :  { %v631_v30 = vpop.f32.mrf.mxu3  ;;  %v759_v39 = vpop.f32.mrf.mxu2 }
 0x2ce   :  { %v13880_v55 = vadd.f32 %v631_v30, %v13713_v37  ;;  %v13882_v62 = vadd.f32 %v759_v39, %v539_v5  ;;  %v13884_v50 = vpop.f32.mrf.mxu1  ;;  %v565_v37 = vadd.f32 %v13738_v46, %v13635_v11  ;;  %v1630_v11 = vpop.permute.xlu0 %1629  ;;  %v855_v5 = vadd.f32 %v13814_v16, %v478_v59 }
 0x2cf   :  { %v1636_v10 = vsel %vm1631_vm12, %v1628_v4, %v1630_v11  ;;  %v861_v16 = vadd.f32 %v13839_v41, %v481_v24  ;;  %v856_v41 = vadd.f32 %v13832_v31, %v13711_v36  ;;  %v14015_v36 = vld [vmem:[%s20510_s4 + $0xc0] sm:$0xff] }
 0x2d1   :  { %v13891_v8 = vpop.f32.mrf.mxu0  ;;  %10800 = vmatmul.msk.f32.gmra.mxu1 %vm236_vm7, %v13774_v61 }
 0x2d2   :  { %10809 = vmatmul.msk.f32.gmra.mxu2 %vm236_vm7, %v13889_v63  ;;  %10812 = vmatmul.msk.f32.vlgmr.msra.gmra.mxu3 %vm236_vm7, %v13837_v38  ;;  %v873_v40 = vadd.f32 %v13891_v8, %v13733_v44  ;;  %v14042_v44 = vld [vmem:[%s20510_s4 + $0xc8] sm:$0xff]  ;;  %v868_v8 = vadd.f32 %v13884_v50, %v13760_v57  ;;  %v14071_v57 = vld [vmem:[%s20510_s4 + $0xd0] sm:$0xff] }
 0x2d3   :  { %10855 = vmatpush.msk.msra.mxu3 %vm249_vm6, %v1635_v12 }
 0x2d4   :  { %10796 = vmatmul.msk.f32.gmra.mxu0 %vm236_vm7, %v13797_v7 }
 0x2d5   :  { %v762_v61 = vpop.f32.mrf.mxu2  ;;  %v785_v9 = vpop.f32.mrf.mxu3 }
 0x2d6   :  { %v13907_v20 = vadd.f32 %v762_v61, %v542_v49  ;;  %v13909_v21 = vadd.f32 %v785_v9, %v565_v37  ;;  %v13911_v19 = vpop.f32.mrf.mxu1  ;;  %v1869_v29 = vpop.permute.xlu0 %1868 }
 0x2d7   :  { %v1878_v28 = vsel %vm1876_vm13, %v1867_v43, %v1869_v29 }
 0x2d9   :  { %v13918_v46 = vpop.f32.mrf.mxu0  ;;  %10801 = vmatmul.msk.f32.gmra.mxu1 %vm236_vm7, %v13797_v7 }
 0x2da   :  { %10810 = vmatmul.msk.f32.gmra.mxu2 %vm236_vm7, %v13916_v22  ;;  %10813 = vmatmul.msk.f32.gmra.mxu3 %vm236_vm7, %v13865_v53  ;;  %v859_v24 = vadd.f32 %v13918_v46, %v13763_v58  ;;  %v874_v58 = vadd.f32 %v13911_v19, %v13783_v0  ;;  %v14096_v0 = vld [vmem:[%s20510_s4 + $0xd8] sm:$0xff] }
 0x2dc   :  { %10817 = vmatmul.msk.f32.vlgmr.msra.gmra.mxu0 %vm236_vm7, %v13837_v38 }
 0x2dd   :  { %10860 = vmatpush.msk.msra.mxu0 %vm249_vm6, %v1636_v10  ;;  %v765_v7 = vpop.f32.mrf.mxu2  ;;  %v788_v35 = vpop.f32.mrf.mxu3  ;;  %v867_v10 = vadd.f32 %v13867_v54, %v484_v15  ;;  %v862_v54 = vadd.f32 %v13860_v51, %v13736_v45 }
 0x2de   :  { %v13934_v32 = vadd.f32 %v765_v7, %v545_v33  ;;  %v13936_v42 = vadd.f32 %v788_v35, %v568_v60  ;;  %v13938_v26 = vpop.f32.mrf.mxu1  ;;  %v1871_v35 = vpop.permute.xlu1 %1870 }
 0x2df   :  { %v1879_v31 = vsel %vm1876_vm13, %v1869_v29, %v1871_v35  ;;  %v860_v19 = vadd.f32 %v13938_v26, %v13810_v14 }
 0x2e1   :  { %v13940_v18 = vpop.f32.mrf.mxu0  ;;  %10822 = vmatmul.msk.f32.vlgmr.msrb.gmra.mxu1 %vm236_vm7, %v13837_v38 }
 0x2e2   :  { %10814 = vmatmul.msk.f32.gmra.mxu3 %vm236_vm7, %v13889_v63  ;;  %10827 = vmatmul.msk.f32.vlgmr.msra.gmra.mxu2 %vm236_vm7, %v13837_v38  ;;  %v865_v50 = vadd.f32 %v13940_v18, %v13786_v2 }
 0x2e3   :  { %10865 = vmatpush.msk.msrb.mxu1 %vm249_vm6, %v1630_v11  ;;  %10874 = vmatpush.msk.msra.mxu2 %vm249_vm6, %v1877_v17 }
 0x2e4   :  { %10818 = vmatmul.msk.f32.gmra.mxu0 %vm236_vm7, %v13865_v53 }
 0x2e5   :  { %v791_v30 = vpop.f32.mrf.mxu3  ;;  %v943_v52 = vpop.f32.mrf.mxu2 }
 0x2e6   :  { %v13958_v25 = vadd.f32 %v791_v30, %v571_v6  ;;  %v13960_v39 = vadd.f32 %v943_v52, %v855_v5  ;;  %v13962_v4 = vpop.f32.mrf.mxu1  ;;  %v1875_v5 = vpop.permute.xlu0 %1874 }
 0x2e7   :  { %v1873_v30 = vpop.permute.xlu2 %1872  ;;  %v2110_v2 = vpop.permute.xlu1 %2109  ;;  %v866_v26 = vadd.f32 %v13962_v4, %v13830_v27  ;;  %v14140_v27 = vld [vmem:[%s20510_s4 + $0xe0] sm:$0xff] }
 0x2e8   :  { %v1880_v45 = vsel %vm1876_vm13, %v1871_v35, %v1873_v30  ;;  %v1881_v51 = vsel %vm1876_vm13, %v1873_v30, %v1875_v5 }
 0x2e9   :  { %v13964_v12 = vpop.f32.mrf.mxu0  ;;  %10823 = vmatmul.msk.f32.gmra.mxu1 %vm236_vm7, %v13865_v53 }
 0x2ea   :  { %10815 = vmatmul.msk.f32.gmra.mxu3 %vm236_vm7, %v13916_v22  ;;  %10828 = vmatmul.msk.f32.gmra.mxu2 %vm236_vm7, %v13865_v53  ;;  %v871_v18 = vadd.f32 %v13964_v12, %v13807_v13 }
 0x2ec   :  { %10819 = vmatmul.msk.f32.gmra.mxu0 %vm236_vm7, %v13889_v63 }
 0x2ed   :  { %v794_v37 = vpop.f32.mrf.mxu3  ;;  %v946_v49 = vpop.f32.mrf.mxu2 }
 0x2ee   :  { %v13979_v61 = vadd.f32 %v794_v37, %v574_v3  ;;  %v13981_v9 = vadd.f32 %v946_v49, %v861_v16  ;;  %v13983_v56 = vpop.f32.mrf.mxu1 }
 0x2ef   :  { %v2112_v13 = vpop.permute.xlu2 %2111 }
 0x2f0   :  { %v2122_v14 = vsel %vm2121_vm14, %v2110_v2, %v2112_v13 }
 0x2f1   :  { %v13985_v11 = vpop.f32.mrf.mxu0  ;;  %10824 = vmatmul.msk.f32.gmra.mxu1 %vm236_vm7, %v13889_v63 }
 0x2f2   :  { %10829 = vmatmul.msk.f32.gmra.mxu2 %vm236_vm7, %v13889_v63  ;;  %10832 = vmatmul.msk.f32.vlgmr.msrb.gmra.mxu3 %vm236_vm7, %v13837_v38  ;;  %v877_v12 = vadd.f32 %v13985_v11, %v13827_v23 }
 0x2f3   :  { %10879 = vmatpush.msk.msrb.mxu3 %vm249_vm6, %v1878_v28 }
 0x2f4   :  { %10820 = vmatmul.msk.f32.gmra.mxu0 %vm236_vm7, %v13916_v22 }
 0x2f5   :  { %v949_v60 = vpop.f32.mrf.mxu2  ;;  %v972_v33 = vpop.f32.mrf.mxu3 }
 0x2f6   :  { %v14002_v7 = vadd.f32 %v949_v60, %v867_v10  ;;  %v14004_v1 = vadd.f32 %v972_v33, %v856_v41  ;;  %v14006_v34 = vpop.f32.mrf.mxu1 }
 0x2f9   :  { %v14008_v38 = vpop.f32.mrf.mxu0  ;;  %10825 = vmatmul.msk.f32.gmra.mxu1 %vm236_vm7, %v13916_v22 }
 0x2fa   :  { %10830 = vmatmul.msk.f32.gmra.mxu2 %vm236_vm7, %v13916_v22  ;;  %10833 = vmatmul.msk.f32.gmra.mxu3 %vm236_vm7, %v13865_v53 }
 0x2fc   :  { %10841 = vmatmul.msk.f32.vlgmr.msrb.gmra.mxu0 %vm236_vm7, %v14015_v36 }
 0x2fd   :  { %10884 = vmatpush.msk.msrb.mxu0 %vm249_vm6, %v1879_v31  ;;  %v952_v43 = vpop.f32.mrf.mxu2  ;;  %v975_v17 = vpop.f32.mrf.mxu3 }
 0x2fe   :  { %v14029_v59 = vadd.f32 %v952_v43, %v873_v40  ;;  %v14031_v6 = vadd.f32 %v975_v17, %v862_v54  ;;  %v14033_v53 = vpop.f32.mrf.mxu1 }
 0x301   :  { %v14035_v52 = vpop.f32.mrf.mxu0  ;;  %10846 = vmatmul.msk.f32.vlgmr.msra.gmra.mxu1 %vm236_vm7, %v14015_v36 }
 0x302   :  { %10834 = vmatmul.msk.f32.gmra.mxu3 %vm236_vm7, %v13889_v63  ;;  %10851 = vmatmul.msk.f32.vlgmr.msrb.gmra.mxu2 %vm236_vm7, %v14015_v36 }
 0x303   :  { %10889 = vmatpush.msk.msra.mxu1 %vm249_vm6, %v1880_v45  ;;  %10894 = vmatpush.msk.msrb.mxu2 %vm249_vm6, %v1881_v51  ;;  %v2116_v51 = vpop.permute.xlu1 %2115 }
 0x304   :  { %10842 = vmatmul.msk.f32.gmra.mxu0 %vm236_vm7, %v14042_v44 }
 0x305   :  { %v978_v3 = vpop.f32.mrf.mxu3  ;;  %v1059_v16 = vpop.f32.mrf.mxu2 }
 0x306   :  { %v14058_v37 = vadd.f32 %v978_v3, %v868_v8  ;;  %v14060_v63 = vadd.f32 %v1059_v16, %v859_v24  ;;  %v14062_v49 = vpop.f32.mrf.mxu1  ;;  %v2114_v8 = vpop.permute.xlu0 %2113  ;;  %v872_v24 = vadd.f32 %v13983_v56, %v13856_v47  ;;  %v1108_v56 = vadd.f32 %v14035_v52, %v13882_v62 }
 0x307   :  { %v2123_v4 = vsel %vm2121_vm14, %v2112_v13, %v2114_v8  ;;  %v2124_v11 = vsel %vm2121_vm14, %v2114_v8, %v2116_v51  ;;  %v1103_v52 = vadd.f32 %v14033_v53, %v13909_v21 }
 0x309   :  { %v14064_v29 = vpop.f32.mrf.mxu0  ;;  %10847 = vmatmul.msk.f32.gmra.mxu1 %vm236_vm7, %v14042_v44 }
 0x30a   :  { %10835 = vmatmul.msk.f32.gmra.mxu3 %vm236_vm7, %v13916_v22  ;;  %10852 = vmatmul.msk.f32.gmra.mxu2 %vm236_vm7, %v14042_v44 }
 0x30c   :  { %10843 = vmatmul.msk.f32.gmra.mxu0 %vm236_vm7, %v14071_v57 }
 0x30d   :  { %v981_v46 = vpop.f32.mrf.mxu3  ;;  %v1062_v28 = vpop.f32.mrf.mxu2 }
 0x30e   :  { %v14083_v15 = vadd.f32 %v981_v46, %v874_v58  ;;  %v14085_v41 = vadd.f32 %v1062_v28, %v865_v50  ;;  %v14087_v10 = vpop.f32.mrf.mxu1  ;;  %v14169_v28 = vld [vmem:[%s20510_s4 + $0xe8] sm:$0xff]  ;;  %v2120_v21 = vpop.permute.xlu0 %2119 }
 0x310   :  { %20645 = vst [vmem:[#allocation5_spill] sm:$0xff] %v14083_v15 }
 0x311   :  { %20646 = vst [vmem:[#allocation6_spill] sm:$0xff] %v14085_v41  ;;  %v14089_v22 = vpop.f32.mrf.mxu0  ;;  %10848 = vmatmul.msk.f32.gmra.mxu1 %vm236_vm7, %v14071_v57 }
 0x312   :  { %10853 = vmatmul.msk.f32.gmra.mxu2 %vm236_vm7, %v14071_v57  ;;  %10856 = vmatmul.msk.f32.vlgmr.msra.gmra.mxu3 %vm236_vm7, %v14015_v36 }
 0x313   :  { %10899 = vmatpush.msk.msra.mxu3 %vm249_vm6, %v1875_v5 }
 0x314   :  { %10844 = vmatmul.msk.f32.gmra.mxu0 %vm236_vm7, %v14096_v0 }
 0x315   :  { %v1065_v60 = vpop.f32.mrf.mxu2  ;;  %v1088_v33 = vpop.f32.mrf.mxu3 }
 0x316   :  { %v14109_v35 = vadd.f32 %v1065_v60, %v871_v18  ;;  %v14111_v31 = vadd.f32 %v1088_v33, %v860_v19  ;;  %v14113_v54 = vpop.f32.mrf.mxu1  ;;  %v14194_v60 = vld [vmem:[%s20510_s4 + $0xf0] sm:$0xff]  ;;  %v1114_v33 = vadd.f32 %v14064_v29, %v13907_v20  ;;  %v1109_v29 = vadd.f32 %v14062_v49, %v13936_v42 }
 0x318   :  { %20647 = vst [vmem:[#allocation7_spill] sm:$0xff] %v14109_v35 }
 0x319   :  { %20648 = vst [vmem:[#allocation8_spill] sm:$0xff] %v14111_v31  ;;  %v14115_v40 = vpop.f32.mrf.mxu0  ;;  %10849 = vmatmul.msk.f32.gmra.mxu1 %vm236_vm7, %v14096_v0 }
 0x31a   :  { %10854 = vmatmul.msk.f32.gmra.mxu2 %vm236_vm7, %v14096_v0  ;;  %10857 = vmatmul.msk.f32.gmra.mxu3 %vm236_vm7, %v14042_v44  ;;  %v1345_v41 = vadd.f32 %v14115_v40, %v13960_v39  ;;  %v14484_v39 = vpop.permute.xlu0 %2365 }
 0x31c   :  { %10861 = vmatmul.msk.f32.vlgmr.msra.gmra.mxu0 %vm236_vm7, %v14015_v36 }
 0x31d   :  { %10908 = vmatpush.msk.msra.mxu0 %vm249_vm6, %v2122_v14  ;;  %v1068_v43 = vpop.f32.mrf.mxu2  ;;  %v1091_v17 = vpop.f32.mrf.mxu3 }
 0x31e   :  { %v14131_v5 = vadd.f32 %v1068_v43, %v877_v12  ;;  %v14133_v30 = vadd.f32 %v1091_v17, %v866_v26  ;;  %v14135_v45 = vpop.f32.mrf.mxu1  ;;  %v14221_v43 = vld [vmem:[%s20510_s4 + $0xf8] sm:$0xff]  ;;  %v1120_v17 = vadd.f32 %v14089_v22, %v13934_v32  ;;  %v1115_v32 = vadd.f32 %v14087_v10, %v13958_v25 }
 0x31f   :  { %v1121_v25 = vadd.f32 %v14113_v54, %v13979_v61 }
 0x320   :  { %20649 = vst [vmem:[#allocation9_spill] sm:$0xff] %v14131_v5 }
 0x321   :  { %20650 = vst [vmem:[#allocation10_spill] sm:$0xff] %v14133_v30  ;;  %v14142_v23 = vpop.f32.mrf.mxu0  ;;  %10866 = vmatmul.msk.f32.vlgmr.msrb.gmra.mxu1 %vm236_vm7, %v14015_v36  ;;  %v1102_v36 = vadd.f32 %v14008_v38, %v13858_v48  ;;  %v878_v48 = vadd.f32 %v14006_v34, %v13880_v55  ;;  %v2118_v55 = vpop.permute.xlu2 %2117 }
 0x322   :  { %10858 = vmatmul.msk.f32.gmra.mxu3 %vm236_vm7, %v14071_v57  ;;  %10875 = vmatmul.msk.f32.vlgmr.msra.gmra.mxu2 %vm236_vm7, %v14140_v27  ;;  %v2125_v62 = vsel %vm2121_vm14, %v2116_v51, %v2118_v55  ;;  %v2126_v20 = vsel %vm2121_vm14, %v2118_v55, %v2120_v21 }
 0x323   :  { %10913 = vmatpush.msk.msrb.mxu1 %vm249_vm6, %v2123_v4  ;;  %10918 = vmatpush.msk.msra.mxu2 %vm249_vm6, %v2124_v11 }
 0x324   :  { %10862 = vmatmul.msk.f32.gmra.mxu0 %vm236_vm7, %v14042_v44 }
 0x325   :  { %v1094_v3 = vpop.f32.mrf.mxu3  ;;  %v1246_v16 = vpop.f32.mrf.mxu2 }
 0x326   :  { %v14160_v58 = vadd.f32 %v1094_v3, %v872_v24  ;;  %v14162_v50 = vadd.f32 %v1246_v16, %v1102_v36  ;;  %v14164_v46 = vpop.f32.mrf.mxu1 }
 0x328   :  { %20651 = vst [vmem:[#allocation11_spill] sm:$0xff] %v14160_v58 }
 0x329   :  { %v14171_v47 = vpop.f32.mrf.mxu0  ;;  %10867 = vmatmul.msk.f32.gmra.mxu1 %vm236_vm7, %v14042_v44 }
 0x32a   :  { %10859 = vmatmul.msk.f32.gmra.mxu3 %vm236_vm7, %v14096_v0  ;;  %10876 = vmatmul.msk.f32.gmra.mxu2 %vm236_vm7, %v14169_v28 }
 0x32c   :  { %10863 = vmatmul.msk.f32.gmra.mxu0 %vm236_vm7, %v14071_v57 }
 0x32d   :  { %v1097_v38 = vpop.f32.mrf.mxu3  ;;  %v1249_v2 = vpop.f32.mrf.mxu2 }
 0x32e   :  { %v14185_v19 = vadd.f32 %v1097_v38, %v878_v48  ;;  %v14187_v44 = vadd.f32 %v1249_v2, %v1108_v56  ;;  %v14189_v18 = vpop.f32.mrf.mxu1 }
 0x330   :  { %20652 = vst [vmem:[#allocation12_spill] sm:$0xff] %v14185_v19 }
 0x331   :  { %v14196_v34 = vpop.f32.mrf.mxu0  ;;  %10868 = vmatmul.msk.f32.gmra.mxu1 %vm236_vm7, %v14071_v57 }
 0x332   :  { %10877 = vmatmul.msk.f32.gmra.mxu2 %vm236_vm7, %v14194_v60  ;;  %10880 = vmatmul.msk.f32.vlgmr.msrb.gmra.mxu3 %vm236_vm7, %v14140_v27 }
 0x333   :  { %10923 = vmatpush.msk.msrb.mxu3 %vm249_vm6, %v2125_v62  ;;  %v10904_v62 = vld [vmem:[%s20510_s4 + $0x100] sm:$0xff] }
 0x334   :  { %10864 = vmatmul.msk.f32.gmra.mxu0 %vm236_vm7, %v14096_v0 }
 0x335   :  { %v1252_v57 = vpop.f32.mrf.mxu2  ;;  %v1275_v13 = vpop.f32.mrf.mxu3 }
 0x336   :  { %v14212_v14 = vadd.f32 %v1252_v57, %v1114_v33  ;;  %v14214_v26 = vadd.f32 %v1275_v13, %v1103_v52  ;;  %v14216_v12 = vpop.f32.mrf.mxu1 }
 0x337   :  { %20653 = vst [vmem:[#allocation13_spill] sm:$0xff] %v14216_v12 }
 0x339   :  { %v14223_v53 = vpop.f32.mrf.mxu0  ;;  %10869 = vmatmul.msk.f32.gmra.mxu1 %vm236_vm7, %v14096_v0 }
 0x33a   :  { %10878 = vmatmul.msk.f32.gmra.mxu2 %vm236_vm7, %v14221_v43  ;;  %10881 = vmatmul.msk.f32.gmra.mxu3 %vm236_vm7, %v14169_v28 }
 0x33c   :  { %10885 = vmatmul.msk.f32.vlgmr.msrb.gmra.mxu0 %vm236_vm7, %v14140_v27 }
 0x33d   :  { %10928 = vmatpush.msk.msrb.mxu0 %vm249_vm6, %v2126_v20  ;;  %v1255_v0 = vpop.f32.mrf.mxu2  ;;  %v1278_v51 = vpop.f32.mrf.mxu3 }
 0x33e   :  { %v14239_v8 = vadd.f32 %v1255_v0, %v1120_v17  ;;  %v14241_v4 = vadd.f32 %v1278_v51, %v1109_v29  ;;  %v14243_v11 = vpop.f32.mrf.mxu1 }
 0x33f   :  { %20656 = vst [vmem:[#allocation16_spill] sm:$0xff] %v14243_v11 }
 0x340   :  { %20654 = vst [vmem:[#allocation14_spill] sm:$0xff] %v14239_v8 }
 0x341   :  { %20655 = vst [vmem:[#allocation15_spill] sm:$0xff] %v14241_v4  ;;  %v14245_v24 = vpop.f32.mrf.mxu0  ;;  %10890 = vmatmul.msk.f32.vlgmr.msra.gmra.mxu1 %vm236_vm7, %v14140_v27 }
 0x342   :  { %20657 = vst [vmem:[#allocation17_spill] sm:$0xff] %v14245_v24  ;;  %10882 = vmatmul.msk.f32.gmra.mxu3 %vm236_vm7, %v14194_v60  ;;  %10895 = vmatmul.msk.f32.vlgmr.msrb.gmra.mxu2 %vm236_vm7, %v14140_v27 }
 0x343   :  { %10933 = vmatpush.msk.msra.mxu1 %vm249_vm6, %v2120_v21  ;;  %v2397_v21 = vld [vmem:[%s20512_s6] sm:$0xff] }
 0x344   :  { %10886 = vmatmul.msk.f32.gmra.mxu0 %vm236_vm7, %v14169_v28 }
 0x345   :  { %v1281_v42 = vpop.f32.mrf.mxu3  ;;  %v14258_v49 = vpop.f32.mrf.mxu2 }
 0x346   :  { %v14260_v22 = vadd.f32 %v1281_v42, %v1115_v32  ;;  %v14262_v36 = vpop.f32.mrf.mxu1  ;;  %v1590_v12 = vadd.f32 %v14258_v49, %v1345_v41  ;;  %v1351_v41 = vadd.f32 %v14142_v23, %v13981_v9 }
 0x347   :  { %20659 = vst [vmem:[#allocation19_spill] sm:$0xff] %v14262_v36 }
 0x348   :  { %20658 = vst [vmem:[#allocation18_spill] sm:$0xff] %v14260_v22 }
 0x349   :  { %v14264_v3 = vpop.f32.mrf.mxu0  ;;  %10891 = vmatmul.msk.f32.gmra.mxu1 %vm236_vm7, %v14169_v28 }
 0x34a   :  { %20660 = vst [vmem:[#allocation20_spill] sm:$0xff] %v14264_v3  ;;  %10883 = vmatmul.msk.f32.gmra.mxu3 %vm236_vm7, %v14221_v43  ;;  %10896 = vmatmul.msk.f32.gmra.mxu2 %vm236_vm7, %v14169_v28 }
 0x34c   :  { %10887 = vmatmul.msk.f32.gmra.mxu0 %vm236_vm7, %v14194_v60 }
 0x34d   :  { %v1284_v10 = vpop.f32.mrf.mxu3  ;;  %v14276_v16 = vpop.f32.mrf.mxu2 }
 0x34e   :  { %v14278_v48 = vadd.f32 %v1284_v10, %v1121_v25  ;;  %v14280_v56 = vpop.f32.mrf.mxu1  ;;  %v10907_v10 = vld [vmem:[%s20510_s4 + $0x118] sm:$0xff] }
 0x34f   :  { %20662 = vst [vmem:[#allocation22_spill] sm:$0xff] %v14280_v56 }
 0x350   :  { %20661 = vst [vmem:[#allocation21_spill] sm:$0xff] %v14278_v48 }
 0x351   :  { %v14282_v38 = vpop.f32.mrf.mxu0  ;;  %10892 = vmatmul.msk.f32.gmra.mxu1 %vm236_vm7, %v14194_v60 }
 0x352   :  { %20663 = vst [vmem:[#allocation23_spill] sm:$0xff] %v14282_v38  ;;  %10897 = vmatmul.msk.f32.gmra.mxu2 %vm236_vm7, %v14194_v60  ;;  %10900 = vmatmul.msk.f32.vlgmr.msra.gmra.mxu3 %vm236_vm7, %v14140_v27  ;;  %v2350_v27 = vld [vmem:[%s20511_s5 + $0x8] sm:$0xff] }
 0x353   :  { %2360 = vperm.xlu2 %11554, %v2350_v27  }
 0x354   :  { %10888 = vmatmul.msk.f32.gmra.mxu0 %vm236_vm7, %v14221_v43 }
 0x355   :  { %v14292_v61 = vpop.f32.mrf.mxu2  ;;  %v14294_v54 = vpop.f32.mrf.mxu3 }
 0x356   :  { %v14296_v2 = vpop.f32.mrf.mxu1 }
 0x357   :  { %20664 = vst [vmem:[#allocation24_spill] sm:$0xff] %v14296_v2 }
 0x359   :  { %v14298_v55 = vpop.f32.mrf.mxu0  ;;  %10893 = vmatmul.msk.f32.gmra.mxu1 %vm236_vm7, %v14221_v43 }
 0x35a   :  { %10898 = vmatmul.msk.f32.gmra.mxu2 %vm236_vm7, %v14221_v43  ;;  %10901 = vmatmul.msk.f32.gmra.mxu3 %vm236_vm7, %v14169_v28  ;;  %v10905_v28 = vld [vmem:[%s20510_s4 + $0x108] sm:$0xff] }
 0x35b   :  { %2403 = vperm.xlu2 %11554, %v2397_v21  }
 0x35c   :  { %10909 = vmatmul.msk.f32.vlgmr.msra.gmra.mxu0 %vm236_vm7, %v10904_v62 }
 0x35d   :  { %v14313_v52 = vpop.f32.mrf.mxu2  ;;  %v14315_v33 = vpop.f32.mrf.mxu3 }
 0x35e   :  { %v14317_v57 = vpop.f32.mrf.mxu1 }
 0x361   :  { %v14319_v13 = vpop.f32.mrf.mxu0  ;;  %10914 = vmatmul.msk.f32.vlgmr.msrb.gmra.mxu1 %vm236_vm7, %v10904_v62 }
 0x362   :  { %10902 = vmatmul.msk.f32.gmra.mxu3 %vm236_vm7, %v14194_v60  ;;  %10919 = vmatmul.msk.f32.vlgmr.msra.gmra.mxu2 %vm236_vm7, %v10904_v62  ;;  %v10906_v60 = vld [vmem:[%s20510_s4 + $0x110] sm:$0xff] }
 0x364   :  { %10910 = vmatmul.msk.f32.gmra.mxu0 %vm236_vm7, %v10905_v28 }
 0x365   :  { %v14332_v20 = vpop.f32.mrf.mxu3  ;;  %v14334_v29 = vpop.f32.mrf.mxu2 }
 0x366   :  { %v14336_v17 = vpop.f32.mrf.mxu1 }
 0x367   :  { %20665 = vst [vmem:[#allocation25_spill] sm:$0xff] %v14336_v17 }
 0x369   :  { %v14338_v0 = vpop.f32.mrf.mxu0  ;;  %10915 = vmatmul.msk.f32.gmra.mxu1 %vm236_vm7, %v10905_v28 }
 0x36a   :  { %10903 = vmatmul.msk.f32.gmra.mxu3 %vm236_vm7, %v14221_v43  ;;  %10920 = vmatmul.msk.f32.gmra.mxu2 %vm236_vm7, %v10905_v28  ;;  %v2400_v43 = vld [vmem:[%s20512_s6 + $0x18] sm:$0xff] }
 0x36b   :  { %2418 = vperm.xlu2 %11554, %v2400_v43  }
 0x36c   :  { %10911 = vmatmul.msk.f32.gmra.mxu0 %vm236_vm7, %v10906_v60 }
 0x36d   :  { %v14348_v51 = vpop.f32.mrf.mxu3  ;;  %v14350_v32 = vpop.f32.mrf.mxu2 }
 0x36e   :  { %20666 = vst [vmem:[#allocation26_spill] sm:$0xff] %v14348_v51  ;;  %v14352_v42 = vpop.f32.mrf.mxu1 }
 0x36f   :  { %20667 = vst [vmem:[#allocation27_spill] sm:$0xff] %v14350_v32 }
 0x370   :  { %20668 = vst [vmem:[#allocation28_spill] sm:$0xff] %v14352_v42 }
 0x371   :  { %v14354_v25 = vpop.f32.mrf.mxu0  ;;  %10916 = vmatmul.msk.f32.gmra.mxu1 %vm236_vm7, %v10906_v60 }
 0x372   :  { %20669 = vst [vmem:[#allocation29_spill] sm:$0xff] %v14354_v25  ;;  %10921 = vmatmul.msk.f32.gmra.mxu2 %vm236_vm7, %v10906_v60  ;;  %10924 = vmatmul.msk.f32.vlgmr.msrb.gmra.mxu3 %vm236_vm7, %v10904_v62 }
 0x374   :  { %10912 = vmatmul.msk.f32.gmra.mxu0 %vm236_vm7, %v10907_v10 }
 0x375   :  { %v14366_v27 = vpop.f32.mrf.mxu2  ;;  %v14368_v21 = vpop.f32.mrf.mxu3 }
 0x376   :  { %20670 = vst [vmem:[#allocation30_spill] sm:$0xff] %v14366_v27  ;;  %v14370_v56 = vpop.f32.mrf.mxu1 }
 0x377   :  { %20671 = vst [vmem:[#allocation31_spill] sm:$0xff] %v14368_v21 }
 0x378   :  { %20672 = vst [vmem:[#allocation32_spill] sm:$0xff] %v14370_v56 }
 0x379   :  { %v14372_v58 = vpop.f32.mrf.mxu0  ;;  %10917 = vmatmul.msk.f32.gmra.mxu1 %vm236_vm7, %v10907_v10 }
 0x37a   :  { %10922 = vmatmul.msk.f32.gmra.mxu2 %vm236_vm7, %v10907_v10  ;;  %10925 = vmatmul.msk.f32.gmra.mxu3 %vm236_vm7, %v10905_v28  ;;  %v1835_v15 = vadd.f32 %v14372_v58, %v1590_v12  ;;  %v1596_v12 = vadd.f32 %v14276_v16, %v1351_v41 }
 0x37c   :  { %10929 = vmatmul.msk.f32.vlgmr.msrb.gmra.mxu0 %vm236_vm7, %v10904_v62 }
 0x37d   :  { %v14378_v2 = vpop.f32.mrf.mxu2  ;;  %v14380_v19 = vpop.f32.mrf.mxu3 }
 0x37e   :  { %20673 = vst [vmem:[#allocation33_spill] sm:$0xff] %v14378_v2  ;;  %v14382_v43 = vpop.f32.mrf.mxu1 }
 0x37f   :  { %20674 = vst [vmem:[#allocation34_spill] sm:$0xff] %v14380_v19 }
 0x381   :  { %v14384_v38 = vpop.f32.mrf.mxu0  ;;  %10934 = vmatmul.msk.f32.vlgmr.msra.gmra.mxu1 %vm236_vm7, %v10904_v62 }
 0x382   :  { %10926 = vmatmul.msk.f32.gmra.mxu3 %vm236_vm7, %v10906_v60  ;;  %v1841_v23 = vadd.f32 %v14384_v38, %v1596_v12 }
 0x384   :  { %10930 = vmatmul.msk.f32.gmra.mxu0 %vm236_vm7, %v10905_v28 }
 0x385   :  { %v14389_v21 = vpop.f32.mrf.mxu3  ;;  %v14391_v5 = vpop.f32.mrf.mxu2 }
 0x386   :  { %20675 = vst [vmem:[#allocation35_spill] sm:$0xff] %v14389_v21  ;;  %v14393_v11 = vpop.f32.mrf.mxu1 }
 0x389   :  { %v14395_v31 = vpop.f32.mrf.mxu0  ;;  %10935 = vmatmul.msk.f32.gmra.mxu1 %vm236_vm7, %v10905_v28 }
 0x38a   :  { %10927 = vmatmul.msk.f32.gmra.mxu3 %vm236_vm7, %v10907_v10 }
 0x38c   :  { %10931 = vmatmul.msk.f32.gmra.mxu0 %vm236_vm7, %v10906_v60 }
 0x38d   :  { %v14400_v2 = vpop.f32.mrf.mxu3  ;;  %v14402_v62 = vpop.f32.mrf.mxu2 }
 0x38e   :  { %20676 = vst [vmem:[#allocation36_spill] sm:$0xff] %v14400_v2  ;;  %v14404_v56 = vpop.f32.mrf.mxu1 }
 0x391   :  { %v14406_v48 = vpop.f32.mrf.mxu0  ;;  %10936 = vmatmul.msk.f32.gmra.mxu1 %vm236_vm7, %v10906_v60 }
 0x394   :  { %10932 = vmatmul.msk.f32.gmra.mxu0 %vm236_vm7, %v10907_v10 }
 0x395   :  { %v14410_v21 = vpop.f32.mrf.mxu2  ;;  %v14412_v27 = vpop.f32.mrf.mxu3 }
 0x396   :  { %v14414_v28 = vpop.f32.mrf.mxu1 }
 0x397   :  { %20677 = vst [vmem:[#allocation37_spill] sm:$0xff] %v14414_v28 }
 0x399   :  { %v14416_v19 = vpop.f32.mrf.mxu0  ;;  %10937 = vmatmul.msk.f32.gmra.mxu1 %vm236_vm7, %v10907_v10 }
 0x39a   :  { %20678 = vst [vmem:[#allocation38_spill] sm:$0xff] %v14416_v19 }
 0x39d   :  { %v14419_v2 = vpop.f32.mrf.mxu2  ;;  %v14421_v25 = vpop.f32.mrf.mxu3 }
 0x39e   :  { %20679 = vst [vmem:[#allocation39_spill] sm:$0xff] %v14419_v2  ;;  %v14423_v8 = vpop.f32.mrf.mxu1 }
 0x39f   :  { %20680 = vst [vmem:[#allocation40_spill] sm:$0xff] %v14421_v25 }
 0x3a0   :  { %20681 = vst [vmem:[#allocation41_spill] sm:$0xff] %v14423_v8 }
 0x3a1   :  { %v14425_v42 = vpop.f32.mrf.mxu0 }
 0x3a2   :  { %20682 = vst [vmem:[#allocation42_spill] sm:$0xff] %v14425_v42 }
 0x3a5   :  { %v14427_v60 = vpop.f32.mrf.mxu3  ;;  %v1923_v22 = vpop.f32.mrf.mxu2 }
 0x3a6   :  { %20683 = vst [vmem:[#allocation43_spill] sm:$0xff] %v14427_v60  ;;  %v14429_v32 = vpop.f32.mrf.mxu1 }
 0x3a7   :  { %20684 = vst [vmem:[#allocation44_spill] sm:$0xff] %v14429_v32 }
 0x3a9   :  { %v14431_v3 = vpop.f32.mrf.mxu0 }
 0x3aa   :  { %20685 = vst [vmem:[#allocation45_spill] sm:$0xff] %v14431_v3 }
 0x3ad   :  { %v14433_v35 = vpop.f32.mrf.mxu3  ;;  %v1926_v28 = vpop.f32.mrf.mxu2 }
 0x3ae   :  { %20686 = vst [vmem:[#allocation46_spill] sm:$0xff] %v14433_v35  ;;  %v14435_v51 = vpop.f32.mrf.mxu1  ;;  %v14467_v24 = vpop.permute.xlu2 %2360 }
 0x3af   :  { %20687 = vst [vmem:[#allocation47_spill] sm:$0xff] %v14435_v51 }
 0x3b1   :  { %v14437_v10 = vpop.f32.mrf.mxu0 }
 0x3b2   :  { %20688 = vst [vmem:[#allocation48_spill] sm:$0xff] %v14437_v10 }
 0x3b5   :  { %v14439_v2 = vpop.f32.mrf.mxu2  ;;  %v1952_v25 = vpop.f32.mrf.mxu3 }
 0x3b6   :  { %v14441_v8 = vpop.f32.mrf.mxu1  ;;  %v14489_v58 = vpop.permute.xlu2 %2403 }
 0x3b7   :  { %20689 = vst [vmem:[#allocation49_spill] sm:$0xff] %v14441_v8 }
 0x3b9   :  { %v1981_v42 = vpop.f32.mrf.mxu0 }
 0x3bd   :  { %v14443_v17 = vpop.f32.mrf.mxu2  ;;  %v14445_v60 = vpop.f32.mrf.mxu3 }
 0x3be   :  { %v14447_v32 = vpop.f32.mrf.mxu1 }
 0x3bf   :  { %20690 = vst [vmem:[#allocation50_spill] sm:$0xff] %v14447_v32 }
 0x3c1   :  { %v14449_v3 = vpop.f32.mrf.mxu0 }
 0x3c5   :  { %v14451_v35 = vpop.f32.mrf.mxu3  ;;  %v14453_v4 = vpop.f32.mrf.mxu2 }
 0x3c6   :  { %20691 = vst [vmem:[#allocation51_spill] sm:$0xff] %v14453_v4  ;;  %v14455_v51 = vpop.f32.mrf.mxu1 }
 0x3c7   :  { %20692 = vst [vmem:[#allocation52_spill] sm:$0xff] %v14455_v51 }
 0x3c9   :  { %v14457_v10 = vpop.f32.mrf.mxu0 }
 0x3ca   :  { %20693 = vst [vmem:[#allocation53_spill] sm:$0xff] %v14457_v10 }
 0x3cd   :  { %v14459_v36 = vpop.f32.mrf.mxu3  ;;  %v14461_v8 = vpop.f32.mrf.mxu2 }
 0x3ce   :  { %20694 = vst [vmem:[#allocation54_spill] sm:$0xff] %v14459_v36  ;;  %v14463_v30 = vpop.f32.mrf.mxu1 }
 0x3cf   :  { %20695 = vst [vmem:[#allocation55_spill] sm:$0xff] %v14461_v8  ;;  %v14481_v8 = vpop.permute.xlu1 %2355 }
 0x3d0   :  { %20696 = vst [vmem:[#allocation56_spill] sm:$0xff] %v14463_v30  ;;  %v1346_v30 = vadd.f32 %v14135_v45, %v14004_v1 }
 0x3d1   :  { %v14465_v19 = vpop.f32.mrf.mxu0 }
 0x3d2   :  { %20697 = vst [vmem:[#allocation57_spill] sm:$0xff] %v14465_v19  ;;  %v2080_v19 = vadd.f32 %v1923_v22, %v1835_v15  ;;  %v1591_v10 = vadd.f32 %v14294_v54, %v1346_v30  ;;  %v14500_v30 = vld [vmem:[%s20642_s22] sm:$0x3f]  ;;  %v1592_v54 = vadd.f32 %v14298_v55, %v14162_v50 }
 0x3d3   :  { %v14503_v9 = vperm.slane %v14500_v30, 0 }
 0x3d4   :  { %v1836_v49 = vadd.f32 %v14382_v43, %v1591_v10  ;;  %v1357_v43 = vadd.f32 %v14171_v47, %v14002_v7  ;;  %v1352_v7 = vadd.f32 %v14164_v46, %v14031_v6 }
 0x3d5   :  { %v14472_v4 = vpop.f32.mrf.mxu2  ;;  %v14474_v51 = vpop.f32.mrf.mxu3  ;;  %20699 = vst [vmem:[#allocation59_spill] sm:$0xff] %v14503_v9 }
 0x3d6   :  { %20698 = vst [vmem:[#allocation58_spill] sm:$0xff] %v14474_v51  ;;  %v14477_v36 = vpop.f32.mrf.mxu1  ;;  %v2081_v45 = vadd.f32 %v1952_v25, %v1836_v49 }
 0x3d7   :  { %v14511_v41 = vpop.permute.xlu1 %2370 }
 0x3d9   :  { %v2168_v32 = vpop.f32.mrf.mxu0 }
 0x3da   :  { %v2325_v40 = vadd.f32 %v2168_v32, %v2080_v19  ;;  %v2086_v32 = vadd.f32 %v1926_v28, %v1841_v23 }
 0x3dc   :  { %v2373_v1 = vmul.f32 %v14481_v8, %v2325_v40  ;;  %v1837_v40 = vadd.f32 %v14391_v5, %v1592_v54  ;;  %v14532_v54 = vperm.slane %v14500_v30, 1 }
 0x3dd   :  { %v14493_v51 = vpop.f32.mrf.mxu2  ;;  %v14495_v15 = vpop.f32.mrf.mxu3 }
 0x3de   :  { %v2197_v19 = vpop.f32.mrf.mxu1  ;;  %v2421_v22 = vadd.f32 %v14489_v58, %v2373_v1  ;;  %v14516_v1 = vpop.permute.xlu0 %2408  ;;  %v2082_v50 = vadd.f32 %v1981_v42, %v1837_v40  ;;  %v1597_v42 = vadd.f32 %v14315_v33, %v1352_v7  ;;  %20700 = vst [vmem:[#allocation60_spill] sm:$0xff] %v14532_v54 }
 0x3df   :  { %v2326_v16 = vadd.f32 %v2197_v19, %v2081_v45  ;;  %v1602_v45 = vadd.f32 %v14292_v61, %v1357_v43  ;;  %v1358_v61 = vadd.f32 %v14189_v18, %v14058_v37 }
 0x3e0   :  { %v2445_v25 = vmax.f32 %v2421_v22, 0.0  ;;  %v1842_v37 = vadd.f32 %v14393_v11, %v1597_v42 }
 0x3e1   :  { %v2171_v10 = vpop.f32.mrf.mxu0  ;;  %v2374_v49 = vmul.f32 %v14481_v8, %v2326_v16  ;;  %v1847_v28 = vadd.f32 %v14395_v31, %v1602_v45  ;;  %v14537_v31 = vperm.slane %v14500_v30, 2  ;;  %v1603_v43 = vadd.f32 %v14332_v20, %v1358_v61 }
 0x3e2   :  { %v2331_v38 = vadd.f32 %v2171_v10, %v2086_v32  ;;  %v2481_v12 = vmul.f32 %v14503_v9, %v2445_v25  ;;  %v1363_v25 = vadd.f32 %v14196_v34, %v14029_v59  ;;  %v1349_v61 = vadd.f32 %v14223_v53, %v14060_v63 }
 0x3e3   :  { %v2422_v23 = vadd.f32 %v14489_v58, %v2374_v49  ;;  %v2092_v6 = vadd.f32 %v14439_v2, %v1847_v28  ;;  %20701 = vst [vmem:[#allocation61_spill] sm:$0xff] %v14537_v31  ;;  %v1848_v49 = vadd.f32 %v14404_v56, %v1603_v43  ;;  %v1593_v28 = vadd.f32 %v14317_v57, %v14214_v26  ;;  %v14586_v43 = vpop.permute.xlu2 %2418 }
 0x3e4   :  { %v2379_v55 = vmul.f32 %v14467_v24, %v2331_v38  ;;  %2529 = vrot.lane.b32.xlu0 %v2481_v12, %s13122_s23  ;;  %v2087_v38 = vadd.f32 %v14445_v60, %v1842_v37  ;;  %v14547_v12 = vpop.permute.xlu1 %2413  ;;  %v1608_v45 = vadd.f32 %v14313_v52, %v1363_v25  ;;  %v20706_v37 = vld [vmem:[#allocation5_spill] sm:$0xff] }
 0x3e5   :  { %v14523_v47 = vpop.f32.mrf.mxu3  ;;  %v2226_v5 = vpop.f32.mrf.mxu2  ;;  %v2446_v33 = vmax.f32 %v2422_v23, 0.0  ;;  %v2093_v11 = vadd.f32 %v14451_v35, %v1848_v49  ;;  %v1598_v23 = vadd.f32 %v14319_v13, %v14187_v44  ;;  %v1838_v44 = vadd.f32 %v14412_v27, %v1593_v28  ;;  %v20705_v27 = vld [vmem:[#allocation53_spill] sm:$0xff] }
 0x3e6   :  { %v2427_v19 = vadd.f32 %v14516_v1, %v2379_v55  ;;  %v2327_v22 = vadd.f32 %v2226_v5, %v2082_v50  ;;  %v2200_v16 = vpop.f32.mrf.mxu1  ;;  %v1853_v7 = vadd.f32 %v14406_v48, %v1608_v45  ;;  %v14575_v13 = vperm.slane %v14500_v30, 3  ;;  %v20710_v45 = vld [vmem:[#allocation38_spill] sm:$0xff]  ;;  %v20714_v28 = vld [vmem:[#allocation25_spill] sm:$0xff] }
 0x3e7   :  { %v2332_v20 = vadd.f32 %v2200_v16, %v2087_v38  ;;  %v2482_v5 = vmul.f32 %v14532_v54, %v2446_v33  ;;  %v1843_v42 = vadd.f32 %v14402_v62, %v1598_v23 }
 0x3e8   :  { %v2375_v46 = vmul.f32 %v14481_v8, %v2327_v22  ;;  %v2451_v32 = vmax.f32 %v2427_v19, 0.0  ;;  %v1604_v19 = vadd.f32 %v14338_v0, %v14212_v14  ;;  %v2098_v22 = vadd.f32 %v14443_v17, %v1853_v7  ;;  %20702 = vst [vmem:[#allocation62_spill] sm:$0xff] %v14575_v13 }
 0x3e9   :  { %v2174_v18 = vpop.f32.mrf.mxu0  ;;  %v14578_v17 = vperm.slane %v14500_v30, 4  ;;  %v2088_v63 = vadd.f32 %v14449_v3, %v1843_v42  ;;  %v1594_v0 = vadd.f32 %v14334_v29, %v1349_v61 }
 0x3ea   :  { %v2423_v10 = vadd.f32 %v14489_v58, %v2375_v46  ;;  %v2337_v40 = vadd.f32 %v2174_v18, %v2092_v6  ;;  %v2487_v2 = vmul.f32 %v14503_v9, %v2451_v32  ;;  %v2380_v6 = vmul.f32 %v14467_v24, %v2332_v20  ;;  %v20707_v18 = vld [vmem:[#allocation13_spill] sm:$0xff] }
 0x3eb   :  { %v1849_v26 = vadd.f32 %v14410_v21, %v1604_v19  ;;  %20703 = vst [vmem:[#allocation63_spill] sm:$0xff] %v14578_v17  ;;  %v20704_v21 = vld [vmem:[#allocation50_spill] sm:$0xff]  ;;  %v1364_v33 = vadd.f32 %v20707_v18, %v20706_v37  ;;  %v20721_v37 = vld [vmem:[#allocation27_spill] sm:$0xff] }
 0x3ec   :  { %v2447_v59 = vmax.f32 %v2423_v10, 0.0  ;;  %v2385_v34 = vmul.f32 %v14484_v39, %v2337_v40  ;;  %2541 = vrot.lane.b32.xlu2 %v2487_v2, %s13122_s23  ;;  %v2083_v62 = vadd.f32 %v20704_v21, %v1838_v44  ;;  %v20708_v10 = vld [vmem:[#allocation6_spill] sm:$0xff]  ;;  %v20709_v40 = vld [vmem:[#allocation17_spill] sm:$0xff]  ;;  %v2428_v2 = vadd.f32 %v14516_v1, %v2380_v6 }
 0x3ed   :  { %v14553_v50 = vpop.f32.mrf.mxu3  ;;  %v2229_v55 = vpop.f32.mrf.mxu2  ;;  %v2094_v32 = vadd.f32 %v20705_v27, %v1849_v26  ;;  %v1355_v3 = vadd.f32 %v20709_v40, %v20708_v10  ;;  %v20717_v6 = vld [vmem:[#allocation37_spill] sm:$0xff]  ;;  %v20718_v26 = vld [vmem:[#allocation40_spill] sm:$0xff]  ;;  %v20719_v27 = vld [vmem:[#allocation7_spill] sm:$0xff] }
 0x3ee   :  { %v2433_v56 = vadd.f32 %v14547_v12, %v2385_v34  ;;  %v2203_v60 = vpop.f32.mrf.mxu1  ;;  %v2483_v52 = vmul.f32 %v14537_v31, %v2447_v59  ;;  %v2333_v49 = vadd.f32 %v2229_v55, %v2088_v63  ;;  %v1839_v59 = vadd.f32 %v20710_v45, %v1594_v0  ;;  %v20716_v55 = vld [vmem:[#allocation51_spill] sm:$0xff] }
 0x3ef   :  { %v2338_v35 = vadd.f32 %v2203_v60, %v2093_v11  ;;  %v20712_v60 = vld [vmem:[#allocation19_spill] sm:$0xff]  ;;  %v1600_v18 = vadd.f32 %v20721_v37, %v1355_v3 }
 0x3f0   :  { %v11555_v48 = vpack.i.bf16 %v2483_v52, %v2482_v5  ;;  %v2457_v16 = vmax.f32 %v2433_v56, 0.0  ;;  %v20711_v56 = vld [vmem:[#allocation10_spill] sm:$0xff]  ;;  %v20713_v52 = vld [vmem:[#allocation15_spill] sm:$0xff] }
 0x3f1   :  { %v2177_v46 = vpop.f32.mrf.mxu0  ;;  %v2386_v53 = vmul.f32 %v14484_v39, %v2338_v35  ;;  %v1356_v5 = vadd.f32 %v20712_v60, %v20711_v56  ;;  %v1599_v23 = vadd.f32 %v20714_v28, %v20713_v52  ;;  %v20715_v35 = vld [vmem:[#allocation26_spill] sm:$0xff] }
 0x3f2   :  { %v2343_v57 = vadd.f32 %v2177_v46, %v2098_v22  ;;  %11556 = vrot.lane.b32.xlu1 %v11555_v48, %s13122_s23  ;;  %v2493_v14 = vmul.f32 %v14503_v9, %v2457_v16  ;;  %v1609_v19 = vadd.f32 %v20715_v35, %v1364_v33  ;;  %v2084_v48 = vadd.f32 %v20716_v55, %v1839_v59  ;;  %v20722_v33 = vld [vmem:[#allocation54_spill] sm:$0xff] }
 0x3f3   :  { %v2434_v22 = vadd.f32 %v14547_v12, %v2386_v53  ;;  %v1844_v44 = vadd.f32 %v20718_v26, %v1599_v23  ;;  %v20724_v59 = vld [vmem:[#allocation18_spill] sm:$0xff] }
 0x3f4   :  { %v2391_v25 = vmul.f32 %v14511_v41, %v2343_v57  ;;  %2553 = vrot.lane.b32.xlu0 %v2493_v14, %s13122_s23  ;;  %v1854_v46 = vadd.f32 %v20717_v6, %v1609_v19  ;;  %v2452_v57 = vmax.f32 %v2428_v2, 0.0  ;;  %v2381_v14 = vmul.f32 %v14467_v24, %v2333_v49  ;;  %v20727_v55 = vld [vmem:[#allocation14_spill] sm:$0xff] }
 0x3f5   :  { %v2232_v29 = vpop.f32.mrf.mxu2  ;;  %v2255_v38 = vpop.f32.mrf.mxu3  ;;  %v2458_v40 = vmax.f32 %v2434_v22, 0.0 }
 0x3f6   :  { %v2339_v34 = vadd.f32 %v2232_v29, %v2094_v32  ;;  %v2328_v11 = vadd.f32 %v2255_v38, %v2083_v62  ;;  %v2206_v20 = vpop.f32.mrf.mxu1  ;;  %v2439_v7 = vadd.f32 %v14586_v43, %v2391_v25  ;;  %v20720_v32 = vld [vmem:[#allocation20_spill] sm:$0xff]  ;;  %v2099_v10 = vadd.f32 %v20722_v33, %v1854_v46  ;;  %v20730_v46 = vld [vmem:[#allocation55_spill] sm:$0xff] }
 0x3f7   :  { %v1361_v25 = vadd.f32 %v20720_v32, %v20719_v27  ;;  %v20723_v29 = vld [vmem:[#allocation52_spill] sm:$0xff]  ;;  %v2429_v60 = vadd.f32 %v14516_v1, %v2381_v14  ;;  %v2488_v22 = vmul.f32 %v14532_v54, %v2452_v57  ;;  %v14631_v6 = vmul.f32 %v14532_v54, %v2458_v40  ;;  %v20732_v27 = vld [vmem:[#allocation43_spill] sm:$0xff] }
 0x3f8   :  { %v2387_v16 = vmul.f32 %v14484_v39, %v2339_v34  ;;  %v2376_v61 = vmul.f32 %v14481_v8, %v2328_v11  ;;  %v2463_v42 = vmax.f32 %v2439_v7, 0.0  ;;  %v2089_v2 = vadd.f32 %v20723_v29, %v1844_v44  ;;  %v20725_v34 = vld [vmem:[#allocation28_spill] sm:$0xff]  ;;  %v20726_v7 = vld [vmem:[#allocation42_spill] sm:$0xff] }
 0x3f9   :  { %v2284_v63 = vpop.f32.mrf.mxu0  ;;  %v1605_v11 = vadd.f32 %v20725_v34, %v20724_v59  ;;  %v1845_v56 = vadd.f32 %v20726_v7, %v1600_v18  ;;  %v2344_v52 = vadd.f32 %v2206_v20, %v2099_v10  ;;  %v2453_v57 = vmax.f32 %v2429_v60, 0.0  ;;  %v20733_v10 = vld [vmem:[#allocation30_spill] sm:$0xff]  ;;  %v20734_v29 = vld [vmem:[#allocation44_spill] sm:$0xff]  ;;  %v20736_v59 = vld [vmem:[#allocation57_spill] sm:$0xff] }
 0x3fa   :  { %v2435_v0 = vadd.f32 %v14547_v12, %v2387_v16  ;;  %v2424_v21 = vadd.f32 %v14489_v58, %v2376_v61  ;;  %v2329_v53 = vadd.f32 %v2284_v63, %v2084_v48  ;;  %v2499_v62 = vmul.f32 %v14503_v9, %v2463_v42  ;;  %v20728_v48 = vld [vmem:[#allocation29_spill] sm:$0xff]  ;;  %v20729_v61 = vld [vmem:[#allocation34_spill] sm:$0xff]  ;;  %v15032_v9 = vld [vmem:[%s20513_s7 + $0x20] sm:$0xff] }
 0x3fb   :  { %v1610_v16 = vadd.f32 %v20728_v48, %v20727_v55  ;;  %v1601_v42 = vadd.f32 %v20729_v61, %v1356_v5  ;;  %v2090_v26 = vadd.f32 %v20730_v46, %v1845_v56  ;;  %v1850_v32 = vadd.f32 %v20732_v27, %v1605_v11  ;;  %v20737_v11 = vld [vmem:[#allocation45_spill] sm:$0xff]  ;;  %v20739_v61 = vld [vmem:[#allocation32_spill] sm:$0xff]  ;;  %v20744_v27 = vld [vmem:[#allocation46_spill] sm:$0xff] }
 0x3fc   :  { %v2459_v38 = vmax.f32 %v2435_v0, 0.0  ;;  %v2448_v49 = vmax.f32 %v2424_v21, 0.0  ;;  %v2377_v45 = vmul.f32 %v14481_v8, %v2329_v53  ;;  %2565 = vrot.lane.b32.xlu2 %v2499_v62, %s13122_s23  ;;  %v20731_v0 = vld [vmem:[#allocation39_spill] sm:$0xff]  ;;  %v2392_v53 = vmul.f32 %v14511_v41, %v2344_v52 }
 0x3fd   :  { %v2258_v3 = vpop.f32.mrf.mxu3  ;;  %v1855_v21 = vadd.f32 %v20731_v0, %v1610_v16  ;;  %v1606_v40 = vadd.f32 %v20733_v10, %v1361_v25  ;;  %v20738_v16 = vld [vmem:[#allocation21_spill] sm:$0xff]  ;;  %v20741_v0 = vld [vmem:[#allocation16_spill] sm:$0xff] }
 0x3fe   :  { %v2425_v28 = vadd.f32 %v14489_v58, %v2377_v45  ;;  %v2334_v23 = vadd.f32 %v2258_v3, %v2089_v2  ;;  %v14623_v35 = vpop.f32.mrf.mxu1  ;;  %v2484_v19 = vmul.f32 %v14575_v13, %v2448_v49  ;;  %v14634_v20 = vmul.f32 %v14537_v31, %v2459_v38  ;;  %v2235_v38 = vpop.f32.mrf.mxu2  ;;  %v20735_v49 = vld [vmem:[#allocation56_spill] sm:$0xff] }
 0x3ff   :  { %v1846_v2 = vadd.f32 %v20734_v29, %v1601_v42  ;;  %v2095_v45 = vadd.f32 %v20735_v49, %v1850_v32  ;;  %v2100_v34 = vadd.f32 %v20736_v59, %v1855_v21  ;;  %v1851_v60 = vadd.f32 %v20737_v11, %v1606_v40  ;;  %v20745_v29 = vld [vmem:[#allocation31_spill] sm:$0xff] }
 0x400   :  { %v2382_v44 = vmul.f32 %v14467_v24, %v2334_v23  ;;  %v11560_v14 = vpack.i.bf16 %v2488_v22, %v2484_v19  ;;  %v2449_v63 = vmax.f32 %v2425_v28, 0.0  ;;  %v11570_v5 = vpack.i.bf16 %v14634_v20, %v14631_v6 }
 0x401   :  { %v2287_v62 = vpop.f32.mrf.mxu0  ;;  %v2091_v52 = vadd.f32 %v14495_v15, %v1846_v2  ;;  %v2440_v25 = vadd.f32 %v14586_v43, %v2392_v53  ;;  %v14656_v28 = vmul.f32 %v14537_v31, %v2453_v57  ;;  %v2345_v23 = vadd.f32 %v2235_v38, %v2100_v34  ;;  %v20742_v57 = vld [vmem:[#allocation9_spill] sm:$0xff]  ;;  %v20743_v53 = vld [vmem:[#allocation23_spill] sm:$0xff] }
 0x402   :  { %v2430_v37 = vadd.f32 %v14516_v1, %v2382_v44  ;;  %v2335_v18 = vadd.f32 %v2287_v62, %v2090_v26  ;;  %v2485_v33 = vmul.f32 %v14578_v17, %v2449_v63  ;;  %v1611_v42 = vadd.f32 %v20739_v61, %v20738_v16  ;;  %v20740_v63 = vld [vmem:[#allocation8_spill] sm:$0xff]  ;;  %v20746_v38 = vld [vmem:[#allocation33_spill] sm:$0xff] }
 0x403   :  { %v2096_v46 = vadd.f32 %v14472_v4, %v1851_v60  ;;  %v1350_v21 = vadd.f32 %v20741_v0, %v20740_v63  ;;  %v1367_v62 = vadd.f32 %v20743_v53, %v20742_v57  ;;  %v20748_v60 = vld [vmem:[#allocation48_spill] sm:$0xff]  ;;  %v20753_v57 = vld [vmem:[#allocation22_spill] sm:$0xff] }
 0x404   :  { %v2454_v7 = vmax.f32 %v2430_v37, 0.0  ;;  %v2383_v56 = vmul.f32 %v14467_v24, %v2335_v18  ;;  %11561 = vrot.lane.b32.xlu2 %v11560_v14, %s13122_s23  ;;  %2537 = vrot.lane.b32.xlu0 %v2485_v33, %s13122_s23  ;;  %v1856_v32 = vadd.f32 %v20744_v27, %v1611_v42  ;;  %v2464_v37 = vmax.f32 %v2440_v25, 0.0  ;;  %v20750_v16 = vld [vmem:[#allocation24_spill] sm:$0xff]  ;;  %v20751_v42 = vld [vmem:[#allocation58_spill] sm:$0xff] }
 0x405   :  { %v2261_v3 = vpop.f32.mrf.mxu3  ;;  %v2393_v33 = vmul.f32 %v14511_v41, %v2345_v23  ;;  %v1595_v2 = vadd.f32 %v20745_v29, %v1350_v21  ;;  %v1612_v49 = vadd.f32 %v20746_v38, %v1367_v62  ;;  %v20752_v21 = vld [vmem:[#allocation11_spill] sm:$0xff]  ;;  %v20754_v62 = vld [vmem:[#allocation36_spill] sm:$0xff] }
 0x406   :  { %v2431_v19 = vadd.f32 %v14516_v1, %v2383_v56  ;;  %v2340_v22 = vadd.f32 %v2261_v3, %v2095_v45  ;;  %v2316_v55 = vpop.f32.mrf.mxu1  ;;  %v14660_v48 = vmul.f32 %v14575_v13, %v2454_v7  ;;  %v2101_v45 = vadd.f32 %v14477_v36, %v1856_v32  ;;  %v20747_v56 = vld [vmem:[#allocation41_spill] sm:$0xff] }
 0x407   :  { %v2336_v26 = vadd.f32 %v2316_v55, %v2091_v52  ;;  %v1840_v11 = vadd.f32 %v20747_v56, %v1595_v2  ;;  %v1857_v52 = vadd.f32 %v20748_v60, %v1612_v49  ;;  %v2500_v3 = vmul.f32 %v14532_v54, %v2464_v37 }
 0x408   :  { %v2388_v15 = vmul.f32 %v14484_v39, %v2340_v22  ;;  %v2455_v44 = vmax.f32 %v2431_v19, 0.0  ;;  %v11565_v14 = vpack.i.bf16 %v14660_v48, %v14656_v28  ;;  %v2441_v23 = vadd.f32 %v14586_v43, %v2393_v33 }
 0x409   :  { %v2290_v18 = vpop.f32.mrf.mxu0  ;;  %v2384_v34 = vmul.f32 %v14467_v24, %v2336_v26  ;;  %v20749_v24 = vld [vmem:[#allocation12_spill] sm:$0xff]  ;;  %v1362_v53 = vadd.f32 %v20753_v57, %v20752_v21  ;;  %v14710_v49 = vperm.slane %v14500_v30, 5 }
 0x40a   :  { %v2436_v4 = vadd.f32 %v14547_v12, %v2388_v15  ;;  %v2341_v10 = vadd.f32 %v2290_v18, %v2096_v46  ;;  %v2491_v40 = vmul.f32 %v14578_v17, %v2455_v44  ;;  %v1368_v61 = vadd.f32 %v20750_v16, %v20749_v24 }
 0x40b   :  { %v2085_v46 = vadd.f32 %v20751_v42, %v1840_v11  ;;  %v2102_v15 = vadd.f32 %v14493_v51, %v1857_v52  ;;  %v2432_v26 = vadd.f32 %v14516_v1, %v2384_v34  ;;  %v2465_v18 = vmax.f32 %v2441_v23, 0.0  ;;  %v20755_v1 = vld [vmem:[#allocation35_spill] sm:$0xff]  ;;  %20757 = vst [vmem:[#allocation50_spill] sm:$0xff] %v14710_v49 }
 0x40c   :  { %v2460_v59 = vmax.f32 %v2436_v4, 0.0  ;;  %v2389_v7 = vmul.f32 %v14484_v39, %v2341_v10  ;;  %2549 = vrot.lane.b32.xlu1 %v2491_v40, %s13122_s23  ;;  %v1613_v27 = vadd.f32 %v20754_v62, %v1368_v61  ;;  %v1607_v10 = vadd.f32 %v20755_v1, %v1362_v53  ;;  %v20756_v40 = vld [vmem:[#allocation49_spill] sm:$0xff] }
 0x40d   :  { %v2264_v25 = vpop.f32.mrf.mxu3  ;;  %v2330_v32 = vadd.f32 %v14623_v35, %v2085_v46  ;;  %v2456_v35 = vmax.f32 %v2432_v26, 0.0  ;;  %v2501_v60 = vmul.f32 %v14537_v31, %v2465_v18 }
 0x40e   :  { %v2437_v19 = vadd.f32 %v14547_v12, %v2389_v7  ;;  %v2346_v22 = vadd.f32 %v2264_v25, %v2101_v45  ;;  %v2319_v36 = vpop.f32.mrf.mxu1  ;;  %v2496_v55 = vmul.f32 %v14575_v13, %v2460_v59  ;;  %v1858_v29 = vadd.f32 %v20756_v40, %v1613_v27  ;;  %v20758_v45 = vld [vmem:[#allocation47_spill] sm:$0xff] }
 0x40f   :  { %v1852_v59 = vadd.f32 %v20758_v45, %v1607_v10  ;;  %v2378_v7 = vmul.f32 %v14481_v8, %v2330_v32  ;;  %v2492_v52 = vmul.f32 %v14710_v49, %v2456_v35 }
 0x410   :  { %v2394_v44 = vmul.f32 %v14511_v41, %v2346_v22  ;;  %v11575_v63 = vpack.i.bf16 %v2500_v3, %v2496_v55  ;;  %v2461_v0 = vmax.f32 %v2437_v19, 0.0  ;;  %v2103_v34 = vadd.f32 %v14553_v50, %v1858_v29 }
 0x411   :  { %v2293_v37 = vpop.f32.mrf.mxu0  ;;  %v2426_v50 = vadd.f32 %v14489_v58, %v2378_v7 }
 0x412   :  { %v2442_v33 = vadd.f32 %v14586_v43, %v2394_v44  ;;  %v2347_v4 = vadd.f32 %v2293_v37, %v2102_v15  ;;  %11576 = vrot.lane.b32.xlu2 %v11575_v63, %s13122_s23  ;;  %v2497_v51 = vmul.f32 %v14578_v17, %v2461_v0 }
 0x414   :  { %v2466_v2 = vmax.f32 %v2442_v33, 0.0  ;;  %v2395_v38 = vmul.f32 %v14511_v41, %v2347_v4  ;;  %11571 = vrot.lane.b32.xlu1 %v11570_v5, %s13122_s23  ;;  %2561 = vrot.lane.b32.xlu0 %v2497_v51, %s13122_s23  ;;  %v2097_v5 = vadd.f32 %v14523_v47, %v1852_v59 }
 0x416   :  { %v2443_v56 = vadd.f32 %v14586_v43, %v2395_v38  ;;  %v2322_v11 = vpop.f32.mrf.mxu1  ;;  %v2502_v6 = vmul.f32 %v14575_v13, %v2466_v2  ;;  %v2342_v23 = vadd.f32 %v2319_v36, %v2097_v5 }
 0x417   :  { %v2348_v20 = vadd.f32 %v2322_v11, %v2103_v34 }
 0x418   :  { %v2467_v30 = vmax.f32 %v2443_v56, 0.0  ;;  %v11580_v25 = vpack.i.bf16 %v2502_v6, %v2501_v60  ;;  %v2390_v22 = vmul.f32 %v14484_v39, %v2342_v23 }
 0x419   :  { %v2396_v3 = vmul.f32 %v14511_v41, %v2348_v20  ;;  %v2450_v41 = vmax.f32 %v2426_v50, 0.0 }
 0x41a   :  { %2551 = vrot.lane.b32.xlu2 %v2492_v52, %s13122_s23  ;;  %v2503_v8 = vmul.f32 %v14578_v17, %v2467_v30  ;;  %v2438_v36 = vadd.f32 %v14547_v12, %v2390_v22 }
 0x41b   :  { %v2444_v19 = vadd.f32 %v14586_v43, %v2396_v3  ;;  %v2486_v55 = vmul.f32 %v14710_v49, %v2450_v41 }
 0x41c   :  { %2573 = vrot.lane.b32.xlu1 %v2503_v8, %s13122_s23  ;;  %11566 = vrot.lane.b32.xlu0 %v11565_v14, %s13122_s23  ;;  %v2462_v43 = vmax.f32 %v2438_v36, 0.0 }
 0x41d   :  { %v2468_v47 = vmax.f32 %v2444_v19, 0.0 }
 0x41e   :  { %v2498_v28 = vmul.f32 %v14710_v49, %v2462_v43 }
 0x41f   :  { %v2504_v58 = vmul.f32 %v14710_v49, %v2468_v47 }
 0x422   :  { %2575 = vrot.lane.b32.xlu2 %v2504_v58, %s13122_s23 }
 0x424   :  { %2539 = vrot.lane.b32.xlu1 %v2486_v55, %s13122_s23  ;;  %11581 = vrot.lane.b32.xlu0 %v11580_v25, %s13122_s23 }
 0x42c   :  { %2563 = vrot.lane.b32.xlu1 %v2498_v28, %s13122_s23 }
 0x446   :  { %v14739_v48 = vpop.permute.xlu2 %2541 }
 0x447   :  { %v14745_v12 = vsel %vm196_vm3, 0.0, %v14739_v48 }
 0x456   :  { %v14741_v39 = vpop.permute.xlu2 %2565  ;;  %v14753_v61 = vpop.permute.xlu0 %2529 }
 0x457   :  { %v14749_v14 = vsel %vm196_vm3, 0.0, %v14741_v39  ;;  %v2621_v44 = vsel %vm196_vm3, 0.0, %v14753_v61 }
 0x45e   :  { %v11562_v16 = vpop.permute.xlu2 %11561 }
 0x45f   :  { %v11563_v46 = vunpack.i.l.bf16 %v11562_v16  ;;  %v11564_v62 = vunpack.i.h.bf16 %v11562_v16 }
 0x461   :  { %v14780_v27 = vsel %vm196_vm3, %v14739_v48, %v11564_v62 }
 0x462   :  { %v14784_v32 = vpack.i.bf16 %v14780_v27, %v14745_v12 }
 0x464   :  { %v11557_v42 = vpop.permute.xlu1 %11556  ;;  %20759 = vst [vmem:[#allocation53_spill] sm:$0xff] %v14784_v32 }
 0x465   :  { %v11559_v15 = vunpack.i.h.bf16 %v11557_v42  ;;  %v11558_v26 = vunpack.i.l.bf16 %v11557_v42 }
 0x466   :  { %v14788_v37 = vpop.permute.xlu0 %2553 }
 0x467   :  { %v14758_v63 = vsel %vm196_vm3, %v11559_v15, %v11563_v46  ;;  %v14762_v0 = vsel %vm196_vm3, %v14753_v61, %v11558_v26  ;;  %v14765_v21 = vsel %vm196_vm3, %v11558_v26, %v11559_v15  ;;  %v14792_v40 = vsel %vm196_vm3, 0.0, %v14788_v37 }
 0x468   :  { %v14769_v57 = vpack.i.bf16 %v14758_v63, %v14765_v21  ;;  %v14772_v53 = vpack.i.bf16 %v14762_v0, %v2621_v44 }
 0x46a   :  { %11591 = vrot.lane.b32.xlu1 %v14769_v57, %s13123_s3  ;;  %11586 = vrot.lane.b32.xlu0 %v14772_v53, %s13123_s3 }
 0x46c   :  { %v11577_v10 = vpop.permute.xlu2 %11576 }
 0x46d   :  { %v11579_v38 = vunpack.i.h.bf16 %v11577_v10  ;;  %v11578_v52 = vunpack.i.l.bf16 %v11577_v10 }
 0x46f   :  { %v14806_v59 = vsel %vm196_vm3, %v14741_v39, %v11579_v38 }
 0x470   :  { %v14820_v6 = vpack.i.bf16 %v14806_v59, %v14749_v14 }
 0x472   :  { %11596 = vrot.lane.b32.xlu0 %v14784_v32, %s13123_s3 }
 0x474   :  { %v2552_v20 = vpop.permute.xlu2 %2551 }
 0x476   :  { %v2538_v18 = vpop.permute.xlu0 %2537 }
 0x477   :  { %v14836_v23 = vsel %vm196_vm3, %v11563_v46, %v2538_v18 }
 0x47c   :  { %v2576_v55 = vpop.permute.xlu2 %2575 }
 0x47e   :  { %v2550_v33 = vpop.permute.xlu1 %2549 }
 0x47f   :  { %v14851_v41 = vsel %vm196_vm3, %v2550_v33, %v2552_v20 }
 0x480   :  { %v14861_v43 = vsel %vm205_vm4, %v14851_v41, 0.0 }
 0x481   :  { %20763 = vst [vmem:[#allocation17_spill] sm:$0xff] %v14861_v43 }
 0x486   :  { %v2562_v4 = vpop.permute.xlu0 %2561  ;;  %v11572_v51 = vpop.permute.xlu1 %11571 }
 0x487   :  { %v11573_v1 = vunpack.i.l.bf16 %v11572_v51  ;;  %v11574_v5 = vunpack.i.h.bf16 %v11572_v51  ;;  %v14905_v10 = vsel %vm196_vm3, %v11578_v52, %v2562_v4 }
 0x489   :  { %v14796_v29 = vsel %vm196_vm3, %v14788_v37, %v11573_v1  ;;  %v14827_v25 = vsel %vm196_vm3, %v11574_v5, %v11578_v52  ;;  %v14830_v3 = vsel %vm196_vm3, %v11573_v1, %v11574_v5 }
 0x48a   :  { %v14800_v2 = vpack.i.bf16 %v14796_v29, %v14792_v40  ;;  %v14848_v22 = vpack.i.bf16 %v14827_v25, %v14830_v3 }
 0x48c   :  { %20760 = vst [vmem:[#allocation5_spill] sm:$0xff] %v14800_v2  ;;  %11606 = vrot.lane.b32.xlu0 %v14800_v2, %s13123_s3 }
 0x48e   :  { %v11567_v35 = vpop.permute.xlu0 %11566  ;;  %v2574_v45 = vpop.permute.xlu1 %2573 }
 0x48f   :  { %v11569_v34 = vunpack.i.h.bf16 %v11567_v35  ;;  %v11568_v7 = vunpack.i.l.bf16 %v11567_v35  ;;  %v14867_v16 = vsel %vm196_vm3, %v2574_v45, %v2576_v55 }
 0x491   :  { %v14809_v56 = vsel %vm196_vm3, %v11564_v62, %v11568_v7  ;;  %v14812_v11 = vsel %vm196_vm3, %v11568_v7, %v11569_v34  ;;  %v14864_v28 = vsel %vm196_vm3, %v11569_v34, %v2550_v33 }
 0x492   :  { %v14816_v60 = vpack.i.bf16 %v14812_v11, %v14809_v56  ;;  %v14890_v33 = vpack.i.bf16 %v14861_v43, %v14864_v28 }
 0x494   :  { %20761 = vst [vmem:[#allocation13_spill] sm:$0xff] %v14816_v60  ;;  %11601 = vrot.lane.b32.xlu1 %v14816_v60, %s13123_s3  ;;  %11616 = vrot.lane.b32.xlu0 %v14820_v6, %s13123_s3 }
 0x496   :  { %v2540_v30 = vpop.permute.xlu1 %2539  ;;  %v11582_v8 = vpop.permute.xlu0 %11581 }
 0x497   :  { %v14833_v50 = vsel %vm196_vm3, %v2538_v18, %v2540_v30  ;;  %v11584_v58 = vunpack.i.h.bf16 %v11582_v8  ;;  %v11583_v36 = vunpack.i.l.bf16 %v11582_v8  ;;  %v14886_v18 = vsel %vm205_vm4, %v14867_v16, 0.0 }
 0x498   :  { %v14840_v19 = vsel %vm205_vm4, %v14833_v50, 0.0  ;;  %20765 = vst [vmem:[#allocation10_spill] sm:$0xff] %v14886_v18 }
 0x499   :  { %20762 = vst [vmem:[#allocation6_spill] sm:$0xff] %v14840_v19  ;;  %v14844_v47 = vpack.i.bf16 %v14840_v19, %v14836_v23  ;;  %v14870_v46 = vsel %vm196_vm3, %v11579_v38, %v11583_v36  ;;  %v14873_v15 = vsel %vm196_vm3, %v11583_v36, %v11584_v58  ;;  %v14918_v35 = vsel %vm196_vm3, %v11584_v58, %v2574_v45 }
 0x49a   :  { %v14894_v51 = vpack.i.bf16 %v14873_v15, %v14870_v46 }
 0x49b   :  { %11626 = vrot.lane.b32.xlu2 %v14844_v47, %s13123_s3 }
 0x49c   :  { %11611 = vrot.lane.b32.xlu1 %v14848_v22, %s13123_s3  ;;  %11646 = vrot.lane.b32.xlu0 %v14772_v53, %s13124_s24 }
 0x49e   :  { %v2564_v42 = vpop.permute.xlu1 %2563 }
 0x49f   :  { %v14876_v26 = vsel %vm196_vm3, %v2562_v4, %v2564_v42  ;;  %v14922_v4 = vpack.i.bf16 %v14886_v18, %v14918_v35 }
 0x4a0   :  { %v14882_v62 = vsel %vm205_vm4, %v14876_v26, 0.0 }
 0x4a1   :  { %20764 = vst [vmem:[#allocation38_spill] sm:$0xff] %v14882_v62  ;;  %v14909_v38 = vpack.i.bf16 %v14882_v62, %v14905_v10 }
 0x4a3   :  { %11631 = vrot.lane.b32.xlu2 %v14890_v33, %s13123_s3 }
 0x4a4   :  { %11621 = vrot.lane.b32.xlu1 %v14894_v51, %s13123_s3  ;;  %11661 = vrot.lane.b32.xlu0 %v14784_v32, %s13124_s24 }
 0x4ab   :  { %11636 = vrot.lane.b32.xlu2 %v14909_v38, %s13123_s3 }
 0x4ac   :  { %11651 = vrot.lane.b32.xlu1 %v14769_v57, %s13124_s24  ;;  %11676 = vrot.lane.b32.xlu0 %v14800_v2, %s13124_s24 }
 0x4b3   :  { %11641 = vrot.lane.b32.xlu2 %v14922_v4, %s13123_s3 }
 0x4b4   :  { %11666 = vrot.lane.b32.xlu1 %v14816_v60, %s13124_s24  ;;  %11691 = vrot.lane.b32.xlu0 %v14820_v6, %s13124_s24 }
 0x4bb   :  { %11656 = vrot.lane.b32.xlu2 %v14844_v47, %s13124_s24 }
 0x4bc   :  { %11681 = vrot.lane.b32.xlu1 %v14848_v22, %s13124_s24  ;;  %11706 = vrot.lane.b32.xlu0 %v14772_v53, %s13125_s25 }
 0x4c3   :  { %11671 = vrot.lane.b32.xlu2 %v14890_v33, %s13124_s24 }
 0x4c4   :  { %11696 = vrot.lane.b32.xlu1 %v14894_v51, %s13124_s24  ;;  %11721 = vrot.lane.b32.xlu0 %v14784_v32, %s13125_s25 }
 0x4cb   :  { %11686 = vrot.lane.b32.xlu2 %v14909_v38, %s13124_s24 }
 0x4cc   :  { %11711 = vrot.lane.b32.xlu1 %v14769_v57, %s13125_s25  ;;  %11736 = vrot.lane.b32.xlu0 %v14800_v2, %s13125_s25 }
 0x4d3   :  { %11701 = vrot.lane.b32.xlu2 %v14922_v4, %s13124_s24 }
 0x4d4   :  { %11726 = vrot.lane.b32.xlu1 %v14816_v60, %s13125_s25  ;;  %11751 = vrot.lane.b32.xlu0 %v14820_v6, %s13125_s25 }
 0x4db   :  { %11716 = vrot.lane.b32.xlu2 %v14844_v47, %s13125_s25 }
 0x4dc   :  { %11741 = vrot.lane.b32.xlu1 %v14848_v22, %s13125_s25  ;;  %11766 = vrot.lane.b32.xlu0 %v14772_v53, %s13126_s26  ;;  %v14968_v45 = vpop.permute.xlu0 %11586  ;;  %v14992_v5 = vpop.permute.xlu1 %11591 }
 0x4dd   :  { %v11588_v13 = vunpack.i.l.bf16 %v14968_v45 }
 0x4e3   :  { %11731 = vrot.lane.b32.xlu2 %v14890_v33, %s13125_s25 }
 0x4e4   :  { %11756 = vrot.lane.b32.xlu1 %v14894_v51, %s13125_s25  ;;  %11781 = vrot.lane.b32.xlu0 %v14784_v32, %s13126_s26  ;;  %v14982_v7 = vpop.permute.xlu0 %11596 }
 0x4e5   :  { %v11598_v49 = vunpack.i.l.bf16 %v14982_v7  ;;  %v20766_v31 = vunpack.i.h.bf16 %v14982_v7 }
 0x4e7   :  { %v2699_v54 = vsel %vm230_vm5, %v11598_v49, %v20766_v31 }
 0x4eb   :  { %11746 = vrot.lane.b32.xlu2 %v14909_v38, %s13125_s25 }
 0x4ec   :  { %11771 = vrot.lane.b32.xlu1 %v14769_v57, %s13126_s26  ;;  %11796 = vrot.lane.b32.xlu0 %v14800_v2, %s13126_s26 }
 0x4f3   :  { %11761 = vrot.lane.b32.xlu2 %v14922_v4, %s13125_s25 }
 0x4f4   :  { %11786 = vrot.lane.b32.xlu1 %v14816_v60, %s13126_s26  ;;  %11811 = vrot.lane.b32.xlu0 %v14820_v6, %s13126_s26 }
 0x4f5   :  { %v14980_v34 = vpop.permute.xlu2 %11626 }
 0x4fb   :  { %11776 = vrot.lane.b32.xlu2 %v14844_v47, %s13126_s26 }
 0x4fc   :  { %11801 = vrot.lane.b32.xlu1 %v14848_v22, %s13126_s26  ;;  %11821 = vrot.lane.b32.xlu0 %v14772_v53, %s13127_s27 }
 0x4fd   :  { %v14990_v20 = vpop.permute.xlu2 %11631 }
 0x4fe   :  { %v14994_v52 = vpop.permute.xlu0 %11606  ;;  %v11633_v31 = vunpack.i.l.bf16 %v14990_v20 }
 0x4ff   :  { %v20540_v42 = vunpack.i.h.bf16 %v14994_v52  ;;  %v11608_v44 = vunpack.i.l.bf16 %v14994_v52 }
 0x503   :  { %11791 = vrot.lane.b32.xlu2 %v14890_v33, %s13126_s26 }
 0x504   :  { %11816 = vrot.lane.b32.xlu1 %v14894_v51, %s13126_s26  ;;  %11841 = vrot.lane.b32.xlu0 %v14784_v32, %s13127_s27  ;;  %v20769_v32 = vunpack.i.h.bf16 %v14980_v34 }
 0x505   :  { %v15002_v30 = vpop.permute.xlu2 %11636 }
 0x506   :  { %v15004_v8 = vpop.permute.xlu1 %11601  ;;  %v11617_v58 = vpop.permute.xlu0 %11616 }
 0x507   :  { %v11619_v36 = vunpack.i.h.bf16 %v11617_v58  ;;  %v11618_v55 = vunpack.i.l.bf16 %v11617_v58  ;;  %v2704_v58 = vsel %vm230_vm5, %v11608_v44, %v20540_v42  ;;  %v20547_v44 = vunpack.i.h.bf16 %v15002_v30 }
 0x508   :  { %v20767_v42 = vunpack.i.h.bf16 %v14968_v45 }
 0x509   :  { %v2709_v1 = vsel %vm230_vm5, %v11618_v55, %v11619_v36 }
 0x50a   :  { %2763 = vmatpush.msrb.mxu2 %v2709_v1  ;;  %v2694_v1 = vsel %vm230_vm5, %v11588_v13, %v20767_v42  ;;  %v11628_v42 = vunpack.i.l.bf16 %v14980_v34 }
 0x50b   :  { %11806 = vrot.lane.b32.xlu2 %v14909_v38, %s13126_s26 }
 0x50c   :  { %11826 = vrot.lane.b32.xlu1 %v14769_v57, %s13127_s27  ;;  %11856 = vrot.lane.b32.xlu0 %v14800_v2, %s13127_s27 }
 0x50d   :  { %2764 = vmatpush.msrb.mxu2 %v2704_v58  ;;  %v15022_v55 = vpop.permute.xlu2 %11641  ;;  %v11638_v58 = vunpack.i.l.bf16 %v15002_v30 }
 0x50e   :  { %v11643_v24 = vunpack.i.l.bf16 %v15022_v55  ;;  %v11612_v17 = vpop.permute.xlu1 %11611  ;;  %v20768_v43 = vunpack.i.h.bf16 %v15022_v55  ;;  %v15046_v49 = vpop.permute.xlu0 %11646 }
 0x50f   :  { %2765 = vmatpush.msrb.mxu2 %v2699_v54  ;;  %v20551_v54 = vunpack.i.h.bf16 %v14990_v20  ;;  %v11614_v62 = vunpack.i.h.bf16 %v11612_v17  ;;  %v11613_v2 = vunpack.i.l.bf16 %v11612_v17  ;;  %v11594_v17 = vunpack.i.h.bf16 %v14992_v5 }
 0x510   :  { %v2713_v19 = vsel %vm230_vm5, %v11643_v24, %v20768_v43  ;;  %v2708_v43 = vsel %vm230_vm5, %v11638_v58, %v20547_v44  ;;  %v2698_v44 = vsel %vm230_vm5, %v11628_v42, %v20769_v32  ;;  %v11603_v32 = vunpack.i.l.bf16 %v15004_v8 }
 0x511   :  { %2766 = vmatpush.msrb.mxu2 %v2694_v1 }
 0x512   :  { %10942 = vmatmul.msk.f32.vlgmr.msrb.gmra.mxu2 %vm2738_vm15, %v15032_v9 }
 0x513   :  { %2879 = vmatpush.msra.mxu2 %v2713_v19  ;;  %11831 = vrot.lane.b32.xlu2 %v14922_v4, %s13126_s26  ;;  %v2703_v19 = vsel %vm230_vm5, %v11633_v31, %v20551_v54 }
 0x514   :  { %11846 = vrot.lane.b32.xlu1 %v14816_v60, %s13127_s27  ;;  %11871 = vrot.lane.b32.xlu0 %v14909_v38, %s13127_s27  ;;  %v15068_v60 = vld [vmem:[%s20513_s7 + $0x28] sm:$0xff] }
 0x515   :  { %2880 = vmatpush.msra.mxu2 %v2708_v43 }
 0x516   :  { %v11622_v1 = vpop.permute.xlu1 %11621 }
 0x517   :  { %2881 = vmatpush.msra.mxu2 %v2703_v19  ;;  %v11624_v13 = vunpack.i.h.bf16 %v11622_v1  ;;  %v11623_v18 = vunpack.i.l.bf16 %v11622_v1  ;;  %v11604_v1 = vunpack.i.h.bf16 %v15004_v8  ;;  %v2707_v8 = vsel %vm230_vm5, %v11614_v62, %v11638_v58 }
 0x519   :  { %2882 = vmatpush.msra.mxu2 %v2698_v44  ;;  %v2710_v43 = vsel %vm230_vm5, %v11619_v36, %v11623_v18  ;;  %v2711_v54 = vsel %vm230_vm5, %v11623_v18, %v11624_v13  ;;  %v2712_v19 = vsel %vm230_vm5, %v11624_v13, %v11643_v24  ;;  %v11593_v18 = vunpack.i.l.bf16 %v14992_v5  ;;  %v15081_v36 = vpop.permute.xlu0 %11661 }
 0x51a   :  { %2792 = vmatpush.msra.mxu3 %v2710_v43  ;;  %10943 = vmatmul.msk.f32.gmra.mxu2 %vm2738_vm15, %v15068_v60  ;;  %v2706_v24 = vsel %vm230_vm5, %v11613_v2, %v11614_v62  ;;  %v20770_v44 = vunpack.i.h.bf16 %v14994_v52  ;;  %v2701_v5 = vsel %vm230_vm5, %v11603_v32, %v11604_v1  ;;  %v2702_v43 = vsel %vm230_vm5, %v11604_v1, %v11633_v31  ;;  %v15106_v52 = vld [vmem:[%s20513_s7 + $0x30] sm:$0xff] }
 0x51b   :  { %3007 = vmatpush.msrb.mxu2 %v14870_v46  ;;  %2821 = vmatpush.msra.mxu0 %v2711_v54  ;;  %v20771_v62 = vunpack.i.h.bf16 %v14982_v7  ;;  %v2697_v7 = vsel %vm230_vm5, %v11594_v17, %v11628_v42  ;;  %v20773_v31 = vmov 0  ;;  %v20776_v42 = vunpack.i.h.bf16 %v15022_v55 }
 0x51c   :  { %2850 = vmatpush.msrb.mxu1 %v2712_v19  ;;  %11836 = vrot.lane.b32.xlu2 %v14844_v47, %s13127_s27  ;;  %v2705_v54 = vsel %vm230_vm5, %v20770_v44, %v11613_v2  ;;  %v2696_v2 = vsel %vm230_vm5, %v11593_v18, %v11594_v17  ;;  %v20772_v19 = vunpack.i.h.bf16 %v14968_v45  ;;  %v20774_v31 = vsel %vm15114_vm0, 4294967295, %v20773_v31  ;;  %v15126_v45 = vpop.permute.xlu2 %11656 }
 0x51d   :  { %3008 = vmatpush.msrb.mxu2 %v14830_v3  ;;  %11861 = vrot.lane.b32.xlu1 %v14848_v22, %s13127_s27  ;;  %v2700_v58 = vsel %vm230_vm5, %v20771_v62, %v11603_v32  ;;  %20775 = vst [vmem:[#allocation19_spill] sm:$0xff] %v20774_v31  ;;  %v20777_v17 = vunpack.i.h.bf16 %v15002_v30  ;;  %v20778_v55 = vpack.i.bf16 %v14749_v14, %v14745_v12  ;;  %v20779_v30 = vunpack.i.h.bf16 %v14990_v20 }
 0x51e   :  { %2822 = vmatpush.msra.mxu0 %v2706_v24  ;;  %2851 = vmatpush.msrb.mxu1 %v2707_v8  ;;  %v15092_v13 = vpop.permute.xlu1 %11651  ;;  %v2695_v24 = vsel %vm230_vm5, %v20772_v19, %v11593_v18  ;;  %v11905_v20 = vpack.i.bf16 %v14792_v40, %v14806_v59  ;;  %v11648_v18 = vunpack.i.l.bf16 %v15046_v49 }
 0x51f   :  { %11886 = vrot.lane.b32.xlu0 %v14772_v53, %s13128_s19  ;;  %2793 = vmatpush.msra.mxu3 %v2705_v54 }
 0x520   :  { %3009 = vmatpush.msrb.mxu2 %v14809_v56  ;;  %2823 = vmatpush.msra.mxu0 %v2701_v5  ;;  %v11920_v5 = vpack.i.bf16 %v14873_v15, %v14809_v56 }
 0x521   :  { %2852 = vmatpush.msrb.mxu1 %v2702_v43  ;;  %2794 = vmatpush.msra.mxu3 %v2700_v58  ;;  %v15133_v1 = vpop.permute.xlu0 %11676 }
 0x522   :  { %3010 = vmatpush.msrb.mxu2 %v14765_v21  ;;  %2824 = vmatpush.msra.mxu0 %v2696_v2 }
 0x523   :  { %2795 = vmatpush.msra.mxu3 %v2695_v24  ;;  %2853 = vmatpush.msrb.mxu1 %v2697_v7  ;;  %v15266_v24 = vld [vmem:[%s20513_s7] sm:$0xff] }
 0x524   :  { %10944 = vmatmul.msk.f32.gmra.mxu2 %vm2738_vm15, %v15106_v52  ;;  %10946 = vmatmul.msk.f32.vlgmr.msra.gmra.mxu3 %vm2738_vm15, %v15032_v9 }
 0x525   :  { %10950 = vmatmul.msk.f32.vlgmr.msra.gmra.mxu0 %vm2738_vm15, %v15032_v9  ;;  %10954 = vmatmul.msk.f32.vlgmr.msrb.gmra.mxu1 %vm2738_vm15, %v15032_v9 }
 0x526   :  { %2908 = vmatpush.msrb.mxu3 %v20776_v42  ;;  %10967 = vmatpush.msk.msrb.mxu0 %vm15114_vm0, %v14741_v39  ;;  %v15138_v32 = vpop.permute.xlu1 %11666  ;;  %v15151_v39 = vld [vmem:[%s20513_s7 + $0x38] sm:$0xff] }
 0x527   :  { %2978 = vmatpush.msra.mxu1 %v14806_v59  ;;  %11851 = vrot.lane.b32.xlu2 %v14890_v33, %s13127_s27 }
 0x528   :  { %2909 = vmatpush.msrb.mxu3 %v20777_v17  ;;  %10969 = vmatpush.msk.msrb.mxu0 %vm15114_vm0, %v14788_v37  ;;  %v20780_v37 = vunpack.i.h.bf16 %v14980_v34  ;;  %v11668_v17 = vunpack.i.l.bf16 %v15138_v32 }
 0x529   :  { %2979 = vmatpush.msra.mxu1 %v14796_v29  ;;  %11876 = vrot.lane.b32.xlu1 %v14894_v51, %s13127_s27  ;;  %v15183_v12 = vpop.permute.xlu0 %11691 }
 0x52a   :  { %11901 = vrot.lane.b32.xlu0 %v20778_v55, %s13128_s19  ;;  %2910 = vmatpush.msrb.mxu3 %v20779_v30 }
 0x52b   :  { %10971 = vmatpush.msk.msrb.mxu0 %vm15114_vm0, %v14739_v48  ;;  %2980 = vmatpush.msra.mxu1 %v14780_v27  ;;  %v15177_v48 = vpop.permute.xlu2 %11671 }
 0x52c   :  { %2911 = vmatpush.msrb.mxu3 %v20780_v37  ;;  %10945 = vmatmul.msk.f32.gmra.mxu2 %vm2738_vm15, %v15151_v39  ;;  %v11910_v37 = vpack.i.bf16 %v14780_v27, %v14796_v29  ;;  %v11654_v27 = vunpack.i.h.bf16 %v15092_v13 }
 0x52d   :  { %10973 = vmatpush.msk.msrb.mxu0 %vm15114_vm0, %v14753_v61  ;;  %2981 = vmatpush.msra.mxu1 %v14762_v0  ;;  %v15195_v61 = vpack.i.bf16 %v14830_v3, %v14870_v46  ;;  %v11694_v0 = vunpack.i.h.bf16 %v15183_v12  ;;  %v11679_v3 = vunpack.i.h.bf16 %v15133_v1  ;;  %v11678_v46 = vunpack.i.l.bf16 %v15133_v1 }
 0x52e   :  { %3036 = vmatpush.msra.mxu3 %v14873_v15  ;;  %10951 = vmatmul.msk.f32.gmra.mxu0 %vm2738_vm15, %v15068_v60  ;;  %v15187_v14 = vpop.permute.xlu1 %11681 }
 0x52f   :  { %3065 = vmatpush.msra.mxu0 %v14918_v35  ;;  %10994 = vmatpush.msk.msrb.mxu1 %vm205_vm4, %v14867_v16  ;;  %v11693_v16 = vunpack.i.l.bf16 %v15183_v12  ;;  %v3174_v44 = vsel %vm651_vm8, %v11678_v46, %v11679_v3  ;;  %v11684_v7 = vunpack.i.h.bf16 %v15187_v14  ;;  %v11683_v42 = vunpack.i.l.bf16 %v15187_v14 }
 0x530   :  { %10947 = vmatmul.msk.f32.gmra.mxu3 %vm2738_vm15, %v15068_v60  ;;  %10955 = vmatmul.msk.f32.gmra.mxu1 %vm2738_vm15, %v15068_v60  ;;  %v11669_v14 = vunpack.i.h.bf16 %v15138_v32 }
 0x531   :  { %3037 = vmatpush.msra.mxu3 %v14827_v25  ;;  %3066 = vmatpush.msra.mxu0 %v14905_v10  ;;  %v3179_v34 = vsel %vm651_vm8, %v11693_v16, %v11694_v0  ;;  %v15259_v2 = vpop.permute.xlu0 %11706  ;;  %v11653_v16 = vunpack.i.l.bf16 %v15092_v13  ;;  %v3176_v46 = vsel %vm651_vm8, %v11683_v42, %v11684_v7 }
 0x532   :  { %10995 = vmatpush.msk.msrb.mxu1 %vm205_vm4, %v14876_v26  ;;  %11866 = vrot.lane.b32.xlu2 %v14820_v6, %s13127_s27  ;;  %v11664_v26 = vunpack.i.h.bf16 %v15081_v36  ;;  %v3171_v13 = vsel %vm651_vm8, %v11668_v17, %v11669_v14 }
 0x533   :  { %11891 = vrot.lane.b32.xlu1 %v14769_v57, %s13128_s19  ;;  %3067 = vmatpush.msra.mxu0 %v14864_v28  ;;  %v15228_v8 = vpop.permute.xlu2 %11686 }
 0x534   :  { %11916 = vrot.lane.b32.xlu0 %v15195_v61, %s13128_s19  ;;  %3038 = vmatpush.msra.mxu3 %v14812_v11  ;;  %v11688_v12 = vunpack.i.l.bf16 %v15228_v8  ;;  %v3170_v32 = vsel %vm651_vm8, %v11664_v26, %v11668_v17 }
 0x535   :  { %10996 = vmatpush.msk.msrb.mxu1 %vm205_vm4, %v14851_v41  ;;  %3068 = vmatpush.msra.mxu0 %v14836_v23  ;;  %v11663_v41 = vunpack.i.l.bf16 %v15081_v36  ;;  %v15310_v36 = vld [vmem:[%s20513_s7 + $0x8] sm:$0xff] }
 0x536   :  { %3039 = vmatpush.msra.mxu3 %v14758_v63  ;;  %10958 = vmatmul.msk.f32.vlgmr.msra.gmra.mxu2 %vm2738_vm15, %v15032_v9  ;;  %v11697_v54 = vpop.permute.xlu1 %11696  ;;  %v3177_v29 = vsel %vm651_vm8, %v11684_v7, %v11688_v12 }
 0x537   :  { %10997 = vmatpush.msk.msrb.mxu1 %vm205_vm4, %v14833_v50  ;;  %10952 = vmatmul.msk.f32.gmra.mxu0 %vm2738_vm15, %v15106_v52  ;;  %v11649_v50 = vunpack.i.h.bf16 %v15046_v49  ;;  %v3169_v40 = vsel %vm651_vm8, %v11663_v41, %v11664_v26  ;;  %v11699_v62 = vunpack.i.h.bf16 %v11697_v54  ;;  %v11698_v58 = vunpack.i.l.bf16 %v11697_v54 }
 0x538   :  { %10948 = vmatmul.msk.f32.gmra.mxu3 %vm2738_vm15, %v15106_v52  ;;  %10956 = vmatmul.msk.f32.gmra.mxu1 %vm2738_vm15, %v15106_v52  ;;  %v11673_v41 = vunpack.i.l.bf16 %v15177_v48  ;;  %v11925_v49 = vpack.i.bf16 %v14812_v11, %v14827_v25 }
 0x539   :  { %3232 = vmatpush.msra.mxu2 %v3179_v34  ;;  %v3164_v59 = vsel %vm651_vm8, %v11648_v18, %v11649_v50  ;;  %v3180_v55 = vsel %vm651_vm8, %v11694_v0, %v11698_v58  ;;  %v3181_v30 = vsel %vm651_vm8, %v11698_v58, %v11699_v62  ;;  %v3175_v0 = vsel %vm651_vm8, %v11679_v3, %v11683_v42  ;;  %v15312_v26 = vpop.permute.xlu0 %11721 }
 0x53a   :  { %11881 = vrot.lane.b32.xlu2 %v14922_v4, %s13127_s27  ;;  %v11658_v3 = vunpack.i.l.bf16 %v15126_v45  ;;  %v3172_v34 = vsel %vm651_vm8, %v11669_v14, %v11673_v41  ;;  %v11990_v42 = vpack.i.bf16 %v14836_v23, %v14864_v28  ;;  %v20783_v28 = vld [vmem:[#allocation53_spill] sm:$0xff] }
 0x53b   :  { %3233 = vmatpush.msra.mxu2 %v3174_v44  ;;  %11906 = vrot.lane.b32.xlu1 %v11905_v20, %s13128_s19  ;;  %v15255_v43 = vpop.permute.xlu2 %11701  ;;  %v3165_v20 = vsel %vm651_vm8, %v11649_v50, %v11653_v16  ;;  %v3166_v44 = vsel %vm651_vm8, %v11653_v16, %v11654_v27 }
 0x53c   :  { %11931 = vrot.lane.b32.xlu0 %v14922_v4, %s13128_s19  ;;  %v11703_v1 = vunpack.i.l.bf16 %v15255_v43  ;;  %v3167_v54 = vsel %vm651_vm8, %v11654_v27, %v11658_v3  ;;  %v11704_v50 = vunpack.i.h.bf16 %v15255_v43  ;;  %v11674_v43 = vunpack.i.h.bf16 %v15177_v48 }
 0x53d   :  { %3234 = vmatpush.msra.mxu2 %v3169_v40  ;;  %v20781_v40 = vld [vmem:[#allocation5_spill] sm:$0xff] }
 0x53e   :  { %10959 = vmatmul.msk.f32.gmra.mxu2 %vm2738_vm15, %v15068_v60  ;;  %v15261_v19 = vpop.permute.xlu1 %11711 }
 0x53f   :  { %3235 = vmatpush.msra.mxu2 %v3164_v59  ;;  %10953 = vmatmul.msk.f32.gmra.mxu0 %vm2738_vm15, %v15151_v39  ;;  %v20782_v59 = vld [vmem:[#allocation13_spill] sm:$0xff] }
 0x540   :  { %10949 = vmatmul.msk.f32.gmra.mxu3 %vm2738_vm15, %v15151_v39  ;;  %10957 = vmatmul.msk.f32.gmra.mxu1 %vm2738_vm15, %v15151_v39 }
 0x541   :  { %v11737_v58 = vpop.permute.xlu0 %11736 }
 0x542   :  { %11896 = vrot.lane.b32.xlu2 %v14844_v47, %s13128_s19 }
 0x543   :  { %11921 = vrot.lane.b32.xlu1 %v11920_v5, %s13128_s19  ;;  %v11689_v5 = vunpack.i.h.bf16 %v15228_v8  ;;  %v11659_v8 = vunpack.i.h.bf16 %v15126_v45  ;;  %v15374_v23 = vpop.permute.xlu2 %11716 }
 0x544   :  { %11946 = vrot.lane.b32.xlu0 %v14820_v6, %s13129_s28 }
 0x545   :  { %v3178_v48 = vsel %vm651_vm8, %v11688_v12, %v11689_v5  ;;  %v3168_v45 = vsel %vm651_vm8, %v11658_v3, %v11659_v8  ;;  %v11738_v12 = vunpack.i.l.bf16 %v11737_v58  ;;  %v20784_v3 = vld [vmem:[#allocation38_spill] sm:$0xff] }
 0x546   :  { %10960 = vmatmul.msk.f32.gmra.mxu2 %vm2738_vm15, %v15106_v52  ;;  %v15314_v18 = vpop.permute.xlu1 %11726 }
 0x547   :  { %10974 = vmatmul.msk.f32.vlgmr.msrb.gmra.mxu0 %vm2738_vm15, %v15266_v24 }
 0x548   :  { %10962 = vmatmul.msk.f32.vlgmr.msrb.gmra.mxu3 %vm2738_vm15, %v15032_v9  ;;  %10978 = vmatmul.msk.f32.vlgmr.msra.gmra.mxu1 %vm2738_vm15, %v15266_v24  ;;  %v3182_v9 = vsel %vm651_vm8, %v11699_v62, %v11703_v1  ;;  %v3183_v62 = vsel %vm651_vm8, %v11703_v1, %v11704_v50  ;;  %v15366_v1 = vld [vmem:[%s20513_s7 + $0x18] sm:$0xff] }
 0x549   :  { %3261 = vmatpush.msrb.mxu3 %v3180_v55  ;;  %3290 = vmatpush.msrb.mxu0 %v3181_v30 }
 0x54a   :  { %3319 = vmatpush.msra.mxu1 %v3182_v9  ;;  %11911 = vrot.lane.b32.xlu2 %v11910_v37, %s13128_s19  ;;  %v11739_v37 = vunpack.i.h.bf16 %v11737_v58 }
 0x54b   :  { %3262 = vmatpush.msrb.mxu3 %v3175_v0  ;;  %3291 = vmatpush.msrb.mxu0 %v3176_v46  ;;  %v11728_v0 = vunpack.i.l.bf16 %v15314_v18  ;;  %v11709_v46 = vunpack.i.h.bf16 %v15259_v2  ;;  %v15403_v27 = vpop.permute.xlu2 %11731 }
 0x54c   :  { %3320 = vmatpush.msra.mxu1 %v3177_v29  ;;  %11936 = vrot.lane.b32.xlu1 %v14909_v38, %s13128_s19 }
 0x54d   :  { %11961 = vrot.lane.b32.xlu0 %v14772_v53, %s13129_s28  ;;  %3263 = vmatpush.msrb.mxu3 %v3170_v32  ;;  %v11713_v32 = vunpack.i.l.bf16 %v15261_v19 }
 0x54e   :  { %3292 = vmatpush.msrb.mxu0 %v3171_v13  ;;  %3321 = vmatpush.msra.mxu1 %v3172_v34  ;;  %v15344_v7 = vpop.permute.xlu1 %11741  ;;  %v20785_v13 = vld [vmem:[#allocation10_spill] sm:$0xff] }
 0x54f   :  { %3264 = vmatpush.msrb.mxu3 %v3165_v20  ;;  %10961 = vmatmul.msk.f32.gmra.mxu2 %vm2738_vm15, %v15151_v39  ;;  %v11743_v14 = vunpack.i.l.bf16 %v15344_v7  ;;  %v20786_v34 = vpack.i.bf16 %v20784_v3, %v20785_v13 }
 0x550   :  { %3293 = vmatpush.msrb.mxu0 %v3166_v44  ;;  %3322 = vmatpush.msra.mxu1 %v3167_v54  ;;  %v12035_v54 = vpack.i.bf16 %v14827_v25, %v14873_v15  ;;  %v11729_v15 = vunpack.i.h.bf16 %v15314_v18  ;;  %v15464_v18 = vld [vmem:[%s20513_s7 + $0x48] sm:$0xff] }
 0x551   :  { %10963 = vmatmul.msk.f32.gmra.mxu3 %vm2738_vm15, %v15068_v60  ;;  %10975 = vmatmul.msk.f32.gmra.mxu0 %vm2738_vm15, %v15310_v36  ;;  %v15338_v60 = vld [vmem:[%s20513_s7 + $0x10] sm:$0xff]  ;;  %v3482_v29 = vsel %vm896_vm9, %v11739_v37, %v11743_v14 }
 0x552   :  { %10979 = vmatmul.msk.f32.gmra.mxu1 %vm2738_vm15, %v15310_v36  ;;  %11926 = vrot.lane.b32.xlu2 %v11925_v49, %s13128_s19 }
 0x554   :  { %11951 = vrot.lane.b32.xlu1 %v20781_v40, %s13129_s28 }
 0x555   :  { %11976 = vrot.lane.b32.xlu0 %v20782_v59, %s13129_s28  ;;  %v20787_v59 = vld [vmem:[#allocation6_spill] sm:$0xff] }
 0x556   :  { %v15380_v17 = vpop.permute.xlu1 %11756 }
 0x557   :  { %10982 = vmatmul.msk.f32.vlgmr.msrb.gmra.mxu2 %vm2738_vm15, %v15266_v24  ;;  %v11758_v30 = vunpack.i.l.bf16 %v15380_v17  ;;  %v11759_v44 = vunpack.i.h.bf16 %v15380_v17  ;;  %v12030_v17 = vpack.i.bf16 %v14765_v21, %v14809_v56  ;;  %v11718_v21 = vunpack.i.l.bf16 %v15374_v23 }
 0x558   :  { %3348 = vmatpush.msrb.mxu2 %v3183_v62 }
 0x559   :  { %10964 = vmatmul.msk.f32.gmra.mxu3 %vm2738_vm15, %v15106_v52  ;;  %10976 = vmatmul.msk.f32.gmra.mxu0 %vm2738_vm15, %v15338_v60  ;;  %v3173_v52 = vsel %vm651_vm8, %v11673_v41, %v11674_v43  ;;  %v11708_v41 = vunpack.i.l.bf16 %v15259_v2  ;;  %v3488_v25 = vsel %vm896_vm9, %v11758_v30, %v11759_v44 }
 0x55a   :  { %10980 = vmatmul.msk.f32.gmra.mxu1 %vm2738_vm15, %v15338_v60  ;;  %11941 = vrot.lane.b32.xlu2 %v14890_v33, %s13128_s19 }
 0x55b   :  { %3349 = vmatpush.msrb.mxu2 %v3178_v48  ;;  %v3471_v20 = vsel %vm896_vm9, %v11708_v41, %v11709_v46  ;;  %v5310_v41 = vld [vmem:[%s20515_s9 + $0x10] sm:$0xff] }
 0x55c   :  { %11966 = vrot.lane.b32.xlu1 %v14894_v51, %s13129_s28  ;;  %v11752_v51 = vpop.permute.xlu0 %11751 }
 0x55d   :  { %11991 = vrot.lane.b32.xlu0 %v11990_v42, %s13129_s28  ;;  %3350 = vmatpush.msrb.mxu2 %v3173_v52  ;;  %v11753_v55 = vunpack.i.l.bf16 %v11752_v51 }
 0x55f   :  { %3351 = vmatpush.msrb.mxu2 %v3168_v45 }
 0x560   :  { %10983 = vmatmul.msk.f32.gmra.mxu2 %vm2738_vm15, %v15310_v36 }
 0x561   :  { %10965 = vmatmul.msk.f32.gmra.mxu3 %vm2738_vm15, %v15151_v39  ;;  %10977 = vmatmul.msk.f32.gmra.mxu0 %vm2738_vm15, %v15366_v1  ;;  %v11754_v39 = vunpack.i.h.bf16 %v11752_v51 }
 0x562   :  { %10981 = vmatmul.msk.f32.gmra.mxu1 %vm2738_vm15, %v15366_v1  ;;  %11956 = vrot.lane.b32.xlu2 %v20783_v28, %s13129_s28 }
 0x563   :  { %v3486_v9 = vsel %vm896_vm9, %v11753_v55, %v11754_v39  ;;  %v3487_v16 = vsel %vm896_vm9, %v11754_v39, %v11758_v30  ;;  %v11734_v39 = vunpack.i.h.bf16 %v15403_v27  ;;  %v11733_v55 = vunpack.i.l.bf16 %v15403_v27 }
 0x564   :  { %11981 = vrot.lane.b32.xlu1 %v14769_v57, %s13129_s28  ;;  %v11724_v57 = vunpack.i.h.bf16 %v15312_v26  ;;  %v15434_v49 = vpop.permute.xlu0 %11766 }
 0x565   :  { %12006 = vrot.lane.b32.xlu0 %v14820_v6, %s13130_s29  ;;  %v11723_v6 = vunpack.i.l.bf16 %v15312_v26  ;;  %v3472_v26 = vsel %vm896_vm9, %v11709_v46, %v11713_v32  ;;  %v3479_v56 = vsel %vm896_vm9, %v11729_v15, %v11733_v55 }
 0x567   :  { %v3476_v2 = vsel %vm896_vm9, %v11723_v6, %v11724_v57  ;;  %v3480_v6 = vsel %vm896_vm9, %v11733_v55, %v11734_v39 }
 0x568   :  { %10984 = vmatmul.msk.f32.gmra.mxu2 %vm2738_vm15, %v15338_v60 }
 0x569   :  { %10986 = vmatmul.msk.f32.vlgmr.msra.gmra.mxu3 %vm2738_vm15, %v15266_v24  ;;  %10990 = vmatmul.msk.f32.vlgmr.msra.gmra.mxu0 %vm2738_vm15, %v15266_v24 }
 0x56a   :  { %10998 = vmatmul.msk.f32.vlgmr.msrb.gmra.mxu1 %vm2738_vm15, %v15266_v24  ;;  %3377 = vmatpush.msra.mxu3 %v11704_v50  ;;  %v3481_v24 = vsel %vm896_vm9, %v11738_v12, %v11739_v37  ;;  %v15439_v50 = vld [vmem:[%s20513_s7 + $0x40] sm:$0xff]  ;;  %v5263_v12 = vld [vmem:[%s20514_s8 + $0x18] sm:$0xff] }
 0x56b   :  { %3539 = vmatpush.msra.mxu0 %v3486_v9  ;;  %3568 = vmatpush.msrb.mxu1 %v3487_v16 }
 0x56c   :  { %11971 = vrot.lane.b32.xlu2 %v14848_v22, %s13129_s28  ;;  %3378 = vmatpush.msra.mxu3 %v11689_v5  ;;  %v3477_v22 = vsel %vm896_vm9, %v11724_v57, %v11728_v0  ;;  %v20788_v5 = vld [vmem:[#allocation17_spill] sm:$0xff]  ;;  %v15531_v57 = vld [vmem:[%s20513_s7 + $0x58] sm:$0xff] }
 0x56d   :  { %3540 = vmatpush.msra.mxu0 %v3481_v24  ;;  %3569 = vmatpush.msrb.mxu1 %v3482_v29  ;;  %v20789_v62 = vpack.i.bf16 %v20787_v59, %v20788_v5 }
 0x56e   :  { %11996 = vrot.lane.b32.xlu1 %v20786_v34, %s13129_s28  ;;  %12021 = vrot.lane.b32.xlu0 %v14772_v53, %s13130_s29  ;;  %v11985_v53 = vpack.i.bf16 %v14905_v10, %v14918_v35  ;;  %v11747_v10 = vpop.permute.xlu2 %11746  ;;  %v11744_v35 = vunpack.i.h.bf16 %v15344_v7  ;;  %v15476_v7 = vpop.permute.xlu1 %11771 }
 0x56f   :  { %3379 = vmatpush.msra.mxu3 %v11674_v43  ;;  %3541 = vmatpush.msra.mxu0 %v3476_v2  ;;  %v11749_v52 = vunpack.i.h.bf16 %v11747_v10  ;;  %v11748_v45 = vunpack.i.l.bf16 %v11747_v10  ;;  %v5308_v2 = vld [vmem:[%s20515_s9] sm:$0xff] }
 0x570   :  { %3570 = vmatpush.msrb.mxu1 %v3477_v22  ;;  %10985 = vmatmul.msk.f32.gmra.mxu2 %vm2738_vm15, %v15366_v1  ;;  %v11769_v22 = vunpack.i.h.bf16 %v15434_v49 }
 0x571   :  { %3380 = vmatpush.msra.mxu3 %v11659_v8  ;;  %3542 = vmatpush.msra.mxu0 %v3471_v20  ;;  %v15494_v8 = vld [vmem:[%s20513_s7 + $0x50] sm:$0xff]  ;;  %v3484_v30 = vsel %vm896_vm9, %v11744_v35, %v11748_v45  ;;  %v3485_v37 = vsel %vm896_vm9, %v11748_v45, %v11749_v52  ;;  %v11768_v20 = vunpack.i.l.bf16 %v15434_v49  ;;  %v5309_v45 = vld [vmem:[%s20515_s9 + $0x8] sm:$0xff] }
 0x572   :  { %3571 = vmatpush.msrb.mxu1 %v3472_v26  ;;  %10987 = vmatmul.msk.f32.gmra.mxu3 %vm2738_vm15, %v15310_v36 }
 0x573   :  { %10991 = vmatmul.msk.f32.gmra.mxu0 %vm2738_vm15, %v15310_v36  ;;  %10999 = vmatmul.msk.f32.gmra.mxu1 %vm2738_vm15, %v15310_v36  ;;  %v3483_v36 = vsel %vm896_vm9, %v11743_v14, %v11744_v35  ;;  %v11719_v14 = vunpack.i.h.bf16 %v15374_v23  ;;  %v3778_v35 = vsel %vm1141_vm10, %v11768_v20, %v11769_v22 }
 0x574   :  { %11986 = vrot.lane.b32.xlu2 %v11985_v53, %s13129_s28 }
 0x575   :  { %v3475_v9 = vsel %vm896_vm9, %v11718_v21, %v11719_v14 }
 0x576   :  { %12011 = vrot.lane.b32.xlu1 %v20781_v40, %s13130_s29  ;;  %12036 = vrot.lane.b32.xlu0 %v12035_v54, %s13130_s29  ;;  %v11714_v40 = vunpack.i.h.bf16 %v15261_v19  ;;  %v15471_v19 = vpop.permute.xlu0 %11781  ;;  %v11762_v43 = vpop.permute.xlu2 %11761 }
 0x577   :  { %v11764_v48 = vunpack.i.h.bf16 %v11762_v43  ;;  %v11763_v42 = vunpack.i.l.bf16 %v11762_v43  ;;  %v11784_v13 = vunpack.i.h.bf16 %v15471_v19  ;;  %v11783_v34 = vunpack.i.l.bf16 %v15471_v19  ;;  %v15670_v19 = vld [vmem:[%s20513_s7 + $0x68] sm:$0xff] }
 0x578   :  { %11006 = vmatmul.msk.f32.vlgmr.msra.gmra.mxu2 %vm2738_vm15, %v15439_v50  ;;  %v3473_v58 = vsel %vm896_vm9, %v11713_v32, %v11714_v40  ;;  %v3474_v23 = vsel %vm896_vm9, %v11714_v40, %v11718_v21 }
 0x579   :  { %3597 = vmatpush.msra.mxu2 %v3488_v25  ;;  %v3490_v51 = vsel %vm896_vm9, %v11763_v42, %v11764_v48  ;;  %v3783_v10 = vsel %vm1141_vm10, %v11783_v34, %v11784_v13 }
 0x57a   :  { %10988 = vmatmul.msk.f32.gmra.mxu3 %vm2738_vm15, %v15338_v60 }
 0x57b   :  { %10992 = vmatmul.msk.f32.gmra.mxu0 %vm2738_vm15, %v15338_v60  ;;  %11000 = vmatmul.msk.f32.gmra.mxu1 %vm2738_vm15, %v15338_v60  ;;  %v3478_v60 = vsel %vm896_vm9, %v11728_v0, %v11729_v15  ;;  %v5261_v0 = vld [vmem:[%s20514_s8 + $0x8] sm:$0xff]  ;;  %v5311_v15 = vld [vmem:[%s20515_s9 + $0x18] sm:$0xff] }
 0x57c   :  { %12001 = vrot.lane.b32.xlu2 %v20789_v62, %s13129_s28  ;;  %3598 = vmatpush.msra.mxu2 %v3483_v36 }
 0x57e   :  { %12026 = vrot.lane.b32.xlu1 %v15195_v61, %s13130_s29  ;;  %12046 = vrot.lane.b32.xlu0 %v14909_v38, %s13130_s29  ;;  %v5260_v38 = vld [vmem:[%s20514_s8] sm:$0xff]  ;;  %v12040_v61 = vpack.i.bf16 %v14758_v63, %v14812_v11  ;;  %v15505_v63 = vpop.permute.xlu1 %11786  ;;  %v3489_v11 = vsel %vm896_vm9, %v11759_v44, %v11763_v42 }
 0x57f   :  { %3599 = vmatpush.msra.mxu2 %v3478_v60  ;;  %v11788_v42 = vunpack.i.l.bf16 %v15505_v63 }
 0x580   :  { %11007 = vmatmul.msk.f32.gmra.mxu2 %vm2738_vm15, %v15464_v18 }
 0x581   :  { %3600 = vmatpush.msra.mxu2 %v3473_v58  ;;  %v15622_v58 = vld [vmem:[%s20513_s7 + $0x60] sm:$0xff] }
 0x582   :  { %10989 = vmatmul.msk.f32.gmra.mxu3 %vm2738_vm15, %v15366_v1 }
 0x583   :  { %10993 = vmatmul.msk.f32.gmra.mxu0 %vm2738_vm15, %v15366_v1  ;;  %11001 = vmatmul.msk.f32.gmra.mxu1 %vm2738_vm15, %v15366_v1  ;;  %v15499_v1 = vpop.permute.xlu0 %11796 }
 0x584   :  { %12016 = vrot.lane.b32.xlu2 %v20783_v28, %s13130_s29  ;;  %v15501_v28 = vpop.permute.xlu2 %11776  ;;  %v11799_v32 = vunpack.i.h.bf16 %v15499_v1  ;;  %v11798_v3 = vunpack.i.l.bf16 %v15499_v1 }
 0x586   :  { %12041 = vrot.lane.b32.xlu1 %v12040_v61, %s13130_s29  ;;  %5266 = vperm.xlu0 %11552, %v5260_v38   ;;  %v15549_v46 = vpop.permute.xlu1 %11801  ;;  %v3788_v26 = vsel %vm1141_vm10, %v11798_v3, %v11799_v32 }
 0x587   :  { %v11803_v38 = vunpack.i.l.bf16 %v15549_v46 }
 0x588   :  { %11008 = vmatmul.msk.f32.gmra.mxu2 %vm2738_vm15, %v15494_v8 }
 0x589   :  { %v3789_v55 = vsel %vm1141_vm10, %v11799_v32, %v11803_v38 }
 0x58a   :  { %11010 = vmatmul.msk.f32.vlgmr.msrb.gmra.mxu3 %vm2738_vm15, %v15439_v50 }
 0x58b   :  { %11014 = vmatmul.msk.f32.vlgmr.msrb.gmra.mxu0 %vm2738_vm15, %v15439_v50  ;;  %11018 = vmatmul.msk.f32.vlgmr.msra.gmra.mxu1 %vm2738_vm15, %v15439_v50 }
 0x58c   :  { %3626 = vmatpush.msrb.mxu3 %v3489_v11  ;;  %3655 = vmatpush.msrb.mxu0 %v3490_v51  ;;  %v15540_v16 = vpop.permute.xlu2 %11791  ;;  %v11789_v11 = vunpack.i.h.bf16 %v15505_v63 }
 0x58d   :  { %3684 = vmatpush.msra.mxu1 %v11764_v48  ;;  %12031 = vrot.lane.b32.xlu2 %v12030_v17, %s13130_s29  ;;  %v11804_v48 = vunpack.i.h.bf16 %v15549_v46  ;;  %v11793_v63 = vunpack.i.l.bf16 %v15540_v16 }
 0x58e   :  { %3627 = vmatpush.msrb.mxu3 %v3484_v30  ;;  %3656 = vmatpush.msrb.mxu0 %v3485_v37  ;;  %v11817_v54 = vpop.permute.xlu1 %11816  ;;  %v11774_v37 = vunpack.i.h.bf16 %v15476_v7 }
 0x58f   :  { %3685 = vmatpush.msra.mxu1 %v11749_v52  ;;  %12051 = vrot.lane.b32.xlu1 %v14890_v33, %s13130_s29  ;;  %v15538_v33 = vpop.permute.xlu0 %11811  ;;  %v11818_v5 = vunpack.i.l.bf16 %v11817_v54  ;;  %v11819_v60 = vunpack.i.h.bf16 %v11817_v54 }
 0x590   :  { %5281 = vperm.xlu0 %11552, %v5263_v12   ;;  %3628 = vmatpush.msrb.mxu3 %v3479_v56  ;;  %v11814_v24 = vunpack.i.h.bf16 %v15538_v33  ;;  %v11813_v29 = vunpack.i.l.bf16 %v15538_v33  ;;  %v3790_v12 = vsel %vm1141_vm10, %v11803_v38, %v11804_v48  ;;  %v3784_v56 = vsel %vm1141_vm10, %v11784_v13, %v11788_v42 }
 0x591   :  { %3657 = vmatpush.msrb.mxu0 %v3480_v6  ;;  %3686 = vmatpush.msra.mxu1 %v11734_v39  ;;  %v3795_v51 = vsel %vm1141_vm10, %v11818_v5, %v11819_v60  ;;  %v11773_v39 = vunpack.i.l.bf16 %v15476_v7  ;;  %v11778_v6 = vunpack.i.l.bf16 %v15501_v28  ;;  %v3786_v7 = vsel %vm1141_vm10, %v11789_v11, %v11793_v63 }
 0x592   :  { %3629 = vmatpush.msrb.mxu3 %v3474_v23  ;;  %11009 = vmatmul.msk.f32.gmra.mxu2 %vm2738_vm15, %v15531_v57  ;;  %v3794_v52 = vsel %vm1141_vm10, %v11814_v24, %v11818_v5  ;;  %v3785_v23 = vsel %vm1141_vm10, %v11788_v42, %v11789_v11 }
 0x593   :  { %3658 = vmatpush.msrb.mxu0 %v3475_v9  ;;  %3687 = vmatpush.msra.mxu1 %v11719_v14  ;;  %v3779_v33 = vsel %vm1141_vm10, %v11769_v22, %v11773_v39 }
 0x594   :  { %11011 = vmatmul.msk.f32.gmra.mxu3 %vm2738_vm15, %v15464_v18  ;;  %11015 = vmatmul.msk.f32.gmra.mxu0 %vm2738_vm15, %v15464_v18  ;;  %v15583_v53 = vpop.permute.xlu2 %11806 }
 0x595   :  { %11019 = vmatmul.msk.f32.gmra.mxu1 %vm2738_vm15, %v15464_v18  ;;  %12056 = vrot.lane.b32.xlu2 %v14922_v4, %s13130_s29  ;;  %v15558_v27 = vpop.f32.mrf.mxu2  ;;  %v3793_v4 = vsel %vm1141_vm10, %v11813_v29, %v11814_v24  ;;  %v11808_v1 = vunpack.i.l.bf16 %v15583_v53  ;;  %v3781_v24 = vsel %vm1141_vm10, %v11774_v37, %v11778_v6 }
 0x596   :  { %20790 = vst [vmem:[#allocation15_spill] sm:$0xff] %v15558_v27  ;;  %v15617_v43 = vpop.permute.xlu1 %11826 }
 0x597   :  { %5271 = vperm.xlu1 %11553, %v5261_v0   ;;  %v3791_v14 = vsel %vm1141_vm10, %v11804_v48, %v11808_v1  ;;  %v15680_v49 = vpop.permute.xlu0 %11821 }
 0x598   :  { %5324 = vperm.xlu0 %11552, %v5310_v41   ;;  %v3780_v41 = vsel %vm1141_vm10, %v11773_v39, %v11774_v37 }
 0x59a   :  { %11022 = vmatmul.msk.f32.vlgmr.msrb.gmra.mxu2 %vm2738_vm15, %v15439_v50 }
 0x59b   :  { %3846 = vmatpush.msrb.mxu2 %v3793_v4  ;;  %v11809_v4 = vunpack.i.h.bf16 %v15583_v53 }
 0x59c   :  { %11012 = vmatmul.msk.f32.gmra.mxu3 %vm2738_vm15, %v15494_v8  ;;  %11016 = vmatmul.msk.f32.gmra.mxu0 %vm2738_vm15, %v15494_v8  ;;  %v15613_v59 = vpop.permute.xlu2 %11831 }
 0x59d   :  { %11020 = vmatmul.msk.f32.gmra.mxu1 %vm2738_vm15, %v15494_v8  ;;  %12061 = vrot.lane.b32.xlu2 %v14844_v47, %s13130_s29  ;;  %v15585_v44 = vpop.f32.mrf.mxu2  ;;  %v5262_v47 = vld [vmem:[%s20514_s8 + $0x10] sm:$0xff]  ;;  %v11833_v61 = vunpack.i.l.bf16 %v15613_v59  ;;  %v11834_v3 = vunpack.i.h.bf16 %v15613_v59 }
 0x59e   :  { %3847 = vmatpush.msrb.mxu2 %v3788_v26  ;;  %20791 = vst [vmem:[#allocation25_spill] sm:$0xff] %v15585_v44  ;;  %v15674_v46 = vpop.permute.xlu1 %11846  ;;  %v11779_v26 = vunpack.i.h.bf16 %v15501_v28 }
 0x59f   :  { %5314 = vperm.xlu1 %11553, %v5308_v2   ;;  %v11794_v2 = vunpack.i.h.bf16 %v15540_v16  ;;  %v3797_v22 = vsel %vm1141_vm10, %v11833_v61, %v11834_v3  ;;  %v3792_v16 = vsel %vm1141_vm10, %v11808_v1, %v11809_v4 }
 0x5a0   :  { %3848 = vmatpush.msrb.mxu2 %v3783_v10 }
 0x5a1   :  { %v3787_v28 = vsel %vm1141_vm10, %v11793_v63, %v11794_v2  ;;  %v11848_v63 = vunpack.i.l.bf16 %v15674_v46 }
 0x5a2   :  { %3849 = vmatpush.msrb.mxu2 %v3778_v35  ;;  %v15598_v25 = vpop.f32.mrf.mxu0  ;;  %v15607_v36 = vpop.f32.mrf.mxu1 }
 0x5a3   :  { %11023 = vmatmul.msk.f32.gmra.mxu2 %vm2738_vm15, %v15464_v18  ;;  %20792 = vst [vmem:[#allocation26_spill] sm:$0xff] %v15598_v25  ;;  %v11842_v35 = vpop.permute.xlu0 %11841 }
 0x5a4   :  { %11013 = vmatmul.msk.f32.gmra.mxu3 %vm2738_vm15, %v15531_v57  ;;  %11017 = vmatmul.msk.f32.gmra.mxu0 %vm2738_vm15, %v15531_v57  ;;  %20793 = vst [vmem:[#allocation51_spill] sm:$0xff] %v15607_v36  ;;  %v15662_v9 = vpop.permute.xlu2 %11836  ;;  %v11844_v39 = vunpack.i.h.bf16 %v11842_v35 }
 0x5a5   :  { %11021 = vmatmul.msk.f32.gmra.mxu1 %vm2738_vm15, %v15531_v57  ;;  %5276 = vperm.xlu2 %11554, %v5262_v47   ;;  %v3782_v47 = vsel %vm1141_vm10, %v11778_v6, %v11779_v26  ;;  %v11823_v6 = vunpack.i.l.bf16 %v15680_v49 }
 0x5a6   :  { %v15710_v53 = vpop.permute.xlu1 %11861 }
 0x5a7   :  { %5329 = vperm.xlu1 %11553, %v5311_v15   ;;  %v15611_v40 = vpop.f32.mrf.mxu2  ;;  %v15615_v62 = vpop.f32.mrf.mxu3  ;;  %v15730_v15 = vld [vmem:[%s20513_s7 + $0x78] sm:$0xff] }
 0x5a8   :  { %20794 = vst [vmem:[#allocation37_spill] sm:$0xff] %v15611_v40 }
 0x5a9   :  { %20795 = vst [vmem:[#allocation40_spill] sm:$0xff] %v15615_v62 }
 0x5ab   :  { %11024 = vmatmul.msk.f32.gmra.mxu2 %vm2738_vm15, %v15494_v8  ;;  %v15644_v17 = vpop.f32.mrf.mxu0  ;;  %v11857_v48 = vpop.permute.xlu0 %11856 }
 0x5ac   :  { %11026 = vmatmul.msk.f32.vlgmr.msra.gmra.mxu3 %vm2738_vm15, %v15439_v50  ;;  %11034 = vmatmul.msk.f32.vlgmr.msra.gmra.mxu0 %vm2738_vm15, %v15622_v58  ;;  %v3796_v50 = vsel %vm1141_vm10, %v11819_v60, %v11833_v61  ;;  %20796 = vst [vmem:[#allocation7_spill] sm:$0xff] %v15644_v17  ;;  %v15707_v20 = vpop.permute.xlu2 %11851  ;;  %v11859_v11 = vunpack.i.h.bf16 %v11857_v48 }
 0x5ad   :  { %11038 = vmatmul.msk.f32.vlgmr.msrb.gmra.mxu1 %vm2738_vm15, %v15622_v58  ;;  %3875 = vmatpush.msra.mxu3 %v3794_v52  ;;  %v15648_v30 = vpop.f32.mrf.mxu1 }
 0x5ae   :  { %3904 = vmatpush.msra.mxu0 %v3795_v51  ;;  %3933 = vmatpush.msrb.mxu1 %v3796_v50  ;;  %20797 = vst [vmem:[#allocation20_spill] sm:$0xff] %v15648_v30  ;;  %v15744_v38 = vpop.permute.xlu1 %11876  ;;  %v11858_v51 = vunpack.i.l.bf16 %v11857_v48  ;;  %v11863_v50 = vunpack.i.l.bf16 %v15710_v53 }
 0x5af   :  { %5319 = vperm.xlu2 %11554, %v5309_v45   ;;  %3876 = vmatpush.msra.mxu3 %v3789_v55  ;;  %v15654_v21 = vpop.f32.mrf.mxu2  ;;  %v11843_v55 = vunpack.i.l.bf16 %v11842_v35  ;;  %v15798_v35 = vld [vmem:[%s20513_s7 + $0x80] sm:$0xff] }
 0x5b0   :  { %3905 = vmatpush.msra.mxu0 %v3790_v12  ;;  %3934 = vmatpush.msrb.mxu1 %v3791_v14  ;;  %v11824_v14 = vunpack.i.h.bf16 %v15680_v49 }
 0x5b1   :  { %3877 = vmatpush.msra.mxu3 %v3784_v56 }
 0x5b2   :  { %3906 = vmatpush.msra.mxu0 %v3785_v23  ;;  %3935 = vmatpush.msrb.mxu1 %v3786_v7  ;;  %v11828_v23 = vunpack.i.l.bf16 %v15617_v43  ;;  %v4095_v7 = vsel %vm1386_vm11, %v11858_v51, %v11859_v11  ;;  %v4085_v49 = vsel %vm1386_vm11, %v11823_v6, %v11824_v14 }
 0x5b3   :  { %v15672_v0 = vpop.f32.mrf.mxu3  ;;  %3878 = vmatpush.msra.mxu3 %v3779_v33  ;;  %11025 = vmatmul.msk.f32.gmra.mxu2 %vm2738_vm15, %v15531_v57 }
 0x5b4   :  { %3907 = vmatpush.msra.mxu0 %v3780_v41  ;;  %3936 = vmatpush.msrb.mxu1 %v3781_v24  ;;  %v15686_v29 = vpop.f32.mrf.mxu0  ;;  %v11867_v60 = vpop.permute.xlu2 %11866  ;;  %v4090_v41 = vsel %vm1386_vm11, %v11843_v55, %v11844_v39  ;;  %v4091_v24 = vsel %vm1386_vm11, %v11844_v39, %v11848_v63 }
 0x5b5   :  { %11027 = vmatmul.msk.f32.gmra.mxu3 %vm2738_vm15, %v15464_v18  ;;  %11035 = vmatmul.msk.f32.gmra.mxu0 %vm2738_vm15, %v15670_v19  ;;  %20798 = vst [vmem:[#allocation27_spill] sm:$0xff] %v15686_v29  ;;  %v15690_v32 = vpop.f32.mrf.mxu1  ;;  %v15699_v18 = vld [vmem:[%s20513_s7 + $0x70] sm:$0xff]  ;;  %v11869_v52 = vunpack.i.h.bf16 %v11867_v60  ;;  %v11868_v45 = vunpack.i.l.bf16 %v11867_v60  ;;  %v11849_v60 = vunpack.i.h.bf16 %v15674_v46 }
 0x5b6   :  { %11039 = vmatmul.msk.f32.gmra.mxu1 %vm2738_vm15, %v15670_v19  ;;  %20799 = vst [vmem:[#allocation54_spill] sm:$0xff] %v15690_v32 }
 0x5b7   :  { %v4100_v37 = vsel %vm1386_vm11, %v11868_v45, %v11869_v52  ;;  %v11872_v45 = vpop.permute.xlu0 %11871 }
 0x5b9   :  { %v15694_v13 = vpop.f32.mrf.mxu2 }
 0x5bb   :  { %v15701_v34 = vpop.f32.mrf.mxu3  ;;  %11042 = vmatmul.msk.f32.vlgmr.msra.gmra.mxu2 %vm2738_vm15, %v15622_v58 }
 0x5bc   :  { %3962 = vmatpush.msra.mxu2 %v3797_v22  ;;  %v15717_v54 = vpop.f32.mrf.mxu0 }
 0x5bd   :  { %11028 = vmatmul.msk.f32.gmra.mxu3 %vm2738_vm15, %v15494_v8  ;;  %11036 = vmatmul.msk.f32.gmra.mxu0 %vm2738_vm15, %v15699_v18  ;;  %20800 = vst [vmem:[#allocation52_spill] sm:$0xff] %v15717_v54  ;;  %v15721_v10 = vpop.f32.mrf.mxu1 }
 0x5be   :  { %11040 = vmatmul.msk.f32.gmra.mxu1 %vm2738_vm15, %v15699_v18  ;;  %3963 = vmatpush.msra.mxu2 %v3792_v16  ;;  %20801 = vst [vmem:[#allocation18_spill] sm:$0xff] %v15721_v10 }
 0x5c0   :  { %3964 = vmatpush.msra.mxu2 %v3787_v28  ;;  %v11864_v28 = vunpack.i.h.bf16 %v15710_v53 }
 0x5c1   :  { %v15725_v8 = vpop.f32.mrf.mxu2 }
 0x5c2   :  { %3965 = vmatpush.msra.mxu2 %v3782_v47  ;;  %v4097_v53 = vsel %vm1386_vm11, %v11863_v50, %v11864_v28 }
 0x5c3   :  { %v15732_v59 = vpop.f32.mrf.mxu3  ;;  %11043 = vmatmul.msk.f32.gmra.mxu2 %vm2738_vm15, %v15670_v19 }
 0x5c4   :  { %v15740_v5 = vpop.f32.mrf.mxu0 }
 0x5c5   :  { %11029 = vmatmul.msk.f32.gmra.mxu3 %vm2738_vm15, %v15531_v57  ;;  %11037 = vmatmul.msk.f32.gmra.mxu0 %vm2738_vm15, %v15730_v15  ;;  %20802 = vst [vmem:[#allocation28_spill] sm:$0xff] %v15740_v5  ;;  %v15746_v61 = vpop.f32.mrf.mxu1  ;;  %v11878_v57 = vunpack.i.l.bf16 %v15744_v38 }
 0x5c6   :  { %11041 = vmatmul.msk.f32.gmra.mxu1 %vm2738_vm15, %v15730_v15  ;;  %20803 = vst [vmem:[#allocation42_spill] sm:$0xff] %v15746_v61 }
 0x5c7   :  { %v4101_v12 = vsel %vm1386_vm11, %v11869_v52, %v11878_v57  ;;  %v4092_v52 = vsel %vm1386_vm11, %v11848_v63, %v11849_v60  ;;  %v15847_v63 = vld [vmem:[%s20513_s7 + $0x90] sm:$0xff] }
 0x5c9   :  { %v15748_v42 = vpop.f32.mrf.mxu2 }
 0x5cb   :  { %v15751_v1 = vpop.f32.mrf.mxu3  ;;  %11044 = vmatmul.msk.f32.gmra.mxu2 %vm2738_vm15, %v15699_v18 }
 0x5cd   :  { %11046 = vmatmul.msk.f32.vlgmr.msrb.gmra.mxu3 %vm2738_vm15, %v15622_v58  ;;  %11050 = vmatmul.msk.f32.vlgmr.msrb.gmra.mxu0 %vm2738_vm15, %v15622_v58 }
 0x5ce   :  { %11054 = vmatmul.msk.f32.vlgmr.msra.gmra.mxu1 %vm2738_vm15, %v15622_v58  ;;  %3991 = vmatpush.msrb.mxu3 %v11834_v3  ;;  %v15766_v56 = vpop.f32.mrf.mxu0  ;;  %v4096_v58 = vsel %vm1386_vm11, %v11859_v11, %v11863_v50  ;;  %v11882_v50 = vpop.permute.xlu2 %11881 }
 0x5cf   :  { %4153 = vmatpush.msrb.mxu0 %v4100_v37  ;;  %4182 = vmatpush.msra.mxu1 %v4101_v12  ;;  %20804 = vst [vmem:[#allocation14_spill] sm:$0xff] %v15766_v56  ;;  %v15772_v33 = vpop.f32.mrf.mxu1  ;;  %v11884_v37 = vunpack.i.h.bf16 %v11882_v50  ;;  %v11883_v12 = vunpack.i.l.bf16 %v11882_v50 }
 0x5d0   :  { %3992 = vmatpush.msrb.mxu3 %v11809_v4  ;;  %v4086_v4 = vsel %vm1386_vm11, %v11824_v14, %v11828_v23  ;;  %v15849_v14 = vpop.permute.xlu0 %11886 }
 0x5d1   :  { %4154 = vmatpush.msrb.mxu0 %v4095_v7  ;;  %4183 = vmatpush.msra.mxu1 %v4096_v58  ;;  %v11874_v7 = vunpack.i.h.bf16 %v11872_v45  ;;  %v11873_v58 = vunpack.i.l.bf16 %v11872_v45  ;;  %v11838_v45 = vunpack.i.l.bf16 %v15662_v9  ;;  %v11888_v31 = vunpack.i.l.bf16 %v15849_v14 }
 0x5d2   :  { %3993 = vmatpush.msrb.mxu3 %v11794_v2  ;;  %v15776_v3 = vpop.f32.mrf.mxu2 }
 0x5d3   :  { %4155 = vmatpush.msrb.mxu0 %v4090_v41  ;;  %4184 = vmatpush.msra.mxu1 %v4091_v24  ;;  %v11854_v24 = vunpack.i.h.bf16 %v15707_v20 }
 0x5d4   :  { %3994 = vmatpush.msrb.mxu3 %v11779_v26  ;;  %11045 = vmatmul.msk.f32.gmra.mxu2 %vm2738_vm15, %v15730_v15  ;;  %v15782_v22 = vpop.f32.mrf.mxu3  ;;  %v11879_v26 = vunpack.i.h.bf16 %v15744_v38  ;;  %v11829_v38 = vunpack.i.h.bf16 %v15617_v43  ;;  %v15825_v43 = vld [vmem:[%s20513_s7 + $0x88] sm:$0xff] }
 0x5d5   :  { %4156 = vmatpush.msrb.mxu0 %v4085_v49  ;;  %4185 = vmatpush.msra.mxu1 %v4086_v4  ;;  %v11853_v49 = vunpack.i.l.bf16 %v15707_v20  ;;  %v4099_v20 = vsel %vm1386_vm11, %v11873_v58, %v11874_v7 }
 0x5d6   :  { %11047 = vmatmul.msk.f32.gmra.mxu3 %vm2738_vm15, %v15670_v19  ;;  %11051 = vmatmul.msk.f32.gmra.mxu0 %vm2738_vm15, %v15670_v19  ;;  %v15790_v2 = vpop.f32.mrf.mxu0  ;;  %v4087_v11 = vsel %vm1386_vm11, %v11828_v23, %v11829_v38  ;;  %v15853_v23 = vpop.permute.xlu1 %11891  ;;  %v4103_v41 = vsel %vm1386_vm11, %v11879_v26, %v11883_v12 }
 0x5d7   :  { %11055 = vmatmul.msk.f32.gmra.mxu1 %vm2738_vm15, %v15670_v19  ;;  %20805 = vst [vmem:[#allocation29_spill] sm:$0xff] %v15790_v2  ;;  %v15793_v16 = vpop.f32.mrf.mxu1  ;;  %v4102_v19 = vsel %vm1386_vm11, %v11878_v57, %v11879_v26  ;;  %v15866_v4 = vpop.permute.xlu2 %11896  ;;  %v11839_v26 = vunpack.i.h.bf16 %v15662_v9  ;;  %v4093_v50 = vsel %vm1386_vm11, %v11849_v60, %v11853_v49  ;;  %v4088_v9 = vsel %vm1386_vm11, %v11829_v38, %v11838_v45 }
 0x5da   :  { %v15801_v47 = vpop.f32.mrf.mxu2 }
 0x5db   :  { %20806 = vst [vmem:[#allocation34_spill] sm:$0xff] %v15801_v47 }
 0x5dc   :  { %11062 = vmatmul.msk.f32.vlgmr.msrb.gmra.mxu2 %vm2738_vm15, %v15798_v35  ;;  %v15807_v48 = vpop.f32.mrf.mxu3 }
 0x5dd   :  { %20807 = vst [vmem:[#allocation55_spill] sm:$0xff] %v15807_v48  ;;  %4211 = vmatpush.msrb.mxu2 %v4102_v19  ;;  %v4104_v19 = vsel %vm1386_vm11, %v11883_v12, %v11884_v37 }
 0x5de   :  { %11048 = vmatmul.msk.f32.gmra.mxu3 %vm2738_vm15, %v15699_v18  ;;  %11052 = vmatmul.msk.f32.gmra.mxu0 %vm2738_vm15, %v15699_v18  ;;  %v15817_v46 = vpop.f32.mrf.mxu0 }
 0x5df   :  { %11056 = vmatmul.msk.f32.gmra.mxu1 %vm2738_vm15, %v15699_v18  ;;  %4212 = vmatpush.msrb.mxu2 %v4097_v53  ;;  %v15820_v57 = vpop.f32.mrf.mxu1  ;;  %v4098_v53 = vsel %vm1386_vm11, %v11864_v28, %v11873_v58  ;;  %v4094_v28 = vsel %vm1386_vm11, %v11853_v49, %v11854_v24  ;;  %v4089_v58 = vsel %vm1386_vm11, %v11838_v45, %v11839_v26 }
 0x5e1   :  { %4213 = vmatpush.msrb.mxu2 %v4092_v52 }
 0x5e3   :  { %4214 = vmatpush.msrb.mxu2 %v4087_v11  ;;  %v15828_v51 = vpop.f32.mrf.mxu2 }
 0x5e4   :  { %20808 = vst [vmem:[#allocation39_spill] sm:$0xff] %v15828_v51  ;;  %11063 = vmatmul.msk.f32.gmra.mxu2 %vm2738_vm15, %v15825_v43  ;;  %v15832_v18 = vpop.f32.mrf.mxu3 }
 0x5e5   :  { %20809 = vst [vmem:[#allocation43_spill] sm:$0xff] %v15832_v18 }
 0x5e6   :  { %11049 = vmatmul.msk.f32.gmra.mxu3 %vm2738_vm15, %v15730_v15  ;;  %11053 = vmatmul.msk.f32.gmra.mxu0 %vm2738_vm15, %v15730_v15  ;;  %v15840_v39 = vpop.f32.mrf.mxu0 }
 0x5e7   :  { %11057 = vmatmul.msk.f32.gmra.mxu1 %vm2738_vm15, %v15730_v15  ;;  %v15842_v55 = vpop.f32.mrf.mxu1 }
 0x5eb   :  { %v15851_v6 = vpop.f32.mrf.mxu2 }
 0x5ec   :  { %20810 = vst [vmem:[#allocation30_spill] sm:$0xff] %v15851_v6  ;;  %11064 = vmatmul.msk.f32.gmra.mxu2 %vm2738_vm15, %v15847_v63  ;;  %v15857_v15 = vpop.f32.mrf.mxu3 }
 0x5ed   :  { %20811 = vst [vmem:[#allocation44_spill] sm:$0xff] %v15857_v15 }
 0x5ee   :  { %11066 = vmatmul.msk.f32.vlgmr.msra.gmra.mxu3 %vm2738_vm15, %v15798_v35  ;;  %11070 = vmatmul.msk.f32.vlgmr.msra.gmra.mxu0 %vm2738_vm15, %v15798_v35 }
 0x5ef   :  { %11074 = vmatmul.msk.f32.vlgmr.msrb.gmra.mxu1 %vm2738_vm15, %v15798_v35  ;;  %4240 = vmatpush.msra.mxu3 %v4103_v41  ;;  %v11907_v41 = vpop.permute.xlu1 %11906 }
 0x5f0   :  { %4269 = vmatpush.msra.mxu0 %v4104_v19  ;;  %4298 = vmatpush.msrb.mxu1 %v11884_v37  ;;  %v15872_v52 = vpop.f32.mrf.mxu0  ;;  %v15877_v11 = vpop.f32.mrf.mxu1  ;;  %v15883_v37 = vld [vmem:[%s20513_s7 + $0x98] sm:$0xff]  ;;  %v11908_v49 = vunpack.i.l.bf16 %v11907_v41  ;;  %v11909_v45 = vunpack.i.h.bf16 %v11907_v41 }
 0x5f1   :  { %4241 = vmatpush.msra.mxu3 %v4098_v53 }
 0x5f2   :  { %4270 = vmatpush.msra.mxu0 %v4099_v20  ;;  %4299 = vmatpush.msrb.mxu1 %v11874_v7  ;;  %v11902_v7 = vpop.permute.xlu0 %11901 }
 0x5f3   :  { %4242 = vmatpush.msra.mxu3 %v4093_v50  ;;  %v15886_v12 = vpop.f32.mrf.mxu2  ;;  %v11904_v53 = vunpack.i.h.bf16 %v11902_v7  ;;  %v11903_v10 = vunpack.i.l.bf16 %v11902_v7 }
 0x5f4   :  { %20812 = vst [vmem:[#allocation56_spill] sm:$0xff] %v15886_v12  ;;  %4271 = vmatpush.msra.mxu0 %v4094_v28  ;;  %4300 = vmatpush.msrb.mxu1 %v11854_v24  ;;  %v15902_v24 = vpop.permute.xlu2 %11911 }
 0x5f5   :  { %4243 = vmatpush.msra.mxu3 %v4088_v9  ;;  %11065 = vmatmul.msk.f32.gmra.mxu2 %vm2738_vm15, %v15883_v37  ;;  %v15892_v60 = vpop.f32.mrf.mxu3  ;;  %v11913_v50 = vunpack.i.l.bf16 %v15902_v24  ;;  %v4407_v28 = vsel %vm1631_vm12, %v11904_v53, %v11908_v49 }
 0x5f6   :  { %20813 = vst [vmem:[#allocation57_spill] sm:$0xff] %v15892_v60  ;;  %4272 = vmatpush.msra.mxu0 %v4089_v58  ;;  %4301 = vmatpush.msrb.mxu1 %v11839_v26  ;;  %v20817_v58 = vunpack.i.h.bf16 %v15902_v24  ;;  %v20819_v60 = vunpack.i.h.bf16 %v15849_v14 }
 0x5f7   :  { %11067 = vmatmul.msk.f32.gmra.mxu3 %vm2738_vm15, %v15825_v43  ;;  %11071 = vmatmul.msk.f32.gmra.mxu0 %vm2738_vm15, %v15825_v43  ;;  %v4402_v41 = vsel %vm1631_vm12, %v11909_v45, %v11913_v50 }
 0x5f8   :  { %11075 = vmatmul.msk.f32.gmra.mxu1 %vm2738_vm15, %v15825_v43  ;;  %v15900_v38 = vpop.f32.mrf.mxu0  ;;  %v15904_v19 = vpop.f32.mrf.mxu1  ;;  %v4397_v7 = vsel %vm1631_vm12, %v11903_v10, %v20817_v58  ;;  %v4392_v45 = vsel %vm1631_vm12, %v11888_v31, %v20819_v60 }
 0x5f9   :  { %20814 = vst [vmem:[#allocation45_spill] sm:$0xff] %v15904_v19 }
 0x5fa   :  { %v11917_v26 = vpop.permute.xlu0 %11916 }
 0x5fb   :  { %v15906_v20 = vpop.f32.mrf.mxu2  ;;  %v11918_v12 = vunpack.i.l.bf16 %v11917_v26 }
 0x5fc   :  { %20815 = vst [vmem:[#allocation21_spill] sm:$0xff] %v15906_v20  ;;  %v11927_v32 = vpop.permute.xlu2 %11926 }
 0x5fd   :  { %11078 = vmatmul.msk.f32.vlgmr.msra.gmra.mxu2 %vm2738_vm15, %v15798_v35  ;;  %v15913_v9 = vpop.f32.mrf.mxu3  ;;  %v11929_v2 = vunpack.i.h.bf16 %v11927_v32 }
 0x5fe   :  { %20816 = vst [vmem:[#allocation32_spill] sm:$0xff] %v15913_v9  ;;  %4460 = vmatpush.msra.mxu2 %v4407_v28  ;;  %v11922_v28 = vpop.permute.xlu1 %11921 }
 0x5ff   :  { %11068 = vmatmul.msk.f32.gmra.mxu3 %vm2738_vm15, %v15847_v63  ;;  %11072 = vmatmul.msk.f32.gmra.mxu0 %vm2738_vm15, %v15847_v63  ;;  %v11923_v6 = vunpack.i.l.bf16 %v11922_v28 }
 0x600   :  { %11076 = vmatmul.msk.f32.gmra.mxu1 %vm2738_vm15, %v15847_v63  ;;  %4461 = vmatpush.msra.mxu2 %v4402_v41  ;;  %v15924_v53 = vpop.f32.mrf.mxu0  ;;  %v15929_v9 = vpop.f32.mrf.mxu1 }
 0x601   :  { %20818 = vst [vmem:[#allocation8_spill] sm:$0xff] %v15929_v9 }
 0x602   :  { %4462 = vmatpush.msra.mxu2 %v4397_v7  ;;  %v15948_v31 = vpop.permute.xlu0 %11931 }
 0x603   :  { %v15934_v30 = vpop.f32.mrf.mxu2  ;;  %v11933_v36 = vunpack.i.l.bf16 %v15948_v31 }
 0x604   :  { %20820 = vst [vmem:[#allocation16_spill] sm:$0xff] %v15934_v30  ;;  %4463 = vmatpush.msra.mxu2 %v4392_v45  ;;  %v11924_v45 = vunpack.i.h.bf16 %v11922_v28  ;;  %v15959_v30 = vld [vmem:[%s20513_s7 + $0xa0] sm:$0xff]  ;;  %v15961_v54 = vpop.permute.xlu2 %11941  ;;  %v11893_v28 = vunpack.i.l.bf16 %v15853_v23 }
 0x605   :  { %11079 = vmatmul.msk.f32.gmra.mxu2 %vm2738_vm15, %v15825_v43  ;;  %v15938_v41 = vpop.f32.mrf.mxu3  ;;  %v11943_v29 = vunpack.i.l.bf16 %v15961_v54 }
 0x606   :  { %20821 = vst [vmem:[#allocation9_spill] sm:$0xff] %v15938_v41  ;;  %v15952_v58 = vpop.permute.xlu1 %11936  ;;  %v11919_v41 = vunpack.i.h.bf16 %v11917_v26  ;;  %v4408_v26 = vsel %vm1631_vm12, %v11908_v49, %v11918_v12  ;;  %v4410_v51 = vsel %vm1631_vm12, %v11924_v45, %v11933_v36  ;;  %v11894_v49 = vunpack.i.h.bf16 %v15853_v23 }
 0x607   :  { %11069 = vmatmul.msk.f32.gmra.mxu3 %vm2738_vm15, %v15883_v37  ;;  %11073 = vmatmul.msk.f32.gmra.mxu0 %vm2738_vm15, %v15883_v37  ;;  %v20829_v23 = vunpack.i.h.bf16 %v15849_v14 }
 0x608   :  { %11077 = vmatmul.msk.f32.gmra.mxu1 %vm2738_vm15, %v15883_v37  ;;  %v15946_v10 = vpop.f32.mrf.mxu0  ;;  %v15950_v60 = vpop.f32.mrf.mxu1 }
 0x609   :  { %20822 = vst [vmem:[#allocation23_spill] sm:$0xff] %v15946_v10 }
 0x60a   :  { %20823 = vst [vmem:[#allocation46_spill] sm:$0xff] %v15950_v60  ;;  %v11928_v60 = vunpack.i.l.bf16 %v11927_v32  ;;  %v4400_v32 = vsel %vm1631_vm12, %v11929_v2, %v11943_v29 }
 0x60b   :  { %v15954_v7 = vpop.f32.mrf.mxu2 }
 0x60c   :  { %20824 = vst [vmem:[#allocation31_spill] sm:$0xff] %v15954_v7  ;;  %v11938_v7 = vunpack.i.l.bf16 %v15952_v58  ;;  %v4404_v40 = vsel %vm1631_vm12, %v11919_v41, %v11928_v60 }
 0x60d   :  { %11080 = vmatmul.msk.f32.gmra.mxu2 %vm2738_vm15, %v15847_v63  ;;  %v15965_v15 = vpop.f32.mrf.mxu3 }
 0x60e   :  { %20825 = vst [vmem:[#allocation33_spill] sm:$0xff] %v15965_v15  ;;  %v4409_v15 = vsel %vm1631_vm12, %v11918_v12, %v11924_v45  ;;  %v20828_v12 = vunpack.i.h.bf16 %v15902_v24  ;;  %v11934_v45 = vunpack.i.h.bf16 %v15948_v31 }
 0x60f   :  { %11082 = vmatmul.msk.f32.vlgmr.msrb.gmra.mxu3 %vm2738_vm15, %v15798_v35  ;;  %11090 = vmatmul.msk.f32.vlgmr.msrb.gmra.mxu0 %vm2738_vm15, %v15959_v30  ;;  %v4403_v35 = vsel %vm1631_vm12, %v11913_v50, %v11919_v41  ;;  %v4399_v50 = vsel %vm1631_vm12, %v11923_v6, %v11929_v2  ;;  %v4393_v41 = vsel %vm1631_vm12, %v20829_v23, %v11893_v28 }
 0x610   :  { %11094 = vmatmul.msk.f32.vlgmr.msra.gmra.mxu1 %vm2738_vm15, %v15959_v30  ;;  %4489 = vmatpush.msrb.mxu3 %v4408_v26  ;;  %v4405_v26 = vsel %vm1631_vm12, %v11928_v60, %v11938_v7  ;;  %v4394_v60 = vsel %vm1631_vm12, %v11893_v28, %v11894_v49  ;;  %v11947_v28 = vpop.permute.xlu0 %11946  ;;  %v4411_v31 = vsel %vm1631_vm12, %v11933_v36, %v11934_v45  ;;  %v11957_v36 = vpop.permute.xlu2 %11956 }
 0x611   :  { %4518 = vmatpush.msrb.mxu0 %v4409_v15  ;;  %4547 = vmatpush.msra.mxu1 %v4410_v51  ;;  %v15981_v17 = vpop.f32.mrf.mxu0  ;;  %v4398_v51 = vsel %vm1631_vm12, %v20828_v12, %v11923_v6  ;;  %v11898_v15 = vunpack.i.l.bf16 %v15866_v4  ;;  %v11959_v44 = vunpack.i.h.bf16 %v11957_v36  ;;  %v11958_v61 = vunpack.i.l.bf16 %v11957_v36 }
 0x612   :  { %20826 = vst [vmem:[#allocation41_spill] sm:$0xff] %v15981_v17  ;;  %4490 = vmatpush.msrb.mxu3 %v4403_v35  ;;  %v15986_v56 = vpop.f32.mrf.mxu1 }
 0x613   :  { %20827 = vst [vmem:[#allocation48_spill] sm:$0xff] %v15986_v56  ;;  %4519 = vmatpush.msrb.mxu0 %v4404_v40  ;;  %4548 = vmatpush.msra.mxu1 %v4405_v26  ;;  %v16000_v40 = vld [vmem:[%s20513_s7 + $0xa8] sm:$0xff]  ;;  %v4395_v6 = vsel %vm1631_vm12, %v11894_v49, %v11898_v15  ;;  %v11939_v49 = vunpack.i.h.bf16 %v15952_v58  ;;  %v16022_v26 = vpop.permute.xlu1 %11951  ;;  %v11899_v58 = vunpack.i.h.bf16 %v15866_v4 }
 0x614   :  { %4491 = vmatpush.msrb.mxu3 %v4398_v51  ;;  %v11944_v51 = vunpack.i.h.bf16 %v15961_v54  ;;  %v11953_v56 = vunpack.i.l.bf16 %v16022_v26 }
 0x615   :  { %4520 = vmatpush.msrb.mxu0 %v4399_v50  ;;  %4549 = vmatpush.msra.mxu1 %v4400_v32  ;;  %v16002_v24 = vpop.f32.mrf.mxu2  ;;  %v4406_v32 = vsel %vm1631_vm12, %v11938_v7, %v11939_v49  ;;  %v16054_v7 = vld [vmem:[%s20513_s7 + $0xb8] sm:$0xff] }
 0x616   :  { %4492 = vmatpush.msrb.mxu3 %v4393_v41  ;;  %11081 = vmatmul.msk.f32.gmra.mxu2 %vm2738_vm15, %v15883_v37  ;;  %v4401_v23 = vsel %vm1631_vm12, %v11943_v29, %v11944_v51 }
 0x617   :  { %4521 = vmatpush.msrb.mxu0 %v4394_v60  ;;  %4550 = vmatpush.msra.mxu1 %v4395_v6  ;;  %v16008_v2 = vpop.f32.mrf.mxu3 }
 0x618   :  { %11083 = vmatmul.msk.f32.gmra.mxu3 %vm2738_vm15, %v15825_v43  ;;  %11091 = vmatmul.msk.f32.gmra.mxu0 %vm2738_vm15, %v16000_v40  ;;  %v16027_v43 = vld [vmem:[%s20513_s7 + $0xb0] sm:$0xff]  ;;  %v11962_v4 = vpop.permute.xlu0 %11961 }
 0x619   :  { %11095 = vmatmul.msk.f32.gmra.mxu1 %vm2738_vm15, %v16000_v40  ;;  %v16016_v14 = vpop.f32.mrf.mxu0  ;;  %v11964_v10 = vunpack.i.h.bf16 %v11962_v4  ;;  %v11963_v25 = vunpack.i.l.bf16 %v11962_v4 }
 0x61a   :  { %20830 = vst [vmem:[#allocation12_spill] sm:$0xff] %v16016_v14  ;;  %v16019_v35 = vpop.f32.mrf.mxu1  ;;  %v11954_v14 = vunpack.i.h.bf16 %v16022_v26 }
 0x61b   :  { %20831 = vst [vmem:[#allocation24_spill] sm:$0xff] %v16019_v35  ;;  %v16056_v60 = vpop.permute.xlu1 %11966 }
 0x61d   :  { %v16029_v12 = vpop.f32.mrf.mxu2 }
 0x61e   :  { %11098 = vmatmul.msk.f32.vlgmr.msrb.gmra.mxu2 %vm2738_vm15, %v15959_v30 }
 0x61f   :  { %4576 = vmatpush.msrb.mxu2 %v4411_v31  ;;  %v16035_v50 = vpop.f32.mrf.mxu3 }
 0x620   :  { %11084 = vmatmul.msk.f32.gmra.mxu3 %vm2738_vm15, %v15847_v63  ;;  %11092 = vmatmul.msk.f32.gmra.mxu0 %vm2738_vm15, %v16027_v43  ;;  %v4396_v63 = vsel %vm1631_vm12, %v11898_v15, %v11899_v58 }
 0x621   :  { %11096 = vmatmul.msk.f32.gmra.mxu1 %vm2738_vm15, %v16027_v43  ;;  %4577 = vmatpush.msrb.mxu2 %v4406_v32  ;;  %v16045_v54 = vpop.f32.mrf.mxu0  ;;  %v11949_v32 = vunpack.i.h.bf16 %v11947_v28 }
 0x622   :  { %20832 = vst [vmem:[#allocation58_spill] sm:$0xff] %v16045_v54  ;;  %v16048_v41 = vpop.f32.mrf.mxu1  ;;  %v16077_v54 = vpop.permute.xlu0 %11976 }
 0x623   :  { %20833 = vst [vmem:[#allocation11_spill] sm:$0xff] %v16048_v41  ;;  %4578 = vmatpush.msrb.mxu2 %v4401_v23  ;;  %v11948_v23 = vunpack.i.l.bf16 %v11947_v28  ;;  %v11968_v41 = vunpack.i.l.bf16 %v16056_v60  ;;  %v16088_v28 = vpop.permute.xlu1 %11981  ;;  %v11978_v62 = vunpack.i.l.bf16 %v16077_v54  ;;  %v11979_v4 = vunpack.i.h.bf16 %v16077_v54 }
 0x625   :  { %4579 = vmatpush.msrb.mxu2 %v4396_v63  ;;  %v16074_v63 = vpop.permute.xlu2 %11971  ;;  %v4714_v17 = vsel %vm1876_vm13, %v11948_v23, %v11949_v32  ;;  %v4715_v26 = vsel %vm1876_vm13, %v11949_v32, %v11968_v41  ;;  %v4709_v23 = vsel %vm1876_vm13, %v11953_v56, %v11954_v14 }
 0x626   :  { %11099 = vmatmul.msk.f32.gmra.mxu2 %vm2738_vm15, %v16000_v40  ;;  %v16060_v6 = vpop.f32.mrf.mxu2  ;;  %v11973_v35 = vunpack.i.l.bf16 %v16074_v63 }
 0x627   :  { %v16062_v29 = vpop.f32.mrf.mxu3 }
 0x628   :  { %11085 = vmatmul.msk.f32.gmra.mxu3 %vm2738_vm15, %v15883_v37  ;;  %11093 = vmatmul.msk.f32.gmra.mxu0 %vm2738_vm15, %v16054_v7  ;;  %v4710_v36 = vsel %vm1876_vm13, %v11954_v14, %v11973_v35 }
 0x629   :  { %11097 = vmatmul.msk.f32.gmra.mxu1 %vm2738_vm15, %v16054_v7  ;;  %v16070_v15 = vpop.f32.mrf.mxu0 }
 0x62a   :  { %20834 = vst [vmem:[#allocation22_spill] sm:$0xff] %v16070_v15  ;;  %v16072_v31 = vpop.f32.mrf.mxu1  ;;  %v11983_v15 = vunpack.i.l.bf16 %v16088_v28 }
 0x62b   :  { %20835 = vst [vmem:[#allocation36_spill] sm:$0xff] %v16072_v31 }
 0x62c   :  { %v4700_v56 = vsel %vm1876_vm13, %v11964_v10, %v11983_v15 }
 0x62d   :  { %v11987_v32 = vpop.permute.xlu2 %11986 }
 0x62e   :  { %11100 = vmatmul.msk.f32.gmra.mxu2 %vm2738_vm15, %v16027_v43  ;;  %v16081_v37 = vpop.f32.mrf.mxu2 }
 0x62f   :  { %v16086_v31 = vpop.f32.mrf.mxu3 }
 0x630   :  { %11102 = vmatmul.msk.f32.vlgmr.msra.gmra.mxu3 %vm2738_vm15, %v15959_v30  ;;  %11106 = vmatmul.msk.f32.vlgmr.msra.gmra.mxu0 %vm2738_vm15, %v15959_v30 }
 0x631   :  { %11110 = vmatmul.msk.f32.vlgmr.msrb.gmra.mxu1 %vm2738_vm15, %v15959_v30  ;;  %4605 = vmatpush.msra.mxu3 %v11934_v45  ;;  %v4704_v30 = vsel %vm1876_vm13, %v11958_v61, %v11959_v44 }
 0x632   :  { %4767 = vmatpush.msra.mxu0 %v4714_v17  ;;  %4796 = vmatpush.msrb.mxu1 %v4715_v26  ;;  %v16099_v47 = vpop.f32.mrf.mxu0  ;;  %v4705_v17 = vsel %vm1876_vm13, %v11959_v44, %v11978_v62  ;;  %v11984_v26 = vunpack.i.h.bf16 %v16088_v28  ;;  %v16157_v28 = vld [vmem:[%s20513_s7 + $0xc8] sm:$0xff] }
 0x633   :  { %20836 = vst [vmem:[#allocation35_spill] sm:$0xff] %v16099_v47  ;;  %4606 = vmatpush.msra.mxu3 %v11939_v49  ;;  %v16104_v20 = vpop.f32.mrf.mxu1  ;;  %v4699_v49 = vsel %vm1876_vm13, %v11963_v25, %v11964_v10  ;;  %v11969_v25 = vunpack.i.h.bf16 %v16056_v60  ;;  %v16130_v10 = vld [vmem:[%s20513_s7 + $0xc0] sm:$0xff] }
 0x634   :  { %4768 = vmatpush.msra.mxu0 %v4709_v23  ;;  %4797 = vmatpush.msrb.mxu1 %v4710_v36  ;;  %v4701_v36 = vsel %vm1876_vm13, %v11983_v15, %v11984_v26 }
 0x635   :  { %4607 = vmatpush.msra.mxu3 %v11944_v51  ;;  %v11974_v51 = vunpack.i.h.bf16 %v16074_v63 }
 0x636   :  { %4769 = vmatpush.msra.mxu0 %v4704_v30  ;;  %4798 = vmatpush.msrb.mxu1 %v4705_v17  ;;  %v16108_v45 = vpop.f32.mrf.mxu2  ;;  %v11992_v30 = vpop.permute.xlu0 %11991 }
 0x637   :  { %20837 = vst [vmem:[#allocation49_spill] sm:$0xff] %v16108_v45  ;;  %4608 = vmatpush.msra.mxu3 %v11899_v58  ;;  %11101 = vmatmul.msk.f32.gmra.mxu2 %vm2738_vm15, %v16054_v7  ;;  %v4711_v63 = vsel %vm1876_vm13, %v11973_v35, %v11974_v51  ;;  %v11994_v18 = vunpack.i.h.bf16 %v11992_v30 }
 0x638   :  { %4770 = vmatpush.msra.mxu0 %v4699_v49  ;;  %4799 = vmatpush.msrb.mxu1 %v4700_v56  ;;  %v16114_v14 = vpop.f32.mrf.mxu3  ;;  %v16179_v56 = vld [vmem:[%s20513_s7 + $0xd0] sm:$0xff] }
 0x639   :  { %20838 = vst [vmem:[#allocation47_spill] sm:$0xff] %v16114_v14  ;;  %11103 = vmatmul.msk.f32.gmra.mxu3 %vm2738_vm15, %v16000_v40  ;;  %11107 = vmatmul.msk.f32.gmra.mxu0 %vm2738_vm15, %v16000_v40 }
 0x63a   :  { %11111 = vmatmul.msk.f32.gmra.mxu1 %vm2738_vm15, %v16000_v40  ;;  %v16122_v44 = vpop.f32.mrf.mxu0  ;;  %v4716_v40 = vsel %vm1876_vm13, %v11968_v41, %v11969_v25  ;;  %v4706_v41 = vsel %vm1876_vm13, %v11978_v62, %v11979_v4  ;;  %v12002_v62 = vpop.permute.xlu2 %12001 }
 0x63b   :  { %20839 = vst [vmem:[#allocation5_spill] sm:$0xff] %v16122_v44  ;;  %v16125_v61 = vpop.f32.mrf.mxu1  ;;  %v12003_v5 = vunpack.i.l.bf16 %v12002_v62  ;;  %v12004_v27 = vunpack.i.h.bf16 %v12002_v62  ;;  %v4702_v62 = vsel %vm1876_vm13, %v11984_v26, %v11994_v18 }
 0x63e   :  { %v16133_v58 = vpop.f32.mrf.mxu2  ;;  %v16185_v44 = vpop.permute.xlu0 %12006 }
 0x63f   :  { %20840 = vst [vmem:[#allocation13_spill] sm:$0xff] %v16133_v58  ;;  %11118 = vmatmul.msk.f32.vlgmr.msra.gmra.mxu2 %vm2738_vm15, %v16130_v10  ;;  %v12008_v26 = vunpack.i.l.bf16 %v16185_v44 }
 0x640   :  { %4825 = vmatpush.msra.mxu2 %v4716_v40  ;;  %v16139_v60 = vpop.f32.mrf.mxu3  ;;  %v11988_v40 = vunpack.i.l.bf16 %v11987_v32 }
 0x641   :  { %20841 = vst [vmem:[#allocation53_spill] sm:$0xff] %v16139_v60  ;;  %11104 = vmatmul.msk.f32.gmra.mxu3 %vm2738_vm15, %v16027_v43  ;;  %11108 = vmatmul.msk.f32.gmra.mxu0 %vm2738_vm15, %v16027_v43 }
 0x642   :  { %11112 = vmatmul.msk.f32.gmra.mxu1 %vm2738_vm15, %v16027_v43  ;;  %4826 = vmatpush.msra.mxu2 %v4711_v63  ;;  %v16149_v54 = vpop.f32.mrf.mxu0  ;;  %v11997_v43 = vpop.permute.xlu1 %11996  ;;  %v4717_v58 = vsel %vm1876_vm13, %v11969_v25, %v11988_v40 }
 0x643   :  { %v16152_v23 = vpop.f32.mrf.mxu1  ;;  %v11998_v63 = vunpack.i.l.bf16 %v11997_v43 }
 0x644   :  { %4827 = vmatpush.msra.mxu2 %v4706_v41 }
 0x646   :  { %4828 = vmatpush.msra.mxu2 %v4701_v36  ;;  %v16160_v35 = vpop.f32.mrf.mxu2  ;;  %v11989_v36 = vunpack.i.h.bf16 %v11987_v32  ;;  %v4718_v32 = vsel %vm1876_vm13, %v11988_v40, %v11998_v63  ;;  %v16211_v40 = vld [vmem:[%s20513_s7 + $0xd8] sm:$0xff] }
 0x647   :  { %20842 = vst [vmem:[#allocation38_spill] sm:$0xff] %v16160_v35  ;;  %11119 = vmatmul.msk.f32.gmra.mxu2 %vm2738_vm15, %v16157_v28  ;;  %v11993_v35 = vunpack.i.l.bf16 %v11992_v30  ;;  %v4703_v30 = vsel %vm1876_vm13, %v11994_v18, %v12004_v27  ;;  %v12009_v18 = vunpack.i.h.bf16 %v16185_v44 }
 0x648   :  { %v16164_v17 = vpop.f32.mrf.mxu3 }
 0x649   :  { %20843 = vst [vmem:[#allocation10_spill] sm:$0xff] %v16164_v17  ;;  %11105 = vmatmul.msk.f32.gmra.mxu3 %vm2738_vm15, %v16054_v7  ;;  %11109 = vmatmul.msk.f32.gmra.mxu0 %vm2738_vm15, %v16054_v7  ;;  %v16202_v17 = vpop.permute.xlu2 %12016  ;;  %v5021_v44 = vsel %vm2121_vm14, %v12008_v26, %v12009_v18 }
 0x64a   :  { %11113 = vmatmul.msk.f32.gmra.mxu1 %vm2738_vm15, %v16054_v7  ;;  %v16172_v15 = vpop.f32.mrf.mxu0  ;;  %v11999_v7 = vunpack.i.h.bf16 %v11997_v43  ;;  %v4712_v43 = vsel %vm1876_vm13, %v11974_v51, %v11989_v36  ;;  %v4708_v51 = vsel %vm1876_vm13, %v11993_v35, %v12003_v5 }
 0x64b   :  { %v16174_v49 = vpop.f32.mrf.mxu1 }
 0x64c   :  { %v4713_v25 = vsel %vm1876_vm13, %v11989_v36, %v11999_v7  ;;  %v16222_v36 = vpop.permute.xlu0 %12021 }
 0x64e   :  { %v16181_v41 = vpop.f32.mrf.mxu2 }
 0x64f   :  { %20844 = vst [vmem:[#allocation6_spill] sm:$0xff] %v16181_v41  ;;  %11120 = vmatmul.msk.f32.gmra.mxu2 %vm2738_vm15, %v16179_v56  ;;  %v16194_v41 = vpop.permute.xlu1 %12011 }
 0x650   :  { %v16187_v47 = vpop.f32.mrf.mxu3 }
 0x651   :  { %20845 = vst [vmem:[#allocation17_spill] sm:$0xff] %v16187_v47  ;;  %11122 = vmatmul.msk.f32.vlgmr.msrb.gmra.mxu3 %vm2738_vm15, %v16130_v10  ;;  %11126 = vmatmul.msk.f32.vlgmr.msrb.gmra.mxu0 %vm2738_vm15, %v16130_v10 }
 0x652   :  { %11130 = vmatmul.msk.f32.vlgmr.msra.gmra.mxu1 %vm2738_vm15, %v16130_v10  ;;  %4854 = vmatpush.msrb.mxu3 %v4717_v58  ;;  %v4707_v58 = vsel %vm1876_vm13, %v11979_v4, %v11993_v35 }
 0x653   :  { %4883 = vmatpush.msrb.mxu0 %v4718_v32  ;;  %4912 = vmatpush.msra.mxu1 %v11998_v63  ;;  %v16200_v47 = vpop.f32.mrf.mxu0  ;;  %v12023_v32 = vunpack.i.l.bf16 %v16222_v36 }
 0x654   :  { %4855 = vmatpush.msrb.mxu3 %v4712_v43  ;;  %v16205_v9 = vpop.f32.mrf.mxu1  ;;  %v12013_v43 = vunpack.i.l.bf16 %v16194_v41 }
 0x655   :  { %20846 = vst [vmem:[#allocation64_spill] sm:$0xff] %v16205_v9  ;;  %4884 = vmatpush.msrb.mxu0 %v4713_v25  ;;  %4913 = vmatpush.msra.mxu1 %v11999_v7  ;;  %v16238_v7 = vpop.permute.xlu2 %12031 }
 0x656   :  { %4856 = vmatpush.msrb.mxu3 %v4707_v58  ;;  %v20852_v58 = vunpack.i.h.bf16 %v16194_v41  ;;  %v12033_v48 = vunpack.i.l.bf16 %v16238_v7 }
 0x657   :  { %4885 = vmatpush.msrb.mxu0 %v4708_v51  ;;  %4914 = vmatpush.msra.mxu1 %v12003_v5  ;;  %v16215_v63 = vpop.f32.mrf.mxu2  ;;  %v12018_v51 = vunpack.i.l.bf16 %v16202_v17 }
 0x658   :  { %20847 = vst [vmem:[#allocation65_spill] sm:$0xff] %v16215_v63  ;;  %4857 = vmatpush.msrb.mxu3 %v4702_v62  ;;  %11121 = vmatmul.msk.f32.gmra.mxu2 %vm2738_vm15, %v16211_v40  ;;  %v5016_v63 = vsel %vm2121_vm14, %v12013_v43, %v20852_v58 }
 0x659   :  { %4886 = vmatpush.msrb.mxu0 %v4703_v30  ;;  %4915 = vmatpush.msra.mxu1 %v12004_v27  ;;  %v16220_v4 = vpop.f32.mrf.mxu3  ;;  %v16234_v27 = vpop.permute.xlu1 %12026  ;;  %v20854_v30 = vunpack.i.h.bf16 %v16202_v17 }
 0x65a   :  { %20848 = vst [vmem:[#allocation66_spill] sm:$0xff] %v16220_v4  ;;  %11123 = vmatmul.msk.f32.gmra.mxu3 %vm2738_vm15, %v16157_v28  ;;  %11127 = vmatmul.msk.f32.gmra.mxu0 %vm2738_vm15, %v16157_v28 }
 0x65b   :  { %11131 = vmatmul.msk.f32.gmra.mxu1 %vm2738_vm15, %v16157_v28  ;;  %v16230_v5 = vpop.f32.mrf.mxu0 }
 0x65c   :  { %v16236_v35 = vpop.f32.mrf.mxu1 }
 0x65d   :  { %20849 = vst [vmem:[#allocation67_spill] sm:$0xff] %v16236_v35  ;;  %v20856_v35 = vunpack.i.h.bf16 %v16222_v36 }
 0x65f   :  { %v16242_v25 = vpop.f32.mrf.mxu2  ;;  %v5006_v43 = vsel %vm2121_vm14, %v12023_v32, %v20856_v35 }
 0x660   :  { %20850 = vst [vmem:[#allocation68_spill] sm:$0xff] %v16242_v25  ;;  %11134 = vmatmul.msk.f32.vlgmr.msrb.gmra.mxu2 %vm2738_vm15, %v16130_v10 }
 0x661   :  { %5074 = vmatpush.msrb.mxu2 %v5021_v44  ;;  %v16249_v62 = vpop.f32.mrf.mxu3  ;;  %v12037_v44 = vpop.permute.xlu0 %12036 }
 0x662   :  { %20851 = vst [vmem:[#allocation69_spill] sm:$0xff] %v16249_v62  ;;  %11124 = vmatmul.msk.f32.gmra.mxu3 %vm2738_vm15, %v16179_v56  ;;  %11128 = vmatmul.msk.f32.gmra.mxu0 %vm2738_vm15, %v16179_v56  ;;  %v5011_v62 = vsel %vm2121_vm14, %v12018_v51, %v20854_v30  ;;  %v16269_v25 = vpop.permute.xlu1 %12041  ;;  %v12028_v51 = vunpack.i.l.bf16 %v16234_v27  ;;  %v2964_v30 = vadd.f32 %v15817_v46, %v15654_v21  ;;  %v12039_v9 = vunpack.i.h.bf16 %v12037_v44 }
 0x663   :  { %11132 = vmatmul.msk.f32.gmra.mxu1 %vm2738_vm15, %v16179_v56  ;;  %5075 = vmatpush.msrb.mxu2 %v5016_v63  ;;  %v16262_v26 = vpop.f32.mrf.mxu0  ;;  %v16276_v63 = vpop.permute.xlu2 %12056 }
 0x664   :  { %20853 = vst [vmem:[#allocation70_spill] sm:$0xff] %v16262_v26  ;;  %v16267_v4 = vpop.f32.mrf.mxu1  ;;  %v20863_v46 = vunpack.i.l.bf16 %v16276_v63  ;;  %v3412_v45 = vadd.f32 %v16002_v24, %v2964_v30 }
 0x665   :  { %20855 = vst [vmem:[#allocation71_spill] sm:$0xff] %v16267_v4  ;;  %5076 = vmatpush.msrb.mxu2 %v5011_v62 }
 0x667   :  { %5077 = vmatpush.msrb.mxu2 %v5006_v43  ;;  %v16274_v58 = vpop.f32.mrf.mxu2  ;;  %v16299_v43 = vld [vmem:[%s20513_s7 + $0xe0] sm:$0xff] }
 0x668   :  { %20857 = vst [vmem:[#allocation72_spill] sm:$0xff] %v16274_v58  ;;  %11135 = vmatmul.msk.f32.gmra.mxu2 %vm2738_vm15, %v16157_v28  ;;  %v12029_v58 = vunpack.i.h.bf16 %v16234_v27  ;;  %v5022_v27 = vsel %vm2121_vm14, %v12009_v18, %v12028_v51  ;;  %v12044_v18 = vunpack.i.h.bf16 %v16269_v25 }
 0x669   :  { %v16280_v60 = vpop.f32.mrf.mxu3  ;;  %v16293_v62 = vpop.permute.xlu0 %12046 }
 0x66a   :  { %20858 = vst [vmem:[#allocation73_spill] sm:$0xff] %v16280_v60  ;;  %11125 = vmatmul.msk.f32.gmra.mxu3 %vm2738_vm15, %v16211_v40  ;;  %11129 = vmatmul.msk.f32.gmra.mxu0 %vm2738_vm15, %v16211_v40  ;;  %v16304_v4 = vpop.permute.xlu1 %12051 }
 0x66b   :  { %11133 = vmatmul.msk.f32.gmra.mxu1 %vm2738_vm15, %v16211_v40  ;;  %v16288_v35 = vpop.f32.mrf.mxu0  ;;  %v16314_v26 = vpop.permute.xlu2 %12061 }
 0x66c   :  { %20859 = vst [vmem:[#allocation74_spill] sm:$0xff] %v16288_v35  ;;  %v16290_v32 = vpop.f32.mrf.mxu1  ;;  %v12043_v35 = vunpack.i.l.bf16 %v16269_v25 }
 0x66d   :  { %20860 = vst [vmem:[#allocation75_spill] sm:$0xff] %v16290_v32  ;;  %v12038_v32 = vunpack.i.l.bf16 %v12037_v44 }
 0x66e   :  { %v5013_v24 = vsel %vm2121_vm14, %v12033_v48, %v12043_v35 }
 0x66f   :  { %v16301_v60 = vpop.f32.mrf.mxu2  ;;  %v5023_v21 = vsel %vm2121_vm14, %v12028_v51, %v12038_v32  ;;  %v5024_v44 = vsel %vm2121_vm14, %v12038_v32, %v20863_v46  ;;  %v12063_v51 = vunpack.i.l.bf16 %v16314_v26  ;;  %v5018_v32 = vsel %vm2121_vm14, %v12029_v58, %v12039_v9 }
 0x670   :  { %20861 = vst [vmem:[#allocation76_spill] sm:$0xff] %v16301_v60  ;;  %11136 = vmatmul.msk.f32.gmra.mxu2 %vm2738_vm15, %v16179_v56  ;;  %v20864_v60 = vunpack.i.h.bf16 %v16194_v41  ;;  %v20866_v41 = vunpack.i.h.bf16 %v16202_v17 }
 0x671   :  { %v16309_v19 = vpop.f32.mrf.mxu3 }
 0x672   :  { %20862 = vst [vmem:[#allocation77_spill] sm:$0xff] %v16309_v19  ;;  %11138 = vmatmul.msk.f32.vlgmr.msra.gmra.mxu3 %vm2738_vm15, %v16130_v10  ;;  %11146 = vmatmul.msk.f32.vlgmr.msra.gmra.mxu0 %vm2738_vm15, %v16299_v43  ;;  %v2987_v10 = vadd.f32 %v15772_v33, %v15672_v0  ;;  %v12034_v19 = vunpack.i.h.bf16 %v16238_v7  ;;  %v5017_v14 = vsel %vm2121_vm14, %v20864_v60, %v12029_v58  ;;  %v20865_v0 = vunpack.i.l.bf16 %v16293_v62 }
 0x673   :  { %11150 = vmatmul.msk.f32.vlgmr.msrb.gmra.mxu1 %vm2738_vm15, %v16299_v43  ;;  %5103 = vmatpush.msra.mxu3 %v5022_v27  ;;  %v5012_v60 = vsel %vm2121_vm14, %v20866_v41, %v12033_v48 }
 0x674   :  { %5132 = vmatpush.msra.mxu0 %v5023_v21  ;;  %5161 = vmatpush.msrb.mxu1 %v5024_v44  ;;  %v16336_v27 = vpop.f32.mrf.mxu0  ;;  %v5019_v33 = vsel %vm2121_vm14, %v12039_v9, %v20865_v0  ;;  %v3401_v25 = vadd.f32 %v16008_v2, %v2987_v10  ;;  %v3719_v21 = vadd.f32 %v16149_v54, %v3412_v45  ;;  %v20868_v9 = vunpack.i.h.bf16 %v16222_v36  ;;  %v16362_v2 = vld [vmem:[%s20513_s7 + $0xe8] sm:$0xff]  ;;  %v16396_v0 = vld [vmem:[%s20513_s7 + $0xf0] sm:$0xff] }
 0x675   :  { %5104 = vmatpush.msra.mxu3 %v5017_v14  ;;  %v16344_v7 = vpop.f32.mrf.mxu1  ;;  %v20867_v14 = vunpack.i.l.bf16 %v16304_v4  ;;  %v5008_v17 = vsel %vm2121_vm14, %v12034_v19, %v12044_v18  ;;  %v5009_v54 = vsel %vm2121_vm14, %v12044_v18, %v12063_v51  ;;  %v2990_v44 = vadd.f32 %v15793_v16, %v15701_v34 }
 0x676   :  { %5133 = vmatpush.msra.mxu0 %v5018_v32  ;;  %5162 = vmatpush.msrb.mxu1 %v5019_v33  ;;  %v5007_v30 = vsel %vm2121_vm14, %v20868_v9, %v12034_v19  ;;  %v3708_v48 = vadd.f32 %v16104_v20, %v3401_v25  ;;  %v12059_v10 = vunpack.i.h.bf16 %v16276_v63  ;;  %v12054_v34 = vunpack.i.h.bf16 %v16304_v4 }
 0x677   :  { %5105 = vmatpush.msra.mxu3 %v5012_v60  ;;  %v5014_v58 = vsel %vm2121_vm14, %v12043_v35, %v20867_v14  ;;  %v3071_v35 = vadd.f32 %v15840_v39, %v15694_v13  ;;  %v3407_v18 = vadd.f32 %v16035_v50, %v2990_v44  ;;  %v3074_v60 = vadd.f32 %v15872_v52, %v15725_v8  ;;  %v20879_v44 = vld [vmem:[#allocation47_spill] sm:$0xff] }
 0x678   :  { %5134 = vmatpush.msra.mxu0 %v5013_v24  ;;  %5163 = vmatpush.msrb.mxu1 %v5014_v58  ;;  %v3860_v45 = vpop.f32.mrf.mxu2  ;;  %v12064_v25 = vunpack.i.h.bf16 %v16314_v26  ;;  %v2993_v8 = vadd.f32 %v15820_v57, %v15732_v59  ;;  %v16439_v59 = vld [vmem:[%s20513_s7 + $0xf8] sm:$0xff] }
 0x679   :  { %5106 = vmatpush.msra.mxu3 %v5007_v30  ;;  %11137 = vmatmul.msk.f32.gmra.mxu2 %vm2738_vm15, %v16211_v40  ;;  %v16370_v36 = vadd.f32 %v3860_v45, %v3719_v21  ;;  %v3398_v13 = vadd.f32 %v16029_v12, %v3071_v35  ;;  %v3714_v16 = vadd.f32 %v16125_v61, %v3407_v18  ;;  %v20870_v12 = vunpack.i.l.bf16 %v16276_v63  ;;  %v20880_v18 = vld [vmem:[#allocation70_spill] sm:$0xff] }
 0x67a   :  { %5135 = vmatpush.msra.mxu0 %v5008_v17  ;;  %5164 = vmatpush.msrb.mxu1 %v5009_v54  ;;  %v3883_v19 = vpop.f32.mrf.mxu3  ;;  %v20872_v61 = vunpack.i.l.bf16 %v16293_v62  ;;  %v3404_v52 = vadd.f32 %v16060_v6, %v3074_v60  ;;  %v3413_v58 = vadd.f32 %v16062_v29, %v2993_v8  ;;  %v5010_v30 = vsel %vm2121_vm14, %v12063_v51, %v12064_v25 }
 0x67b   :  { %20869 = vst [vmem:[#allocation78_spill] sm:$0xff] %v16370_v36  ;;  %11139 = vmatmul.msk.f32.gmra.mxu3 %vm2738_vm15, %v16157_v28  ;;  %11147 = vmatmul.msk.f32.gmra.mxu0 %vm2738_vm15, %v16362_v2  ;;  %v16378_v20 = vadd.f32 %v3883_v19, %v3708_v48  ;;  %v12049_v28 = vunpack.i.h.bf16 %v16293_v62  ;;  %v3705_v32 = vadd.f32 %v16172_v15, %v3398_v13 }
 0x67c   :  { %11151 = vmatmul.msk.f32.gmra.mxu1 %vm2738_vm15, %v16362_v2  ;;  %v16382_v46 = vpop.f32.mrf.mxu0  ;;  %v5025_v41 = vsel %vm2121_vm14, %v20870_v12, %v12059_v10  ;;  %v3711_v9 = vadd.f32 %v16200_v47, %v3404_v52  ;;  %v3720_v6 = vadd.f32 %v16152_v23, %v3413_v58  ;;  %v3077_v47 = vadd.f32 %v15900_v38, %v15748_v42 }
 0x67d   :  { %v16388_v39 = vpop.f32.mrf.mxu1  ;;  %v5020_v63 = vsel %vm2121_vm14, %v20872_v61, %v12049_v28  ;;  %v3100_v51 = vadd.f32 %v15842_v55, %v15751_v1  ;;  %v3080_v55 = vadd.f32 %v15924_v53, %v15776_v3  ;;  %v20881_v53 = vld [vmem:[#allocation64_spill] sm:$0xff] }
 0x67e   :  { %v3410_v17 = vadd.f32 %v16081_v37, %v3077_v47  ;;  %v3103_v37 = vadd.f32 %v15877_v11, %v15782_v22 }
 0x67f   :  { %v3399_v42 = vadd.f32 %v16086_v31, %v3100_v51 }
 0x680   :  { %v3967_v33 = vpop.f32.mrf.mxu2  ;;  %v3717_v38 = vadd.f32 %v16230_v5, %v3410_v17  ;;  %v3405_v13 = vadd.f32 %v20879_v44, %v3103_v37 }
 0x681   :  { %11154 = vmatmul.msk.f32.vlgmr.msra.gmra.mxu2 %vm2738_vm15, %v16299_v43  ;;  %v16405_v50 = vadd.f32 %v3967_v33, %v3705_v32  ;;  %v3706_v48 = vadd.f32 %v16174_v49, %v3399_v42  ;;  %v20878_v49 = vld [vmem:[#allocation49_spill] sm:$0xff]  ;;  %v20884_v33 = vld [vmem:[#allocation55_spill] sm:$0xff] }
 0x682   :  { %5190 = vmatpush.msra.mxu2 %v5025_v41  ;;  %v3886_v15 = vpop.f32.mrf.mxu3  ;;  %v3416_v5 = vadd.f32 %v20878_v49, %v3080_v55  ;;  %v11170_v41 = vld [vmem:[%s20513_s7 + $0x100] sm:$0xff]  ;;  %v11173_v55 = vld [vmem:[%s20513_s7 + $0x118] sm:$0xff] }
 0x683   :  { %20871 = vst [vmem:[#allocation79_spill] sm:$0xff] %v16405_v50  ;;  %11140 = vmatmul.msk.f32.gmra.mxu3 %vm2738_vm15, %v16179_v56  ;;  %11148 = vmatmul.msk.f32.gmra.mxu0 %vm2738_vm15, %v16396_v0  ;;  %v16417_v21 = vadd.f32 %v3886_v15, %v3714_v16  ;;  %v20873_v56 = vmov %v20867_v14  ;;  %v20886_v15 = vld [vmem:[#allocation53_spill] sm:$0xff] }
 0x684   :  { %11152 = vmatmul.msk.f32.gmra.mxu1 %vm2738_vm15, %v16396_v0  ;;  %5191 = vmatpush.msra.mxu2 %v5020_v63  ;;  %v16421_v24 = vpop.f32.mrf.mxu0  ;;  %v5015_v14 = vsel %vm2121_vm14, %v20873_v56, %v12054_v34  ;;  %v3723_v32 = vadd.f32 %v20880_v18, %v3416_v5  ;;  %v20890_v56 = vld [vmem:[#allocation43_spill] sm:$0xff]  ;;  %v20969_v50 = vld [vmem:[#allocation9_spill] sm:$0xff] }
 0x685   :  { %v16429_v62 = vpop.f32.mrf.mxu1 }
 0x686   :  { %5192 = vmatpush.msra.mxu2 %v5015_v14  ;;  %v20891_v14 = vld [vmem:[#allocation8_spill] sm:$0xff] }
 0x687   :  { %v3109_v58 = vadd.f32 %v20891_v14, %v20890_v56 }
 0x688   :  { %5193 = vmatpush.msra.mxu2 %v5010_v30  ;;  %v3970_v57 = vpop.f32.mrf.mxu2  ;;  %v11171_v30 = vld [vmem:[%s20513_s7 + $0x108] sm:$0xff] }
 0x689   :  { %11155 = vmatmul.msk.f32.gmra.mxu2 %vm2738_vm15, %v16362_v2  ;;  %v16444_v4 = vadd.f32 %v3970_v57, %v3711_v9  ;;  %v20893_v57 = vld [vmem:[#allocation10_spill] sm:$0xff] }
 0x68a   :  { %v3889_v29 = vpop.f32.mrf.mxu3 }
 0x68b   :  { %20874 = vst [vmem:[#allocation80_spill] sm:$0xff] %v16444_v4  ;;  %11141 = vmatmul.msk.f32.gmra.mxu3 %vm2738_vm15, %v16211_v40  ;;  %11149 = vmatmul.msk.f32.gmra.mxu0 %vm2738_vm15, %v16439_v59  ;;  %v16452_v26 = vadd.f32 %v3889_v29, %v3720_v6  ;;  %v3417_v6 = vadd.f32 %v20893_v57, %v3109_v58 }
 0x68c   :  { %11153 = vmatmul.msk.f32.gmra.mxu1 %vm2738_vm15, %v16439_v59  ;;  %v16456_v23 = vpop.f32.mrf.mxu0 }
 0x68d   :  { %20875 = vst [vmem:[#allocation81_spill] sm:$0xff] %v16452_v26  ;;  %v16461_v45 = vpop.f32.mrf.mxu1 }
 0x690   :  { %v3973_v40 = vpop.f32.mrf.mxu2 }
 0x691   :  { %11156 = vmatmul.msk.f32.gmra.mxu2 %vm2738_vm15, %v16396_v0  ;;  %v16468_v54 = vadd.f32 %v3973_v40, %v3717_v38  ;;  %v11172_v40 = vld [vmem:[%s20513_s7 + $0x110] sm:$0xff] }
 0x692   :  { %v3996_v19 = vpop.f32.mrf.mxu3 }
 0x693   :  { %20876 = vst [vmem:[#allocation82_spill] sm:$0xff] %v16468_v54  ;;  %11158 = vmatmul.msk.f32.vlgmr.msrb.gmra.mxu3 %vm2738_vm15, %v16299_v43  ;;  %11162 = vmatmul.msk.f32.vlgmr.msrb.gmra.mxu0 %vm2738_vm15, %v16299_v43  ;;  %v16474_v1 = vadd.f32 %v3996_v19, %v3706_v48  ;;  %v20931_v54 = vld [vmem:[#allocation28_spill] sm:$0xff] }
 0x694   :  { %11166 = vmatmul.msk.f32.vlgmr.msra.gmra.mxu1 %vm2738_vm15, %v16299_v43  ;;  %5219 = vmatpush.msrb.mxu3 %v12059_v10  ;;  %v3712_v43 = vadd.f32 %v20881_v53, %v3405_v13 }
 0x695   :  { %20877 = vst [vmem:[#allocation83_spill] sm:$0xff] %v16474_v1  ;;  %v16480_v31 = vpop.f32.mrf.mxu0 }
 0x696   :  { %5220 = vmatpush.msrb.mxu3 %v12049_v28  ;;  %v16485_v35 = vpop.f32.mrf.mxu1 }
 0x698   :  { %5221 = vmatpush.msrb.mxu3 %v12054_v34  ;;  %v20885_v34 = vld [vmem:[#allocation45_spill] sm:$0xff] }
 0x699   :  { %11157 = vmatmul.msk.f32.gmra.mxu2 %vm2738_vm15, %v16439_v59  ;;  %v3976_v3 = vpop.f32.mrf.mxu2  ;;  %v3106_v16 = vadd.f32 %v20885_v34, %v20884_v33 }
 0x69a   :  { %5222 = vmatpush.msrb.mxu3 %v12064_v25  ;;  %v16492_v10 = vadd.f32 %v3976_v3, %v3723_v32 }
 0x69b   :  { %11159 = vmatmul.msk.f32.gmra.mxu3 %vm2738_vm15, %v16362_v2  ;;  %11163 = vmatmul.msk.f32.gmra.mxu0 %vm2738_vm15, %v16362_v2  ;;  %v3999_v22 = vpop.f32.mrf.mxu3  ;;  %v3411_v60 = vadd.f32 %v20886_v15, %v3106_v16 }
 0x69c   :  { %20882 = vst [vmem:[#allocation49_spill] sm:$0xff] %v16492_v10  ;;  %11167 = vmatmul.msk.f32.gmra.mxu1 %vm2738_vm15, %v16362_v2  ;;  %v16500_v11 = vadd.f32 %v3999_v22, %v3712_v43  ;;  %v20887_v2 = vld [vmem:[#allocation67_spill] sm:$0xff] }
 0x69d   :  { %v16502_v28 = vpop.f32.mrf.mxu0  ;;  %v3718_v61 = vadd.f32 %v20887_v2, %v3411_v60 }
 0x69e   :  { %20883 = vst [vmem:[#allocation47_spill] sm:$0xff] %v16500_v11  ;;  %v16506_v12 = vpop.f32.mrf.mxu1 }
 0x6a1   :  { %11174 = vmatmul.msk.f32.vlgmr.msrb.gmra.mxu2 %vm2738_vm15, %v11170_v41  ;;  %v16513_v25 = vpop.f32.mrf.mxu2 }
 0x6a3   :  { %11160 = vmatmul.msk.f32.gmra.mxu3 %vm2738_vm15, %v16396_v0  ;;  %11164 = vmatmul.msk.f32.gmra.mxu0 %vm2738_vm15, %v16396_v0  ;;  %v4002_v63 = vpop.f32.mrf.mxu3 }
 0x6a4   :  { %11168 = vmatmul.msk.f32.gmra.mxu1 %vm2738_vm15, %v16396_v0  ;;  %v16522_v8 = vadd.f32 %v4002_v63, %v3718_v61  ;;  %v20894_v0 = vld [vmem:[#allocation71_spill] sm:$0xff] }
 0x6a5   :  { %v16524_v52 = vpop.f32.mrf.mxu0  ;;  %v3724_v47 = vadd.f32 %v20894_v0, %v3417_v6 }
 0x6a6   :  { %20888 = vst [vmem:[#allocation70_spill] sm:$0xff] %v16522_v8  ;;  %v16528_v9 = vpop.f32.mrf.mxu1 }
 0x6a7   :  { %20889 = vst [vmem:[#allocation64_spill] sm:$0xff] %v16524_v52 }
 0x6a8   :  { %20892 = vst [vmem:[#allocation55_spill] sm:$0xff] %v16528_v9 }
 0x6a9   :  { %11175 = vmatmul.msk.f32.gmra.mxu2 %vm2738_vm15, %v11171_v30  ;;  %v16535_v29 = vpop.f32.mrf.mxu2 }
 0x6ab   :  { %11161 = vmatmul.msk.f32.gmra.mxu3 %vm2738_vm15, %v16439_v59  ;;  %11165 = vmatmul.msk.f32.gmra.mxu0 %vm2738_vm15, %v16439_v59  ;;  %v4005_v51 = vpop.f32.mrf.mxu3 }
 0x6ac   :  { %11169 = vmatmul.msk.f32.gmra.mxu1 %vm2738_vm15, %v16439_v59  ;;  %v16544_v17 = vadd.f32 %v4005_v51, %v3724_v47 }
 0x6ad   :  { %v16546_v42 = vpop.f32.mrf.mxu0 }
 0x6ae   :  { %20895 = vst [vmem:[#allocation45_spill] sm:$0xff] %v16544_v17  ;;  %v16548_v38 = vpop.f32.mrf.mxu1 }
 0x6af   :  { %20896 = vst [vmem:[#allocation53_spill] sm:$0xff] %v16546_v42  ;;  %v20968_v42 = vld [vmem:[#allocation18_spill] sm:$0xff] }
 0x6b0   :  { %20897 = vst [vmem:[#allocation67_spill] sm:$0xff] %v16548_v38 }
 0x6b1   :  { %11176 = vmatmul.msk.f32.gmra.mxu2 %vm2738_vm15, %v11172_v40  ;;  %v16554_v48 = vpop.f32.mrf.mxu2 }
 0x6b3   :  { %11178 = vmatmul.msk.f32.vlgmr.msra.gmra.mxu3 %vm2738_vm15, %v11170_v41  ;;  %11182 = vmatmul.msk.f32.vlgmr.msra.gmra.mxu0 %vm2738_vm15, %v11170_v41  ;;  %v16558_v19 = vpop.f32.mrf.mxu3 }
 0x6b4   :  { %11186 = vmatmul.msk.f32.vlgmr.msrb.gmra.mxu1 %vm2738_vm15, %v11170_v41 }
 0x6b6   :  { %v16561_v59 = vpop.f32.mrf.mxu0 }
 0x6b7   :  { %20898 = vst [vmem:[#allocation43_spill] sm:$0xff] %v16561_v59  ;;  %v16566_v37 = vpop.f32.mrf.mxu1 }
 0x6b8   :  { %20899 = vst [vmem:[#allocation8_spill] sm:$0xff] %v16566_v37 }
 0x6b9   :  { %11177 = vmatmul.msk.f32.gmra.mxu2 %vm2738_vm15, %v11173_v55 }
 0x6ba   :  { %v16569_v49 = vpop.f32.mrf.mxu2 }
 0x6bb   :  { %20900 = vst [vmem:[#allocation10_spill] sm:$0xff] %v16569_v49  ;;  %11179 = vmatmul.msk.f32.gmra.mxu3 %vm2738_vm15, %v11171_v30  ;;  %11183 = vmatmul.msk.f32.gmra.mxu0 %vm2738_vm15, %v11171_v30  ;;  %v20961_v49 = vld [vmem:[#allocation52_spill] sm:$0xff] }
 0x6bc   :  { %11187 = vmatmul.msk.f32.gmra.mxu1 %vm2738_vm15, %v11171_v30  ;;  %v16574_v5 = vpop.f32.mrf.mxu3 }
 0x6be   :  { %v16576_v44 = vpop.f32.mrf.mxu0 }
 0x6bf   :  { %20901 = vst [vmem:[#allocation71_spill] sm:$0xff] %v16576_v44  ;;  %v16578_v13 = vpop.f32.mrf.mxu1  ;;  %v20930_v44 = vld [vmem:[#allocation15_spill] sm:$0xff] }
 0x6c0   :  { %20902 = vst [vmem:[#allocation84_spill] sm:$0xff] %v16578_v13  ;;  %v2955_v38 = vadd.f32 %v20931_v54, %v20930_v44 }
 0x6c1   :  { %11190 = vmatmul.msk.f32.vlgmr.msra.gmra.mxu2 %vm2738_vm15, %v11170_v41 }
 0x6c2   :  { %v16581_v18 = vpop.f32.mrf.mxu2 }
 0x6c3   :  { %11180 = vmatmul.msk.f32.gmra.mxu3 %vm2738_vm15, %v11172_v40  ;;  %11184 = vmatmul.msk.f32.gmra.mxu0 %vm2738_vm15, %v11172_v40 }
 0x6c4   :  { %11188 = vmatmul.msk.f32.gmra.mxu1 %vm2738_vm15, %v11172_v40  ;;  %v16586_v32 = vpop.f32.mrf.mxu3 }
 0x6c5   :  { %20903 = vst [vmem:[#allocation85_spill] sm:$0xff] %v16586_v32  ;;  %v20965_v32 = vld [vmem:[#allocation54_spill] sm:$0xff] }
 0x6c6   :  { %v16588_v3 = vpop.f32.mrf.mxu0 }
 0x6c7   :  { %20904 = vst [vmem:[#allocation86_spill] sm:$0xff] %v16588_v3  ;;  %v16590_v53 = vpop.f32.mrf.mxu1 }
 0x6c8   :  { %20905 = vst [vmem:[#allocation87_spill] sm:$0xff] %v16590_v53 }
 0x6c9   :  { %11191 = vmatmul.msk.f32.gmra.mxu2 %vm2738_vm15, %v11171_v30 }
 0x6ca   :  { %v16593_v43 = vpop.f32.mrf.mxu2 }
 0x6cb   :  { %11181 = vmatmul.msk.f32.gmra.mxu3 %vm2738_vm15, %v11173_v55  ;;  %11185 = vmatmul.msk.f32.gmra.mxu0 %vm2738_vm15, %v11173_v55 }
 0x6cc   :  { %11189 = vmatmul.msk.f32.gmra.mxu1 %vm2738_vm15, %v11173_v55  ;;  %v16598_v22 = vpop.f32.mrf.mxu3 }
 0x6cd   :  { %20906 = vst [vmem:[#allocation88_spill] sm:$0xff] %v16598_v22 }
 0x6ce   :  { %v16600_v33 = vpop.f32.mrf.mxu0 }
 0x6cf   :  { %v16602_v34 = vpop.f32.mrf.mxu1 }
 0x6d1   :  { %11192 = vmatmul.msk.f32.gmra.mxu2 %vm2738_vm15, %v11172_v40 }
 0x6d2   :  { %v16605_v16 = vpop.f32.mrf.mxu2 }
 0x6d3   :  { %11194 = vmatmul.msk.f32.vlgmr.msrb.gmra.mxu3 %vm2738_vm15, %v11170_v41 }
 0x6d4   :  { %v16608_v15 = vpop.f32.mrf.mxu3 }
 0x6d7   :  { %v16610_v60 = vpop.f32.mrf.mxu0 }
 0x6d8   :  { %v16612_v2 = vpop.f32.mrf.mxu1 }
 0x6d9   :  { %11193 = vmatmul.msk.f32.gmra.mxu2 %vm2738_vm15, %v11173_v55 }
 0x6db   :  { %11195 = vmatmul.msk.f32.gmra.mxu3 %vm2738_vm15, %v11171_v30  ;;  %v16616_v61 = vpop.f32.mrf.mxu2 }
 0x6dc   :  { %20907 = vst [vmem:[#allocation89_spill] sm:$0xff] %v16616_v61 }
 0x6dd   :  { %v16618_v63 = vpop.f32.mrf.mxu3 }
 0x6df   :  { %v16620_v56 = vpop.f32.mrf.mxu0 }
 0x6e0   :  { %20908 = vst [vmem:[#allocation90_spill] sm:$0xff] %v16620_v56  ;;  %v16622_v14 = vpop.f32.mrf.mxu1  ;;  %v20972_v56 = vld [vmem:[#allocation31_spill] sm:$0xff] }
 0x6e1   :  { %20909 = vst [vmem:[#allocation91_spill] sm:$0xff] %v16622_v14 }
 0x6e3   :  { %11196 = vmatmul.msk.f32.gmra.mxu3 %vm2738_vm15, %v11172_v40  ;;  %v16625_v41 = vpop.f32.mrf.mxu2 }
 0x6e4   :  { %20910 = vst [vmem:[#allocation92_spill] sm:$0xff] %v16625_v41 }
 0x6e5   :  { %v16627_v58 = vpop.f32.mrf.mxu3 }
 0x6e6   :  { %20911 = vst [vmem:[#allocation93_spill] sm:$0xff] %v16627_v58 }
 0x6e7   :  { %v16629_v57 = vpop.f32.mrf.mxu0 }
 0x6e8   :  { %20912 = vst [vmem:[#allocation94_spill] sm:$0xff] %v16629_v57  ;;  %v16631_v6 = vpop.f32.mrf.mxu1  ;;  %v20949_v57 = vld [vmem:[#allocation14_spill] sm:$0xff] }
 0x6e9   :  { %20913 = vst [vmem:[#allocation95_spill] sm:$0xff] %v16631_v6 }
 0x6eb   :  { %11197 = vmatmul.msk.f32.gmra.mxu3 %vm2738_vm15, %v11173_v55  ;;  %v16634_v30 = vpop.f32.mrf.mxu2 }
 0x6ec   :  { %20914 = vst [vmem:[#allocation96_spill] sm:$0xff] %v16634_v30 }
 0x6ed   :  { %v16636_v0 = vpop.f32.mrf.mxu3 }
 0x6ee   :  { %20915 = vst [vmem:[#allocation97_spill] sm:$0xff] %v16636_v0  ;;  %v20935_v0 = vld [vmem:[#allocation22_spill] sm:$0xff] }
 0x6ef   :  { %v4772_v47 = vpop.f32.mrf.mxu0 }
 0x6f0   :  { %v16638_v51 = vpop.f32.mrf.mxu1 }
 0x6f3   :  { %v16640_v53 = vpop.f32.mrf.mxu2 }
 0x6f4   :  { %20916 = vst [vmem:[#allocation98_spill] sm:$0xff] %v16640_v53 }
 0x6f5   :  { %v16642_v40 = vpop.f32.mrf.mxu3 }
 0x6f6   :  { %20917 = vst [vmem:[#allocation99_spill] sm:$0xff] %v16642_v40 }
 0x6f8   :  { %v16644_v17 = vpop.f32.mrf.mxu0 }
 0x6f9   :  { %20918 = vst [vmem:[#allocation100_spill] sm:$0xff] %v16644_v17  ;;  %v16646_v3 = vpop.f32.mrf.mxu1  ;;  %v20963_v17 = vld [vmem:[#allocation20_spill] sm:$0xff] }
 0x6fa   :  { %20919 = vst [vmem:[#allocation101_spill] sm:$0xff] %v16646_v3 }
 0x6fc   :  { %v16648_v10 = vpop.f32.mrf.mxu2 }
 0x6fd   :  { %20920 = vst [vmem:[#allocation102_spill] sm:$0xff] %v16648_v10 }
 0x6fe   :  { %v16650_v13 = vpop.f32.mrf.mxu3 }
 0x6ff   :  { %20921 = vst [vmem:[#allocation103_spill] sm:$0xff] %v16650_v13 }
 0x700   :  { %v16652_v55 = vpop.f32.mrf.mxu0 }
 0x701   :  { %v16654_v8 = vpop.f32.mrf.mxu1 }
 0x702   :  { %20922 = vst [vmem:[#allocation104_spill] sm:$0xff] %v16654_v8  ;;  %v20945_v8 = vld [vmem:[#allocation13_spill] sm:$0xff] }
 0x704   :  { %v16656_v37 = vpop.f32.mrf.mxu2 }
 0x706   :  { %v16658_v11 = vpop.f32.mrf.mxu3 }
 0x707   :  { %20923 = vst [vmem:[#allocation105_spill] sm:$0xff] %v16658_v11 }
 0x708   :  { %v16660_v30 = vpop.f32.mrf.mxu0 }
 0x709   :  { %20924 = vst [vmem:[#allocation106_spill] sm:$0xff] %v16660_v30  ;;  %v16662_v53 = vpop.f32.mrf.mxu1  ;;  %v20933_v30 = vld [vmem:[#allocation21_spill] sm:$0xff] }
 0x70a   :  { %20925 = vst [vmem:[#allocation107_spill] sm:$0xff] %v16662_v53  ;;  %v3394_v1 = vadd.f32 %v20933_v30, %v2955_v38  ;;  %v20941_v38 = vld [vmem:[#allocation26_spill] sm:$0xff] }
 0x70b   :  { %v20942_v30 = vld [vmem:[#allocation34_spill] sm:$0xff] }
 0x70c   :  { %v16664_v40 = vpop.f32.mrf.mxu2  ;;  %v3701_v9 = vadd.f32 %v20935_v0, %v3394_v1 }
 0x70e   :  { %v16666_v59 = vpop.f32.mrf.mxu3 }
 0x70f   :  { %20926 = vst [vmem:[#allocation108_spill] sm:$0xff] %v16666_v59 }
 0x710   :  { %v16668_v4 = vpop.f32.mrf.mxu0 }
 0x711   :  { %20927 = vst [vmem:[#allocation109_spill] sm:$0xff] %v16668_v4  ;;  %v16670_v10 = vpop.f32.mrf.mxu1  ;;  %v20937_v4 = vld [vmem:[#allocation68_spill] sm:$0xff] }
 0x712   :  { %20928 = vst [vmem:[#allocation110_spill] sm:$0xff] %v16670_v10  ;;  %v4008_v26 = vadd.f32 %v20937_v4, %v3701_v9  ;;  %v16687_v10 = vpop.permute.xlu1 %5271  ;;  %v16700_v9 = vpop.permute.xlu0 %5266 }
 0x713   :  { %20938 = vst [vmem:[#allocation22_spill] sm:$0xff] %v16687_v10  ;;  %v20975_v10 = vld [vmem:[#allocation36_spill] sm:$0xff] }
 0x714   :  { %v16672_v13 = vpop.f32.mrf.mxu2  ;;  %v4315_v36 = vadd.f32 %v16456_v23, %v4008_v26 }
 0x715   :  { %20929 = vst [vmem:[#allocation111_spill] sm:$0xff] %v16672_v13 }
 0x716   :  { %v16674_v61 = vpop.f32.mrf.mxu3  ;;  %v4622_v54 = vadd.f32 %v16581_v18, %v4315_v36  ;;  %v20947_v36 = vld [vmem:[#allocation42_spill] sm:$0xff] }
 0x718   :  { %v16678_v11 = vpop.f32.mrf.mxu0  ;;  %v4929_v1 = vadd.f32 %v4772_v47, %v4622_v54 }
 0x719   :  { %20932 = vst [vmem:[#allocation15_spill] sm:$0xff] %v16678_v11  ;;  %v16681_v53 = vpop.f32.mrf.mxu1  ;;  %v20943_v11 = vld [vmem:[#allocation23_spill] sm:$0xff] }
 0x71a   :  { %20934 = vst [vmem:[#allocation28_spill] sm:$0xff] %v16681_v53  ;;  %v3013_v53 = vadd.f32 %v20942_v30, %v20941_v38  ;;  %v16710_v38 = vpop.permute.xlu1 %5314  ;;  %v20953_v30 = vld [vmem:[#allocation7_spill] sm:$0xff] }
 0x71c   :  { %v16684_v59 = vpop.f32.mrf.mxu2 }
 0x71d   :  { %20936 = vst [vmem:[#allocation21_spill] sm:$0xff] %v16684_v59  ;;  %v3396_v59 = vadd.f32 %v20943_v11, %v3013_v53  ;;  %v20951_v11 = vld [vmem:[#allocation37_spill] sm:$0xff] }
 0x71e   :  { %v16689_v52 = vpop.f32.mrf.mxu3  ;;  %v20952_v53 = vld [vmem:[#allocation29_spill] sm:$0xff] }
 0x71f   :  { %v3703_v26 = vadd.f32 %v20945_v8, %v3396_v59  ;;  %v2961_v54 = vadd.f32 %v20952_v53, %v20951_v11  ;;  %v20964_v11 = vld [vmem:[#allocation57_spill] sm:$0xff] }
 0x720   :  { %v16692_v6 = vpop.f32.mrf.mxu0  ;;  %v3045_v53 = vadd.f32 %v20964_v11, %v20963_v17  ;;  %v20974_v17 = vld [vmem:[#allocation41_spill] sm:$0xff] }
 0x721   :  { %20939 = vst [vmem:[#allocation68_spill] sm:$0xff] %v16692_v6  ;;  %v16695_v44 = vpop.f32.mrf.mxu1  ;;  %v20946_v6 = vld [vmem:[#allocation40_spill] sm:$0xff] }
 0x722   :  { %20940 = vst [vmem:[#allocation112_spill] sm:$0xff] %v16695_v44  ;;  %v2984_v18 = vadd.f32 %v20947_v36, %v20946_v6  ;;  %v20948_v44 = vld [vmem:[#allocation25_spill] sm:$0xff]  ;;  %v20957_v6 = vld [vmem:[#allocation27_spill] sm:$0xff]  ;;  %v20958_v36 = vld [vmem:[#allocation30_spill] sm:$0xff] }
 0x723   :  { %v2958_v58 = vadd.f32 %v20949_v57, %v20948_v44  ;;  %v3019_v22 = vadd.f32 %v20958_v36, %v20957_v6  ;;  %v20959_v57 = vld [vmem:[#allocation51_spill] sm:$0xff]  ;;  %v20960_v44 = vld [vmem:[#allocation44_spill] sm:$0xff]  ;;  %v3051_v6 = vadd.f32 %v20969_v50, %v20968_v42 }
 0x724   :  { %v5079_v0 = vpop.f32.mrf.mxu2  ;;  %v3042_v14 = vadd.f32 %v20960_v44, %v20959_v57  ;;  %v20970_v36 = vld [vmem:[#allocation16_spill] sm:$0xff]  ;;  %v20971_v57 = vld [vmem:[#allocation46_spill] sm:$0xff] }
 0x725   :  { %v5236_v4 = vadd.f32 %v5079_v0, %v4929_v1  ;;  %v20954_v1 = vld [vmem:[#allocation39_spill] sm:$0xff]  ;;  %v3400_v3 = vadd.f32 %v20970_v36, %v2958_v58  ;;  %v20979_v42 = vld [vmem:[#allocation24_spill] sm:$0xff]  ;;  %v20980_v36 = vld [vmem:[#allocation17_spill] sm:$0xff] }
 0x726   :  { %v16702_v41 = vpop.f32.mrf.mxu3  ;;  %v3016_v0 = vadd.f32 %v20954_v1, %v20953_v30  ;;  %v20966_v30 = vld [vmem:[#allocation32_spill] sm:$0xff]  ;;  %v3397_v44 = vadd.f32 %v20971_v57, %v3042_v14 }
 0x727   :  { %20944 = vst [vmem:[#allocation26_spill] sm:$0xff] %v16702_v41  ;;  %v5284_v23 = vmul.f32 %v16700_v9, %v5236_v4  ;;  %v20955_v41 = vld [vmem:[#allocation74_spill] sm:$0xff]  ;;  %v3048_v1 = vadd.f32 %v20966_v30, %v20965_v32  ;;  %v20976_v30 = vld [vmem:[#allocation59_spill] sm:$0xff] }
 0x728   :  { %v16712_v47 = vpop.f32.mrf.mxu0  ;;  %v4010_v8 = vadd.f32 %v20955_v41, %v3703_v26  ;;  %v20967_v41 = vld [vmem:[#allocation33_spill] sm:$0xff]  ;;  %v3402_v11 = vadd.f32 %v20974_v17, %v3016_v0  ;;  %v3704_v14 = vadd.f32 %v20980_v36, %v3397_v44 }
 0x729   :  { %20950 = vst [vmem:[#allocation34_spill] sm:$0xff] %v16712_v47  ;;  %v5332_v59 = vadd.f32 %v16710_v38, %v5284_v23  ;;  %v16720_v4 = vpop.f32.mrf.mxu1  ;;  %v20962_v47 = vld [vmem:[#allocation56_spill] sm:$0xff]  ;;  %v3395_v26 = vadd.f32 %v20967_v41, %v2984_v18  ;;  %v3409_v58 = vadd.f32 %v20979_v42, %v3048_v1  ;;  %v20983_v17 = vld [vmem:[#allocation77_spill] sm:$0xff] }
 0x72a   :  { %20956 = vst [vmem:[#allocation23_spill] sm:$0xff] %v16720_v4  ;;  %v3022_v13 = vadd.f32 %v20962_v47, %v20961_v49  ;;  %v4317_v23 = vadd.f32 %v16513_v25, %v4010_v8  ;;  %v3406_v49 = vadd.f32 %v20972_v56, %v2961_v54  ;;  %v20977_v8 = vld [vmem:[#allocation48_spill] sm:$0xff]  ;;  %v20981_v56 = vld [vmem:[#allocation58_spill] sm:$0xff]  ;;  %v20988_v42 = vld [vmem:[#allocation5_spill] sm:$0xff] }
 0x72b   :  { %v5356_v4 = vmax.f32 %v5332_v59, 0.0  ;;  %v3702_v32 = vadd.f32 %v20975_v10, %v3395_v26  ;;  %v3403_v59 = vadd.f32 %v20977_v8, %v3045_v53  ;;  %v20978_v41 = vld [vmem:[#allocation12_spill] sm:$0xff]  ;;  %v20985_v26 = vld [vmem:[#allocation35_spill] sm:$0xff] }
 0x72c   :  { %v16739_v47 = vpop.f32.mrf.mxu2  ;;  %v4624_v18 = vadd.f32 %v16600_v33, %v4317_v23  ;;  %v3408_v50 = vadd.f32 %v20978_v41, %v3019_v22  ;;  %v3414_v54 = vadd.f32 %v20981_v56, %v3022_v13  ;;  %v3707_v22 = vadd.f32 %v20985_v26, %v3400_v3  ;;  %v20986_v23 = vld [vmem:[#allocation66_spill] sm:$0xff]  ;;  %v20987_v8 = vld [vmem:[#allocation75_spill] sm:$0xff] }
 0x72d   :  { %20973 = vst [vmem:[#allocation13_spill] sm:$0xff] %v16739_v47  ;;  %v5380_v25 = vmul.f32 %v5356_v4, %v20976_v30  ;;  %v20982_v47 = vld [vmem:[#allocation38_spill] sm:$0xff]  ;;  %v4009_v10 = vadd.f32 %v20983_v17, %v3702_v32  ;;  %v20984_v4 = vld [vmem:[#allocation11_spill] sm:$0xff]  ;;  %v3710_v1 = vadd.f32 %v20986_v23, %v3403_v59  ;;  %v4011_v44 = vadd.f32 %v20987_v8, %v3704_v14  ;;  %v20991_v14 = vld [vmem:[#allocation69_spill] sm:$0xff] }
 0x72e   :  { %v16749_v57 = vpop.f32.mrf.mxu3  ;;  %v3709_v0 = vadd.f32 %v20982_v47, %v3402_v11  ;;  %v4931_v33 = vadd.f32 %v16656_v37, %v4624_v18  ;;  %v3415_v53 = vadd.f32 %v20984_v4, %v3051_v6  ;;  %v3713_v36 = vadd.f32 %v20988_v42, %v3406_v49  ;;  %v16763_v37 = vpop.permute.xlu2 %5276  ;;  %v20989_v18 = vld [vmem:[#allocation6_spill] sm:$0xff]  ;;  %v20990_v6 = vld [vmem:[#allocation65_spill] sm:$0xff]  ;;  %v20992_v4 = vld [vmem:[#allocation72_spill] sm:$0xff] }
 0x72f   :  { %5428 = vrot.lane.b32.xlu2 %v5380_v25, %s13122_s23  ;;  %v4316_v47 = vadd.f32 %v16461_v45, %v4009_v10  ;;  %v3715_v25 = vadd.f32 %v20989_v18, %v3408_v50  ;;  %v3721_v56 = vadd.f32 %v20990_v6, %v3414_v54  ;;  %v4017_v3 = vadd.f32 %v16344_v7, %v3710_v1  ;;  %v20994_v7 = vld [vmem:[#allocation73_spill] sm:$0xff]  ;;  %v16791_v42 = vpop.permute.xlu0 %5281 }
 0x730   :  { %v5137_v41 = vpop.f32.mrf.mxu0  ;;  %v4016_v13 = vadd.f32 %v16336_v27, %v3709_v0  ;;  %v4318_v59 = vadd.f32 %v16558_v19, %v4011_v44  ;;  %v3716_v17 = vadd.f32 %v20991_v14, %v3409_v58  ;;  %v4014_v49 = vadd.f32 %v20992_v4, %v3707_v22  ;;  %v20993_v0 = vld [vmem:[#allocation76_spill] sm:$0xff]  ;;  %v20999_v14 = vld [vmem:[#allocation53_spill] sm:$0xff] }
 0x731   :  { %v5238_v11 = vadd.f32 %v5137_v41, %v4931_v33  ;;  %v5166_v32 = vpop.f32.mrf.mxu1  ;;  %v4623_v45 = vadd.f32 %v16608_v15, %v4316_v47  ;;  %v4020_v10 = vadd.f32 %v20993_v0, %v3713_v36  ;;  %v4324_v33 = vadd.f32 %v16574_v5, %v4017_v3  ;;  %v21000_v4 = vld [vmem:[#allocation85_spill] sm:$0xff] }
 0x732   :  { %v4323_v27 = vadd.f32 %v16535_v29, %v4016_v13  ;;  %v4625_v50 = vadd.f32 %v16602_v34, %v4318_v59  ;;  %v3722_v23 = vadd.f32 %v20994_v7, %v3415_v53  ;;  %v4022_v19 = vadd.f32 %v16382_v46, %v3715_v25  ;;  %v20998_v59 = vld [vmem:[#allocation79_spill] sm:$0xff] }
 0x733   :  { %v5286_v54 = vmul.f32 %v16700_v9, %v5238_v11  ;;  %v4930_v22 = vadd.f32 %v16638_v51, %v4623_v45  ;;  %v4023_v29 = vadd.f32 %v16388_v39, %v3716_v17  ;;  %v4327_v15 = vadd.f32 %v16502_v28, %v4020_v10 }
 0x734   :  { %v5085_v26 = vpop.f32.mrf.mxu2  ;;  %v4630_v58 = vadd.f32 %v16610_v60, %v4323_v27  ;;  %v4631_v1 = vadd.f32 %v16612_v2, %v4324_v33  ;;  %v4932_v5 = vadd.f32 %v16674_v61, %v4625_v50  ;;  %v4028_v8 = vadd.f32 %v16421_v24, %v3721_v56  ;;  %v20997_v56 = vld [vmem:[#allocation101_spill] sm:$0xff]  ;;  %v21001_v27 = vld [vmem:[#allocation100_spill] sm:$0xff]  ;;  %v21002_v33 = vld [vmem:[#allocation111_spill] sm:$0xff] }
 0x735   :  { %v4029_v44 = vadd.f32 %v16429_v62, %v3722_v23  ;;  %v4634_v60 = vadd.f32 %v16605_v16, %v4327_v15  ;;  %v5334_v39 = vadd.f32 %v16710_v38, %v5286_v54  ;;  %v4321_v2 = vadd.f32 %v16480_v31, %v4014_v49  ;;  %v21003_v54 = vld [vmem:[#allocation60_spill] sm:$0xff] }
 0x736   :  { %v5108_v34 = vpop.f32.mrf.mxu3  ;;  %v4937_v53 = vadd.f32 %v16664_v40, %v4630_v58  ;;  %v4938_v51 = vadd.f32 %v16689_v52, %v4631_v1  ;;  %v5239_v41 = vadd.f32 %v5166_v32, %v4932_v5  ;;  %v4322_v24 = vadd.f32 %v16485_v35, %v16378_v20  ;;  %v20995_v32 = vld [vmem:[#allocation22_spill] sm:$0xff]  ;;  %v16805_v35 = vpop.permute.xlu2 %5319 }
 0x737   :  { %v5237_v46 = vadd.f32 %v5108_v34, %v4930_v22  ;;  %v4328_v16 = vadd.f32 %v16506_v12, %v16417_v21  ;;  %v4329_v52 = vadd.f32 %v16554_v48, %v4022_v19  ;;  %v4941_v36 = vadd.f32 %v16652_v55, %v4634_v60  ;;  %v20996_v48 = vld [vmem:[#allocation90_spill] sm:$0xff]  ;;  %v21004_v19 = vld [vmem:[#allocation61_spill] sm:$0xff] }
 0x738   :  { %v5140_v28 = vpop.f32.mrf.mxu0  ;;  %v4628_v47 = vadd.f32 %v16593_v43, %v4321_v2  ;;  %v4629_v11 = vadd.f32 %v16618_v63, %v4322_v24  ;;  %v5358_v18 = vmax.f32 %v5334_v39, 0.0  ;;  %v5287_v25 = vmul.f32 %v16700_v9, %v5239_v41  ;;  %v21006_v39 = vld [vmem:[#allocation91_spill] sm:$0xff]  ;;  %v21008_v24 = vld [vmem:[#allocation62_spill] sm:$0xff] }
 0x739   :  { %v5285_v62 = vmul.f32 %v16700_v9, %v5237_v46  ;;  %v5244_v61 = vadd.f32 %v5140_v28, %v4937_v53  ;;  %v5169_v40 = vpop.f32.mrf.mxu1  ;;  %v5248_v6 = vadd.f32 %v5085_v26, %v4941_v36  ;;  %v4636_v55 = vadd.f32 %v20996_v48, %v4329_v52  ;;  %v21007_v28 = vld [vmem:[#allocation13_spill] sm:$0xff]  ;;  %v21009_v52 = vld [vmem:[#allocation88_spill] sm:$0xff]  ;;  %v21012_v48 = vld [vmem:[#allocation94_spill] sm:$0xff] }
 0x73a   :  { %v5245_v13 = vadd.f32 %v5169_v40, %v4938_v51  ;;  %v4936_v43 = vadd.f32 %v20997_v56, %v4629_v11  ;;  %v4319_v17 = vadd.f32 %v20999_v14, %v20998_v59  ;;  %v4330_v49 = vadd.f32 %v21000_v4, %v4023_v29  ;;  %v21005_v29 = vld [vmem:[#allocation10_spill] sm:$0xff]  ;;  %v16830_v40 = vpop.permute.xlu0 %5324  ;;  %v21013_v56 = vld [vmem:[#allocation104_spill] sm:$0xff] }
 0x73b   :  { %v5333_v31 = vadd.f32 %v16710_v38, %v5285_v62  ;;  %v5292_v20 = vmul.f32 %v20995_v32, %v5244_v61  ;;  %v4935_v45 = vadd.f32 %v21001_v27, %v4628_v47  ;;  %v4943_v50 = vadd.f32 %v21002_v33, %v4636_v55  ;;  %v21016_v27 = vld [vmem:[#allocation21_spill] sm:$0xff] }
 0x73c   :  { %v5293_v21 = vmul.f32 %v20995_v32, %v5245_v13  ;;  %v16809_v12 = vpop.f32.mrf.mxu2  ;;  %v5382_v58 = vmul.f32 %v5358_v18, %v21004_v19  ;;  %v5335_v22 = vadd.f32 %v16710_v38, %v5287_v25  ;;  %v5296_v15 = vmul.f32 %v16763_v37, %v5248_v6  ;;  %v21010_v13 = vld [vmem:[#allocation93_spill] sm:$0xff] }
 0x73d   :  { %v5357_v3 = vmax.f32 %v5333_v31, 0.0  ;;  %v5340_v63 = vadd.f32 %v16805_v35, %v5292_v20  ;;  %v4335_v34 = vadd.f32 %v21005_v29, %v4028_v8  ;;  %v4637_v41 = vadd.f32 %v21006_v39, %v4330_v49  ;;  %v21011_v31 = vld [vmem:[#allocation26_spill] sm:$0xff]  ;;  %v21021_v29 = vld [vmem:[#allocation109_spill] sm:$0xff] }
 0x73e   :  { %v5341_v0 = vadd.f32 %v16805_v35, %v5293_v21  ;;  %v5111_v10 = vpop.f32.mrf.mxu3  ;;  %v5242_v2 = vadd.f32 %v21007_v28, %v4935_v45  ;;  %v4336_v36 = vadd.f32 %v21009_v52, %v4029_v44  ;;  %v4635_v47 = vadd.f32 %v21010_v13, %v4328_v16  ;;  %v21023_v13 = vld [vmem:[#allocation83_spill] sm:$0xff] }
 0x73f   :  { %v5381_v26 = vmul.f32 %v5357_v3, %v21003_v54  ;;  %v5364_v7 = vmax.f32 %v5340_v63, 0.0  ;;  %v5243_v23 = vadd.f32 %v5111_v10, %v4936_v43  ;;  %v4944_v20 = vadd.f32 %v21011_v31, %v4637_v41  ;;  %v21014_v3 = vld [vmem:[#allocation92_spill] sm:$0xff]  ;;  %v21015_v63 = vld [vmem:[#allocation95_spill] sm:$0xff] }
 0x740   :  { %v5365_v1 = vmax.f32 %v5341_v0, 0.0  ;;  %v5143_v5 = vpop.f32.mrf.mxu0  ;;  %v5359_v18 = vmax.f32 %v5335_v22, 0.0  ;;  %v5344_v25 = vadd.f32 %v16830_v40, %v5296_v15  ;;  %v4642_v55 = vadd.f32 %v21012_v48, %v4335_v34  ;;  %v21019_v15 = vld [vmem:[#allocation81_spill] sm:$0xff] }
 0x741   :  { %v5388_v53 = vmul.f32 %v5364_v7, %v21004_v19  ;;  %v5291_v46 = vmul.f32 %v20995_v32, %v5243_v23  ;;  %v5250_v60 = vadd.f32 %v5143_v5, %v4943_v50  ;;  %v5172_v51 = vpop.f32.mrf.mxu1  ;;  %v12065_v61 = vpack.i.bf16 %v5382_v58, %v5381_v26  ;;  %v21017_v50 = vld [vmem:[#allocation78_spill] sm:$0xff]  ;;  %v21018_v26 = vld [vmem:[#allocation64_spill] sm:$0xff] }
 0x742   :  { %v5389_v62 = vmul.f32 %v5365_v1, %v21008_v24  ;;  %v4942_v43 = vadd.f32 %v21013_v56, %v4635_v47  ;;  %v4626_v16 = vadd.f32 %v21014_v3, %v4319_v17  ;;  %v4643_v59 = vadd.f32 %v21015_v63, %v4336_v36  ;;  %v21020_v1 = vld [vmem:[#allocation55_spill] sm:$0xff]  ;;  %v16861_v36 = vpop.permute.xlu1 %5329  ;;  %v21028_v3 = vld [vmem:[#allocation89_spill] sm:$0xff] }
 0x743   :  { %v5339_v8 = vadd.f32 %v16805_v35, %v5291_v46  ;;  %v5298_v11 = vmul.f32 %v16763_v37, %v5250_v60  ;;  %12066 = vrot.lane.b32.xlu0 %v12065_v61, %s13122_s23  ;;  %v5290_v14 = vmul.f32 %v20995_v32, %v5242_v2  ;;  %v5251_v4 = vadd.f32 %v5172_v51, %v4944_v20  ;;  %v21024_v47 = vld [vmem:[#allocation67_spill] sm:$0xff] }
 0x744   :  { %v12075_v6 = vpack.i.bf16 %v5389_v62, %v5388_v53  ;;  %v5195_v21 = vpop.f32.mrf.mxu2  ;;  %v4949_v45 = vadd.f32 %v21016_v27, %v4642_v55  ;;  %v4333_v7 = vadd.f32 %v21018_v26, %v21017_v50  ;;  %v4950_v17 = vadd.f32 %v16749_v57, %v4643_v59  ;;  %v21022_v57 = vld [vmem:[#allocation97_spill] sm:$0xff]  ;;  %v21027_v55 = vld [vmem:[#allocation107_spill] sm:$0xff]  ;;  %v21031_v50 = vld [vmem:[#allocation106_spill] sm:$0xff] }
 0x745   :  { %v5363_v44 = vmax.f32 %v5339_v8, 0.0  ;;  %v5346_v10 = vadd.f32 %v16830_v40, %v5298_v11  ;;  %v5383_v23 = vmul.f32 %v5359_v18, %v21008_v24  ;;  %v5368_v58 = vmax.f32 %v5344_v25, 0.0  ;;  %v21025_v25 = vld [vmem:[#allocation82_spill] sm:$0xff] }
 0x746   :  { %12076 = vrot.lane.b32.xlu2 %v12075_v6, %s13122_s23  ;;  %v5114_v49 = vpop.f32.mrf.mxu3  ;;  %v4334_v5 = vadd.f32 %v21020_v1, %v21019_v15  ;;  %v4933_v34 = vadd.f32 %v21021_v29, %v4626_v16  ;;  %v5338_v51 = vadd.f32 %v16805_v35, %v5290_v14  ;;  %v5299_v39 = vmul.f32 %v16763_v37, %v5251_v4  ;;  %v21026_v6 = vld [vmem:[#allocation71_spill] sm:$0xff] }
 0x747   :  { %v5387_v0 = vmul.f32 %v5363_v44, %v21003_v54  ;;  %v5249_v33 = vadd.f32 %v5114_v49, %v4942_v43  ;;  %v5370_v62 = vmax.f32 %v5346_v10, 0.0  ;;  %v4320_v8 = vadd.f32 %v21024_v47, %v21023_v13  ;;  %v21030_v10 = vld [vmem:[#allocation43_spill] sm:$0xff] }
 0x748   :  { %v5146_v22 = vpop.f32.mrf.mxu0  ;;  %v4641_v2 = vadd.f32 %v21022_v57, %v4334_v5  ;;  %v5240_v11 = vadd.f32 %v5195_v21, %v4933_v34  ;;  %v5392_v20 = vmul.f32 %v5368_v58, %v20976_v30  ;;  %v4331_v48 = vadd.f32 %v21026_v6, %v21025_v25  ;;  %v21033_v5 = vld [vmem:[#allocation96_spill] sm:$0xff]  ;;  %v21037_v13 = vld [vmem:[#allocation15_spill] sm:$0xff] }
 0x749   :  { %v5297_v53 = vmul.f32 %v16763_v37, %v5249_v33  ;;  %v5256_v46 = vadd.f32 %v5146_v22, %v4949_v45  ;;  %v5175_v60 = vpop.f32.mrf.mxu1  ;;  %v12070_v28 = vpack.i.bf16 %v5387_v0, %v5383_v23  ;;  %v4640_v16 = vadd.f32 %v21028_v3, %v4333_v7  ;;  %v21029_v0 = vld [vmem:[#allocation80_spill] sm:$0xff]  ;;  %v21032_v23 = vld [vmem:[#allocation98_spill] sm:$0xff] }
 0x74a   :  { %v5257_v41 = vadd.f32 %v5175_v60, %v4950_v17  ;;  %v4948_v56 = vadd.f32 %v21027_v55, %v4641_v2  ;;  %v5362_v63 = vmax.f32 %v5338_v51, 0.0  ;;  %v5347_v21 = vadd.f32 %v16830_v40, %v5299_v39  ;;  %v21034_v60 = vld [vmem:[#allocation99_spill] sm:$0xff]  ;;  %v21035_v39 = vld [vmem:[#allocation68_spill] sm:$0xff] }
 0x74b   :  { %v5345_v61 = vadd.f32 %v16830_v40, %v5297_v53  ;;  %v5304_v52 = vmul.f32 %v16791_v42, %v5256_v46  ;;  %12071 = vrot.lane.b32.xlu1 %v12070_v28, %s13122_s23  ;;  %v5394_v4 = vmul.f32 %v5370_v62, %v21004_v19  ;;  %v4325_v33 = vadd.f32 %v21030_v10, %v21029_v0  ;;  %v21039_v3 = vld [vmem:[#allocation8_spill] sm:$0xff] }
 0x74c   :  { %v5305_v31 = vmul.f32 %v16791_v42, %v5257_v41  ;;  %v5198_v18 = vpop.f32.mrf.mxu2  ;;  %v4947_v26 = vadd.f32 %v21031_v50, %v4640_v16  ;;  %v5288_v7 = vmul.f32 %v16700_v9, %v5240_v11  ;;  %v4638_v58 = vadd.f32 %v21032_v23, %v4331_v48  ;;  %v21042_v10 = vld [vmem:[#allocation28_spill] sm:$0xff]  ;;  %v21043_v23 = vld [vmem:[#allocation50_spill] sm:$0xff] }
 0x74d   :  { %v5369_v43 = vmax.f32 %v5345_v61, 0.0  ;;  %v5352_v44 = vadd.f32 %v16861_v36, %v5304_v52  ;;  %v4632_v29 = vadd.f32 %v21033_v5, %v4325_v33  ;;  %v5386_v46 = vmul.f32 %v5362_v63, %v20976_v30  ;;  %v21046_v5 = vld [vmem:[#allocation49_spill] sm:$0xff] }
 0x74e   :  { %v5353_v59 = vadd.f32 %v16861_v36, %v5305_v31  ;;  %5452 = vrot.lane.b32.xlu2 %v5392_v20, %s13122_s23  ;;  %v5117_v14 = vpop.f32.mrf.mxu3  ;;  %v5254_v34 = vadd.f32 %v16809_v12, %v4947_v26  ;;  %v4627_v51 = vadd.f32 %v21034_v60, %v4320_v8  ;;  %v4945_v41 = vadd.f32 %v21035_v39, %v4638_v58  ;;  %v21036_v12 = vld [vmem:[#allocation110_spill] sm:$0xff]  ;;  %v21049_v39 = vld [vmem:[#allocation105_spill] sm:$0xff] }
 0x74f   :  { %v5393_v49 = vmul.f32 %v5369_v43, %v21003_v54  ;;  %v5376_v27 = vmax.f32 %v5352_v44, 0.0  ;;  %v5255_v45 = vadd.f32 %v5117_v14, %v4948_v56  ;;  %v5371_v28 = vmax.f32 %v5347_v21, 0.0  ;;  %v21038_v44 = vld [vmem:[#allocation47_spill] sm:$0xff]  ;;  %v21048_v60 = vld [vmem:[#allocation102_spill] sm:$0xff] }
 0x750   :  { %v5377_v17 = vmax.f32 %v5353_v59, 0.0  ;;  %v5336_v2 = vadd.f32 %v16710_v38, %v5288_v7  ;;  %v4934_v52 = vadd.f32 %v21036_v12, %v4627_v51  ;;  %v4939_v47 = vadd.f32 %v21037_v13, %v4632_v29  ;;  %v21040_v14 = vld [vmem:[#allocation103_spill] sm:$0xff]  ;;  %v21047_v29 = vld [vmem:[#allocation86_spill] sm:$0xff] }
 0x751   :  { %v5400_v22 = vmul.f32 %v5376_v27, %v21004_v19  ;;  %v5303_v15 = vmul.f32 %v16791_v42, %v5255_v45  ;;  %v12080_v1 = vpack.i.bf16 %v5394_v4, %v5393_v49  ;;  %v5302_v8 = vmul.f32 %v16791_v42, %v5254_v34  ;;  %v21041_v45 = vld [vmem:[#allocation63_spill] sm:$0xff] }
 0x752   :  { %v5401_v53 = vmul.f32 %v5377_v17, %v21008_v24  ;;  %v5395_v25 = vmul.f32 %v5371_v28, %v21008_v24  ;;  %v5246_v48 = vadd.f32 %v5198_v18, %v4939_v47  ;;  %v5360_v56 = vmax.f32 %v5336_v2, 0.0 }
 0x753   :  { %v5351_v57 = vadd.f32 %v16861_v36, %v5303_v15  ;;  %12081 = vrot.lane.b32.xlu0 %v12080_v1, %s13122_s23  ;;  %5440 = vrot.lane.b32.xlu1 %v5386_v46, %s13122_s23  ;;  %v4326_v16 = vadd.f32 %v21039_v3, %v21038_v44  ;;  %v5350_v59 = vadd.f32 %v16861_v36, %v5302_v8  ;;  %v21045_v15 = vld [vmem:[#allocation84_spill] sm:$0xff]  ;;  %v21055_v3 = vld [vmem:[#allocation23_spill] sm:$0xff] }
 0x754   :  { %v12090_v62 = vpack.i.bf16 %v5401_v53, %v5400_v22  ;;  %v5201_v61 = vpop.f32.mrf.mxu2  ;;  %v5294_v49 = vmul.f32 %v20995_v32, %v5246_v48  ;;  %v5384_v0 = vmul.f32 %v5360_v56, %v21041_v45  ;;  %v4337_v34 = vadd.f32 %v21047_v29, %v21046_v5 }
 0x755   :  { %v5375_v11 = vmax.f32 %v5351_v57, 0.0  ;;  %v5252_v31 = vadd.f32 %v5201_v61, %v4945_v41  ;;  %v4633_v4 = vadd.f32 %v21040_v14, %v4326_v16  ;;  %v5374_v26 = vmax.f32 %v5350_v59, 0.0  ;;  %v21050_v61 = vld [vmem:[#allocation112_spill] sm:$0xff] }
 0x756   :  { %12091 = vrot.lane.b32.xlu2 %v12090_v62, %s13122_s23  ;;  %v5224_v20 = vpop.f32.mrf.mxu3  ;;  %v5342_v7 = vadd.f32 %v16805_v35, %v5294_v49  ;;  %v4644_v51 = vadd.f32 %v21048_v60, %v4337_v34 }
 0x757   :  { %v5399_v6 = vmul.f32 %v5375_v11, %v21003_v54  ;;  %v5241_v55 = vadd.f32 %v5224_v20, %v4934_v52  ;;  %v5300_v43 = vmul.f32 %v16763_v37, %v5252_v31  ;;  %v4940_v33 = vadd.f32 %v21042_v10, %v4633_v4  ;;  %v21051_v52 = vld [vmem:[#allocation34_spill] sm:$0xff]  ;;  %v21052_v20 = vld [vmem:[#allocation45_spill] sm:$0xff] }
 0x758   :  { %v5398_v46 = vmul.f32 %v5374_v26, %v20976_v30  ;;  %v5366_v28 = vmax.f32 %v5342_v7, 0.0 }
 0x759   :  { %v5289_v63 = vmul.f32 %v16700_v9, %v5241_v55  ;;  %v12085_v21 = vpack.i.bf16 %v5399_v6, %v5395_v25  ;;  %v5348_v18 = vadd.f32 %v16830_v40, %v5300_v43  ;;  %v21053_v25 = vld [vmem:[#allocation87_spill] sm:$0xff]  ;;  %v21054_v55 = vld [vmem:[#allocation108_spill] sm:$0xff] }
 0x75a   :  { %v5390_v8 = vmul.f32 %v5366_v28, %v21041_v45 }
 0x75b   :  { %v5337_v27 = vadd.f32 %v16710_v38, %v5289_v63  ;;  %12086 = vrot.lane.b32.xlu1 %v12085_v21, %s13122_s23  ;;  %v5372_v22 = vmax.f32 %v5348_v18, 0.0  ;;  %v21044_v38 = vld [vmem:[#allocation70_spill] sm:$0xff] }
 0x75c   :  { %v4332_v1 = vadd.f32 %v21045_v15, %v21044_v38  ;;  %v5204_v2 = vpop.f32.mrf.mxu2 }
 0x75d   :  { %v5361_v50 = vmax.f32 %v5337_v27, 0.0  ;;  %v5396_v62 = vmul.f32 %v5372_v22, %v21041_v45 }
 0x75e   :  { %5436 = vrot.lane.b32.xlu2 %v5384_v0, %s13122_s23  ;;  %v5227_v9 = vpop.f32.mrf.mxu3  ;;  %v4639_v41 = vadd.f32 %v21049_v39, %v4332_v1 }
 0x75f   :  { %v5247_v17 = vadd.f32 %v5227_v9, %v4940_v33  ;;  %v5385_v58 = vmul.f32 %v5361_v50, %v21043_v23 }
 0x760   :  { %v4946_v12 = vadd.f32 %v21050_v61, %v4639_v41 }
 0x761   :  { %v5295_v53 = vmul.f32 %v20995_v32, %v5247_v17  ;;  %5438 = vrot.lane.b32.xlu0 %v5385_v58, %s13122_s23  ;;  %v4951_v32 = vadd.f32 %v21051_v52, %v4644_v51 }
 0x763   :  { %v5343_v57 = vadd.f32 %v16805_v35, %v5295_v53  ;;  %5464 = vrot.lane.b32.xlu1 %v5398_v46, %s13122_s23  ;;  %v5258_v11 = vadd.f32 %v5204_v2, %v4951_v32  ;;  %v4338_v35 = vadd.f32 %v21053_v25, %v21052_v20 }
 0x765   :  { %v5367_v13 = vmax.f32 %v5343_v57, 0.0  ;;  %v4645_v56 = vadd.f32 %v21054_v55, %v4338_v35  ;;  %v5306_v43 = vmul.f32 %v16791_v42, %v5258_v11 }
 0x766   :  { %5460 = vrot.lane.b32.xlu2 %v5396_v62, %s13122_s23  ;;  %v5230_v47 = vpop.f32.mrf.mxu3 }
 0x767   :  { %v5253_v31 = vadd.f32 %v5230_v47, %v4946_v12  ;;  %v5391_v48 = vmul.f32 %v5367_v13, %v21043_v23  ;;  %v4952_v16 = vadd.f32 %v21055_v3, %v4645_v56  ;;  %v5354_v59 = vadd.f32 %v16861_v36, %v5306_v43 }
 0x769   :  { %v5301_v6 = vmul.f32 %v16763_v37, %v5253_v31  ;;  %5448 = vrot.lane.b32.xlu0 %v5390_v8, %s13122_s23  ;;  %v5378_v49 = vmax.f32 %v5354_v59, 0.0 }
 0x76b   :  { %v5349_v44 = vadd.f32 %v16830_v40, %v5301_v6  ;;  %5450 = vrot.lane.b32.xlu1 %v5391_v48, %s13122_s23  ;;  %v5402_v0 = vmul.f32 %v5378_v49, %v21041_v45 }
 0x76d   :  { %v5373_v63 = vmax.f32 %v5349_v44, 0.0 }
 0x76e   :  { %v5233_v21 = vpop.f32.mrf.mxu3 }
 0x76f   :  { %v5259_v14 = vadd.f32 %v5233_v21, %v4952_v16  ;;  %v5397_v37 = vmul.f32 %v5373_v63, %v21043_v23 }
 0x771   :  { %v5307_v4 = vmul.f32 %v16791_v42, %v5259_v14  ;;  %5462 = vrot.lane.b32.xlu0 %v5397_v37, %s13122_s23 }
 0x773   :  { %v5355_v27 = vadd.f32 %v16861_v36, %v5307_v4 }
 0x775   :  { %v5379_v18 = vmax.f32 %v5355_v27, 0.0 }
 0x777   :  { %v5403_v40 = vmul.f32 %v5379_v18, %v21043_v23 }
 0x779   :  { %5474 = vrot.lane.b32.xlu1 %v5403_v40, %s13122_s23  ;;  %5472 = vrot.lane.b32.xlu0 %v5402_v0, %s13122_s23 }
 0x789   :  { %v16951_v10 = vpop.permute.xlu2 %5428 }
 0x78a   :  { %v16959_v36 = vsel %vm196_vm3, 0.0, %v16951_v10 }
 0x7a0   :  { %v16953_v33 = vpop.permute.xlu2 %12076 }
 0x7a1   :  { %v12079_v34 = vunpack.i.h.bf16 %v16953_v33  ;;  %v12078_v53 = vunpack.i.l.bf16 %v16953_v33 }
 0x7a3   :  { %v17002_v57 = vsel %vm196_vm3, %v12078_v53, %v12079_v34 }
 0x7a8   :  { %v16955_v50 = vpop.permute.xlu2 %5452 }
 0x7a9   :  { %v5522_v13 = vsel %vm196_vm3, 0.0, %v16955_v50 }
 0x7b0   :  { %v16971_v38 = vpop.permute.xlu2 %12091 }
 0x7b1   :  { %v12093_v47 = vunpack.i.l.bf16 %v16971_v38  ;;  %v12094_v0 = vunpack.i.h.bf16 %v16971_v38 }
 0x7b5   :  { %v12067_v42 = vpop.permute.xlu0 %12066 }
 0x7b6   :  { %v12068_v26 = vunpack.i.l.bf16 %v12067_v42  ;;  %v12069_v17 = vunpack.i.h.bf16 %v12067_v42 }
 0x7b8   :  { %v16963_v9 = vsel %vm196_vm3, %v16951_v10, %v12068_v26  ;;  %v16974_v15 = vsel %vm196_vm3, %v12068_v26, %v12069_v17  ;;  %v5437_v62 = vpop.permute.xlu2 %5436 }
 0x7b9   :  { %v16967_v7 = vpack.i.bf16 %v16963_v9, %v16959_v36 }
 0x7bb   :  { %12101 = vrot.lane.b32.xlu2 %v16967_v7, %s13123_s3 }
 0x7bd   :  { %v12072_v58 = vpop.permute.xlu1 %12071 }
 0x7be   :  { %v12073_v22 = vunpack.i.l.bf16 %v12072_v58  ;;  %v12074_v29 = vunpack.i.h.bf16 %v12072_v58  ;;  %v17091_v58 = vsel %vm196_vm3, %v12093_v47, %v12094_v0 }
 0x7c0   :  { %v16977_v1 = vsel %vm196_vm3, %v12069_v17, %v12073_v22  ;;  %v16990_v51 = vsel %vm196_vm3, %v12074_v29, %v12078_v53  ;;  %v5461_v48 = vpop.permute.xlu2 %5460  ;;  %v17061_v14 = vsel %vm196_vm3, %v12073_v22, %v5437_v62 }
 0x7c1   :  { %v16981_v5 = vpack.i.bf16 %v16977_v1, %v16974_v15  ;;  %v17008_v61 = vpack.i.bf16 %v17002_v57, %v16990_v51 }
 0x7c3   :  { %12096 = vrot.lane.b32.xlu0 %v16981_v5, %s13123_s3 }
 0x7c5   :  { %v16987_v46 = vpop.permute.xlu1 %5440  ;;  %v12082_v60 = vpop.permute.xlu0 %12081 }
 0x7c6   :  { %v16994_v39 = vsel %vm196_vm3, %v16987_v46, %v12074_v29  ;;  %v5521_v41 = vsel %vm196_vm3, 0.0, %v16987_v46  ;;  %v12083_v2 = vunpack.i.l.bf16 %v12082_v60  ;;  %v12084_v12 = vunpack.i.h.bf16 %v12082_v60 }
 0x7c7   :  { %v16999_v28 = vpack.i.bf16 %v16994_v39, %v5521_v41 }
 0x7c8   :  { %v17014_v52 = vsel %vm196_vm3, %v16955_v50, %v12083_v2  ;;  %v17023_v8 = vsel %vm196_vm3, %v12083_v2, %v12084_v12 }
 0x7c9   :  { %12111 = vrot.lane.b32.xlu2 %v16999_v28, %s13123_s3  ;;  %v17020_v31 = vpack.i.bf16 %v17014_v52, %v5522_v13 }
 0x7cb   :  { %12106 = vrot.lane.b32.xlu0 %v17008_v61, %s13123_s3 }
 0x7cd   :  { %v12087_v32 = vpop.permute.xlu1 %12086 }
 0x7ce   :  { %v12089_v11 = vunpack.i.h.bf16 %v12087_v32  ;;  %v12088_v25 = vunpack.i.l.bf16 %v12087_v32 }
 0x7d0   :  { %v17026_v20 = vsel %vm196_vm3, %v12089_v11, %v12093_v47  ;;  %v17040_v56 = vsel %vm196_vm3, %v12084_v12, %v12088_v25  ;;  %v17043_v43 = vsel %vm196_vm3, %v12088_v25, %v5461_v48 }
 0x7d1   :  { %12116 = vrot.lane.b32.xlu2 %v17020_v31, %s13123_s3  ;;  %v17032_v35 = vpack.i.bf16 %v17023_v8, %v17026_v20  ;;  %v12140_v59 = vpack.i.bf16 %v17043_v43, %v17040_v56  ;;  %v12190_v13 = vpack.i.bf16 %v17040_v56, %v17023_v8 }
 0x7d3   :  { %v5439_v6 = vpop.permute.xlu0 %5438  ;;  %12126 = vrot.lane.b32.xlu1 %v17032_v35, %s13123_s3 }
 0x7d4   :  { %v17035_v55 = vsel %vm196_vm3, %v5437_v62, %v5439_v6 }
 0x7d5   :  { %v17045_v44 = vpop.permute.xlu1 %5464  ;;  %v5524_v3 = vsel %vm205_vm4, %v17035_v55, 0.0 }
 0x7d6   :  { %v17051_v16 = vsel %vm196_vm3, %v17045_v44, %v12089_v11  ;;  %v5523_v63 = vsel %vm196_vm3, 0.0, %v17045_v44  ;;  %v12130_v37 = vpack.i.bf16 %v5524_v3, %v17061_v14  ;;  %v12205_v11 = vpack.i.bf16 %v17091_v58, %v17026_v20 }
 0x7d7   :  { %v17056_v21 = vpack.i.bf16 %v17051_v16, %v5523_v63  ;;  %v12250_v25 = vpack.i.bf16 %v5523_v63, %v17023_v8  ;;  %v12255_v6 = vpack.i.bf16 %v17026_v20, %v17051_v16 }
 0x7d9   :  { %12121 = vrot.lane.b32.xlu0 %v17056_v21, %s13123_s3  ;;  %12141 = vrot.lane.b32.xlu2 %v12140_v59, %s13123_s3 }
 0x7db   :  { %v5449_v4 = vpop.permute.xlu0 %5448  ;;  %12131 = vrot.lane.b32.xlu1 %v12130_v37, %s13123_s3 }
 0x7dc   :  { %v17072_v18 = vsel %vm196_vm3, %v12079_v34, %v5449_v4 }
 0x7dd   :  { %v5451_v49 = vpop.permute.xlu1 %5450 }
 0x7de   :  { %v17069_v27 = vsel %vm196_vm3, %v5449_v4, %v5451_v49 }
 0x7df   :  { %v17076_v40 = vsel %vm205_vm4, %v17069_v27, 0.0 }
 0x7e0   :  { %v12135_v33 = vpack.i.bf16 %v17076_v40, %v17072_v18  ;;  %v17082_v42 = vpack.i.bf16 %v5524_v3, %v17076_v40 }
 0x7e1   :  { %12156 = vrot.lane.b32.xlu2 %v16967_v7, %s13124_s24 }
 0x7e3   :  { %v5463_v26 = vpop.permute.xlu0 %5462  ;;  %12136 = vrot.lane.b32.xlu1 %v12135_v33, %s13123_s3 }
 0x7e4   :  { %v17087_v17 = vsel %vm196_vm3, %v5461_v48, %v5463_v26 }
 0x7e5   :  { %v17095_v22 = vsel %vm205_vm4, %v17087_v17, 0.0 }
 0x7e6   :  { %v12145_v38 = vpack.i.bf16 %v17095_v22, %v17091_v58  ;;  %v12330_v29 = vpack.i.bf16 %v17076_v40, %v17095_v22  ;;  %v12195_v47 = vpack.i.bf16 %v17095_v22, %v17043_v43 }
 0x7e8   :  { %12146 = vrot.lane.b32.xlu0 %v12145_v38, %s13123_s3 }
 0x7e9   :  { %12171 = vrot.lane.b32.xlu2 %v16999_v28, %s13124_s24 }
 0x7eb   :  { %v5475_v34 = vpop.permute.xlu1 %5474  ;;  %v5473_v53 = vpop.permute.xlu0 %5472 }
 0x7ec   :  { %v17105_v60 = vsel %vm196_vm3, %v12094_v0, %v5473_v53  ;;  %v17108_v41 = vsel %vm196_vm3, %v5473_v53, %v5475_v34  ;;  %v12315_v0 = vpack.i.bf16 %v17002_v57, %v17040_v56 }
 0x7ed   :  { %v5527_v2 = vsel %vm205_vm4, %v17108_v41, 0.0  ;;  %v12265_v48 = vpack.i.bf16 %v17105_v60, %v17091_v58  ;;  %v17173_v3 = vpack.i.bf16 %v17043_v43, %v17105_v60 }
 0x7ee   :  { %v12150_v62 = vpack.i.bf16 %v5527_v2, %v17105_v60  ;;  %v12280_v12 = vpack.i.bf16 %v5527_v2, %v17095_v22  ;;  %v17115_v32 = vpack.i.bf16 %v17095_v22, %v5527_v2  ;;  %v17226_v22 = vld [vmem:[%s20516_s10 + $0x20] sm:$0xff] }
 0x7f0   :  { %12151 = vrot.lane.b32.xlu1 %v12150_v62, %s13123_s3  ;;  %12161 = vrot.lane.b32.xlu0 %v16981_v5, %s13124_s24 }
 0x7f1   :  { %12186 = vrot.lane.b32.xlu2 %v17020_v31, %s13124_s24 }
 0x7f8   :  { %12166 = vrot.lane.b32.xlu1 %v12130_v37, %s13124_s24  ;;  %12176 = vrot.lane.b32.xlu0 %v17008_v61, %s13124_s24 }
 0x7f9   :  { %12201 = vrot.lane.b32.xlu2 %v17056_v21, %s13124_s24 }
 0x800   :  { %12181 = vrot.lane.b32.xlu1 %v12135_v33, %s13124_s24  ;;  %12191 = vrot.lane.b32.xlu0 %v12190_v13, %s13124_s24 }
 0x801   :  { %12216 = vrot.lane.b32.xlu2 %v16967_v7, %s13125_s25 }
 0x808   :  { %12196 = vrot.lane.b32.xlu1 %v12195_v47, %s13124_s24  ;;  %12206 = vrot.lane.b32.xlu0 %v12205_v11, %s13124_s24 }
 0x809   :  { %12231 = vrot.lane.b32.xlu2 %v16999_v28, %s13125_s25 }
 0x810   :  { %12211 = vrot.lane.b32.xlu1 %v12150_v62, %s13124_s24  ;;  %12221 = vrot.lane.b32.xlu0 %v16981_v5, %s13125_s25 }
 0x811   :  { %12246 = vrot.lane.b32.xlu2 %v17020_v31, %s13125_s25 }
 0x818   :  { %12226 = vrot.lane.b32.xlu1 %v12130_v37, %s13125_s25  ;;  %12236 = vrot.lane.b32.xlu0 %v17008_v61, %s13125_s25  ;;  %v12102_v61 = vpop.permute.xlu2 %12101 }
 0x819   :  { %12261 = vrot.lane.b32.xlu2 %v12140_v59, %s13125_s25 }
 0x820   :  { %12241 = vrot.lane.b32.xlu1 %v12135_v33, %s13125_s25  ;;  %12251 = vrot.lane.b32.xlu0 %v12250_v25, %s13125_s25  ;;  %v12325_v33 = vpack.i.bf16 %v5527_v2, %v17072_v18 }
 0x821   :  { %12271 = vrot.lane.b32.xlu2 %v16967_v7, %s13126_s26 }
 0x823   :  { %v12112_v63 = vpop.permute.xlu2 %12111 }
 0x824   :  { %v12114_v11 = vunpack.i.h.bf16 %v12112_v63  ;;  %v12113_v2 = vunpack.i.l.bf16 %v12112_v63 }
 0x828   :  { %12256 = vrot.lane.b32.xlu1 %v12255_v6, %s13125_s25  ;;  %12266 = vrot.lane.b32.xlu0 %v12265_v48, %s13125_s25 }
 0x829   :  { %12291 = vrot.lane.b32.xlu2 %v17056_v21, %s13126_s26 }
 0x830   :  { %12281 = vrot.lane.b32.xlu1 %v12280_v12, %s13125_s25  ;;  %12276 = vrot.lane.b32.xlu0 %v16981_v5, %s13126_s26  ;;  %v12310_v5 = vpack.i.bf16 %v17091_v58, %v16990_v51 }
 0x831   :  { %12306 = vrot.lane.b32.xlu2 %v17032_v35, %s13126_s26 }
 0x835   :  { %v17175_v59 = vpop.permute.xlu0 %12096 }
 0x838   :  { %12286 = vrot.lane.b32.xlu1 %v12130_v37, %s13126_s26  ;;  %12296 = vrot.lane.b32.xlu0 %v17020_v31, %s13126_s26  ;;  %v12117_v37 = vpop.permute.xlu2 %12116 }
 0x839   :  { %12321 = vrot.lane.b32.xlu2 %v17173_v3, %s13126_s26  ;;  %v12119_v26 = vunpack.i.h.bf16 %v12117_v37  ;;  %v12118_v34 = vunpack.i.l.bf16 %v12117_v37  ;;  %v17208_v37 = vpack.i.bf16 %v17040_v56, %v17091_v58 }
 0x83b   :  { %v5603_v63 = vsel %vm230_vm5, %v12118_v34, %v12119_v26 }
 0x83d   :  { %v17186_v4 = vpop.permute.xlu0 %12106 }
 0x83e   :  { %v12108_v48 = vunpack.i.l.bf16 %v17186_v4 }
 0x840   :  { %12301 = vrot.lane.b32.xlu1 %v16999_v28, %s13126_s26  ;;  %12311 = vrot.lane.b32.xlu0 %v12310_v5, %s13126_s26  ;;  %v17197_v53 = vpop.permute.xlu2 %12141  ;;  %v5599_v40 = vsel %vm230_vm5, %v12114_v11, %v12108_v48 }
 0x841   :  { %12336 = vrot.lane.b32.xlu2 %v17056_v21, %s13127_s27  ;;  %v12144_v23 = vunpack.i.h.bf16 %v17197_v53 }
 0x845   :  { %v17188_v49 = vpop.permute.xlu1 %12126 }
 0x846   :  { %v12128_v62 = vunpack.i.l.bf16 %v17188_v49  ;;  %v12129_v47 = vunpack.i.h.bf16 %v17188_v49  ;;  %v12098_v49 = vunpack.i.l.bf16 %v17175_v59 }
 0x848   :  { %12316 = vrot.lane.b32.xlu1 %v12315_v0, %s13126_s26  ;;  %12326 = vrot.lane.b32.xlu0 %v12325_v33, %s13126_s26  ;;  %v12104_v0 = vunpack.i.h.bf16 %v12102_v61  ;;  %v12103_v33 = vunpack.i.l.bf16 %v12102_v61  ;;  %v5598_v61 = vsel %vm230_vm5, %v12113_v2, %v12114_v11 }
 0x849   :  { %12351 = vrot.lane.b32.xlu2 %v16967_v7, %s13127_s27 }
 0x84a   :  { %v5594_v34 = vsel %vm230_vm5, %v12104_v0, %v12098_v49 }
 0x84b   :  { %v12122_v38 = vpop.permute.xlu0 %12121 }
 0x84c   :  { %v12124_v12 = vunpack.i.h.bf16 %v12122_v38  ;;  %v12123_v13 = vunpack.i.l.bf16 %v12122_v38  ;;  %v5604_v38 = vsel %vm230_vm5, %v12119_v26, %v12129_v47  ;;  %v17238_v26 = vpack.i.bf16 %v17061_v14, %v17072_v18 }
 0x84d   :  { %v17204_v5 = vpop.permute.xlu1 %12131 }
 0x84e   :  { %v5608_v25 = vsel %vm230_vm5, %v12123_v13, %v12124_v12  ;;  %v5609_v6 = vsel %vm230_vm5, %v12124_v12, %v12128_v62  ;;  %v17230_v12 = vpop.permute.xlu2 %12156 }
 0x84f   :  { %5661 = vmatpush.msrb.mxu0 %v5608_v25  ;;  %5690 = vmatpush.msra.mxu1 %v5609_v6  ;;  %v17251_v25 = vld [vmem:[%s20516_s10 + $0x28] sm:$0xff]  ;;  %v12143_v6 = vunpack.i.l.bf16 %v17197_v53  ;;  %v17299_v53 = vpack.i.bf16 %v17043_v43, %v16977_v1 }
 0x850   :  { %12331 = vrot.lane.b32.xlu1 %v12330_v29, %s13126_s26  ;;  %12341 = vrot.lane.b32.xlu0 %v17020_v31, %s13127_s27  ;;  %v5593_v29 = vsel %vm230_vm5, %v12103_v33, %v12104_v0  ;;  %v12109_v0 = vunpack.i.h.bf16 %v17186_v4 }
 0x851   :  { %12366 = vrot.lane.b32.xlu2 %v17208_v37, %s13127_s27  ;;  %5662 = vmatpush.msrb.mxu0 %v5603_v63  ;;  %v12099_v63 = vunpack.i.h.bf16 %v17175_v59 }
 0x852   :  { %5691 = vmatpush.msra.mxu1 %v5604_v38  ;;  %v17261_v38 = vpack.i.bf16 %v16974_v15, %v16990_v51  ;;  %v5600_v59 = vsel %vm230_vm5, %v12108_v48, %v12109_v0 }
 0x853   :  { %5663 = vmatpush.msrb.mxu0 %v5598_v61  ;;  %v17265_v61 = vpack.i.bf16 %v17105_v60, %v17002_v57 }
 0x854   :  { %5692 = vmatpush.msra.mxu1 %v5599_v40  ;;  %v5605_v40 = vsel %vm230_vm5, %v12129_v47, %v12143_v6 }
 0x855   :  { %5664 = vmatpush.msrb.mxu0 %v5593_v29  ;;  %v17244_v13 = vpop.permute.xlu1 %12136 }
 0x856   :  { %5693 = vmatpush.msra.mxu1 %v5594_v34  ;;  %11202 = vmatmul.msk.f32.vlgmr.msrb.gmra.mxu0 %vm2738_vm15, %v17226_v22  ;;  %v17270_v4 = vpop.permute.xlu2 %12171 }
 0x857   :  { %11206 = vmatmul.msk.f32.vlgmr.msra.gmra.mxu1 %vm2738_vm15, %v17226_v22 }
 0x858   :  { %12346 = vrot.lane.b32.xlu1 %v16999_v28, %s13127_s27  ;;  %12356 = vrot.lane.b32.xlu0 %v17032_v35, %s13127_s27 }
 0x859   :  { %12381 = vrot.lane.b32.xlu2 %v17238_v26, %s13127_s27 }
 0x85a   :  { %v12147_v11 = vpop.permute.xlu0 %12146 }
 0x85b   :  { %v12148_v2 = vunpack.i.l.bf16 %v12147_v11  ;;  %v12149_v48 = vunpack.i.h.bf16 %v12147_v11  ;;  %v12138_v11 = vunpack.i.l.bf16 %v17244_v13 }
 0x85d   :  { %v5610_v33 = vsel %vm230_vm5, %v12128_v62, %v12148_v2 }
 0x85e   :  { %5719 = vmatpush.msrb.mxu2 %v5610_v33  ;;  %11203 = vmatmul.msk.f32.gmra.mxu0 %vm2738_vm15, %v17251_v25  ;;  %v5595_v33 = vsel %vm230_vm5, %v12098_v49, %v12099_v63  ;;  %v12139_v49 = vunpack.i.h.bf16 %v17244_v13  ;;  %v12133_v13 = vunpack.i.l.bf16 %v17204_v5 }
 0x85f   :  { %11207 = vmatmul.msk.f32.gmra.mxu1 %vm2738_vm15, %v17251_v25 }
 0x860   :  { %5720 = vmatpush.msrb.mxu2 %v5605_v40  ;;  %12361 = vrot.lane.b32.xlu1 %v17261_v38, %s13127_s27  ;;  %v17285_v40 = vld [vmem:[%s20516_s10 + $0x30] sm:$0xff] }
 0x861   :  { %12371 = vrot.lane.b32.xlu0 %v17265_v61, %s13127_s27  ;;  %12396 = vrot.lane.b32.xlu2 %v17056_v21, %s13128_s19 }
 0x862   :  { %v12152_v62 = vpop.permute.xlu1 %12151  ;;  %v17279_v29 = vpop.permute.xlu0 %12161  ;;  %5721 = vmatpush.msrb.mxu2 %v5600_v59 }
 0x863   :  { %v12154_v47 = vunpack.i.h.bf16 %v12152_v62  ;;  %v12153_v34 = vunpack.i.l.bf16 %v12152_v62 }
 0x864   :  { %5722 = vmatpush.msrb.mxu2 %v5595_v33 }
 0x865   :  { %11210 = vmatmul.msk.f32.vlgmr.msrb.gmra.mxu2 %vm2738_vm15, %v17226_v22  ;;  %5806 = vmatpush.msrb.mxu1 %v12154_v47  ;;  %v5611_v45 = vsel %vm230_vm5, %v12148_v2, %v12153_v34  ;;  %v5612_v59 = vsel %vm230_vm5, %v12153_v34, %v12154_v47  ;;  %v12134_v2 = vunpack.i.h.bf16 %v17204_v5  ;;  %v5607_v47 = vsel %vm230_vm5, %v12144_v23, %v12149_v48 }
 0x866   :  { %11227 = vmatpush.msk.msra.mxu2 %vm15114_vm0, %v17045_v44  ;;  %5748 = vmatpush.msra.mxu3 %v5611_v45  ;;  %v5606_v45 = vsel %vm230_vm5, %v12143_v6, %v12144_v23  ;;  %v17313_v44 = vpack.i.bf16 %v16959_v36, %v17026_v20  ;;  %v17326_v36 = vpop.permute.xlu2 %12186  ;;  %v5601_v5 = vsel %vm230_vm5, %v12109_v0, %v12138_v11 }
 0x867   :  { %11204 = vmatmul.msk.f32.gmra.mxu0 %vm2738_vm15, %v17285_v40  ;;  %5807 = vmatpush.msrb.mxu1 %v12149_v48  ;;  %v5602_v6 = vsel %vm230_vm5, %v12138_v11, %v12139_v49  ;;  %v5596_v23 = vsel %vm230_vm5, %v12099_v63, %v12133_v13  ;;  %v5597_v33 = vsel %vm230_vm5, %v12133_v13, %v12134_v2  ;;  %v12164_v13 = vunpack.i.h.bf16 %v17279_v29 }
 0x868   :  { %11208 = vmatmul.msk.f32.gmra.mxu1 %vm2738_vm15, %v17285_v40  ;;  %5777 = vmatpush.msra.mxu0 %v5612_v59 }
 0x869   :  { %11229 = vmatpush.msk.msra.mxu2 %vm15114_vm0, %v16955_v50  ;;  %12376 = vrot.lane.b32.xlu1 %v17299_v53, %s13127_s27 }
 0x86a   :  { %12386 = vrot.lane.b32.xlu0 %v17115_v32, %s13127_s27  ;;  %5749 = vmatpush.msra.mxu3 %v5606_v45  ;;  %v17320_v50 = vpop.permute.xlu1 %12166  ;;  %v17322_v34 = vpop.permute.xlu0 %12176 }
 0x86b   :  { %5778 = vmatpush.msra.mxu0 %v5607_v47  ;;  %12411 = vrot.lane.b32.xlu2 %v17313_v44, %s13128_s19  ;;  %v12179_v45 = vunpack.i.h.bf16 %v17322_v34 }
 0x86c   :  { %5808 = vmatpush.msrb.mxu1 %v12139_v49  ;;  %11231 = vmatpush.msk.msra.mxu2 %vm15114_vm0, %v16987_v46  ;;  %v17343_v46 = vld [vmem:[%s20516_s10 + $0x38] sm:$0xff] }
 0x86d   :  { %5750 = vmatpush.msra.mxu3 %v5601_v5  ;;  %5779 = vmatpush.msra.mxu0 %v5602_v6 }
 0x86e   :  { %5809 = vmatpush.msrb.mxu1 %v12134_v2  ;;  %11233 = vmatpush.msk.msra.mxu2 %vm15114_vm0, %v16951_v10 }
 0x86f   :  { %5751 = vmatpush.msra.mxu3 %v5596_v23  ;;  %5780 = vmatpush.msra.mxu0 %v5597_v33 }
 0x870   :  { %5934 = vmatpush.msra.mxu1 %v17091_v58  ;;  %5963 = vmatpush.msrb.mxu2 %v17105_v60  ;;  %v17397_v60 = vpack.i.bf16 %v17023_v8, %v16963_v9 }
 0x871   :  { %11211 = vmatmul.msk.f32.gmra.mxu2 %vm2738_vm15, %v17251_v25  ;;  %11214 = vmatmul.msk.f32.vlgmr.msra.gmra.mxu3 %vm2738_vm15, %v17226_v22 }
 0x872   :  { %5876 = vmatpush.msrb.mxu3 %v17051_v16  ;;  %5905 = vmatpush.msrb.mxu0 %v17026_v20  ;;  %v17351_v10 = vpop.permute.xlu0 %12191  ;;  %v17357_v58 = vpop.permute.xlu1 %12181 }
 0x873   :  { %11205 = vmatmul.msk.f32.gmra.mxu0 %vm2738_vm15, %v17343_v46  ;;  %11209 = vmatmul.msk.f32.gmra.mxu1 %vm2738_vm15, %v17343_v46  ;;  %v12202_v16 = vpop.permute.xlu2 %12201  ;;  %v12193_v0 = vunpack.i.l.bf16 %v17351_v10 }
 0x874   :  { %5935 = vmatpush.msra.mxu1 %v17040_v56  ;;  %5964 = vmatpush.msrb.mxu2 %v17043_v43  ;;  %v12204_v20 = vunpack.i.h.bf16 %v12202_v16  ;;  %v12189_v43 = vunpack.i.h.bf16 %v17326_v36 }
 0x875   :  { %5877 = vmatpush.msrb.mxu3 %v17014_v52  ;;  %5906 = vmatpush.msrb.mxu0 %v17023_v8  ;;  %v12203_v52 = vunpack.i.l.bf16 %v12202_v16  ;;  %v12168_v16 = vunpack.i.l.bf16 %v17320_v50 }
 0x876   :  { %12391 = vrot.lane.b32.xlu1 %v17082_v42, %s13127_s27  ;;  %12401 = vrot.lane.b32.xlu0 %v17020_v31, %s13128_s19 }
 0x877   :  { %5936 = vmatpush.msra.mxu1 %v17002_v57  ;;  %5965 = vmatpush.msrb.mxu2 %v17072_v18  ;;  %v12188_v18 = vunpack.i.l.bf16 %v17326_v36 }
 0x878   :  { %12426 = vrot.lane.b32.xlu2 %v17208_v37, %s13128_s19  ;;  %5878 = vmatpush.msrb.mxu3 %v16994_v39 }
 0x879   :  { %5907 = vmatpush.msrb.mxu0 %v16990_v51  ;;  %5937 = vmatpush.msra.mxu1 %v16977_v1  ;;  %v12174_v51 = vunpack.i.h.bf16 %v17270_v4 }
 0x87a   :  { %5966 = vmatpush.msrb.mxu2 %v17061_v14  ;;  %5879 = vmatpush.msrb.mxu3 %v16963_v9  ;;  %v17376_v56 = vpop.permute.xlu0 %12206  ;;  %v12173_v14 = vunpack.i.l.bf16 %v17270_v4  ;;  %v12159_v4 = vunpack.i.h.bf16 %v17230_v12  ;;  %v6072_v9 = vsel %vm651_vm8, %v12188_v18, %v12189_v43  ;;  %v6065_v18 = vsel %vm651_vm8, %v12164_v13, %v12168_v16 }
 0x87b   :  { %5908 = vmatpush.msrb.mxu0 %v16974_v15  ;;  %v12208_v39 = vunpack.i.l.bf16 %v17376_v56  ;;  %11212 = vmatmul.msk.f32.gmra.mxu2 %vm2738_vm15, %v17285_v40  ;;  %v6077_v15 = vsel %vm651_vm8, %v12203_v52, %v12204_v20  ;;  %v12209_v11 = vunpack.i.h.bf16 %v17376_v56  ;;  %v17480_v6 = vpop.permute.xlu2 %12216  ;;  %v17507_v56 = vld [vmem:[%s20516_s10 + $0x10] sm:$0xff] }
 0x87c   :  { %11254 = vmatpush.msk.msra.mxu3 %vm205_vm4, %v17108_v41  ;;  %11218 = vmatmul.msk.f32.vlgmr.msra.gmra.mxu0 %vm2738_vm15, %v17226_v22  ;;  %v17399_v41 = vpop.permute.xlu1 %12196  ;;  %v6067_v8 = vsel %vm651_vm8, %v12173_v14, %v12174_v51 }
 0x87d   :  { %11215 = vmatmul.msk.f32.gmra.mxu3 %vm2738_vm15, %v17251_v25  ;;  %11222 = vmatmul.msk.f32.vlgmr.msrb.gmra.mxu1 %vm2738_vm15, %v17226_v22  ;;  %v6078_v63 = vsel %vm651_vm8, %v12204_v20, %v12208_v39  ;;  %v12158_v22 = vunpack.i.l.bf16 %v17230_v12  ;;  %v12178_v12 = vunpack.i.l.bf16 %v17322_v34  ;;  %v6079_v2 = vsel %vm651_vm8, %v12208_v39, %v12209_v11 }
 0x87e   :  { %11255 = vmatpush.msk.msra.mxu3 %vm205_vm4, %v17087_v17  ;;  %6130 = vmatpush.msra.mxu0 %v6077_v15  ;;  %v6073_v17 = vsel %vm651_vm8, %v12189_v43, %v12193_v0  ;;  %v12198_v23 = vunpack.i.l.bf16 %v17399_v41  ;;  %v12199_v39 = vunpack.i.h.bf16 %v17399_v41  ;;  %v12184_v15 = vunpack.i.h.bf16 %v17357_v58 }
 0x87f   :  { %12406 = vrot.lane.b32.xlu1 %v16999_v28, %s13128_s19  ;;  %12416 = vrot.lane.b32.xlu0 %v17397_v60, %s13128_s19  ;;  %v6062_v48 = vsel %vm651_vm8, %v12158_v22, %v12159_v4  ;;  %v6068_v49 = vsel %vm651_vm8, %v12174_v51, %v12178_v12  ;;  %v6069_v34 = vsel %vm651_vm8, %v12178_v12, %v12179_v45  ;;  %v12169_v41 = vunpack.i.h.bf16 %v17320_v50 }
 0x880   :  { %11256 = vmatpush.msk.msra.mxu3 %vm205_vm4, %v17069_v27  ;;  %6131 = vmatpush.msra.mxu0 %v6072_v9  ;;  %v12163_v27 = vunpack.i.l.bf16 %v17279_v29 }
 0x881   :  { %12441 = vrot.lane.b32.xlu2 %v17238_v26, %s13128_s19  ;;  %6159 = vmatpush.msrb.mxu1 %v6078_v63  ;;  %v6076_v63 = vsel %vm651_vm8, %v12198_v23, %v12199_v39 }
 0x882   :  { %11257 = vmatpush.msk.msra.mxu3 %vm205_vm4, %v17035_v55  ;;  %6132 = vmatpush.msra.mxu0 %v6067_v8  ;;  %v17431_v55 = vpack.i.bf16 %v16977_v1, %v17002_v57  ;;  %v6063_v1 = vsel %vm651_vm8, %v12159_v4, %v12163_v27  ;;  %v17449_v57 = vld [vmem:[%s20516_s10] sm:$0xff]  ;;  %v6064_v5 = vsel %vm651_vm8, %v12163_v27, %v12164_v13  ;;  %v17483_v33 = vpop.permute.xlu0 %12221 }
 0x883   :  { %6160 = vmatpush.msrb.mxu1 %v6073_v17  ;;  %11213 = vmatmul.msk.f32.gmra.mxu2 %vm2738_vm15, %v17343_v46  ;;  %v17516_v51 = vpop.permute.xlu2 %12231  ;;  %v6066_v4 = vsel %vm651_vm8, %v12168_v16, %v12169_v41 }
 0x884   :  { %6133 = vmatpush.msra.mxu0 %v6062_v48  ;;  %v17439_v59 = vpop.permute.xlu1 %12211  ;;  %v12234_v27 = vunpack.i.h.bf16 %v17516_v51 }
 0x885   :  { %11216 = vmatmul.msk.f32.gmra.mxu3 %vm2738_vm15, %v17285_v40  ;;  %11219 = vmatmul.msk.f32.gmra.mxu0 %vm2738_vm15, %v17251_v25  ;;  %v12213_v36 = vunpack.i.l.bf16 %v17439_v59 }
 0x886   :  { %11223 = vmatmul.msk.f32.gmra.mxu1 %vm2738_vm15, %v17251_v25  ;;  %v12194_v25 = vunpack.i.h.bf16 %v17351_v10 }
 0x887   :  { %12421 = vrot.lane.b32.xlu1 %v17261_v38, %s13128_s19  ;;  %12431 = vrot.lane.b32.xlu0 %v17431_v55, %s13128_s19  ;;  %v6080_v10 = vsel %vm651_vm8, %v12209_v11, %v12213_v36  ;;  %v12218_v11 = vunpack.i.l.bf16 %v17480_v6 }
 0x888   :  { %6161 = vmatpush.msrb.mxu1 %v6068_v49  ;;  %v6074_v47 = vsel %vm651_vm8, %v12193_v0, %v12194_v25  ;;  %v6075_v20 = vsel %vm651_vm8, %v12194_v25, %v12198_v23 }
 0x889   :  { %12456 = vrot.lane.b32.xlu2 %v17056_v21, %s13129_s28 }
 0x88a   :  { %6162 = vmatpush.msrb.mxu1 %v6063_v1  ;;  %v17518_v14 = vpop.permute.xlu0 %12236 }
 0x88b   :  { %11234 = vmatmul.msk.f32.vlgmr.msra.gmra.mxu2 %vm2738_vm15, %v17449_v57  ;;  %v12247_v22 = vpop.permute.xlu2 %12246 }
 0x88c   :  { %6188 = vmatpush.msra.mxu2 %v6079_v2  ;;  %v17472_v29 = vpop.permute.xlu1 %12226  ;;  %v12249_v17 = vunpack.i.h.bf16 %v12247_v22  ;;  %v12248_v12 = vunpack.i.l.bf16 %v12247_v22 }
 0x88d   :  { %11217 = vmatmul.msk.f32.gmra.mxu3 %vm2738_vm15, %v17343_v46  ;;  %11220 = vmatmul.msk.f32.gmra.mxu0 %vm2738_vm15, %v17285_v40 }
 0x88e   :  { %11224 = vmatmul.msk.f32.gmra.mxu1 %vm2738_vm15, %v17285_v40  ;;  %6189 = vmatpush.msra.mxu2 %v6074_v47  ;;  %v17477_v40 = vld [vmem:[%s20516_s10 + $0x8] sm:$0xff] }
 0x88f   :  { %12436 = vrot.lane.b32.xlu1 %v17173_v3, %s13128_s19  ;;  %12446 = vrot.lane.b32.xlu0 %v17115_v32, %s13128_s19 }
 0x890   :  { %6190 = vmatpush.msra.mxu2 %v6069_v34 }
 0x891   :  { %12471 = vrot.lane.b32.xlu2 %v16967_v7, %s13129_s28  ;;  %v12183_v7 = vunpack.i.l.bf16 %v17357_v58  ;;  %v17537_v58 = vld [vmem:[%s20516_s10 + $0x18] sm:$0xff] }
 0x892   :  { %6191 = vmatpush.msra.mxu2 %v6064_v5  ;;  %v17551_v9 = vpop.permute.xlu0 %12251 }
 0x893   :  { %11235 = vmatmul.msk.f32.gmra.mxu2 %vm2738_vm15, %v17477_v40  ;;  %v6070_v52 = vsel %vm651_vm8, %v12179_v45, %v12183_v7  ;;  %v6071_v50 = vsel %vm651_vm8, %v12183_v7, %v12184_v15  ;;  %v12254_v48 = vunpack.i.h.bf16 %v17551_v9  ;;  %v12253_v2 = vunpack.i.l.bf16 %v17551_v9  ;;  %v17614_v7 = vld [vmem:[%s20516_s10 + $0x40] sm:$0xff] }
 0x894   :  { %v17510_v43 = vpop.permute.xlu1 %12241 }
 0x895   :  { %11238 = vmatmul.msk.f32.vlgmr.msrb.gmra.mxu3 %vm2738_vm15, %v17449_v57  ;;  %11221 = vmatmul.msk.f32.gmra.mxu0 %vm2738_vm15, %v17343_v46  ;;  %v6380_v34 = vsel %vm896_vm9, %v12249_v17, %v12253_v2 }
 0x896   :  { %6217 = vmatpush.msrb.mxu3 %v6080_v10  ;;  %11225 = vmatmul.msk.f32.gmra.mxu1 %vm2738_vm15, %v17343_v46  ;;  %v12214_v46 = vunpack.i.h.bf16 %v17439_v59  ;;  %v12233_v59 = vunpack.i.l.bf16 %v17516_v51 }
 0x897   :  { %12451 = vrot.lane.b32.xlu1 %v17082_v42, %s13128_s19  ;;  %12461 = vrot.lane.b32.xlu0 %v17020_v31, %s13129_s28 }
 0x898   :  { %6218 = vmatpush.msrb.mxu3 %v6075_v20  ;;  %v6081_v0 = vsel %vm651_vm8, %v12213_v36, %v12214_v46  ;;  %v6374_v1 = vsel %vm896_vm9, %v12233_v59, %v12234_v27  ;;  %v12262_v36 = vpop.permute.xlu2 %12261  ;;  %v12243_v20 = vunpack.i.l.bf16 %v17510_v43 }
 0x899   :  { %12486 = vrot.lane.b32.xlu2 %v17208_v37, %s13129_s28  ;;  %v12263_v10 = vunpack.i.l.bf16 %v12262_v36 }
 0x89a   :  { %6219 = vmatpush.msrb.mxu3 %v6070_v52  ;;  %v17596_v47 = vpop.permute.xlu0 %12266 }
 0x89b   :  { %11236 = vmatmul.msk.f32.gmra.mxu2 %vm2738_vm15, %v17507_v56  ;;  %v12268_v5 = vunpack.i.l.bf16 %v17596_v47 }
 0x89c   :  { %6220 = vmatpush.msrb.mxu3 %v6065_v18  ;;  %v12228_v18 = vunpack.i.l.bf16 %v17472_v29 }
 0x89d   :  { %11239 = vmatmul.msk.f32.gmra.mxu3 %vm2738_vm15, %v17477_v40  ;;  %11242 = vmatmul.msk.f32.vlgmr.msrb.gmra.mxu0 %vm2738_vm15, %v17449_v57 }
 0x89e   :  { %11246 = vmatmul.msk.f32.vlgmr.msra.gmra.mxu1 %vm2738_vm15, %v17449_v57  ;;  %6246 = vmatpush.msrb.mxu0 %v6081_v0  ;;  %v8158_v0 = vld [vmem:[%s20517_s11] sm:$0xff] }
 0x89f   :  { %6275 = vmatpush.msra.mxu1 %v12214_v46  ;;  %12466 = vrot.lane.b32.xlu1 %v16999_v28, %s13129_s28  ;;  %v12224_v46 = vunpack.i.h.bf16 %v17483_v33 }
 0x8a0   :  { %12476 = vrot.lane.b32.xlu0 %v17032_v35, %s13129_s28  ;;  %6247 = vmatpush.msrb.mxu0 %v6076_v63  ;;  %v17545_v35 = vpop.permute.xlu1 %12256 }
 0x8a1   :  { %6276 = vmatpush.msra.mxu1 %v12199_v39  ;;  %12501 = vrot.lane.b32.xlu2 %v17238_v26, %s13129_s28  ;;  %v12258_v8 = vunpack.i.l.bf16 %v17545_v35  ;;  %v12259_v25 = vunpack.i.h.bf16 %v17545_v35 }
 0x8a2   :  { %6248 = vmatpush.msrb.mxu0 %v6071_v50  ;;  %v17660_v63 = vpop.permute.xlu0 %12276  ;;  %v17669_v50 = vld [vmem:[%s20516_s10 + $0x50] sm:$0xff] }
 0x8a3   :  { %6277 = vmatpush.msra.mxu1 %v12184_v15  ;;  %11237 = vmatmul.msk.f32.gmra.mxu2 %vm2738_vm15, %v17537_v58  ;;  %v6384_v49 = vsel %vm896_vm9, %v12254_v48, %v12258_v8  ;;  %v6385_v13 = vsel %vm896_vm9, %v12258_v8, %v12259_v25  ;;  %v6386_v16 = vsel %vm896_vm9, %v12259_v25, %v12268_v5  ;;  %v8209_v48 = vld [vmem:[%s20518_s12 + $0x18] sm:$0xff] }
 0x8a4   :  { %6249 = vmatpush.msrb.mxu0 %v6066_v4  ;;  %v12244_v4 = vunpack.i.h.bf16 %v17510_v43  ;;  %v8161_v43 = vld [vmem:[%s20517_s11 + $0x18] sm:$0xff] }
 0x8a5   :  { %11240 = vmatmul.msk.f32.gmra.mxu3 %vm2738_vm15, %v17507_v56  ;;  %6278 = vmatpush.msra.mxu1 %v12169_v41 }
 0x8a6   :  { %11243 = vmatmul.msk.f32.gmra.mxu0 %vm2738_vm15, %v17477_v40  ;;  %11247 = vmatmul.msk.f32.gmra.mxu1 %vm2738_vm15, %v17477_v40 }
 0x8a7   :  { %12481 = vrot.lane.b32.xlu1 %v17261_v38, %s13129_s28 }
 0x8a8   :  { %12491 = vrot.lane.b32.xlu0 %v17265_v61, %s13129_s28  ;;  %v12219_v61 = vunpack.i.h.bf16 %v17480_v6  ;;  %v12269_v6 = vunpack.i.h.bf16 %v17596_v47  ;;  %v12282_v15 = vpop.permute.xlu1 %12281  ;;  %v8206_v47 = vld [vmem:[%s20518_s12] sm:$0xff] }
 0x8a9   :  { %12516 = vrot.lane.b32.xlu2 %v17056_v21, %s13130_s29  ;;  %v6379_v21 = vsel %vm896_vm9, %v12248_v12, %v12249_v17  ;;  %v12284_v41 = vunpack.i.h.bf16 %v12282_v15  ;;  %v17697_v17 = vld [vmem:[%s20516_s10 + $0x58] sm:$0xff]  ;;  %v8159_v12 = vld [vmem:[%s20517_s11 + $0x8] sm:$0xff] }
 0x8aa   :  { %v6369_v45 = vsel %vm896_vm9, %v12218_v11, %v12219_v61  ;;  %v6387_v52 = vsel %vm896_vm9, %v12268_v5, %v12269_v6 }
 0x8ab   :  { %11250 = vmatmul.msk.f32.vlgmr.msrb.gmra.mxu2 %vm2738_vm15, %v17449_v57  ;;  %v6388_v35 = vsel %vm896_vm9, %v12269_v6, %v12284_v41 }
 0x8ac   :  { %6437 = vmatpush.msrb.mxu2 %v6384_v49 }
 0x8ad   :  { %11241 = vmatmul.msk.f32.gmra.mxu3 %vm2738_vm15, %v17537_v58 }
 0x8ae   :  { %11244 = vmatmul.msk.f32.gmra.mxu0 %vm2738_vm15, %v17507_v56  ;;  %11248 = vmatmul.msk.f32.gmra.mxu1 %vm2738_vm15, %v17507_v56 }
 0x8af   :  { %6438 = vmatpush.msrb.mxu2 %v6379_v21  ;;  %12496 = vrot.lane.b32.xlu1 %v17299_v53, %s13129_s28  ;;  %v12238_v53 = vunpack.i.l.bf16 %v17518_v14 }
 0x8b0   :  { %12506 = vrot.lane.b32.xlu0 %v17115_v32, %s13129_s28  ;;  %v17689_v9 = vpop.permute.xlu1 %12286 }
 0x8b1   :  { %6439 = vmatpush.msrb.mxu2 %v6374_v1  ;;  %12531 = vrot.lane.b32.xlu2 %v17313_v44, %s13130_s29  ;;  %v12223_v44 = vunpack.i.l.bf16 %v17483_v33 }
 0x8b3   :  { %6440 = vmatpush.msrb.mxu2 %v6369_v45  ;;  %v6370_v23 = vsel %vm896_vm9, %v12219_v61, %v12223_v44 }
 0x8b4   :  { %11251 = vmatmul.msk.f32.gmra.mxu2 %vm2738_vm15, %v17477_v40 }
 0x8b5   :  { %11258 = vmatmul.msk.f32.vlgmr.msra.gmra.mxu3 %vm2738_vm15, %v17449_v57  ;;  %v6375_v57 = vsel %vm896_vm9, %v12234_v27, %v12238_v53 }
 0x8b6   :  { %6466 = vmatpush.msra.mxu3 %v6385_v13  ;;  %11245 = vmatmul.msk.f32.gmra.mxu0 %vm2738_vm15, %v17537_v58 }
 0x8b7   :  { %11249 = vmatmul.msk.f32.gmra.mxu1 %vm2738_vm15, %v17537_v58  ;;  %12511 = vrot.lane.b32.xlu1 %v17082_v42, %s13129_s28 }
 0x8b8   :  { %6467 = vmatpush.msra.mxu3 %v6380_v34  ;;  %12521 = vrot.lane.b32.xlu0 %v17020_v31, %s13130_s29  ;;  %v12264_v31 = vunpack.i.h.bf16 %v12262_v36  ;;  %v12302_v11 = vpop.permute.xlu1 %12301 }
 0x8b9   :  { %12546 = vrot.lane.b32.xlu2 %v17208_v37, %s13130_s29  ;;  %v12239_v37 = vunpack.i.h.bf16 %v17518_v14  ;;  %v17645_v14 = vpop.permute.xlu2 %12271  ;;  %v12303_v13 = vunpack.i.l.bf16 %v12302_v11 }
 0x8ba   :  { %6468 = vmatpush.msra.mxu3 %v6375_v57  ;;  %v6382_v39 = vsel %vm896_vm9, %v12263_v10, %v12264_v31  ;;  %v12274_v5 = vunpack.i.h.bf16 %v17645_v14  ;;  %v12273_v6 = vunpack.i.l.bf16 %v17645_v14 }
 0x8bb   :  { %v6376_v33 = vsel %vm896_vm9, %v12238_v53, %v12239_v37  ;;  %v6377_v51 = vsel %vm896_vm9, %v12239_v37, %v12243_v20  ;;  %v12304_v53 = vunpack.i.h.bf16 %v12302_v11 }
 0x8bc   :  { %6469 = vmatpush.msra.mxu3 %v6370_v23  ;;  %11252 = vmatmul.msk.f32.gmra.mxu2 %vm2738_vm15, %v17507_v56 }
 0x8bd   :  { %11259 = vmatmul.msk.f32.gmra.mxu3 %vm2738_vm15, %v17477_v40  ;;  %v6381_v40 = vsel %vm896_vm9, %v12253_v2, %v12263_v10 }
 0x8be   :  { %11266 = vmatmul.msk.f32.vlgmr.msra.gmra.mxu0 %vm2738_vm15, %v17614_v7 }
 0x8bf   :  { %11270 = vmatmul.msk.f32.vlgmr.msrb.gmra.mxu1 %vm2738_vm15, %v17614_v7  ;;  %6495 = vmatpush.msra.mxu0 %v6386_v16  ;;  %v6676_v16 = vsel %vm1141_vm10, %v12273_v6, %v12274_v5 }
 0x8c0   :  { %6524 = vmatpush.msrb.mxu1 %v6387_v52  ;;  %12526 = vrot.lane.b32.xlu1 %v16999_v28, %s13130_s29  ;;  %v17643_v28 = vld [vmem:[%s20516_s10 + $0x48] sm:$0xff] }
 0x8c1   :  { %12536 = vrot.lane.b32.xlu0 %v17397_v60, %s13130_s29  ;;  %6496 = vmatpush.msra.mxu0 %v6381_v40  ;;  %v6371_v60 = vsel %vm896_vm9, %v12223_v44, %v12224_v46  ;;  %v8207_v52 = vld [vmem:[%s20518_s12 + $0x8] sm:$0xff] }
 0x8c2   :  { %6525 = vmatpush.msrb.mxu1 %v6382_v39  ;;  %12561 = vrot.lane.b32.xlu2 %v17238_v26, %s13130_s29  ;;  %v6372_v26 = vsel %vm896_vm9, %v12224_v46, %v12228_v18  ;;  %v8208_v46 = vld [vmem:[%s20518_s12 + $0x10] sm:$0xff]  ;;  %v12317_v39 = vpop.permute.xlu1 %12316 }
 0x8c3   :  { %6497 = vmatpush.msra.mxu0 %v6376_v33  ;;  %v12318_v14 = vunpack.i.l.bf16 %v12317_v39 }
 0x8c4   :  { %6526 = vmatpush.msrb.mxu1 %v6377_v51  ;;  %11253 = vmatmul.msk.f32.gmra.mxu2 %vm2738_vm15, %v17537_v58  ;;  %v17777_v51 = vld [vmem:[%s20516_s10 + $0x60] sm:$0xff] }
 0x8c5   :  { %6498 = vmatpush.msra.mxu0 %v6371_v60  ;;  %11260 = vmatmul.msk.f32.gmra.mxu3 %vm2738_vm15, %v17507_v56  ;;  %v12283_v56 = vunpack.i.l.bf16 %v12282_v15  ;;  %v12319_v15 = vunpack.i.h.bf16 %v12317_v39 }
 0x8c6   :  { %6527 = vmatpush.msrb.mxu1 %v6372_v26  ;;  %11267 = vmatmul.msk.f32.gmra.mxu0 %vm2738_vm15, %v17643_v28 }
 0x8c7   :  { %11271 = vmatmul.msk.f32.gmra.mxu1 %vm2738_vm15, %v17643_v28  ;;  %v6383_v22 = vsel %vm896_vm9, %v12264_v31, %v12283_v56  ;;  %v12278_v31 = vunpack.i.l.bf16 %v17660_v63 }
 0x8c8   :  { %12541 = vrot.lane.b32.xlu1 %v17261_v38, %s13130_s29  ;;  %v12292_v38 = vpop.permute.xlu2 %12291 }
 0x8c9   :  { %12551 = vrot.lane.b32.xlu0 %v17431_v55, %s13130_s29  ;;  %v12229_v55 = vunpack.i.h.bf16 %v17472_v29  ;;  %v12297_v29 = vpop.permute.xlu0 %12296  ;;  %v12294_v59 = vunpack.i.h.bf16 %v12292_v38  ;;  %v12293_v49 = vunpack.i.l.bf16 %v12292_v38 }
 0x8ca   :  { %8164 = vperm.xlu2 %11554, %v8158_v0   ;;  %v12299_v21 = vunpack.i.h.bf16 %v12297_v29  ;;  %v12298_v1 = vunpack.i.l.bf16 %v12297_v29 }
 0x8cb   :  { %v6373_v8 = vsel %vm896_vm9, %v12228_v18, %v12229_v55  ;;  %v6691_v44 = vsel %vm1141_vm10, %v12293_v49, %v12294_v59  ;;  %v17822_v49 = vld [vmem:[%s20516_s10 + $0x70] sm:$0xff] }
 0x8cc   :  { %11274 = vmatmul.msk.f32.vlgmr.msra.gmra.mxu2 %vm2738_vm15, %v17614_v7  ;;  %v6686_v23 = vsel %vm1141_vm10, %v12298_v1, %v12299_v21 }
 0x8cd   :  { %11261 = vmatmul.msk.f32.gmra.mxu3 %vm2738_vm15, %v17537_v58  ;;  %6553 = vmatpush.msra.mxu2 %v6388_v35  ;;  %v6378_v58 = vsel %vm896_vm9, %v12243_v20, %v12244_v4  ;;  %v6677_v20 = vsel %vm1141_vm10, %v12274_v5, %v12278_v31 }
 0x8ce   :  { %11268 = vmatmul.msk.f32.gmra.mxu0 %vm2738_vm15, %v17669_v50 }
 0x8cf   :  { %11272 = vmatmul.msk.f32.gmra.mxu1 %vm2738_vm15, %v17669_v50  ;;  %6554 = vmatpush.msra.mxu2 %v6383_v22 }
 0x8d0   :  { %12556 = vrot.lane.b32.xlu1 %v17173_v3, %s13130_s29  ;;  %v17717_v27 = vpop.permute.xlu2 %12306 }
 0x8d1   :  { %12566 = vrot.lane.b32.xlu0 %v17115_v32, %s13130_s29  ;;  %6555 = vmatpush.msra.mxu2 %v6378_v58  ;;  %v12308_v61 = vunpack.i.l.bf16 %v17717_v27  ;;  %v17722_v25 = vpop.permute.xlu0 %12311  ;;  %v12309_v34 = vunpack.i.h.bf16 %v17717_v27  ;;  %v12332_v27 = vpop.permute.xlu1 %12331 }
 0x8d2   :  { %8179 = vperm.xlu2 %11554, %v8161_v43   ;;  %v12313_v57 = vunpack.i.l.bf16 %v17722_v25  ;;  %v12314_v33 = vunpack.i.h.bf16 %v17722_v25  ;;  %v12334_v25 = vunpack.i.h.bf16 %v12332_v27 }
 0x8d3   :  { %6556 = vmatpush.msra.mxu2 %v6373_v8  ;;  %v17701_v3 = vpop.f32.mrf.mxu0  ;;  %v6692_v36 = vsel %vm1141_vm10, %v12294_v59, %v12308_v61  ;;  %v6687_v10 = vsel %vm1141_vm10, %v12299_v21, %v12309_v34  ;;  %v6688_v0 = vsel %vm1141_vm10, %v12309_v34, %v12318_v14 }
 0x8d4   :  { %11275 = vmatmul.msk.f32.gmra.mxu2 %vm2738_vm15, %v17643_v28  ;;  %v17705_v32 = vpop.f32.mrf.mxu1  ;;  %v6682_v37 = vsel %vm1141_vm10, %v12304_v53, %v12313_v57  ;;  %v6693_v26 = vsel %vm1141_vm10, %v12308_v61, %v12314_v33 }
 0x8d5   :  { %11278 = vmatmul.msk.f32.vlgmr.msrb.gmra.mxu3 %vm2738_vm15, %v17614_v7 }
 0x8d6   :  { %6582 = vmatpush.msrb.mxu3 %v12284_v41  ;;  %11269 = vmatmul.msk.f32.gmra.mxu0 %vm2738_vm15, %v17697_v17 }
 0x8d7   :  { %11273 = vmatmul.msk.f32.gmra.mxu1 %vm2738_vm15, %v17697_v17 }
 0x8d8   :  { %6583 = vmatpush.msrb.mxu3 %v12283_v56  ;;  %12571 = vrot.lane.b32.xlu1 %v17082_v42, %s13130_s29  ;;  %v8160_v42 = vld [vmem:[%s20517_s11 + $0x10] sm:$0xff]  ;;  %v12322_v41 = vpop.permute.xlu2 %12321  ;;  %v6683_v56 = vsel %vm1141_vm10, %v12313_v57, %v12319_v15  ;;  %v17847_v57 = vld [vmem:[%s20516_s10 + $0x78] sm:$0xff] }
 0x8d9   :  { %8169 = vperm.xlu0 %11552, %v8159_v12   ;;  %v12327_v38 = vpop.permute.xlu0 %12326  ;;  %v12323_v22 = vunpack.i.l.bf16 %v12322_v41  ;;  %v12288_v12 = vunpack.i.l.bf16 %v17689_v9 }
 0x8da   :  { %8227 = vperm.xlu2 %11554, %v8209_v48   ;;  %6584 = vmatpush.msrb.mxu3 %v12244_v4  ;;  %v12328_v43 = vunpack.i.l.bf16 %v12327_v38  ;;  %v12329_v61 = vunpack.i.h.bf16 %v12327_v38 }
 0x8db   :  { %v17726_v45 = vpop.f32.mrf.mxu0  ;;  %v6694_v58 = vsel %vm1141_vm10, %v12314_v33, %v12323_v22 }
 0x8dc   :  { %6585 = vmatpush.msrb.mxu3 %v12229_v55  ;;  %11276 = vmatmul.msk.f32.gmra.mxu2 %vm2738_vm15, %v17669_v50  ;;  %v17733_v2 = vpop.f32.mrf.mxu1  ;;  %v6684_v59 = vsel %vm1141_vm10, %v12319_v15, %v12328_v43 }
 0x8dd   :  { %11279 = vmatmul.msk.f32.gmra.mxu3 %vm2738_vm15, %v17643_v28 }
 0x8de   :  { %11282 = vmatmul.msk.f32.vlgmr.msrb.gmra.mxu0 %vm2738_vm15, %v17614_v7 }
 0x8df   :  { %11286 = vmatmul.msk.f32.vlgmr.msra.gmra.mxu1 %vm2738_vm15, %v17614_v7  ;;  %6744 = vmatpush.msrb.mxu0 %v6691_v44  ;;  %v6681_v7 = vsel %vm1141_vm10, %v12303_v13, %v12304_v53 }
 0x8e0   :  { %6773 = vmatpush.msra.mxu1 %v6692_v36  ;;  %8174 = vperm.xlu1 %11553, %v8160_v42   ;;  %v6695_v42 = vsel %vm1141_vm10, %v12323_v22, %v12329_v61  ;;  %v12337_v44 = vpop.permute.xlu2 %12336  ;;  %v6685_v36 = vsel %vm1141_vm10, %v12328_v43, %v12334_v25 }
 0x8e1   :  { %8212 = vperm.xlu0 %11552, %v8206_v47   ;;  %6745 = vmatpush.msrb.mxu0 %v6686_v23  ;;  %v12289_v47 = vunpack.i.h.bf16 %v17689_v9  ;;  %v12342_v23 = vpop.permute.xlu0 %12341 }
 0x8e2   :  { %6774 = vmatpush.msra.mxu1 %v6687_v10 }
 0x8e3   :  { %6746 = vmatpush.msrb.mxu0 %v6681_v7  ;;  %v6680_v9 = vsel %vm1141_vm10, %v12288_v12, %v12289_v47  ;;  %v12339_v7 = vunpack.i.h.bf16 %v12337_v44 }
 0x8e4   :  { %6775 = vmatpush.msra.mxu1 %v6682_v37  ;;  %11277 = vmatmul.msk.f32.gmra.mxu2 %vm2738_vm15, %v17697_v17  ;;  %v17767_v40 = vpop.f32.mrf.mxu0  ;;  %v12338_v37 = vunpack.i.l.bf16 %v12337_v44 }
 0x8e5   :  { %6747 = vmatpush.msrb.mxu0 %v6676_v16  ;;  %11280 = vmatmul.msk.f32.gmra.mxu3 %vm2738_vm15, %v17669_v50  ;;  %v17769_v18 = vpop.f32.mrf.mxu1 }
 0x8e6   :  { %6776 = vmatpush.msra.mxu1 %v6677_v20  ;;  %11283 = vmatmul.msk.f32.gmra.mxu0 %vm2738_vm15, %v17643_v28 }
 0x8e7   :  { %11287 = vmatmul.msk.f32.gmra.mxu1 %vm2738_vm15, %v17643_v28  ;;  %v12279_v28 = vunpack.i.h.bf16 %v17660_v63  ;;  %v17800_v63 = vld [vmem:[%s20516_s10 + $0x68] sm:$0xff] }
 0x8e8   :  { %8217 = vperm.xlu1 %11553, %v8207_v52   ;;  %v17779_v60 = vpop.f32.mrf.mxu2  ;;  %v12352_v20 = vpop.permute.xlu2 %12351  ;;  %v12344_v52 = vunpack.i.h.bf16 %v12342_v23 }
 0x8e9   :  { %8222 = vperm.xlu0 %11552, %v8208_v46   ;;  %v6678_v55 = vsel %vm1141_vm10, %v12278_v31, %v12279_v28  ;;  %v6679_v1 = vsel %vm1141_vm10, %v12279_v28, %v12288_v12  ;;  %v12347_v31 = vpop.permute.xlu1 %12346  ;;  %v12343_v46 = vunpack.i.l.bf16 %v12342_v23  ;;  %v12354_v28 = vunpack.i.h.bf16 %v12352_v20 }
 0x8ea   :  { %v12348_v15 = vunpack.i.l.bf16 %v12347_v31 }
 0x8ec   :  { %11294 = vmatmul.msk.f32.vlgmr.msrb.gmra.mxu2 %vm2738_vm15, %v17777_v51 }
 0x8ed   :  { %11281 = vmatmul.msk.f32.gmra.mxu3 %vm2738_vm15, %v17697_v17  ;;  %6802 = vmatpush.msrb.mxu2 %v6693_v26  ;;  %v6998_v26 = vsel %vm1386_vm11, %v12338_v37, %v12339_v7 }
 0x8ee   :  { %11284 = vmatmul.msk.f32.gmra.mxu0 %vm2738_vm15, %v17669_v50 }
 0x8ef   :  { %11288 = vmatmul.msk.f32.gmra.mxu1 %vm2738_vm15, %v17669_v50  ;;  %6803 = vmatpush.msrb.mxu2 %v6688_v0  ;;  %v12324_v50 = vunpack.i.h.bf16 %v12322_v41  ;;  %v12353_v0 = vunpack.i.l.bf16 %v12352_v20  ;;  %v12357_v41 = vpop.permute.xlu0 %12356 }
 0x8f0   :  { %v17793_v4 = vpop.f32.mrf.mxu0  ;;  %v17795_v35 = vpop.f32.mrf.mxu1  ;;  %v12358_v43 = vunpack.i.l.bf16 %v12357_v41  ;;  %v12359_v12 = vunpack.i.h.bf16 %v12357_v41 }
 0x8f1   :  { %6804 = vmatpush.msrb.mxu2 %v6683_v56  ;;  %v6689_v48 = vsel %vm1141_vm10, %v12318_v14, %v12324_v50  ;;  %v12349_v14 = vunpack.i.h.bf16 %v12347_v31  ;;  %v6993_v56 = vsel %vm1386_vm11, %v12343_v46, %v12344_v52  ;;  %v17921_v31 = vld [vmem:[%s20516_s10 + $0x80] sm:$0xff] }
 0x8f3   :  { %6805 = vmatpush.msrb.mxu2 %v6678_v55  ;;  %v17883_v55 = vpop.permute.xlu1 %12361 }
 0x8f4   :  { %11295 = vmatmul.msk.f32.gmra.mxu2 %vm2738_vm15, %v17800_v63  ;;  %v17808_v29 = vpop.f32.mrf.mxu2  ;;  %v17810_v8 = vpop.f32.mrf.mxu3 }
 0x8f5   :  { %11298 = vmatmul.msk.f32.vlgmr.msra.gmra.mxu3 %vm2738_vm15, %v17777_v51 }
 0x8f6   :  { %6831 = vmatpush.msra.mxu3 %v6694_v58  ;;  %11285 = vmatmul.msk.f32.gmra.mxu0 %vm2738_vm15, %v17697_v17  ;;  %v6983_v58 = vsel %vm1386_vm11, %v12353_v0, %v12354_v28 }
 0x8f7   :  { %11289 = vmatmul.msk.f32.gmra.mxu1 %vm2738_vm15, %v17697_v17  ;;  %v12333_v17 = vunpack.i.l.bf16 %v12332_v27  ;;  %v12367_v27 = vpop.permute.xlu2 %12366  ;;  %v17907_v44 = vpop.permute.xlu0 %12371 }
 0x8f8   :  { %6832 = vmatpush.msra.mxu3 %v6689_v48 }
 0x8f9   :  { %v17824_v11 = vpop.f32.mrf.mxu0  ;;  %v6690_v34 = vsel %vm1141_vm10, %v12324_v50, %v12333_v17  ;;  %v6988_v50 = vsel %vm1386_vm11, %v12348_v15, %v12349_v14 }
 0x8fa   :  { %6833 = vmatpush.msra.mxu3 %v6684_v59  ;;  %v17826_v21 = vpop.f32.mrf.mxu1 }
 0x8fc   :  { %6834 = vmatpush.msra.mxu3 %v6679_v1  ;;  %11296 = vmatmul.msk.f32.gmra.mxu2 %vm2738_vm15, %v17822_v49  ;;  %v6999_v1 = vsel %vm1386_vm11, %v12339_v7, %v12358_v43  ;;  %v12368_v7 = vunpack.i.l.bf16 %v12367_v27 }
 0x8fd   :  { %11299 = vmatmul.msk.f32.gmra.mxu3 %vm2738_vm15, %v17800_v63 }
 0x8fe   :  { %11302 = vmatmul.msk.f32.vlgmr.msra.gmra.mxu0 %vm2738_vm15, %v17777_v51  ;;  %v17838_v53 = vpop.f32.mrf.mxu2  ;;  %v7000_v15 = vsel %vm1386_vm11, %v12358_v43, %v12368_v7 }
 0x8ff   :  { %11306 = vmatmul.msk.f32.vlgmr.msrb.gmra.mxu1 %vm2738_vm15, %v17777_v51  ;;  %6860 = vmatpush.msra.mxu0 %v6695_v42  ;;  %v17930_v46 = vpop.permute.xlu2 %12381 }
 0x900   :  { %v17840_v13 = vpop.f32.mrf.mxu3  ;;  %6889 = vmatpush.msrb.mxu1 %v12329_v61  ;;  %v12363_v61 = vunpack.i.l.bf16 %v17883_v55 }
 0x901   :  { %6861 = vmatpush.msra.mxu0 %v6690_v34  ;;  %v17912_v34 = vpop.permute.xlu1 %12376 }
 0x902   :  { %6890 = vmatpush.msrb.mxu1 %v12333_v17  ;;  %v17850_v5 = vpop.f32.mrf.mxu0  ;;  %v12364_v17 = vunpack.i.h.bf16 %v17883_v55  ;;  %v12379_v20 = vunpack.i.h.bf16 %v17912_v34  ;;  %v12378_v0 = vunpack.i.l.bf16 %v17912_v34  ;;  %v12383_v55 = vunpack.i.l.bf16 %v17930_v46 }
 0x903   :  { %6862 = vmatpush.msra.mxu0 %v6685_v36  ;;  %v17852_v6 = vpop.f32.mrf.mxu1  ;;  %v12374_v36 = vunpack.i.h.bf16 %v17907_v44 }
 0x904   :  { %6891 = vmatpush.msrb.mxu1 %v12334_v25  ;;  %11297 = vmatmul.msk.f32.gmra.mxu2 %vm2738_vm15, %v17847_v57  ;;  %v6994_v25 = vsel %vm1386_vm11, %v12344_v52, %v12359_v12  ;;  %v12369_v52 = vunpack.i.h.bf16 %v12367_v27 }
 0x905   :  { %6863 = vmatpush.msra.mxu0 %v6680_v9  ;;  %11300 = vmatmul.msk.f32.gmra.mxu3 %vm2738_vm15, %v17822_v49  ;;  %v6984_v9 = vsel %vm1386_vm11, %v12354_v28, %v12364_v17 }
 0x906   :  { %6892 = vmatpush.msrb.mxu1 %v12289_v47  ;;  %11303 = vmatmul.msk.f32.gmra.mxu0 %vm2738_vm15, %v17800_v63  ;;  %v17863_v10 = vpop.f32.mrf.mxu2 }
 0x907   :  { %11307 = vmatmul.msk.f32.gmra.mxu1 %vm2738_vm15, %v17800_v63 }
 0x908   :  { %v17865_v16 = vpop.f32.mrf.mxu3 }
 0x90a   :  { %v17867_v39 = vpop.f32.mrf.mxu0 }
 0x90b   :  { %v17869_v33 = vpop.f32.mrf.mxu1 }
 0x90c   :  { %11310 = vmatmul.msk.f32.vlgmr.msra.gmra.mxu2 %vm2738_vm15, %v17777_v51 }
 0x90d   :  { %11301 = vmatmul.msk.f32.gmra.mxu3 %vm2738_vm15, %v17847_v57  ;;  %7051 = vmatpush.msra.mxu2 %v6998_v26  ;;  %v7001_v26 = vsel %vm1386_vm11, %v12368_v7, %v12374_v36 }
 0x90e   :  { %11304 = vmatmul.msk.f32.gmra.mxu0 %vm2738_vm15, %v17822_v49  ;;  %v17881_v38 = vpop.f32.mrf.mxu2 }
 0x90f   :  { %11308 = vmatmul.msk.f32.gmra.mxu1 %vm2738_vm15, %v17822_v49  ;;  %7052 = vmatpush.msra.mxu2 %v6993_v56  ;;  %v6995_v56 = vsel %vm1386_vm11, %v12359_v12, %v12369_v52 }
 0x910   :  { %v17885_v22 = vpop.f32.mrf.mxu3 }
 0x911   :  { %7053 = vmatpush.msra.mxu2 %v6988_v50  ;;  %v6996_v50 = vsel %vm1386_vm11, %v12369_v52, %v12379_v20 }
 0x912   :  { %v17889_v48 = vpop.f32.mrf.mxu0 }
 0x913   :  { %7054 = vmatpush.msra.mxu2 %v6983_v58  ;;  %v17891_v59 = vpop.f32.mrf.mxu1  ;;  %v12384_v58 = vunpack.i.h.bf16 %v17930_v46 }
 0x914   :  { %11311 = vmatmul.msk.f32.gmra.mxu2 %vm2738_vm15, %v17800_v63 }
 0x915   :  { %11314 = vmatmul.msk.f32.vlgmr.msrb.gmra.mxu3 %vm2738_vm15, %v17777_v51  ;;  %v6989_v51 = vsel %vm1386_vm11, %v12349_v14, %v12363_v61  ;;  %v12373_v14 = vunpack.i.l.bf16 %v17907_v44  ;;  %v6986_v44 = vsel %vm1386_vm11, %v12378_v0, %v12384_v58 }
 0x916   :  { %7080 = vmatpush.msrb.mxu3 %v6999_v1  ;;  %11305 = vmatmul.msk.f32.gmra.mxu0 %vm2738_vm15, %v17847_v57  ;;  %v17905_v42 = vpop.f32.mrf.mxu2 }
 0x917   :  { %11309 = vmatmul.msk.f32.gmra.mxu1 %vm2738_vm15, %v17847_v57  ;;  %v6990_v43 = vsel %vm1386_vm11, %v12363_v61, %v12373_v14  ;;  %v6991_v27 = vsel %vm1386_vm11, %v12373_v14, %v12383_v55  ;;  %v12387_v61 = vpop.permute.xlu0 %12386  ;;  %v5856_v54 = vadd.f32 %v17905_v42, %v17726_v45 }
 0x918   :  { %7081 = vmatpush.msrb.mxu3 %v6994_v25  ;;  %v17909_v47 = vpop.f32.mrf.mxu3  ;;  %v6985_v25 = vsel %vm1386_vm11, %v12364_v17, %v12378_v0  ;;  %v12388_v34 = vunpack.i.l.bf16 %v12387_v61  ;;  %v12392_v17 = vpop.permute.xlu1 %12391  ;;  %v12389_v46 = vunpack.i.h.bf16 %v12387_v61 }
 0x91a   :  { %7082 = vmatpush.msrb.mxu3 %v6989_v51  ;;  %v17915_v23 = vpop.f32.mrf.mxu0  ;;  %v6997_v0 = vsel %vm1386_vm11, %v12379_v20, %v12389_v46 }
 0x91b   :  { %v17923_v37 = vpop.f32.mrf.mxu1 }
 0x91c   :  { %7083 = vmatpush.msrb.mxu3 %v6984_v9  ;;  %11312 = vmatmul.msk.f32.gmra.mxu2 %vm2738_vm15, %v17822_v49 }
 0x91d   :  { %11315 = vmatmul.msk.f32.gmra.mxu3 %vm2738_vm15, %v17800_v63 }
 0x91e   :  { %11322 = vmatmul.msk.f32.vlgmr.msrb.gmra.mxu0 %vm2738_vm15, %v17921_v31  ;;  %v5858_v28 = vpop.f32.mrf.mxu2 }
 0x91f   :  { %11326 = vmatmul.msk.f32.vlgmr.msra.gmra.mxu1 %vm2738_vm15, %v17921_v31  ;;  %7109 = vmatpush.msrb.mxu0 %v7000_v15  ;;  %v17941_v63 = vadd.f32 %v5858_v28, %v17767_v40  ;;  %v17956_v40 = vld [vmem:[%s20516_s10 + $0x88] sm:$0xff]  ;;  %v12393_v15 = vunpack.i.l.bf16 %v12392_v17  ;;  %v12394_v28 = vunpack.i.h.bf16 %v12392_v17 }
 0x920   :  { %7138 = vmatpush.msra.mxu1 %v7001_v26  ;;  %v17943_v41 = vpop.f32.mrf.mxu3 }
 0x921   :  { %7110 = vmatpush.msrb.mxu0 %v6995_v56  ;;  %v6987_v61 = vsel %vm1386_vm11, %v12384_v58, %v12394_v28 }
 0x922   :  { %7139 = vmatpush.msra.mxu1 %v6996_v50  ;;  %v12402_v50 = vpop.permute.xlu0 %12401 }
 0x923   :  { %7111 = vmatpush.msrb.mxu0 %v6990_v43  ;;  %v17951_v1 = vpop.f32.mrf.mxu0  ;;  %v17958_v12 = vpop.f32.mrf.mxu1 }
 0x924   :  { %7140 = vmatpush.msra.mxu1 %v6991_v27  ;;  %11313 = vmatmul.msk.f32.gmra.mxu2 %vm2738_vm15, %v17847_v57 }
 0x925   :  { %7112 = vmatpush.msrb.mxu0 %v6985_v25  ;;  %11316 = vmatmul.msk.f32.gmra.mxu3 %vm2738_vm15, %v17822_v49  ;;  %v17981_v49 = vld [vmem:[%s20516_s10 + $0x90] sm:$0xff]  ;;  %v12407_v25 = vpop.permute.xlu1 %12406 }
 0x926   :  { %7141 = vmatpush.msra.mxu1 %v6986_v44  ;;  %11323 = vmatmul.msk.f32.gmra.mxu0 %vm2738_vm15, %v17956_v40  ;;  %v5861_v51 = vpop.f32.mrf.mxu2  ;;  %v18008_v44 = vld [vmem:[%s20516_s10 + $0x98] sm:$0xff] }
 0x927   :  { %11327 = vmatmul.msk.f32.gmra.mxu1 %vm2738_vm15, %v17956_v40  ;;  %v17971_v9 = vadd.f32 %v5861_v51, %v17793_v4  ;;  %v7002_v4 = vsel %vm1386_vm11, %v12374_v36, %v12388_v34 }
 0x928   :  { %v5887_v7 = vpop.f32.mrf.mxu3 }
 0x929   :  { %v17974_v52 = vadd.f32 %v5887_v7, %v17769_v18  ;;  %v12397_v18 = vpop.permute.xlu2 %12396 }
 0x92a   :  { %v12399_v7 = vunpack.i.h.bf16 %v12397_v18 }
 0x92b   :  { %v17976_v14 = vpop.f32.mrf.mxu0  ;;  %v17983_v26 = vpop.f32.mrf.mxu1 }
 0x92c   :  { %11330 = vmatmul.msk.f32.vlgmr.msrb.gmra.mxu2 %vm2738_vm15, %v17921_v31 }
 0x92d   :  { %11317 = vmatmul.msk.f32.gmra.mxu3 %vm2738_vm15, %v17847_v57  ;;  %7167 = vmatpush.msrb.mxu2 %v7002_v4  ;;  %v6992_v57 = vsel %vm1386_vm11, %v12383_v55, %v12393_v15  ;;  %v12398_v4 = vunpack.i.l.bf16 %v12397_v18 }
 0x92e   :  { %11324 = vmatmul.msk.f32.gmra.mxu0 %vm2738_vm15, %v17981_v49  ;;  %v5968_v56 = vpop.f32.mrf.mxu2 }
 0x92f   :  { %11328 = vmatmul.msk.f32.gmra.mxu1 %vm2738_vm15, %v17981_v49  ;;  %7168 = vmatpush.msrb.mxu2 %v6997_v0  ;;  %v17996_v36 = vadd.f32 %v5968_v56, %v17824_v11  ;;  %v7305_v18 = vsel %vm1631_vm12, %v12398_v4, %v12399_v7 }
 0x930   :  { %v5890_v43 = vpop.f32.mrf.mxu3 }
 0x931   :  { %v18000_v27 = vadd.f32 %v5890_v43, %v17795_v35  ;;  %7169 = vmatpush.msrb.mxu2 %v6992_v57  ;;  %v18020_v11 = vpop.permute.xlu2 %12411  ;;  %v12404_v43 = vunpack.i.h.bf16 %v12402_v50  ;;  %v12403_v57 = vunpack.i.l.bf16 %v12402_v50 }
 0x932   :  { %v12413_v0 = vunpack.i.l.bf16 %v18020_v11 }
 0x933   :  { %v18003_v20 = vpop.f32.mrf.mxu0  ;;  %7170 = vmatpush.msrb.mxu2 %v6987_v61  ;;  %v18033_v61 = vpop.permute.xlu1 %12421  ;;  %v7300_v24 = vsel %vm1631_vm12, %v12403_v57, %v12404_v43 }
 0x934   :  { %v18010_v51 = vpop.f32.mrf.mxu1  ;;  %11331 = vmatmul.msk.f32.gmra.mxu2 %vm2738_vm15, %v17956_v40  ;;  %v12423_v50 = vunpack.i.l.bf16 %v18033_v61  ;;  %v12424_v4 = vunpack.i.h.bf16 %v18033_v61 }
 0x935   :  { %11334 = vmatmul.msk.f32.vlgmr.msra.gmra.mxu3 %vm2738_vm15, %v17921_v31 }
 0x936   :  { %7196 = vmatpush.msra.mxu3 %v12388_v34  ;;  %11325 = vmatmul.msk.f32.gmra.mxu0 %vm2738_vm15, %v18008_v44  ;;  %v18028_v34 = vpop.permute.xlu0 %12416 }
 0x937   :  { %11329 = vmatmul.msk.f32.gmra.mxu1 %vm2738_vm15, %v18008_v44  ;;  %v5971_v35 = vpop.f32.mrf.mxu2 }
 0x938   :  { %7197 = vmatpush.msra.mxu3 %v12389_v46  ;;  %v18023_v55 = vadd.f32 %v5971_v35, %v17850_v5  ;;  %v5997_v58 = vpop.f32.mrf.mxu3  ;;  %v12409_v5 = vunpack.i.h.bf16 %v12407_v25 }
 0x939   :  { %v18026_v17 = vadd.f32 %v5997_v58, %v17826_v21  ;;  %v12419_v21 = vunpack.i.h.bf16 %v18028_v34  ;;  %v12418_v58 = vunpack.i.l.bf16 %v18028_v34 }
 0x93a   :  { %7198 = vmatpush.msra.mxu3 %v12393_v15  ;;  %v12408_v15 = vunpack.i.l.bf16 %v12407_v25 }
 0x93b   :  { %v18031_v56 = vpop.f32.mrf.mxu0 }
 0x93c   :  { %v18035_v46 = vpop.f32.mrf.mxu1  ;;  %7199 = vmatpush.msra.mxu3 %v12394_v28  ;;  %11332 = vmatmul.msk.f32.gmra.mxu2 %vm2738_vm15, %v17981_v49  ;;  %v7306_v28 = vsel %vm1631_vm12, %v12399_v7, %v12413_v0  ;;  %v12414_v7 = vunpack.i.h.bf16 %v18020_v11  ;;  %v7295_v34 = vsel %vm1631_vm12, %v12408_v15, %v12409_v5 }
 0x93d   :  { %11335 = vmatmul.msk.f32.gmra.mxu3 %vm2738_vm15, %v17956_v40 }
 0x93e   :  { %11338 = vmatmul.msk.f32.vlgmr.msra.gmra.mxu0 %vm2738_vm15, %v17921_v31  ;;  %v7290_v61 = vsel %vm1631_vm12, %v12414_v7, %v12418_v58 }
 0x93f   :  { %11342 = vmatmul.msk.f32.vlgmr.msrb.gmra.mxu1 %vm2738_vm15, %v17921_v31  ;;  %7358 = vmatpush.msra.mxu0 %v7305_v18  ;;  %v5974_v35 = vpop.f32.mrf.mxu2  ;;  %v7301_v31 = vsel %vm1631_vm12, %v12404_v43, %v12419_v21 }
 0x940   :  { %7387 = vmatpush.msrb.mxu1 %v7306_v28  ;;  %v18051_v62 = vadd.f32 %v5974_v35, %v17867_v39  ;;  %v6000_v25 = vpop.f32.mrf.mxu3  ;;  %v7296_v39 = vsel %vm1631_vm12, %v12409_v5, %v12423_v50  ;;  %v12432_v28 = vpop.permute.xlu0 %12431 }
 0x941   :  { %v18056_v19 = vadd.f32 %v6000_v25, %v17852_v6  ;;  %7359 = vmatpush.msra.mxu0 %v7300_v24  ;;  %v12427_v24 = vpop.permute.xlu2 %12426  ;;  %v7291_v6 = vsel %vm1631_vm12, %v12418_v58, %v12424_v4  ;;  %v18085_v58 = vld [vmem:[%s20516_s10 + $0xa0] sm:$0xff]  ;;  %v12433_v7 = vunpack.i.l.bf16 %v12432_v28 }
 0x942   :  { %7388 = vmatpush.msrb.mxu1 %v7301_v31  ;;  %v12428_v43 = vunpack.i.l.bf16 %v12427_v24  ;;  %v12429_v31 = vunpack.i.h.bf16 %v12427_v24 }
 0x943   :  { %7360 = vmatpush.msra.mxu0 %v7295_v34  ;;  %v18062_v18 = vpop.f32.mrf.mxu0  ;;  %v18096_v34 = vpop.permute.xlu1 %12436 }
 0x944   :  { %7389 = vmatpush.msrb.mxu1 %v7296_v39  ;;  %v18064_v57 = vpop.f32.mrf.mxu1  ;;  %11333 = vmatmul.msk.f32.gmra.mxu2 %vm2738_vm15, %v18008_v44  ;;  %v5911_v39 = vadd.f32 %v17915_v23, %v17779_v60  ;;  %v18115_v60 = vld [vmem:[%s20516_s10 + $0xa8] sm:$0xff] }
 0x945   :  { %7361 = vmatpush.msra.mxu0 %v7290_v61  ;;  %11336 = vmatmul.msk.f32.gmra.mxu3 %vm2738_vm15, %v17981_v49  ;;  %v7302_v61 = vsel %vm1631_vm12, %v12419_v21, %v12429_v31 }
 0x946   :  { %7390 = vmatpush.msrb.mxu1 %v7291_v6  ;;  %11339 = vmatmul.msk.f32.gmra.mxu0 %vm2738_vm15, %v17956_v40 }
 0x947   :  { %11343 = vmatmul.msk.f32.gmra.mxu1 %vm2738_vm15, %v17956_v40  ;;  %v5977_v11 = vpop.f32.mrf.mxu2 }
 0x948   :  { %v18077_v5 = vadd.f32 %v5977_v11, %v17889_v48  ;;  %v6003_v15 = vpop.f32.mrf.mxu3  ;;  %v7307_v48 = vsel %vm1631_vm12, %v12413_v0, %v12428_v43  ;;  %v7297_v11 = vsel %vm1631_vm12, %v12423_v50, %v12433_v7 }
 0x949   :  { %v18080_v35 = vadd.f32 %v6003_v15, %v17869_v33  ;;  %v12434_v33 = vunpack.i.h.bf16 %v12432_v28  ;;  %v12438_v15 = vunpack.i.l.bf16 %v18096_v34 }
 0x94b   :  { %v18087_v25 = vpop.f32.mrf.mxu0  ;;  %v7292_v23 = vsel %vm1631_vm12, %v12424_v4, %v12434_v33 }
 0x94c   :  { %v18089_v40 = vpop.f32.mrf.mxu1  ;;  %11350 = vmatmul.msk.f32.vlgmr.msra.gmra.mxu2 %vm2738_vm15, %v18085_v58 }
 0x94d   :  { %11337 = vmatmul.msk.f32.gmra.mxu3 %vm2738_vm15, %v18008_v44  ;;  %7416 = vmatpush.msra.mxu2 %v7307_v48  ;;  %v12442_v48 = vpop.permute.xlu2 %12441 }
 0x94e   :  { %11340 = vmatmul.msk.f32.gmra.mxu0 %vm2738_vm15, %v17981_v49  ;;  %v12443_v4 = vunpack.i.l.bf16 %v12442_v48 }
 0x94f   :  { %11344 = vmatmul.msk.f32.gmra.mxu1 %vm2738_vm15, %v17981_v49  ;;  %7417 = vmatpush.msra.mxu2 %v7302_v61  ;;  %v6193_v0 = vpop.f32.mrf.mxu2  ;;  %v12439_v49 = vunpack.i.h.bf16 %v18096_v34  ;;  %v12447_v34 = vpop.permute.xlu0 %12446  ;;  %v5940_v61 = vadd.f32 %v17923_v37, %v17810_v8 }
 0x950   :  { %v6006_v24 = vpop.f32.mrf.mxu3  ;;  %v18105_v6 = vadd.f32 %v6193_v0, %v5911_v39  ;;  %v5914_v39 = vadd.f32 %v17951_v1, %v17808_v29  ;;  %v12444_v29 = vunpack.i.h.bf16 %v12442_v48  ;;  %v12448_v8 = vunpack.i.l.bf16 %v12447_v34  ;;  %v12452_v37 = vpop.permute.xlu1 %12451 }
 0x951   :  { %v18110_v28 = vadd.f32 %v6006_v24, %v17891_v59  ;;  %7418 = vmatpush.msra.mxu2 %v7297_v11  ;;  %v7308_v59 = vsel %vm1631_vm12, %v12428_v43, %v12438_v15  ;;  %v7303_v0 = vsel %vm1631_vm12, %v12429_v31, %v12439_v49  ;;  %v5917_v48 = vadd.f32 %v17976_v14, %v17838_v53 }
 0x952   :  { %v7293_v31 = vsel %vm1631_vm12, %v12434_v33, %v12444_v29  ;;  %v5943_v33 = vadd.f32 %v17958_v12, %v17840_v13  ;;  %v18175_v13 = vld [vmem:[%s20516_s10 + $0xb8] sm:$0xff] }
 0x953   :  { %v18119_v21 = vpop.f32.mrf.mxu0  ;;  %7419 = vmatpush.msra.mxu2 %v7292_v23  ;;  %v7298_v23 = vsel %vm1631_vm12, %v12433_v7, %v12443_v4  ;;  %v12453_v7 = vunpack.i.l.bf16 %v12452_v37 }
 0x954   :  { %v18121_v50 = vpop.f32.mrf.mxu1  ;;  %11351 = vmatmul.msk.f32.gmra.mxu2 %vm2738_vm15, %v18115_v60 }
 0x955   :  { %11354 = vmatmul.msk.f32.vlgmr.msrb.gmra.mxu3 %vm2738_vm15, %v18085_v58  ;;  %v7299_v12 = vsel %vm1631_vm12, %v12443_v4, %v12453_v7  ;;  %v5920_v4 = vadd.f32 %v18003_v20, %v17863_v10 }
 0x956   :  { %7445 = vmatpush.msrb.mxu3 %v7308_v59  ;;  %11341 = vmatmul.msk.f32.gmra.mxu0 %vm2738_vm15, %v18008_v44  ;;  %v18145_v59 = vld [vmem:[%s20516_s10 + $0xb0] sm:$0xff] }
 0x957   :  { %11345 = vmatmul.msk.f32.gmra.mxu1 %vm2738_vm15, %v18008_v44  ;;  %v6196_v24 = vpop.f32.mrf.mxu2 }
 0x958   :  { %7446 = vmatpush.msrb.mxu3 %v7303_v0  ;;  %v18137_v43 = vadd.f32 %v6196_v24, %v5914_v39  ;;  %v6222_v11 = vpop.f32.mrf.mxu3  ;;  %v12449_v39 = vunpack.i.h.bf16 %v12447_v34  ;;  %v18165_v24 = vpop.permute.xlu2 %12456 }
 0x959   :  { %v18139_v1 = vadd.f32 %v6222_v11, %v5940_v61  ;;  %v7309_v61 = vsel %vm1631_vm12, %v12438_v15, %v12448_v8  ;;  %v12454_v11 = vunpack.i.h.bf16 %v12452_v37 }
 0x95a   :  { %7447 = vmatpush.msrb.mxu3 %v7298_v23  ;;  %v7304_v14 = vsel %vm1631_vm12, %v12439_v49, %v12449_v39 }
 0x95b   :  { %v18147_v44 = vpop.f32.mrf.mxu0  ;;  %v7294_v49 = vsel %vm1631_vm12, %v12444_v29, %v12454_v11 }
 0x95c   :  { %v18150_v0 = vpop.f32.mrf.mxu1  ;;  %7448 = vmatpush.msrb.mxu3 %v7293_v31  ;;  %11352 = vmatmul.msk.f32.gmra.mxu2 %vm2738_vm15, %v18145_v59 }
 0x95d   :  { %11355 = vmatmul.msk.f32.gmra.mxu3 %vm2738_vm15, %v18115_v60 }
 0x95e   :  { %11358 = vmatmul.msk.f32.vlgmr.msrb.gmra.mxu0 %vm2738_vm15, %v18085_v58 }
 0x95f   :  { %11362 = vmatmul.msk.f32.vlgmr.msra.gmra.mxu1 %vm2738_vm15, %v18085_v58  ;;  %7474 = vmatpush.msrb.mxu0 %v7309_v61  ;;  %v6199_v34 = vpop.f32.mrf.mxu2  ;;  %v12458_v61 = vunpack.i.l.bf16 %v18165_v24 }
 0x960   :  { %7503 = vmatpush.msra.mxu1 %v12448_v8  ;;  %v18167_v23 = vadd.f32 %v6199_v34, %v5917_v48  ;;  %v6225_v53 = vpop.f32.mrf.mxu3  ;;  %v18180_v8 = vpop.permute.xlu0 %12461  ;;  %v12459_v48 = vunpack.i.h.bf16 %v18165_v24 }
 0x961   :  { %v18170_v31 = vadd.f32 %v6225_v53, %v5943_v33  ;;  %7475 = vmatpush.msrb.mxu0 %v7304_v14  ;;  %v12472_v10 = vpop.permute.xlu2 %12471  ;;  %v12464_v20 = vunpack.i.h.bf16 %v18180_v8 }
 0x962   :  { %7504 = vmatpush.msra.mxu1 %v12449_v39  ;;  %v18189_v39 = vpop.permute.xlu1 %12466 }
 0x963   :  { %7476 = vmatpush.msrb.mxu0 %v7299_v12  ;;  %v18178_v15 = vpop.f32.mrf.mxu0  ;;  %v12468_v12 = vunpack.i.l.bf16 %v18189_v39 }
 0x964   :  { %7505 = vmatpush.msra.mxu1 %v12453_v7  ;;  %v18182_v37 = vpop.f32.mrf.mxu1  ;;  %11353 = vmatmul.msk.f32.gmra.mxu2 %vm2738_vm15, %v18175_v13  ;;  %v5946_v7 = vadd.f32 %v17983_v26, %v17865_v16  ;;  %v5853_v16 = vadd.f32 %v17881_v38, %v17701_v3  ;;  %v12469_v26 = vunpack.i.h.bf16 %v18189_v39  ;;  %v5949_v39 = vadd.f32 %v18010_v51, %v17885_v22 }
 0x965   :  { %7477 = vmatpush.msrb.mxu0 %v7294_v49  ;;  %11356 = vmatmul.msk.f32.gmra.mxu3 %vm2738_vm15, %v18145_v59  ;;  %v7612_v49 = vsel %vm1876_vm13, %v12458_v61, %v12459_v48 }
 0x966   :  { %7506 = vmatpush.msra.mxu1 %v12454_v11  ;;  %11359 = vmatmul.msk.f32.gmra.mxu0 %vm2738_vm15, %v18115_v60  ;;  %v12463_v11 = vunpack.i.l.bf16 %v18180_v8  ;;  %v12474_v8 = vunpack.i.h.bf16 %v12472_v10  ;;  %v6292_v3 = vadd.f32 %v18031_v56, %v5853_v16  ;;  %v7602_v56 = vsel %vm1876_vm13, %v12468_v12, %v12469_v26 }
 0x967   :  { %11363 = vmatmul.msk.f32.gmra.mxu1 %vm2738_vm15, %v18115_v60  ;;  %v6202_v29 = vpop.f32.mrf.mxu2  ;;  %v5882_v12 = vadd.f32 %v17909_v47, %v17705_v32 }
 0x968   :  { %v18201_v33 = vadd.f32 %v6202_v29, %v5920_v4  ;;  %v6228_v34 = vpop.f32.mrf.mxu3  ;;  %v12473_v4 = vunpack.i.l.bf16 %v12472_v10  ;;  %v7607_v38 = vsel %vm1876_vm13, %v12463_v11, %v12464_v20 }
 0x969   :  { %v18203_v53 = vadd.f32 %v6228_v34, %v5946_v7  ;;  %v18220_v7 = vpop.permute.xlu0 %12476  ;;  %v6293_v42 = vadd.f32 %v18035_v46, %v5882_v12 }
 0x96a   :  { %v18230_v61 = vpop.permute.xlu1 %12481  ;;  %v12478_v16 = vunpack.i.l.bf16 %v18220_v7  ;;  %v7597_v11 = vsel %vm1876_vm13, %v12473_v4, %v12474_v8  ;;  %v12479_v22 = vunpack.i.h.bf16 %v18220_v7  ;;  %v6298_v7 = vadd.f32 %v18062_v18, %v5856_v54 }
 0x96b   :  { %v18207_v14 = vpop.f32.mrf.mxu0  ;;  %v12484_v45 = vunpack.i.h.bf16 %v18230_v61 }
 0x96c   :  { %v18213_v24 = vpop.f32.mrf.mxu1  ;;  %11366 = vmatmul.msk.f32.vlgmr.msrb.gmra.mxu2 %vm2738_vm15, %v18085_v58  ;;  %v7613_v4 = vsel %vm1876_vm13, %v12459_v48, %v12478_v16  ;;  %v7608_v32 = vsel %vm1876_vm13, %v12464_v20, %v12479_v22 }
 0x96d   :  { %11357 = vmatmul.msk.f32.gmra.mxu3 %vm2738_vm15, %v18175_v13  ;;  %7665 = vmatpush.msrb.mxu2 %v7612_v49  ;;  %v7598_v20 = vsel %vm1876_vm13, %v12474_v8, %v12484_v45 }
 0x96e   :  { %11360 = vmatmul.msk.f32.gmra.mxu0 %vm2738_vm15, %v18145_v59 }
 0x96f   :  { %11364 = vmatmul.msk.f32.gmra.mxu1 %vm2738_vm15, %v18145_v59  ;;  %7666 = vmatpush.msrb.mxu2 %v7607_v38  ;;  %v6442_v29 = vpop.f32.mrf.mxu2  ;;  %v12487_v38 = vpop.permute.xlu2 %12486 }
 0x970   :  { %v6231_v34 = vpop.f32.mrf.mxu3  ;;  %v18232_v10 = vadd.f32 %v6442_v29, %v6292_v3  ;;  %v12489_v8 = vunpack.i.h.bf16 %v12487_v38 }
 0x971   :  { %v18236_v49 = vadd.f32 %v6231_v34, %v5949_v39  ;;  %7667 = vmatpush.msrb.mxu2 %v7602_v56  ;;  %v12483_v39 = vunpack.i.l.bf16 %v18230_v61  ;;  %v18262_v29 = vpop.permute.xlu0 %12491  ;;  %v18278_v56 = vld [vmem:[%s20516_s10 + $0xc0] sm:$0xff] }
 0x972   :  { %v18269_v34 = vpop.permute.xlu1 %12496  ;;  %v12494_v46 = vunpack.i.h.bf16 %v18262_v29 }
 0x973   :  { %v18240_v51 = vpop.f32.mrf.mxu0  ;;  %7668 = vmatpush.msrb.mxu2 %v7597_v11  ;;  %v7603_v48 = vsel %vm1876_vm13, %v12469_v26, %v12483_v39  ;;  %v12488_v11 = vunpack.i.l.bf16 %v12487_v38  ;;  %v5885_v26 = vadd.f32 %v17943_v41, %v17733_v2  ;;  %v12498_v38 = vunpack.i.l.bf16 %v18269_v34 }
 0x974   :  { %v18244_v3 = vpop.f32.mrf.mxu1  ;;  %11367 = vmatmul.msk.f32.gmra.mxu2 %vm2738_vm15, %v18115_v60 }
 0x975   :  { %11370 = vmatmul.msk.f32.vlgmr.msra.gmra.mxu3 %vm2738_vm15, %v18085_v58  ;;  %v6299_v2 = vadd.f32 %v18064_v57, %v5885_v26  ;;  %v7615_v41 = vsel %vm1876_vm13, %v12488_v11, %v12494_v46 }
 0x976   :  { %7694 = vmatpush.msra.mxu3 %v7613_v4  ;;  %11361 = vmatmul.msk.f32.gmra.mxu0 %vm2738_vm15, %v18175_v13  ;;  %v12499_v4 = vunpack.i.h.bf16 %v18269_v34 }
 0x977   :  { %11365 = vmatmul.msk.f32.gmra.mxu1 %vm2738_vm15, %v18175_v13  ;;  %v6445_v47 = vpop.f32.mrf.mxu2 }
 0x978   :  { %7695 = vmatpush.msra.mxu3 %v7608_v32  ;;  %v18264_v58 = vadd.f32 %v6445_v47, %v6298_v7  ;;  %v6471_v54 = vpop.f32.mrf.mxu3  ;;  %v18289_v7 = vpop.permute.xlu2 %12501  ;;  %v6304_v32 = vadd.f32 %v18087_v25, %v17941_v63  ;;  %v7614_v47 = vsel %vm1876_vm13, %v12478_v16, %v12488_v11 }
 0x979   :  { %v18266_v18 = vadd.f32 %v6471_v54, %v6293_v42  ;;  %v12493_v42 = vunpack.i.l.bf16 %v18262_v29  ;;  %v7609_v54 = vsel %vm1876_vm13, %v12479_v22, %v12489_v8  ;;  %v12503_v16 = vunpack.i.l.bf16 %v18289_v7  ;;  %v18319_v22 = vld [vmem:[%s20516_s10 + $0xc8] sm:$0xff] }
 0x97a   :  { %7696 = vmatpush.msra.mxu3 %v7603_v48  ;;  %v7610_v48 = vsel %vm1876_vm13, %v12489_v8, %v12499_v4  ;;  %v12504_v11 = vunpack.i.h.bf16 %v18289_v7  ;;  %v7599_v8 = vsel %vm1876_vm13, %v12484_v45, %v12498_v38  ;;  %v6305_v45 = vadd.f32 %v18089_v40, %v17974_v52 }
 0x97b   :  { %v18272_v61 = vpop.f32.mrf.mxu0  ;;  %v7605_v34 = vsel %vm1876_vm13, %v12493_v42, %v12503_v16 }
 0x97c   :  { %v18280_v12 = vpop.f32.mrf.mxu1  ;;  %7697 = vmatpush.msra.mxu3 %v7598_v20  ;;  %11368 = vmatmul.msk.f32.gmra.mxu2 %vm2738_vm15, %v18145_v59  ;;  %v7604_v20 = vsel %vm1876_vm13, %v12483_v39, %v12493_v42  ;;  %v12507_v39 = vpop.permute.xlu0 %12506  ;;  %v7600_v7 = vsel %vm1876_vm13, %v12498_v38, %v12504_v11  ;;  %v6310_v42 = vadd.f32 %v18119_v21, %v17971_v9  ;;  %v18346_v21 = vld [vmem:[%s20516_s10 + $0xd0] sm:$0xff] }
 0x97d   :  { %11371 = vmatmul.msk.f32.gmra.mxu3 %vm2738_vm15, %v18115_v60 }
 0x97e   :  { %11378 = vmatmul.msk.f32.vlgmr.msra.gmra.mxu0 %vm2738_vm15, %v18278_v56 }
 0x97f   :  { %11382 = vmatmul.msk.f32.vlgmr.msrb.gmra.mxu1 %vm2738_vm15, %v18278_v56  ;;  %7723 = vmatpush.msra.mxu0 %v7614_v47  ;;  %v6448_v60 = vpop.f32.mrf.mxu2 }
 0x980   :  { %7752 = vmatpush.msrb.mxu1 %v7615_v41  ;;  %v18304_v63 = vadd.f32 %v6448_v60, %v6304_v32  ;;  %v6474_v25 = vpop.f32.mrf.mxu3  ;;  %v12512_v41 = vpop.permute.xlu1 %12511 }
 0x981   :  { %v18308_v57 = vadd.f32 %v6474_v25, %v6299_v2  ;;  %7724 = vmatpush.msra.mxu0 %v7609_v54  ;;  %v12508_v2 = vunpack.i.l.bf16 %v12507_v39  ;;  %v12509_v25 = vunpack.i.h.bf16 %v12507_v39  ;;  %v12513_v52 = vunpack.i.l.bf16 %v12512_v41 }
 0x982   :  { %7753 = vmatpush.msrb.mxu1 %v7610_v48  ;;  %v12517_v48 = vpop.permute.xlu2 %12516  ;;  %v6311_v39 = vadd.f32 %v18121_v50, %v18000_v27  ;;  %v18377_v27 = vld [vmem:[%s20516_s10 + $0xd8] sm:$0xff] }
 0x983   :  { %7725 = vmatpush.msra.mxu0 %v7604_v20  ;;  %v18314_v26 = vpop.f32.mrf.mxu0  ;;  %v7616_v54 = vsel %vm1876_vm13, %v12494_v46, %v12508_v2  ;;  %v12514_v20 = vunpack.i.h.bf16 %v12512_v41 }
 0x984   :  { %7754 = vmatpush.msrb.mxu1 %v7605_v34  ;;  %v18321_v32 = vpop.f32.mrf.mxu1  ;;  %11369 = vmatmul.msk.f32.gmra.mxu2 %vm2738_vm15, %v18175_v13  ;;  %v6296_v34 = vadd.f32 %v18147_v44, %v17996_v36 }
 0x985   :  { %7726 = vmatpush.msra.mxu0 %v7599_v8  ;;  %11372 = vmatmul.msk.f32.gmra.mxu3 %vm2738_vm15, %v18145_v59  ;;  %v7611_v8 = vsel %vm1876_vm13, %v12499_v4, %v12509_v25  ;;  %v7601_v4 = vsel %vm1876_vm13, %v12504_v11, %v12514_v20  ;;  %v6297_v11 = vadd.f32 %v18150_v0, %v18026_v17 }
 0x986   :  { %7755 = vmatpush.msrb.mxu1 %v7600_v7  ;;  %11379 = vmatmul.msk.f32.gmra.mxu0 %vm2738_vm15, %v18319_v22 }
 0x987   :  { %11383 = vmatmul.msk.f32.gmra.mxu1 %vm2738_vm15, %v18319_v22  ;;  %v6451_v47 = vpop.f32.mrf.mxu2 }
 0x988   :  { %v18337_v60 = vadd.f32 %v6451_v47, %v6310_v42  ;;  %v6477_v38 = vpop.f32.mrf.mxu3  ;;  %v7606_v42 = vsel %vm1876_vm13, %v12503_v16, %v12513_v52  ;;  %v12527_v44 = vpop.permute.xlu1 %12526  ;;  %v6302_v16 = vadd.f32 %v18178_v15, %v18023_v55  ;;  %v12519_v55 = vunpack.i.h.bf16 %v12517_v48 }
 0x989   :  { %v18339_v59 = vadd.f32 %v6477_v38, %v6305_v45  ;;  %v12518_v15 = vunpack.i.l.bf16 %v12517_v48  ;;  %v12528_v48 = vunpack.i.l.bf16 %v12527_v44 }
 0x98a   :  { %v18393_v41 = vpop.permute.xlu2 %12531 }
 0x98b   :  { %v18341_v9 = vpop.f32.mrf.mxu0 }
 0x98c   :  { %v18348_v40 = vpop.f32.mrf.mxu1  ;;  %11386 = vmatmul.msk.f32.vlgmr.msra.gmra.mxu2 %vm2738_vm15, %v18278_v56 }
 0x98d   :  { %11373 = vmatmul.msk.f32.gmra.mxu3 %vm2738_vm15, %v18175_v13  ;;  %7781 = vmatpush.msra.mxu2 %v7616_v54  ;;  %v12522_v13 = vpop.permute.xlu0 %12521 }
 0x98e   :  { %11380 = vmatmul.msk.f32.gmra.mxu0 %vm2738_vm15, %v18346_v21  ;;  %v12524_v0 = vunpack.i.h.bf16 %v12522_v13 }
 0x98f   :  { %11384 = vmatmul.msk.f32.gmra.mxu1 %vm2738_vm15, %v18346_v21  ;;  %7782 = vmatpush.msra.mxu2 %v7611_v8  ;;  %v6558_v29 = vpop.f32.mrf.mxu2  ;;  %v12533_v8 = vunpack.i.l.bf16 %v18393_v41 }
 0x990   :  { %v6480_v46 = vpop.f32.mrf.mxu3  ;;  %v18366_v7 = vadd.f32 %v6558_v29, %v6296_v34  ;;  %v18404_v29 = vpop.permute.xlu1 %12541 }
 0x991   :  { %v18369_v36 = vadd.f32 %v6480_v46, %v6311_v39  ;;  %7783 = vmatpush.msra.mxu2 %v7606_v42  ;;  %v12523_v39 = vunpack.i.l.bf16 %v12522_v13  ;;  %v6308_v42 = vadd.f32 %v18207_v14, %v18051_v62  ;;  %v7919_v13 = vsel %vm2121_vm14, %v12518_v15, %v12519_v55 }
 0x993   :  { %v18372_v45 = vpop.f32.mrf.mxu0  ;;  %7784 = vmatpush.msra.mxu2 %v7601_v4  ;;  %v6303_v4 = vadd.f32 %v18182_v37, %v18056_v19  ;;  %v12534_v37 = vunpack.i.h.bf16 %v18393_v41 }
 0x994   :  { %v18379_v50 = vpop.f32.mrf.mxu1  ;;  %11387 = vmatmul.msk.f32.gmra.mxu2 %vm2738_vm15, %v18319_v22 }
 0x995   :  { %11390 = vmatmul.msk.f32.vlgmr.msrb.gmra.mxu3 %vm2738_vm15, %v18278_v56 }
 0x996   :  { %7810 = vmatpush.msrb.mxu3 %v12508_v2  ;;  %11381 = vmatmul.msk.f32.gmra.mxu0 %vm2738_vm15, %v18377_v27  ;;  %v18399_v2 = vpop.permute.xlu0 %12536 }
 0x997   :  { %11385 = vmatmul.msk.f32.gmra.mxu1 %vm2738_vm15, %v18377_v27  ;;  %v6561_v47 = vpop.f32.mrf.mxu2 }
 0x998   :  { %7811 = vmatpush.msrb.mxu3 %v12509_v25  ;;  %v18395_v38 = vadd.f32 %v6561_v47, %v6302_v16  ;;  %v6587_v54 = vpop.f32.mrf.mxu3  ;;  %v12539_v25 = vunpack.i.h.bf16 %v18399_v2  ;;  %v7920_v16 = vsel %vm2121_vm14, %v12519_v55, %v12533_v8  ;;  %v7914_v47 = vsel %vm2121_vm14, %v12523_v39, %v12524_v0 }
 0x999   :  { %v18397_v34 = vadd.f32 %v6587_v54, %v6297_v11  ;;  %v12538_v11 = vunpack.i.l.bf16 %v18399_v2  ;;  %v12544_v54 = vunpack.i.h.bf16 %v18404_v29 }
 0x99a   :  { %7812 = vmatpush.msrb.mxu3 %v12513_v52  ;;  %v12529_v52 = vunpack.i.h.bf16 %v12527_v44  ;;  %v7915_v19 = vsel %vm2121_vm14, %v12524_v0, %v12539_v25  ;;  %v6314_v0 = vadd.f32 %v18240_v51, %v18077_v5  ;;  %v18460_v5 = vld [vmem:[%s20516_s10 + $0xe0] sm:$0xff] }
 0x99b   :  { %v18402_v17 = vpop.f32.mrf.mxu0  ;;  %v7904_v39 = vsel %vm2121_vm14, %v12534_v37, %v12538_v11  ;;  %v7905_v41 = vsel %vm2121_vm14, %v12538_v11, %v12544_v54  ;;  %v6601_v37 = vadd.f32 %v18272_v61, %v18105_v6 }
 0x99c   :  { %v18406_v46 = vpop.f32.mrf.mxu1  ;;  %7813 = vmatpush.msrb.mxu3 %v12514_v20  ;;  %11388 = vmatmul.msk.f32.gmra.mxu2 %vm2738_vm15, %v18346_v21  ;;  %v12543_v20 = vunpack.i.l.bf16 %v18404_v29  ;;  %v12547_v29 = vpop.permute.xlu2 %12546 }
 0x99d   :  { %11391 = vmatmul.msk.f32.gmra.mxu3 %vm2738_vm15, %v18319_v22 }
 0x99e   :  { %11394 = vmatmul.msk.f32.vlgmr.msrb.gmra.mxu0 %vm2738_vm15, %v18278_v56  ;;  %v7910_v55 = vsel %vm2121_vm14, %v12529_v52, %v12543_v20 }
 0x99f   :  { %11398 = vmatmul.msk.f32.vlgmr.msra.gmra.mxu1 %vm2738_vm15, %v18278_v56  ;;  %7972 = vmatpush.msrb.mxu0 %v7919_v13  ;;  %v6564_v44 = vpop.f32.mrf.mxu2  ;;  %v7909_v56 = vsel %vm2121_vm14, %v12528_v48, %v12529_v52  ;;  %v6309_v52 = vadd.f32 %v18213_v24, %v18080_v35  ;;  %v12548_v13 = vunpack.i.l.bf16 %v12547_v29 }
 0x9a0   :  { %8001 = vmatpush.msra.mxu1 %v7920_v16  ;;  %v18425_v62 = vadd.f32 %v6564_v44, %v6308_v42  ;;  %v6590_v14 = vpop.f32.mrf.mxu3  ;;  %v12552_v44 = vpop.permute.xlu0 %12551 }
 0x9a1   :  { %v18429_v15 = vadd.f32 %v6590_v14, %v6303_v4  ;;  %7973 = vmatpush.msrb.mxu0 %v7914_v47  ;;  %v12549_v14 = vunpack.i.h.bf16 %v12547_v29  ;;  %v12553_v35 = vunpack.i.l.bf16 %v12552_v44  ;;  %v12554_v47 = vunpack.i.h.bf16 %v12552_v44 }
 0x9a2   :  { %8002 = vmatpush.msra.mxu1 %v7915_v19  ;;  %v18471_v19 = vpop.permute.xlu1 %12556  ;;  %v6602_v44 = vadd.f32 %v18280_v12, %v18139_v1 }
 0x9a3   :  { %7974 = vmatpush.msrb.mxu0 %v7909_v56  ;;  %v18435_v2 = vpop.f32.mrf.mxu0  ;;  %v7916_v56 = vsel %vm2121_vm14, %v12539_v25, %v12549_v14  ;;  %v12558_v6 = vunpack.i.l.bf16 %v18471_v19  ;;  %v18491_v25 = vld [vmem:[%s20516_s10 + $0xe8] sm:$0xff] }
 0x9a4   :  { %8003 = vmatpush.msra.mxu1 %v7910_v55  ;;  %v18437_v42 = vpop.f32.mrf.mxu1  ;;  %11389 = vmatmul.msk.f32.gmra.mxu2 %vm2738_vm15, %v18377_v27  ;;  %v6315_v55 = vadd.f32 %v18244_v3, %v18110_v28  ;;  %v7906_v28 = vsel %vm2121_vm14, %v12544_v54, %v12554_v47  ;;  %v12559_v3 = vunpack.i.h.bf16 %v18471_v19 }
 0x9a5   :  { %7975 = vmatpush.msrb.mxu0 %v7904_v39  ;;  %11392 = vmatmul.msk.f32.gmra.mxu3 %vm2738_vm15, %v18346_v21 }
 0x9a6   :  { %8004 = vmatpush.msra.mxu1 %v7905_v41  ;;  %11395 = vmatmul.msk.f32.gmra.mxu0 %vm2738_vm15, %v18319_v22  ;;  %v7911_v41 = vsel %vm2121_vm14, %v12543_v20, %v12553_v35  ;;  %v7922_v20 = vsel %vm2121_vm14, %v12548_v13, %v12558_v6 }
 0x9a7   :  { %11399 = vmatmul.msk.f32.gmra.mxu1 %vm2738_vm15, %v18319_v22  ;;  %v6567_v48 = vpop.f32.mrf.mxu2  ;;  %v7921_v22 = vsel %vm2121_vm14, %v12533_v8, %v12548_v13 }
 0x9a8   :  { %v18453_v4 = vadd.f32 %v6567_v48, %v6314_v0  ;;  %v6593_v16 = vpop.f32.mrf.mxu3  ;;  %v12562_v0 = vpop.permute.xlu2 %12561  ;;  %v6607_v48 = vadd.f32 %v18314_v26, %v18137_v43 }
 0x9a9   :  { %v18455_v11 = vadd.f32 %v6593_v16, %v6309_v52  ;;  %v12563_v54 = vunpack.i.l.bf16 %v12562_v0  ;;  %v12567_v16 = vpop.permute.xlu0 %12566  ;;  %v12564_v43 = vunpack.i.h.bf16 %v12562_v0 }
 0x9aa   :  { %21057 = vst [vmem:[#allocation40_spill] sm:$0xff] %v18453_v4  ;;  %v12568_v1 = vunpack.i.l.bf16 %v12567_v16  ;;  %v12572_v12 = vpop.permute.xlu1 %12571 }
 0x9ab   :  { %21058 = vst [vmem:[#allocation42_spill] sm:$0xff] %v18455_v11  ;;  %v18462_v51 = vpop.f32.mrf.mxu0 }
 0x9ac   :  { %v18464_v24 = vpop.f32.mrf.mxu1  ;;  %11406 = vmatmul.msk.f32.vlgmr.msrb.gmra.mxu2 %vm2738_vm15, %v18460_v5 }
 0x9ad   :  { %11393 = vmatmul.msk.f32.gmra.mxu3 %vm2738_vm15, %v18377_v27  ;;  %8030 = vmatpush.msrb.mxu2 %v7921_v22  ;;  %v7917_v22 = vsel %vm2121_vm14, %v12549_v14, %v12559_v3  ;;  %v7907_v14 = vsel %vm2121_vm14, %v12554_v47, %v12564_v43  ;;  %v6608_v47 = vadd.f32 %v18321_v32, %v18170_v31 }
 0x9ae   :  { %11396 = vmatmul.msk.f32.gmra.mxu0 %vm2738_vm15, %v18346_v21 }
 0x9af   :  { %11400 = vmatmul.msk.f32.gmra.mxu1 %vm2738_vm15, %v18346_v21  ;;  %8031 = vmatpush.msrb.mxu2 %v7916_v56  ;;  %v6807_v8 = vpop.f32.mrf.mxu2  ;;  %v7912_v56 = vsel %vm2121_vm14, %v12553_v35, %v12563_v54  ;;  %v12573_v35 = vunpack.i.l.bf16 %v12572_v12 }
 0x9b0   :  { %v6596_v39 = vpop.f32.mrf.mxu3  ;;  %v18482_v29 = vadd.f32 %v6807_v8, %v6601_v37  ;;  %v12569_v8 = vunpack.i.h.bf16 %v12567_v16 }
 0x9b1   :  { %v18486_v61 = vadd.f32 %v6596_v39, %v6315_v55  ;;  %8032 = vmatpush.msrb.mxu2 %v7911_v41  ;;  %v18521_v55 = vld [vmem:[%s20516_s10 + $0xf0] sm:$0xff]  ;;  %v6613_v41 = vadd.f32 %v18341_v9, %v18167_v23  ;;  %v7913_v31 = vsel %vm2121_vm14, %v12563_v54, %v12573_v35  ;;  %v6614_v54 = vadd.f32 %v18348_v40, %v18203_v53 }
 0x9b2   :  { %v7918_v23 = vsel %vm2121_vm14, %v12559_v3, %v12569_v8  ;;  %v6619_v3 = vadd.f32 %v18372_v45, %v18201_v33  ;;  %v6620_v33 = vadd.f32 %v18379_v50, %v18236_v49 }
 0x9b3   :  { %21059 = vst [vmem:[#allocation25_spill] sm:$0xff] %v18486_v61  ;;  %v18495_v21 = vpop.f32.mrf.mxu0  ;;  %8033 = vmatpush.msrb.mxu2 %v7906_v28  ;;  %v7923_v28 = vsel %vm2121_vm14, %v12558_v6, %v12568_v1  ;;  %v11405_v6 = vld [vmem:[%s20516_s10 + $0xf8] sm:$0xff] }
 0x9b4   :  { %v18497_v52 = vpop.f32.mrf.mxu1  ;;  %11407 = vmatmul.msk.f32.gmra.mxu2 %vm2738_vm15, %v18491_v25 }
 0x9b5   :  { %11410 = vmatmul.msk.f32.vlgmr.msra.gmra.mxu3 %vm2738_vm15, %v18460_v5 }
 0x9b6   :  { %8059 = vmatpush.msra.mxu3 %v7922_v20  ;;  %11397 = vmatmul.msk.f32.gmra.mxu0 %vm2738_vm15, %v18377_v27  ;;  %v12574_v20 = vunpack.i.h.bf16 %v12572_v12 }
 0x9b7   :  { %11401 = vmatmul.msk.f32.gmra.mxu1 %vm2738_vm15, %v18377_v27  ;;  %v6810_v19 = vpop.f32.mrf.mxu2 }
 0x9b8   :  { %8060 = vmatpush.msra.mxu3 %v7917_v22  ;;  %v18513_v13 = vadd.f32 %v6810_v19, %v6607_v48  ;;  %v6836_v37 = vpop.f32.mrf.mxu3  ;;  %v7908_v22 = vsel %vm2121_vm14, %v12564_v43, %v12574_v20 }
 0x9b9   :  { %v18515_v26 = vadd.f32 %v6836_v37, %v6602_v44 }
 0x9ba   :  { %21060 = vst [vmem:[#allocation14_spill] sm:$0xff] %v18513_v13  ;;  %8061 = vmatpush.msra.mxu3 %v7912_v56 }
 0x9bb   :  { %21061 = vst [vmem:[#allocation37_spill] sm:$0xff] %v18515_v26  ;;  %v18523_v27 = vpop.f32.mrf.mxu0 }
 0x9bc   :  { %v18526_v39 = vpop.f32.mrf.mxu1  ;;  %8062 = vmatpush.msra.mxu3 %v7907_v14  ;;  %11408 = vmatmul.msk.f32.gmra.mxu2 %vm2738_vm15, %v18521_v55 }
 0x9bd   :  { %11411 = vmatmul.msk.f32.gmra.mxu3 %vm2738_vm15, %v18491_v25 }
 0x9be   :  { %11414 = vmatmul.msk.f32.vlgmr.msra.gmra.mxu0 %vm2738_vm15, %v18460_v5 }
 0x9bf   :  { %11418 = vmatmul.msk.f32.vlgmr.msrb.gmra.mxu1 %vm2738_vm15, %v18460_v5  ;;  %8088 = vmatpush.msra.mxu0 %v7923_v28  ;;  %v6813_v0 = vpop.f32.mrf.mxu2 }
 0x9c0   :  { %8117 = vmatpush.msrb.mxu1 %v12568_v1  ;;  %v18541_v48 = vadd.f32 %v6813_v0, %v6613_v41  ;;  %v6839_v16 = vpop.f32.mrf.mxu3  ;;  %v11430_v41 = vld [vmem:[%s20516_s10 + $0x100] sm:$0xff] }
 0x9c1   :  { %v18544_v9 = vadd.f32 %v6839_v16, %v6608_v47  ;;  %8089 = vmatpush.msra.mxu0 %v7918_v23 }
 0x9c2   :  { %21062 = vst [vmem:[#allocation29_spill] sm:$0xff] %v18541_v48  ;;  %8118 = vmatpush.msrb.mxu1 %v12569_v8 }
 0x9c3   :  { %21063 = vst [vmem:[#allocation7_spill] sm:$0xff] %v18544_v9  ;;  %8090 = vmatpush.msra.mxu0 %v7913_v31  ;;  %v18550_v32 = vpop.f32.mrf.mxu0 }
 0x9c4   :  { %8119 = vmatpush.msrb.mxu1 %v12573_v35  ;;  %v18552_v44 = vpop.f32.mrf.mxu1  ;;  %11409 = vmatmul.msk.f32.gmra.mxu2 %vm2738_vm15, %v11405_v6 }
 0x9c5   :  { %21064 = vst [vmem:[#allocation39_spill] sm:$0xff] %v18552_v44  ;;  %8091 = vmatpush.msra.mxu0 %v7908_v22  ;;  %11412 = vmatmul.msk.f32.gmra.mxu3 %vm2738_vm15, %v18521_v55  ;;  %v11432_v22 = vld [vmem:[%s20516_s10 + $0x110] sm:$0xff]  ;;  %v6906_v44 = vadd.f32 %v18402_v17, %v18232_v10  ;;  %v6912_v10 = vadd.f32 %v18435_v2, %v18264_v58 }
 0x9c6   :  { %8120 = vmatpush.msrb.mxu1 %v12574_v20  ;;  %11415 = vmatmul.msk.f32.gmra.mxu0 %vm2738_vm15, %v18491_v25  ;;  %v11431_v20 = vld [vmem:[%s20516_s10 + $0x108] sm:$0xff] }
 0x9c7   :  { %11419 = vmatmul.msk.f32.gmra.mxu1 %vm2738_vm15, %v18491_v25  ;;  %v6816_v19 = vpop.f32.mrf.mxu2 }
 0x9c8   :  { %v18566_v37 = vadd.f32 %v6816_v19, %v6619_v3  ;;  %v6842_v43 = vpop.f32.mrf.mxu3 }
 0x9c9   :  { %v18568_v56 = vadd.f32 %v6842_v43, %v6614_v54  ;;  %v11433_v43 = vld [vmem:[%s20516_s10 + $0x118] sm:$0xff] }
 0x9ca   :  { %21065 = vst [vmem:[#allocation74_spill] sm:$0xff] %v18566_v37 }
 0x9cb   :  { %v18570_v1 = vpop.f32.mrf.mxu0 }
 0x9cc   :  { %v18572_v12 = vpop.f32.mrf.mxu1  ;;  %11422 = vmatmul.msk.f32.vlgmr.msra.gmra.mxu2 %vm2738_vm15, %v18460_v5 }
 0x9cd   :  { %21066 = vst [vmem:[#allocation27_spill] sm:$0xff] %v18572_v12  ;;  %11413 = vmatmul.msk.f32.gmra.mxu3 %vm2738_vm15, %v11405_v6 }
 0x9ce   :  { %11416 = vmatmul.msk.f32.gmra.mxu0 %vm2738_vm15, %v18521_v55 }
 0x9cf   :  { %11420 = vmatmul.msk.f32.gmra.mxu1 %vm2738_vm15, %v18521_v55  ;;  %v18583_v53 = vpop.f32.mrf.mxu2 }
 0x9d0   :  { %v6845_v40 = vpop.f32.mrf.mxu3 }
 0x9d1   :  { %v18585_v45 = vadd.f32 %v6845_v40, %v6620_v33 }
 0x9d3   :  { %v18587_v14 = vpop.f32.mrf.mxu0 }
 0x9d4   :  { %21067 = vst [vmem:[#allocation30_spill] sm:$0xff] %v18587_v14  ;;  %v18589_v8 = vpop.f32.mrf.mxu1  ;;  %11423 = vmatmul.msk.f32.gmra.mxu2 %vm2738_vm15, %v18491_v25 }
 0x9d5   :  { %21068 = vst [vmem:[#allocation51_spill] sm:$0xff] %v18589_v8  ;;  %11426 = vmatmul.msk.f32.vlgmr.msrb.gmra.mxu3 %vm2738_vm15, %v18460_v5 }
 0x9d6   :  { %11417 = vmatmul.msk.f32.gmra.mxu0 %vm2738_vm15, %v11405_v6 }
 0x9d7   :  { %11421 = vmatmul.msk.f32.gmra.mxu1 %vm2738_vm15, %v11405_v6  ;;  %v18597_v49 = vpop.f32.mrf.mxu2 }
 0x9d8   :  { %v18599_v50 = vpop.f32.mrf.mxu3 }
 0x9db   :  { %v18601_v35 = vpop.f32.mrf.mxu0 }
 0x9dc   :  { %v18606_v28 = vpop.f32.mrf.mxu1  ;;  %11424 = vmatmul.msk.f32.gmra.mxu2 %vm2738_vm15, %v18521_v55 }
 0x9dd   :  { %21069 = vst [vmem:[#allocation44_spill] sm:$0xff] %v18606_v28  ;;  %11427 = vmatmul.msk.f32.gmra.mxu3 %vm2738_vm15, %v18491_v25 }
 0x9de   :  { %11434 = vmatmul.msk.f32.vlgmr.msrb.gmra.mxu0 %vm2738_vm15, %v11430_v41 }
 0x9df   :  { %11438 = vmatmul.msk.f32.vlgmr.msra.gmra.mxu1 %vm2738_vm15, %v11430_v41  ;;  %v18614_v5 = vpop.f32.mrf.mxu2 }
 0x9e0   :  { %v18616_v47 = vpop.f32.mrf.mxu3 }
 0x9e3   :  { %v18618_v0 = vpop.f32.mrf.mxu0 }
 0x9e4   :  { %21070 = vst [vmem:[#allocation52_spill] sm:$0xff] %v18618_v0  ;;  %v18623_v16 = vpop.f32.mrf.mxu1  ;;  %11425 = vmatmul.msk.f32.gmra.mxu2 %vm2738_vm15, %v11405_v6 }
 0x9e5   :  { %21071 = vst [vmem:[#allocation56_spill] sm:$0xff] %v18623_v16  ;;  %11428 = vmatmul.msk.f32.gmra.mxu3 %vm2738_vm15, %v18521_v55 }
 0x9e6   :  { %11435 = vmatmul.msk.f32.gmra.mxu0 %vm2738_vm15, %v11431_v20 }
 0x9e7   :  { %11439 = vmatmul.msk.f32.gmra.mxu1 %vm2738_vm15, %v11431_v20  ;;  %v18630_v25 = vpop.f32.mrf.mxu2 }
 0x9e8   :  { %v18632_v23 = vpop.f32.mrf.mxu3 }
 0x9eb   :  { %v18634_v31 = vpop.f32.mrf.mxu0 }
 0x9ec   :  { %21072 = vst [vmem:[#allocation20_spill] sm:$0xff] %v18634_v31  ;;  %v18639_v3 = vpop.f32.mrf.mxu1  ;;  %11442 = vmatmul.msk.f32.vlgmr.msrb.gmra.mxu2 %vm2738_vm15, %v11430_v41 }
 0x9ed   :  { %11429 = vmatmul.msk.f32.gmra.mxu3 %vm2738_vm15, %v11405_v6 }
 0x9ee   :  { %11436 = vmatmul.msk.f32.gmra.mxu0 %vm2738_vm15, %v11432_v22 }
 0x9ef   :  { %11440 = vmatmul.msk.f32.gmra.mxu1 %vm2738_vm15, %v11432_v22  ;;  %v18645_v55 = vpop.f32.mrf.mxu2 }
 0x9f0   :  { %21073 = vst [vmem:[#allocation57_spill] sm:$0xff] %v18645_v55  ;;  %v18647_v54 = vpop.f32.mrf.mxu3 }
 0x9f1   :  { %21074 = vst [vmem:[#allocation54_spill] sm:$0xff] %v18647_v54 }
 0x9f3   :  { %v18649_v19 = vpop.f32.mrf.mxu0 }
 0x9f4   :  { %21075 = vst [vmem:[#allocation32_spill] sm:$0xff] %v18649_v19  ;;  %v18654_v33 = vpop.f32.mrf.mxu1  ;;  %11443 = vmatmul.msk.f32.gmra.mxu2 %vm2738_vm15, %v11431_v20 }
 0x9f5   :  { %11446 = vmatmul.msk.f32.vlgmr.msra.gmra.mxu3 %vm2738_vm15, %v11430_v41 }
 0x9f6   :  { %11437 = vmatmul.msk.f32.gmra.mxu0 %vm2738_vm15, %v11433_v43 }
 0x9f7   :  { %11441 = vmatmul.msk.f32.gmra.mxu1 %vm2738_vm15, %v11433_v43  ;;  %v18660_v6 = vpop.f32.mrf.mxu2 }
 0x9f8   :  { %21076 = vst [vmem:[#allocation33_spill] sm:$0xff] %v18660_v6  ;;  %v18662_v40 = vpop.f32.mrf.mxu3 }
 0x9f9   :  { %21077 = vst [vmem:[#allocation18_spill] sm:$0xff] %v18662_v40 }
 0x9fb   :  { %v18664_v8 = vpop.f32.mrf.mxu0 }
 0x9fc   :  { %v18666_v61 = vpop.f32.mrf.mxu1  ;;  %11444 = vmatmul.msk.f32.gmra.mxu2 %vm2738_vm15, %v11432_v22 }
 0x9fd   :  { %11447 = vmatmul.msk.f32.gmra.mxu3 %vm2738_vm15, %v11431_v20 }
 0x9fe   :  { %11450 = vmatmul.msk.f32.vlgmr.msra.gmra.mxu0 %vm2738_vm15, %v11430_v41 }
 0x9ff   :  { %11454 = vmatmul.msk.f32.vlgmr.msrb.gmra.mxu1 %vm2738_vm15, %v11430_v41  ;;  %v18672_v14 = vpop.f32.mrf.mxu2 }
 0xa00   :  { %v18674_v4 = vpop.f32.mrf.mxu3 }
 0xa01   :  { %21078 = vst [vmem:[#allocation9_spill] sm:$0xff] %v18674_v4 }
 0xa03   :  { %v18676_v12 = vpop.f32.mrf.mxu0 }
 0xa04   :  { %v18678_v11 = vpop.f32.mrf.mxu1  ;;  %11445 = vmatmul.msk.f32.gmra.mxu2 %vm2738_vm15, %v11433_v43 }
 0xa05   :  { %11448 = vmatmul.msk.f32.gmra.mxu3 %vm2738_vm15, %v11432_v22 }
 0xa06   :  { %11451 = vmatmul.msk.f32.gmra.mxu0 %vm2738_vm15, %v11431_v20 }
 0xa07   :  { %11455 = vmatmul.msk.f32.gmra.mxu1 %vm2738_vm15, %v11431_v20  ;;  %v18684_v19 = vpop.f32.mrf.mxu2 }
 0xa08   :  { %21079 = vst [vmem:[#allocation16_spill] sm:$0xff] %v18684_v19  ;;  %v18686_v37 = vpop.f32.mrf.mxu3 }
 0xa09   :  { %21080 = vst [vmem:[#allocation46_spill] sm:$0xff] %v18686_v37 }
 0xa0b   :  { %v18688_v41 = vpop.f32.mrf.mxu0 }
 0xa0c   :  { %21081 = vst [vmem:[#allocation31_spill] sm:$0xff] %v18688_v41  ;;  %v18690_v40 = vpop.f32.mrf.mxu1 }
 0xa0d   :  { %11449 = vmatmul.msk.f32.gmra.mxu3 %vm2738_vm15, %v11433_v43 }
 0xa0e   :  { %11452 = vmatmul.msk.f32.gmra.mxu0 %vm2738_vm15, %v11432_v22 }
 0xa0f   :  { %11456 = vmatmul.msk.f32.gmra.mxu1 %vm2738_vm15, %v11432_v22  ;;  %v18695_v4 = vpop.f32.mrf.mxu2 }
 0xa10   :  { %v18697_v6 = vpop.f32.mrf.mxu3 }
 0xa11   :  { %21082 = vst [vmem:[#allocation41_spill] sm:$0xff] %v18697_v6 }
 0xa13   :  { %v18699_v55 = vpop.f32.mrf.mxu0 }
 0xa14   :  { %21083 = vst [vmem:[#allocation36_spill] sm:$0xff] %v18699_v55  ;;  %v18701_v20 = vpop.f32.mrf.mxu1 }
 0xa15   :  { %21084 = vst [vmem:[#allocation48_spill] sm:$0xff] %v18701_v20 }
 0xa16   :  { %11453 = vmatmul.msk.f32.gmra.mxu0 %vm2738_vm15, %v11433_v43 }
 0xa17   :  { %11457 = vmatmul.msk.f32.gmra.mxu1 %vm2738_vm15, %v11433_v43  ;;  %v18705_v19 = vpop.f32.mrf.mxu2 }
 0xa18   :  { %21085 = vst [vmem:[#allocation12_spill] sm:$0xff] %v18705_v19  ;;  %v18707_v37 = vpop.f32.mrf.mxu3 }
 0xa19   :  { %21086 = vst [vmem:[#allocation24_spill] sm:$0xff] %v18707_v37 }
 0xa1b   :  { %v18709_v31 = vpop.f32.mrf.mxu0 }
 0xa1c   :  { %21087 = vst [vmem:[#allocation17_spill] sm:$0xff] %v18709_v31  ;;  %v18711_v48 = vpop.f32.mrf.mxu1 }
 0xa1d   :  { %21088 = vst [vmem:[#allocation58_spill] sm:$0xff] %v18711_v48 }
 0xa1f   :  { %v18713_v22 = vpop.f32.mrf.mxu2 }
 0xa20   :  { %21089 = vst [vmem:[#allocation38_spill] sm:$0xff] %v18713_v22  ;;  %v18715_v16 = vpop.f32.mrf.mxu3 }
 0xa21   :  { %21090 = vst [vmem:[#allocation77_spill] sm:$0xff] %v18715_v16 }
 0xa23   :  { %v18717_v6 = vpop.f32.mrf.mxu0 }
 0xa24   :  { %21091 = vst [vmem:[#allocation11_spill] sm:$0xff] %v18717_v6  ;;  %v18719_v9 = vpop.f32.mrf.mxu1 }
 0xa25   :  { %21092 = vst [vmem:[#allocation35_spill] sm:$0xff] %v18719_v9 }
 0xa27   :  { %v18721_v20 = vpop.f32.mrf.mxu2 }
 0xa28   :  { %21093 = vst [vmem:[#allocation66_spill] sm:$0xff] %v18721_v20  ;;  %v7456_v0 = vpop.f32.mrf.mxu3 }
 0xa2b   :  { %v7485_v43 = vpop.f32.mrf.mxu0 }
 0xa2c   :  { %v18723_v13 = vpop.f32.mrf.mxu1 }
 0xa2d   :  { %21094 = vst [vmem:[#allocation75_spill] sm:$0xff] %v18723_v13 }
 0xa2f   :  { %v7670_v19 = vpop.f32.mrf.mxu2 }
 0xa30   :  { %v7459_v37 = vpop.f32.mrf.mxu3 }
 0xa33   :  { %v18725_v55 = vpop.f32.mrf.mxu0 }
 0xa34   :  { %21095 = vst [vmem:[#allocation5_spill] sm:$0xff] %v18725_v55  ;;  %v18727_v31 = vpop.f32.mrf.mxu1 }
 0xa35   :  { %21096 = vst [vmem:[#allocation6_spill] sm:$0xff] %v18727_v31  ;;  %v7228_v31 = vadd.f32 %v18639_v3, %v18568_v56  ;;  %v7213_v3 = vadd.f32 %v18583_v53, %v6906_v44  ;;  %v18778_v44 = vpop.permute.xlu1 %8174  ;;  %v7219_v53 = vadd.f32 %v18597_v49, %v6912_v10 }
 0xa37   :  { %v7673_v48 = vpop.f32.mrf.mxu2  ;;  %v7535_v55 = vadd.f32 %v7456_v0, %v7228_v31  ;;  %v18761_v0 = vpop.permute.xlu0 %8169  ;;  %v7526_v58 = vadd.f32 %v18676_v12, %v7219_v53 }
 0xa38   :  { %v7699_v22 = vpop.f32.mrf.mxu3 }
 0xa39   :  { %v7833_v49 = vadd.f32 %v7673_v48, %v7526_v58 }
 0xa3b   :  { %v18729_v54 = vpop.f32.mrf.mxu0 }
 0xa3c   :  { %21097 = vst [vmem:[#allocation65_spill] sm:$0xff] %v18729_v54  ;;  %v18731_v16 = vpop.f32.mrf.mxu1 }
 0xa3d   :  { %21098 = vst [vmem:[#allocation69_spill] sm:$0xff] %v18731_v16 }
 0xa3f   :  { %v18733_v6 = vpop.f32.mrf.mxu2 }
 0xa40   :  { %21099 = vst [vmem:[#allocation72_spill] sm:$0xff] %v18733_v6  ;;  %v18735_v9 = vpop.f32.mrf.mxu3 }
 0xa41   :  { %21100 = vst [vmem:[#allocation76_spill] sm:$0xff] %v18735_v9 }
 0xa43   :  { %v18737_v20 = vpop.f32.mrf.mxu0  ;;  %v21108_v58 = vld [vmem:[#allocation65_spill] sm:$0xff] }
 0xa44   :  { %21101 = vst [vmem:[#allocation73_spill] sm:$0xff] %v18737_v20  ;;  %v18739_v28 = vpop.f32.mrf.mxu1 }
 0xa45   :  { %21102 = vst [vmem:[#allocation22_spill] sm:$0xff] %v18739_v28  ;;  %v7234_v28 = vadd.f32 %v18654_v33, %v18585_v45 }
 0xa47   :  { %v18741_v13 = vpop.f32.mrf.mxu2  ;;  %v7541_v20 = vadd.f32 %v7459_v37, %v7234_v28  ;;  %v6922_v37 = vadd.f32 %v18570_v1, %v18425_v62  ;;  %v6907_v62 = vadd.f32 %v18406_v46, %v18266_v18  ;;  %v6919_v46 = vadd.f32 %v18464_v24, %v18339_v59 }
 0xa48   :  { %21103 = vst [vmem:[#allocation90_spill] sm:$0xff] %v18741_v13  ;;  %v18743_v26 = vpop.f32.mrf.mxu3  ;;  %v6918_v59 = vadd.f32 %v18462_v51, %v18304_v63 }
 0xa49   :  { %v7229_v17 = vadd.f32 %v18672_v14, %v6922_v37  ;;  %v7226_v48 = vadd.f32 %v18632_v23, %v6919_v46  ;;  %v7215_v23 = vadd.f32 %v18601_v35, %v18482_v29 }
 0xa4b   :  { %v18747_v41 = vpop.f32.mrf.mxu0  ;;  %v7533_v24 = vadd.f32 %v18690_v40, %v7226_v48  ;;  %v7225_v40 = vadd.f32 %v18614_v5, %v6918_v59  ;;  %v7522_v29 = vadd.f32 %v18695_v4, %v7215_v23  ;;  %v21117_v59 = vld [vmem:[#allocation7_spill] sm:$0xff]  ;;  %v21119_v23 = vld [vmem:[#allocation29_spill] sm:$0xff] }
 0xa4c   :  { %v7763_v54 = vpop.f32.mrf.mxu1 }
 0xa4d   :  { %v18749_v16 = vadd.f32 %v7763_v54, %v7535_v55  ;;  %v7520_v54 = vadd.f32 %v18664_v8, %v7213_v3  ;;  %v7536_v8 = vadd.f32 %v7485_v43, %v7229_v17 }
 0xa4f   :  { %21104 = vst [vmem:[#allocation101_spill] sm:$0xff] %v18749_v16  ;;  %v18751_v6 = vpop.f32.mrf.mxu2  ;;  %v7827_v45 = vadd.f32 %v7670_v19, %v7520_v54  ;;  %v7214_v54 = vadd.f32 %v18599_v50, %v6907_v62 }
 0xa50   :  { %v18753_v9 = vpop.f32.mrf.mxu3 }
 0xa51   :  { %v7521_v37 = vadd.f32 %v18666_v61, %v7214_v54  ;;  %v6913_v61 = vadd.f32 %v18437_v42, %v18308_v57  ;;  %v6925_v57 = vadd.f32 %v18497_v52, %v18369_v36  ;;  %v6910_v42 = vadd.f32 %v18523_v27, %v18366_v7  ;;  %v21106_v27 = vld [vmem:[#allocation39_spill] sm:$0xff]  ;;  %v21109_v54 = vld [vmem:[#allocation76_spill] sm:$0xff] }
 0xa52   :  { %v6911_v36 = vadd.f32 %v18526_v39, %v18397_v34  ;;  %v6916_v7 = vadd.f32 %v18550_v32, %v18395_v38  ;;  %v18836_v5 = vadd.f32 %v21106_v27, %v18429_v15  ;;  %v21111_v34 = vld [vmem:[#allocation44_spill] sm:$0xff]  ;;  %v21125_v27 = vld [vmem:[#allocation18_spill] sm:$0xff] }
 0xa53   :  { %v18757_v13 = vpop.f32.mrf.mxu0  ;;  %v7828_v12 = vadd.f32 %v7699_v22, %v7521_v37  ;;  %v6924_v22 = vadd.f32 %v18495_v21, %v18337_v60  ;;  %v21112_v37 = vld [vmem:[#allocation54_spill] sm:$0xff]  ;;  %v21113_v32 = vld [vmem:[#allocation36_spill] sm:$0xff] }
 0xa54   :  { %v7766_v56 = vpop.f32.mrf.mxu1  ;;  %v7232_v38 = vadd.f32 %v21112_v37, %v6925_v57  ;;  %v21114_v15 = vld [vmem:[#allocation72_spill] sm:$0xff] }
 0xa55   :  { %v18763_v31 = vadd.f32 %v7766_v56, %v7541_v20  ;;  %v18776_v56 = vpop.permute.xlu2 %8164  ;;  %v7231_v52 = vadd.f32 %v18630_v25, %v6924_v22  ;;  %v21121_v57 = vld [vmem:[#allocation48_spill] sm:$0xff] }
 0xa57   :  { %21105 = vst [vmem:[#allocation79_spill] sm:$0xff] %v18763_v31  ;;  %v18766_v55 = vpop.f32.mrf.mxu2  ;;  %v18782_v31 = vpop.permute.xlu0 %8212  ;;  %v7538_v25 = vadd.f32 %v21113_v32, %v7231_v52  ;;  %v21124_v52 = vld [vmem:[#allocation33_spill] sm:$0xff] }
 0xa58   :  { %v18769_v16 = vpop.f32.mrf.mxu3 }
 0xa5b   :  { %v7977_v28 = vpop.f32.mrf.mxu0 }
 0xa5c   :  { %v8134_v33 = vadd.f32 %v7977_v28, %v7827_v45  ;;  %v8006_v20 = vpop.f32.mrf.mxu1 }
 0xa5d   :  { %v8135_v50 = vadd.f32 %v8006_v20, %v7828_v12  ;;  %v7220_v20 = vadd.f32 %v18616_v47, %v6913_v61  ;;  %v18827_v47 = vpop.permute.xlu2 %8179  ;;  %v21116_v61 = vld [vmem:[#allocation52_spill] sm:$0xff] }
 0xa5e   :  { %v8182_v3 = vmul.f32 %v18776_v56, %v8134_v33  ;;  %v18799_v33 = vpop.permute.xlu1 %8217 }
 0xa5f   :  { %v7792_v1 = vpop.f32.mrf.mxu2  ;;  %v8183_v63 = vmul.f32 %v18776_v56, %v8135_v50  ;;  %v7527_v60 = vadd.f32 %v18678_v11, %v7220_v20  ;;  %v21107_v11 = vld [vmem:[#allocation31_spill] sm:$0xff]  ;;  %v21115_v50 = vld [vmem:[#allocation14_spill] sm:$0xff]  ;;  %v21120_v20 = vld [vmem:[#allocation20_spill] sm:$0xff] }
 0xa60   :  { %v8230_v2 = vadd.f32 %v18782_v31, %v8182_v3  ;;  %v18788_v14 = vadd.f32 %v7792_v1, %v7536_v8  ;;  %v18790_v19 = vpop.f32.mrf.mxu3  ;;  %v7840_v1 = vadd.f32 %v18743_v26, %v7533_v24  ;;  %v7532_v4 = vadd.f32 %v21107_v11, %v7225_v40  ;;  %v21118_v24 = vld [vmem:[#allocation56_spill] sm:$0xff] }
 0xa61   :  { %v7222_v22 = vadd.f32 %v21118_v24, %v21117_v59  ;;  %v7218_v11 = vadd.f32 %v21125_v27, %v6911_v36  ;;  %v21129_v36 = vld [vmem:[#allocation58_spill] sm:$0xff]  ;;  %v21132_v59 = vld [vmem:[#allocation60_spill] sm:$0xff] }
 0xa62   :  { %v8254_v43 = vmax.f32 %v8230_v2, 0.0  ;;  %v7829_v2 = vadd.f32 %v21108_v58, %v7522_v29 }
 0xa63   :  { %v7980_v45 = vpop.f32.mrf.mxu0 }
 0xa64   :  { %v8278_v28 = vmul.f32 %v8254_v43, %v20976_v30  ;;  %v8140_v10 = vadd.f32 %v7980_v45, %v7833_v49  ;;  %v8009_v18 = vpop.f32.mrf.mxu1  ;;  %v7834_v49 = vadd.f32 %v21109_v54, %v7527_v60  ;;  %v21110_v43 = vld [vmem:[#allocation37_spill] sm:$0xff]  ;;  %v8231_v45 = vadd.f32 %v18782_v31, %v8183_v63  ;;  %v21123_v60 = vld [vmem:[#allocation90_spill] sm:$0xff] }
 0xa65   :  { %v7216_v39 = vadd.f32 %v21111_v34, %v21110_v43  ;;  %v21122_v63 = vld [vmem:[#allocation57_spill] sm:$0xff]  ;;  %v21126_v34 = vld [vmem:[#allocation12_spill] sm:$0xff] }
 0xa66   :  { %v8188_v17 = vmul.f32 %v18761_v0, %v8140_v10  ;;  %8326 = vrot.lane.b32.xlu1 %v8278_v28, %s13122_s23  ;;  %v7839_v10 = vadd.f32 %v21114_v15, %v7532_v4  ;;  %v8141_v46 = vadd.f32 %v8009_v18, %v7834_v49  ;;  %v7217_v40 = vadd.f32 %v21122_v63, %v6910_v42 }
 0xa67   :  { %v18802_v53 = vpop.f32.mrf.mxu2  ;;  %v7845_v18 = vadd.f32 %v21123_v60, %v7538_v25  ;;  %v8255_v58 = vmax.f32 %v8231_v45, 0.0  ;;  %v21128_v25 = vld [vmem:[#allocation17_spill] sm:$0xff]  ;;  %v7525_v15 = vadd.f32 %v21129_v36, %v7218_v11  ;;  %v21134_v60 = vld [vmem:[#allocation38_spill] sm:$0xff] }
 0xa68   :  { %v8236_v8 = vadd.f32 %v18799_v33, %v8188_v17  ;;  %v18807_v3 = vpop.f32.mrf.mxu3  ;;  %v8189_v54 = vmul.f32 %v18761_v0, %v8141_v46  ;;  %v18875_v46 = vpop.permute.xlu2 %8227 }
 0xa6a   :  { %v8260_v62 = vmax.f32 %v8236_v8, 0.0  ;;  %v7221_v8 = vadd.f32 %v21116_v61, %v21115_v50  ;;  %v21131_v50 = vld [vmem:[#allocation73_spill] sm:$0xff] }
 0xa6b   :  { %v7983_v51 = vpop.f32.mrf.mxu0 }
 0xa6c   :  { %v8284_v21 = vmul.f32 %v8260_v62, %v20976_v30  ;;  %v8012_v35 = vpop.f32.mrf.mxu1  ;;  %v7227_v62 = vadd.f32 %v21120_v20, %v21119_v23  ;;  %v8146_v29 = vadd.f32 %v7983_v51, %v7839_v10  ;;  %v7528_v37 = vadd.f32 %v21126_v34, %v7221_v8 }
 0xa6d   :  { %v8147_v26 = vadd.f32 %v8012_v35, %v7840_v1  ;;  %v7539_v1 = vadd.f32 %v21121_v57, %v7232_v38  ;;  %v18861_v35 = vpop.permute.xlu0 %8222  ;;  %v21127_v38 = vld [vmem:[#allocation24_spill] sm:$0xff]  ;;  %v8279_v8 = vmul.f32 %v8255_v58, %v21132_v59  ;;  %v8237_v23 = vadd.f32 %v18799_v33, %v8189_v54  ;;  %v21133_v57 = vld [vmem:[#allocation61_spill] sm:$0xff] }
 0xa6e   :  { %8338 = vrot.lane.b32.xlu0 %v8284_v21, %s13122_s23  ;;  %v7523_v32 = vadd.f32 %v21127_v38, %v7216_v39  ;;  %v7835_v61 = vadd.f32 %v21131_v50, %v7528_v37 }
 0xa6f   :  { %v8035_v28 = vpop.f32.mrf.mxu2  ;;  %v8195_v12 = vmul.f32 %v18778_v44, %v8147_v26  ;;  %v7223_v26 = vadd.f32 %v21124_v52, %v6916_v7  ;;  %v7846_v4 = vadd.f32 %v18753_v9, %v7539_v1  ;;  %v7524_v7 = vadd.f32 %v21128_v25, %v7217_v40 }
 0xa70   :  { %v18849_v17 = vpop.f32.mrf.mxu3  ;;  %v8136_v48 = vadd.f32 %v8035_v28, %v7829_v2  ;;  %v8194_v9 = vmul.f32 %v18778_v44, %v8146_v29  ;;  %v8261_v34 = vmax.f32 %v8237_v23, 0.0 }
 0xa71   :  { %v8243_v49 = vadd.f32 %v18861_v35, %v8195_v12  ;;  %v21130_v12 = vld [vmem:[#allocation69_spill] sm:$0xff]  ;;  %v7831_v27 = vadd.f32 %v18751_v6, %v7524_v7 }
 0xa72   :  { %v8184_v21 = vmul.f32 %v18776_v56, %v8136_v48  ;;  %v7830_v48 = vadd.f32 %v21130_v12, %v7523_v32  ;;  %v8242_v11 = vadd.f32 %v18861_v35, %v8194_v9  ;;  %v21136_v7 = vld [vmem:[#allocation9_spill] sm:$0xff] }
 0xa73   :  { %v7986_v2 = vpop.f32.mrf.mxu0  ;;  %v8267_v20 = vmax.f32 %v8243_v49, 0.0  ;;  %v7832_v49 = vadd.f32 %v18769_v16, %v7525_v15 }
 0xa74   :  { %v8232_v42 = vadd.f32 %v18782_v31, %v8184_v21  ;;  %v8152_v43 = vadd.f32 %v7986_v2, %v7845_v18  ;;  %v8015_v51 = vpop.f32.mrf.mxu1  ;;  %v7534_v18 = vadd.f32 %v21134_v60, %v7227_v62  ;;  %v21135_v2 = vld [vmem:[#allocation77_spill] sm:$0xff]  ;;  %v8266_v15 = vmax.f32 %v8242_v11, 0.0 }
 0xa75   :  { %v8153_v28 = vadd.f32 %v8015_v51, %v7846_v4  ;;  %v7529_v54 = vadd.f32 %v21135_v2, %v7222_v22  ;;  %v8291_v62 = vmul.f32 %v8267_v20, %v21132_v59 }
 0xa76   :  { %v8256_v45 = vmax.f32 %v8232_v42, 0.0  ;;  %v8200_v10 = vmul.f32 %v18827_v47, %v8152_v43  ;;  %v7841_v36 = vadd.f32 %v18747_v41, %v7534_v18 }
 0xa77   :  { %v8201_v39 = vmul.f32 %v18827_v47, %v8153_v28  ;;  %v8038_v24 = vpop.f32.mrf.mxu2  ;;  %v7224_v28 = vadd.f32 %v21136_v7, %v18836_v5  ;;  %v21147_v7 = vld [vmem:[#allocation63_spill] sm:$0xff] }
 0xa78   :  { %v8280_v1 = vmul.f32 %v8256_v45, %v21133_v57  ;;  %v8248_v63 = vadd.f32 %v18875_v46, %v8200_v10  ;;  %v8064_v40 = vpop.f32.mrf.mxu3  ;;  %v8142_v21 = vadd.f32 %v8038_v24, %v7835_v61  ;;  %v21137_v45 = vld [vmem:[#allocation22_spill] sm:$0xff]  ;;  %v21139_v24 = vld [vmem:[#allocation35_spill] sm:$0xff] }
 0xa79   :  { %v8249_v29 = vadd.f32 %v18875_v46, %v8201_v39  ;;  %v8137_v52 = vadd.f32 %v8064_v40, %v7830_v48  ;;  %v7836_v10 = vadd.f32 %v21137_v45, %v7529_v54  ;;  %v7531_v23 = vadd.f32 %v21139_v24, %v7224_v28  ;;  %v21140_v40 = vld [vmem:[#allocation62_spill] sm:$0xff] }
 0xa7a   :  { %v8272_v4 = vmax.f32 %v8248_v63, 0.0  ;;  %v12575_v58 = vpack.i.bf16 %v8280_v1, %v8279_v8  ;;  %v8190_v25 = vmul.f32 %v18761_v0, %v8142_v21  ;;  %v21138_v8 = vld [vmem:[#allocation11_spill] sm:$0xff]  ;;  %v18908_v1 = vmul.f32 %v8261_v34, %v21132_v59  ;;  %v21150_v24 = vld [vmem:[#allocation50_spill] sm:$0xff] }
 0xa7b   :  { %v8273_v42 = vmax.f32 %v8249_v29, 0.0  ;;  %v8185_v43 = vmul.f32 %v18776_v56, %v8137_v52  ;;  %v8093_v51 = vpop.f32.mrf.mxu0  ;;  %v7530_v39 = vadd.f32 %v21138_v8, %v7223_v26  ;;  %v21142_v29 = vld [vmem:[#allocation32_spill] sm:$0xff]  ;;  %v8290_v52 = vmul.f32 %v8266_v15, %v20976_v30  ;;  %v21149_v8 = vld [vmem:[#allocation101_spill] sm:$0xff] }
 0xa7c   :  { %v8296_v37 = vmul.f32 %v8272_v4, %v20976_v30  ;;  %v8138_v38 = vadd.f32 %v8093_v51, %v7831_v27  ;;  %v8122_v32 = vpop.f32.mrf.mxu1  ;;  %12576 = vrot.lane.b32.xlu2 %v12575_v58, %s13122_s23  ;;  %v8238_v63 = vadd.f32 %v18799_v33, %v8190_v25  ;;  %v7838_v11 = vadd.f32 %v18790_v19, %v7531_v23 }
 0xa7d   :  { %v8297_v6 = vmul.f32 %v8273_v42, %v21132_v59  ;;  %v8233_v22 = vadd.f32 %v18782_v31, %v8185_v43  ;;  %v8139_v16 = vadd.f32 %v8122_v32, %v7832_v49  ;;  %v7837_v21 = vadd.f32 %v18766_v55, %v7530_v39  ;;  %v21143_v49 = vld [vmem:[#allocation66_spill] sm:$0xff] }
 0xa7e   :  { %v8186_v9 = vmul.f32 %v18776_v56, %v8138_v38  ;;  %8362 = vrot.lane.b32.xlu0 %v8296_v37, %s13122_s23  ;;  %v21144_v55 = vld [vmem:[#allocation42_spill] sm:$0xff]  ;;  %v8262_v37 = vmax.f32 %v8238_v63, 0.0 }
 0xa7f   :  { %v8257_v12 = vmax.f32 %v8233_v22, 0.0  ;;  %v8187_v48 = vmul.f32 %v18776_v56, %v8139_v16  ;;  %v8041_v50 = vpop.f32.mrf.mxu2  ;;  %v12580_v61 = vpack.i.bf16 %v8291_v62, %v8297_v6  ;;  %v21141_v56 = vld [vmem:[#allocation74_spill] sm:$0xff]  ;;  %v21145_v62 = vld [vmem:[#allocation27_spill] sm:$0xff] }
 0xa80   :  { %v8234_v5 = vadd.f32 %v18782_v31, %v8186_v9  ;;  %v8148_v20 = vadd.f32 %v8041_v50, %v7841_v36  ;;  %v8067_v41 = vpop.f32.mrf.mxu3  ;;  %v7233_v26 = vadd.f32 %v21142_v29, %v21141_v56  ;;  %v21146_v22 = vld [vmem:[#allocation46_spill] sm:$0xff] }
 0xa81   :  { %v18912_v60 = vmul.f32 %v8257_v12, %v21140_v40  ;;  %v8143_v18 = vadd.f32 %v8067_v41, %v7836_v10  ;;  %12581 = vrot.lane.b32.xlu1 %v12580_v61, %s13122_s23  ;;  %v8235_v27 = vadd.f32 %v18782_v31, %v8187_v48  ;;  %v6923_v31 = vadd.f32 %v21145_v62, %v21144_v55  ;;  %v21148_v48 = vld [vmem:[#allocation75_spill] sm:$0xff]  ;;  %v21152_v56 = vld [vmem:[#allocation30_spill] sm:$0xff]  ;;  %v21156_v55 = vld [vmem:[#allocation41_spill] sm:$0xff] }
 0xa82   :  { %v8258_v4 = vmax.f32 %v8234_v5, 0.0  ;;  %v7540_v42 = vadd.f32 %v21143_v49, %v7233_v26  ;;  %v8196_v43 = vmul.f32 %v18778_v44, %v8148_v20  ;;  %v8286_v61 = vmul.f32 %v8262_v37, %v21133_v57 }
 0xa83   :  { %v8191_v58 = vmul.f32 %v18761_v0, %v8143_v18  ;;  %v8096_v2 = vpop.f32.mrf.mxu0  ;;  %v12590_v54 = vpack.i.bf16 %v18908_v1, %v18912_v60  ;;  %v8259_v6 = vmax.f32 %v8235_v27, 0.0  ;;  %v7230_v16 = vadd.f32 %v21146_v22, %v6923_v31  ;;  %v21151_v18 = vld [vmem:[#allocation40_spill] sm:$0xff] }
 0xa84   :  { %v8144_v51 = vadd.f32 %v8096_v2, %v7837_v21  ;;  %v8125_v34 = vpop.f32.mrf.mxu1  ;;  %8350 = vrot.lane.b32.xlu2 %v8290_v52, %s13122_s23  ;;  %v7847_v32 = vadd.f32 %v18757_v13, %v7540_v42  ;;  %v8282_v28 = vmul.f32 %v8258_v4, %v21147_v7  ;;  %v8244_v45 = vadd.f32 %v18861_v35, %v8196_v43  ;;  %v21154_v4 = vld [vmem:[#allocation51_spill] sm:$0xff] }
 0xa85   :  { %v8239_v19 = vadd.f32 %v18799_v33, %v8191_v58  ;;  %v8145_v38 = vadd.f32 %v8125_v34, %v7838_v11  ;;  %v7537_v50 = vadd.f32 %v21148_v48, %v7230_v16  ;;  %v8283_v23 = vmul.f32 %v8259_v6, %v21150_v24  ;;  %v21153_v11 = vld [vmem:[#allocation25_spill] sm:$0xff]  ;;  %v21158_v6 = vld [vmem:[#allocation6_spill] sm:$0xff]  ;;  %v21159_v16 = vld [vmem:[#allocation79_spill] sm:$0xff] }
 0xa86   :  { %v8192_v25 = vmul.f32 %v18761_v0, %v8144_v51  ;;  %v6928_v29 = vadd.f32 %v21152_v56, %v21151_v18  ;;  %v8268_v26 = vmax.f32 %v8244_v45, 0.0  ;;  %v6929_v58 = vadd.f32 %v21154_v4, %v21153_v11 }
 0xa87   :  { %v8263_v36 = vmax.f32 %v8239_v19, 0.0  ;;  %v8193_v15 = vmul.f32 %v18761_v0, %v8145_v38  ;;  %v8044_v9 = vpop.f32.mrf.mxu2  ;;  %v7844_v20 = vadd.f32 %v18807_v3, %v7537_v50  ;;  %v21155_v3 = vld [vmem:[#allocation16_spill] sm:$0xff] }
 0xa88   :  { %v8154_v10 = vadd.f32 %v8044_v9, %v7847_v32  ;;  %v8070_v12 = vpop.f32.mrf.mxu3  ;;  %v8240_v5 = vadd.f32 %v18799_v33, %v8192_v25  ;;  %v7235_v42 = vadd.f32 %v21155_v3, %v6928_v29  ;;  %v7236_v62 = vadd.f32 %v21156_v55, %v6929_v58 }
 0xa89   :  { %v8287_v13 = vmul.f32 %v8263_v36, %v21140_v40  ;;  %v8149_v39 = vadd.f32 %v8070_v12, %v21149_v8  ;;  %8334 = vrot.lane.b32.xlu1 %v8282_v28, %s13122_s23  ;;  %v8292_v19 = vmul.f32 %v8268_v26, %v21133_v57 }
 0xa8a   :  { %v8202_v0 = vmul.f32 %v18827_v47, %v8154_v10  ;;  %v8264_v43 = vmax.f32 %v8240_v5, 0.0  ;;  %v7543_v25 = vadd.f32 %v21158_v6, %v7236_v62 }
 0xa8b   :  { %v8099_v41 = vpop.f32.mrf.mxu0  ;;  %v12595_v63 = vpack.i.bf16 %v8287_v13, %v8286_v61  ;;  %v8197_v2 = vmul.f32 %v18778_v44, %v8149_v39 }
 0xa8c   :  { %v8250_v21 = vadd.f32 %v18875_v46, %v8202_v0  ;;  %v8150_v52 = vadd.f32 %v8099_v41, %v18788_v14  ;;  %v8128_v27 = vpop.f32.mrf.mxu1  ;;  %8336 = vrot.lane.b32.xlu2 %v8283_v23, %s13122_s23  ;;  %v21157_v14 = vld [vmem:[#allocation5_spill] sm:$0xff]  ;;  %v8288_v9 = vmul.f32 %v8264_v43, %v21147_v7  ;;  %v7850_v10 = vadd.f32 %v18849_v17, %v7543_v25 }
 0xa8d   :  { %v8151_v49 = vadd.f32 %v8128_v27, %v7844_v20  ;;  %v7542_v37 = vadd.f32 %v21157_v14, %v7235_v42  ;;  %v8245_v22 = vadd.f32 %v18861_v35, %v8197_v2 }
 0xa8e   :  { %v8274_v51 = vmax.f32 %v8250_v21, 0.0  ;;  %v8198_v34 = vmul.f32 %v18778_v44, %v8150_v52 }
 0xa8f   :  { %v8199_v31 = vmul.f32 %v18778_v44, %v8151_v49  ;;  %v7849_v36 = vadd.f32 %v18802_v53, %v7542_v37  ;;  %v8269_v13 = vmax.f32 %v8245_v22, 0.0 }
 0xa90   :  { %v8298_v38 = vmul.f32 %v8274_v51, %v21133_v57  ;;  %v8073_v32 = vpop.f32.mrf.mxu3 }
 0xa91   :  { %v8155_v28 = vadd.f32 %v8073_v32, %v21159_v16  ;;  %12596 = vrot.lane.b32.xlu1 %v12595_v63, %s13122_s23  ;;  %v8247_v44 = vadd.f32 %v18861_v35, %v8199_v31  ;;  %v8293_v17 = vmul.f32 %v8269_v13, %v21140_v40  ;;  %v8241_v63 = vadd.f32 %v18799_v33, %v8193_v15 }
 0xa92   :  { %v12585_v45 = vpack.i.bf16 %v8292_v19, %v8298_v38  ;;  %v8246_v15 = vadd.f32 %v18861_v35, %v8198_v34 }
 0xa93   :  { %v8203_v12 = vmul.f32 %v18827_v47, %v8155_v28  ;;  %v8102_v48 = vpop.f32.mrf.mxu0  ;;  %v8271_v39 = vmax.f32 %v8247_v44, 0.0  ;;  %v8265_v21 = vmax.f32 %v8241_v63, 0.0 }
 0xa94   :  { %v8156_v50 = vadd.f32 %v8102_v48, %v7849_v36  ;;  %v8131_v61 = vpop.f32.mrf.mxu1  ;;  %12586 = vrot.lane.b32.xlu0 %v12585_v45, %s13122_s23  ;;  %8346 = vrot.lane.b32.xlu2 %v8288_v9, %s13122_s23  ;;  %v8270_v1 = vmax.f32 %v8246_v15, 0.0 }
 0xa95   :  { %v8251_v8 = vadd.f32 %v18875_v46, %v8203_v12  ;;  %v8157_v53 = vadd.f32 %v8131_v61, %v7850_v10  ;;  %v8295_v18 = vmul.f32 %v8271_v39, %v21150_v24  ;;  %v8289_v33 = vmul.f32 %v8265_v21, %v21150_v24 }
 0xa96   :  { %v8204_v23 = vmul.f32 %v18827_v47, %v8156_v50  ;;  %v8294_v60 = vmul.f32 %v8270_v1, %v21147_v7 }
 0xa97   :  { %v8275_v5 = vmax.f32 %v8251_v8, 0.0  ;;  %v8205_v0 = vmul.f32 %v18827_v47, %v8157_v53 }
 0xa98   :  { %v8252_v56 = vadd.f32 %v18875_v46, %v8204_v23 }
 0xa99   :  { %v8299_v20 = vmul.f32 %v8275_v5, %v21140_v40  ;;  %v8253_v41 = vadd.f32 %v18875_v46, %v8205_v0 }
 0xa9a   :  { %v8276_v52 = vmax.f32 %v8252_v56, 0.0 }
 0xa9b   :  { %v8277_v29 = vmax.f32 %v8253_v41, 0.0  ;;  %v12600_v26 = vpack.i.bf16 %v8293_v17, %v8299_v20 }
 0xa9c   :  { %12591 = vrot.lane.b32.xlu0 %v12590_v54, %s13122_s23  ;;  %8360 = vrot.lane.b32.xlu2 %v8295_v18, %s13122_s23  ;;  %v8300_v46 = vmul.f32 %v8276_v52, %v21147_v7 }
 0xa9d   :  { %v8301_v47 = vmul.f32 %v8277_v29, %v21150_v24 }
 0xa9f   :  { %8372 = vrot.lane.b32.xlu1 %v8301_v47, %s13122_s23 }
 0xaa4   :  { %8348 = vrot.lane.b32.xlu0 %v8289_v33, %s13122_s23  ;;  %8370 = vrot.lane.b32.xlu2 %v8300_v46, %s13122_s23 }
 0xaa7   :  { %12601 = vrot.lane.b32.xlu1 %v12600_v26, %s13122_s23 }
 0xaac   :  { %8358 = vrot.lane.b32.xlu0 %v8294_v60, %s13122_s23 }
 0xad6   :  { %v18995_v54 = vpop.permute.xlu2 %12576 }
 0xad7   :  { %v12578_v27 = vunpack.i.l.bf16 %v18995_v54  ;;  %v12579_v37 = vunpack.i.h.bf16 %v18995_v54 }
 0xad8   :  { %v18998_v11 = vpop.permute.xlu1 %8326 }
 0xad9   :  { %v19002_v35 = vsel %vm196_vm3, %v18998_v11, %v12578_v27  ;;  %v19006_v4 = vsel %vm196_vm3, 0.0, %v18998_v11  ;;  %v8375_v6 = vsel %vm196_vm3, %v12578_v27, %v12579_v37 }
 0xada   :  { %v12605_v58 = vpack.i.bf16 %v19002_v35, %v19006_v4 }
 0xadc   :  { %12606 = vrot.lane.b32.xlu2 %v12605_v58, %s13123_s3 }
 0xade   :  { %v19011_v2 = vpop.permute.xlu2 %8350 }
 0xadf   :  { %v8420_v42 = vsel %vm196_vm3, 0.0, %v19011_v2 }
 0xae0   :  { %v19018_v43 = vpop.permute.xlu0 %8338 }
 0xae1   :  { %v8419_v45 = vsel %vm196_vm3, 0.0, %v19018_v43 }
 0xae6   :  { %v8337_v55 = vpop.permute.xlu2 %8336 }
 0xaee   :  { %v19080_v23 = vpop.permute.xlu2 %8346 }
 0xaf0   :  { %v19035_v14 = vpop.permute.xlu0 %8362 }
 0xaf1   :  { %v8421_v1 = vsel %vm196_vm3, 0.0, %v19035_v14 }
 0xaf3   :  { %v19013_v49 = vpop.permute.xlu1 %12581 }
 0xaf4   :  { %v12584_v3 = vunpack.i.h.bf16 %v19013_v49  ;;  %v12583_v16 = vunpack.i.l.bf16 %v19013_v49 }
 0xaf6   :  { %v19022_v51 = vsel %vm196_vm3, %v19011_v2, %v12584_v3  ;;  %v8361_v15 = vpop.permute.xlu2 %8360  ;;  %v19151_v46 = vsel %vm196_vm3, %v19035_v14, %v12583_v16 }
 0xaf7   :  { %v19025_v34 = vpack.i.bf16 %v19022_v51, %v8420_v42  ;;  %v19158_v60 = vpack.i.bf16 %v19151_v46, %v8421_v1 }
 0xaf9   :  { %12641 = vrot.lane.b32.xlu2 %v19025_v34, %s13123_s3 }
 0xafb   :  { %v19029_v62 = vpop.permute.xlu1 %8334 }
 0xafc   :  { %v19033_v31 = vsel %vm196_vm3, %v19029_v62, %v8337_v55 }
 0xafd   :  { %v8422_v20 = vsel %vm205_vm4, %v19033_v31, 0.0 }
 0xafe   :  { %v8371_v54 = vpop.permute.xlu2 %8370 }
 0xb01   :  { %12646 = vrot.lane.b32.xlu2 %v19025_v34, %s13124_s24 }
 0xb03   :  { %v19040_v19 = vpop.permute.xlu1 %12596 }
 0xb04   :  { %v12599_v38 = vunpack.i.h.bf16 %v19040_v19  ;;  %v12598_v32 = vunpack.i.l.bf16 %v19040_v19 }
 0xb06   :  { %v19048_v25 = vsel %vm196_vm3, %v12598_v32, %v12599_v38  ;;  %v12587_v22 = vpop.permute.xlu0 %12586 }
 0xb07   :  { %v12589_v28 = vunpack.i.h.bf16 %v12587_v22  ;;  %v12588_v36 = vunpack.i.l.bf16 %v12587_v22  ;;  %v19052_v9 = vpack.i.bf16 %v19048_v25, %v8375_v6 }
 0xb09   :  { %v8390_v44 = vsel %vm196_vm3, %v12583_v16, %v12588_v36  ;;  %12651 = vrot.lane.b32.xlu2 %v19025_v34, %s13125_s25  ;;  %v8385_v10 = vsel %vm196_vm3, %v12584_v3, %v12589_v28 }
 0xb0a   :  { %8707 = vmatpush.msrb.mxu0 %v8390_v44  ;;  %v19060_v12 = vpack.i.bf16 %v8419_v45, %v8390_v44 }
 0xb0c   :  { %8708 = vmatpush.msrb.mxu0 %v8385_v10 }
 0xb0e   :  { %v19062_v48 = vpop.permute.xlu0 %12591 }
 0xb0f   :  { %v12594_v50 = vunpack.i.h.bf16 %v19062_v48  ;;  %v12593_v52 = vunpack.i.l.bf16 %v19062_v48 }
 0xb11   :  { %v19067_v61 = vsel %vm196_vm3, %v19018_v43, %v12594_v50  ;;  %v8380_v13 = vsel %vm196_vm3, %v12594_v50, %v12598_v32  ;;  %v19070_v8 = vpop.permute.xlu1 %8372  ;;  %12656 = vrot.lane.b32.xlu2 %v19025_v34, %s13126_s26  ;;  %v19124_v33 = vsel %vm196_vm3, %v12579_v37, %v12593_v52  ;;  %v19179_v42 = vsel %vm196_vm3, %v12593_v52, %v19029_v62 }
 0xb12   :  { %8709 = vmatpush.msrb.mxu0 %v8380_v13  ;;  %v19075_v53 = vpack.i.bf16 %v8385_v10, %v19067_v61  ;;  %v12610_v39 = vpack.i.bf16 %v8375_v6, %v8380_v13  ;;  %v19097_v56 = vpack.i.bf16 %v8380_v13, %v19002_v35 }
 0xb14   :  { %12671 = vrot.lane.b32.xlu1 %v19075_v53, %s13123_s3  ;;  %12611 = vrot.lane.b32.xlu0 %v12610_v39, %s13123_s3 }
 0xb15   :  { %8710 = vmatpush.msrb.mxu0 %v8375_v6  ;;  %v19212_v6 = vsel %vm196_vm3, %v8371_v54, %v19070_v8 }
 0xb16   :  { %v8349_v5 = vpop.permute.xlu0 %8348  ;;  %v19222_v16 = vsel %vm205_vm4, %v19212_v6, 0.0 }
 0xb17   :  { %v19084_v0 = vsel %vm196_vm3, %v19080_v23, %v8349_v5 }
 0xb18   :  { %v8423_v17 = vsel %vm205_vm4, %v19084_v0, 0.0 }
 0xb19   :  { %v19090_v41 = vpop.permute.xlu1 %12601  ;;  %12661 = vrot.lane.b32.xlu2 %v19025_v34, %s13127_s27  ;;  %v19099_v29 = vpack.i.bf16 %v8422_v20, %v8423_v17 }
 0xb1a   :  { %v12604_v63 = vunpack.i.h.bf16 %v19090_v41  ;;  %v12603_v18 = vunpack.i.l.bf16 %v19090_v41 }
 0xb1c   :  { %v19104_v26 = vsel %vm196_vm3, %v12589_v28, %v12604_v63  ;;  %v19109_v47 = vsel %vm196_vm3, %v12588_v36, %v12603_v18  ;;  %12676 = vrot.lane.b32.xlu1 %v19075_v53, %s13124_s24  ;;  %12616 = vrot.lane.b32.xlu0 %v19097_v56, %s13124_s24  ;;  %v19229_v36 = vsel %vm196_vm3, %v12599_v38, %v19080_v23 }
 0xb1d   :  { %8727 = vmatpush.msra.mxu1 %v19109_v47  ;;  %v12785_v44 = vpack.i.bf16 %v19179_v42, %v19229_v36  ;;  %v19239_v10 = vsel %vm196_vm3, %v12603_v18, %v8371_v54  ;;  %v19249_v38 = vpack.i.bf16 %v19229_v36, %v19124_v33  ;;  %v19300_v52 = vpack.i.bf16 %v19006_v4, %v19109_v47 }
 0xb1e   :  { %v8359_v27 = vpop.permute.xlu0 %8358  ;;  %v12900_v19 = vpack.i.bf16 %v19048_v25, %v19239_v10 }
 0xb1f   :  { %8728 = vmatpush.msra.mxu1 %v19104_v26  ;;  %v19165_v58 = vsel %vm196_vm3, %v8359_v27, %v8361_v15  ;;  %v19305_v15 = vsel %vm196_vm3, %v12604_v63, %v8359_v27 }
 0xb20   :  { %v8424_v3 = vsel %vm205_vm4, %v19165_v58, 0.0 }
 0xb21   :  { %8729 = vmatpush.msra.mxu1 %v19048_v25  ;;  %12666 = vrot.lane.b32.xlu2 %v19025_v34, %s13128_s19  ;;  %v19182_v55 = vpack.i.bf16 %v19179_v42, %v8424_v3  ;;  %v12860_v28 = vpack.i.bf16 %v8424_v3, %v19222_v16 }
 0xb23   :  { %8730 = vmatpush.msra.mxu1 %v19124_v33 }
 0xb24   :  { %12681 = vrot.lane.b32.xlu1 %v19075_v53, %s13125_s25  ;;  %12621 = vrot.lane.b32.xlu0 %v19097_v56, %s13125_s25 }
 0xb29   :  { %12791 = vrot.lane.b32.xlu2 %v19052_v9, %s13124_s24 }
 0xb2c   :  { %12686 = vrot.lane.b32.xlu1 %v19075_v53, %s13126_s26  ;;  %12626 = vrot.lane.b32.xlu0 %v19097_v56, %s13126_s26 }
 0xb31   :  { %12801 = vrot.lane.b32.xlu2 %v19052_v9, %s13125_s25 }
 0xb34   :  { %12691 = vrot.lane.b32.xlu1 %v19075_v53, %s13127_s27  ;;  %12631 = vrot.lane.b32.xlu0 %v19097_v56, %s13127_s27 }
 0xb36   :  { %v19169_v49 = vpop.permute.xlu2 %12606 }
 0xb39   :  { %12811 = vrot.lane.b32.xlu2 %v19052_v9, %s13126_s26 }
 0xb3c   :  { %12696 = vrot.lane.b32.xlu1 %v19075_v53, %s13128_s19  ;;  %12636 = vrot.lane.b32.xlu0 %v19097_v56, %s13128_s19 }
 0xb41   :  { %12821 = vrot.lane.b32.xlu2 %v19052_v9, %s13127_s27 }
 0xb44   :  { %12701 = vrot.lane.b32.xlu1 %v19158_v60, %s13123_s3  ;;  %12731 = vrot.lane.b32.xlu0 %v19060_v12, %s13123_s3 }
 0xb49   :  { %12831 = vrot.lane.b32.xlu2 %v19052_v9, %s13128_s19 }
 0xb4c   :  { %12706 = vrot.lane.b32.xlu1 %v19158_v60, %s13124_s24  ;;  %12736 = vrot.lane.b32.xlu0 %v19060_v12, %s13124_s24 }
 0xb51   :  { %12836 = vrot.lane.b32.xlu2 %v19182_v55, %s13124_s24 }
 0xb53   :  { %v19186_v37 = vpop.permute.xlu2 %12641 }
 0xb54   :  { %12711 = vrot.lane.b32.xlu1 %v19158_v60, %s13125_s25  ;;  %12741 = vrot.lane.b32.xlu0 %v19060_v12, %s13125_s25 }
 0xb59   :  { %12841 = vrot.lane.b32.xlu2 %v19182_v55, %s13125_s25 }
 0xb5b   :  { %v19194_v32 = vpop.permute.xlu2 %12646 }
 0xb5c   :  { %12716 = vrot.lane.b32.xlu1 %v19158_v60, %s13126_s26  ;;  %12746 = vrot.lane.b32.xlu0 %v19060_v12, %s13126_s26 }
 0xb61   :  { %12846 = vrot.lane.b32.xlu2 %v19182_v55, %s13126_s26 }
 0xb63   :  { %v19202_v62 = vpop.permute.xlu2 %12651 }
 0xb64   :  { %12721 = vrot.lane.b32.xlu1 %v19158_v60, %s13127_s27  ;;  %12751 = vrot.lane.b32.xlu0 %v19060_v12, %s13127_s27  ;;  %v20564_v1 = vunpack.i.h.bf16 %v19202_v62 }
 0xb69   :  { %12851 = vrot.lane.b32.xlu2 %v19182_v55, %s13127_s27 }
 0xb6b   :  { %v19214_v22 = vpop.permute.xlu2 %12656 }
 0xb6c   :  { %21160 = vst [vmem:[#allocation53_spill] sm:$0xff] %v19214_v22  ;;  %12726 = vrot.lane.b32.xlu1 %v19158_v60, %s13128_s19  ;;  %12756 = vrot.lane.b32.xlu0 %v19060_v12, %s13128_s19 }
 0xb71   :  { %12861 = vrot.lane.b32.xlu2 %v12860_v28, %s13123_s3 }
 0xb73   :  { %v19234_v45 = vpop.permute.xlu2 %12661 }
 0xb74   :  { %21161 = vst [vmem:[#allocation85_spill] sm:$0xff] %v19234_v45  ;;  %12786 = vrot.lane.b32.xlu1 %v12785_v44, %s13123_s3  ;;  %12761 = vrot.lane.b32.xlu0 %v19099_v29, %s13123_s3 }
 0xb79   :  { %12901 = vrot.lane.b32.xlu2 %v12900_v19, %s13123_s3 }
 0xb7b   :  { %v19251_v48 = vpop.permute.xlu2 %12666 }
 0xb7c   :  { %21162 = vst [vmem:[#allocation100_spill] sm:$0xff] %v19251_v48  ;;  %12796 = vrot.lane.b32.xlu1 %v19249_v38, %s13124_s24  ;;  %12766 = vrot.lane.b32.xlu0 %v19099_v29, %s13124_s24 }
 0xb81   :  { %12906 = vrot.lane.b32.xlu2 %v19182_v55, %s13128_s19 }
 0xb83   :  { %v19259_v50 = vpop.permute.xlu2 %12791 }
 0xb84   :  { %12806 = vrot.lane.b32.xlu1 %v19249_v38, %s13125_s25  ;;  %12771 = vrot.lane.b32.xlu0 %v19099_v29, %s13125_s25  ;;  %v20561_v5 = vunpack.i.h.bf16 %v19259_v50 }
 0xb86   :  { %v19265_v25 = vpop.permute.xlu1 %12671  ;;  %v19267_v13 = vpop.permute.xlu0 %12611 }
 0xb89   :  { %12921 = vrot.lane.b32.xlu2 %v19025_v34, %s13129_s28 }
 0xb8b   :  { %v19271_v8 = vpop.permute.xlu2 %12801 }
 0xb8c   :  { %12816 = vrot.lane.b32.xlu1 %v19249_v38, %s13126_s26  ;;  %12776 = vrot.lane.b32.xlu0 %v19099_v29, %s13126_s26  ;;  %v20569_v54 = vunpack.i.h.bf16 %v19271_v8  ;;  %v20567_v3 = vunpack.i.l.bf16 %v19271_v8 }
 0xb8e   :  { %v19277_v39 = vpop.permute.xlu1 %12676  ;;  %v19279_v23 = vpop.permute.xlu0 %12616 }
 0xb8f   :  { %v20562_v17 = vunpack.i.h.bf16 %v19279_v23 }
 0xb91   :  { %12941 = vrot.lane.b32.xlu2 %v19052_v9, %s13129_s28  ;;  %v19290_v20 = vsel %vm651_vm8, %v20562_v17, %v20561_v5 }
 0xb92   :  { %21163 = vst [vmem:[#allocation111_spill] sm:$0xff] %v19290_v20 }
 0xb93   :  { %v19292_v18 = vpop.permute.xlu2 %12811 }
 0xb94   :  { %12826 = vrot.lane.b32.xlu1 %v19249_v38, %s13127_s27  ;;  %12781 = vrot.lane.b32.xlu0 %v19099_v29, %s13127_s27 }
 0xb96   :  { %v19310_v28 = vpop.permute.xlu1 %12681  ;;  %v19312_v44 = vpop.permute.xlu0 %12621 }
 0xb97   :  { %21164 = vst [vmem:[#allocation10_spill] sm:$0xff] %v19310_v28  ;;  %v20563_v19 = vunpack.i.h.bf16 %v19310_v28  ;;  %v20565_v4 = vunpack.i.l.bf16 %v19310_v28  ;;  %v12624_v5 = vunpack.i.h.bf16 %v19312_v44  ;;  %v20566_v41 = vunpack.i.l.bf16 %v19312_v44 }
 0xb98   :  { %21165 = vst [vmem:[#allocation91_spill] sm:$0xff] %v19312_v44 }
 0xb99   :  { %12951 = vrot.lane.b32.xlu2 %v19300_v52, %s13124_s24  ;;  %v19325_v63 = vsel %vm896_vm9, %v20564_v1, %v20563_v19  ;;  %v19330_v27 = vsel %vm896_vm9, %v20565_v4, %v12624_v5  ;;  %v19337_v17 = vsel %vm896_vm9, %v20566_v41, %v20567_v3  ;;  %v19342_v21 = vsel %vm896_vm9, %v12624_v5, %v20569_v54 }
 0xb9a   :  { %21166 = vst [vmem:[#allocation13_spill] sm:$0xff] %v19325_v63  ;;  %v12855_v19 = vpack.i.bf16 %v19124_v33, %v19305_v15  ;;  %v21170_v4 = vpack.i.bf16 %v19104_v26, %v19109_v47  ;;  %v20575_v41 = vunpack.i.h.bf16 %v19214_v22  ;;  %v20576_v3 = vunpack.i.h.bf16 %v19292_v18 }
 0xb9b   :  { %21167 = vst [vmem:[#allocation88_spill] sm:$0xff] %v19330_v27  ;;  %v19346_v1 = vpop.permute.xlu2 %12821  ;;  %v21176_v47 = vunpack.i.l.bf16 %v19292_v18  ;;  %v21199_v27 = vunpack.i.l.bf16 %v19267_v13 }
 0xb9c   :  { %21168 = vst [vmem:[#allocation93_spill] sm:$0xff] %v19337_v17  ;;  %12891 = vrot.lane.b32.xlu1 %v21170_v4, %s13123_s3  ;;  %12856 = vrot.lane.b32.xlu0 %v12855_v19, %s13123_s3  ;;  %v12608_v17 = vunpack.i.l.bf16 %v19169_v49 }
 0xb9d   :  { %21169 = vst [vmem:[#allocation26_spill] sm:$0xff] %v19342_v21 }
 0xb9e   :  { %v19356_v5 = vpop.permute.xlu1 %12686  ;;  %v19358_v54 = vpop.permute.xlu0 %12626 }
 0xb9f   :  { %21171 = vst [vmem:[#allocation94_spill] sm:$0xff] %v19356_v5  ;;  %v20574_v33 = vunpack.i.h.bf16 %v19356_v5  ;;  %v20577_v24 = vunpack.i.l.bf16 %v19356_v5  ;;  %v12629_v57 = vunpack.i.h.bf16 %v19358_v54  ;;  %v21177_v7 = vunpack.i.l.bf16 %v19358_v54 }
 0xba0   :  { %21172 = vst [vmem:[#allocation104_spill] sm:$0xff] %v19358_v54 }
 0xba1   :  { %12966 = vrot.lane.b32.xlu2 %v19300_v52, %s13125_s25  ;;  %v19371_v19 = vsel %vm1141_vm10, %v20575_v41, %v20574_v33  ;;  %v19376_v4 = vsel %vm1141_vm10, %v20577_v24, %v12629_v57  ;;  %v19381_v40 = vsel %vm1141_vm10, %v12629_v57, %v20576_v3  ;;  %v19388_v59 = vsel %vm1141_vm10, %v21177_v7, %v21176_v47 }
 0xba2   :  { %21173 = vst [vmem:[#allocation92_spill] sm:$0xff] %v19371_v19  ;;  %v19392_v33 = vpack.i.bf16 %v19222_v16, %v19305_v15  ;;  %v20585_v57 = vunpack.i.h.bf16 %v19234_v45  ;;  %v21185_v19 = vunpack.i.h.bf16 %v19346_v1 }
 0xba3   :  { %21174 = vst [vmem:[#allocation95_spill] sm:$0xff] %v19376_v4  ;;  %v19394_v41 = vpop.permute.xlu2 %12831  ;;  %v21183_v4 = vunpack.i.l.bf16 %v19346_v1 }
 0xba4   :  { %21175 = vst [vmem:[#allocation21_spill] sm:$0xff] %v19381_v40  ;;  %12896 = vrot.lane.b32.xlu1 %v19249_v38, %s13128_s19  ;;  %12866 = vrot.lane.b32.xlu0 %v19392_v33, %s13124_s24 }
 0xba5   :  { %21178 = vst [vmem:[#allocation78_spill] sm:$0xff] %v19388_v59 }
 0xba6   :  { %v19403_v7 = vpop.permute.xlu1 %12691  ;;  %v19405_v47 = vpop.permute.xlu0 %12631 }
 0xba7   :  { %21179 = vst [vmem:[#allocation64_spill] sm:$0xff] %v19403_v7  ;;  %v20584_v16 = vunpack.i.h.bf16 %v19403_v7  ;;  %v20587_v30 = vunpack.i.l.bf16 %v19403_v7  ;;  %v12634_v59 = vunpack.i.h.bf16 %v19405_v47  ;;  %v20586_v40 = vunpack.i.l.bf16 %v19405_v47 }
 0xba8   :  { %21180 = vst [vmem:[#allocation81_spill] sm:$0xff] %v19405_v47  ;;  %v21191_v47 = vunpack.i.h.bf16 %v19394_v41 }
 0xba9   :  { %12971 = vrot.lane.b32.xlu2 %v19182_v55, %s13129_s28  ;;  %v19418_v3 = vsel %vm1386_vm11, %v20585_v57, %v20584_v16  ;;  %v19423_v24 = vsel %vm1386_vm11, %v20587_v30, %v12634_v59  ;;  %v19430_v54 = vsel %vm1386_vm11, %v20586_v40, %v21183_v4  ;;  %v19435_v22 = vsel %vm1386_vm11, %v12634_v59, %v21185_v19 }
 0xbaa   :  { %21181 = vst [vmem:[#allocation55_spill] sm:$0xff] %v19418_v3  ;;  %v20592_v16 = vunpack.i.h.bf16 %v19251_v48 }
 0xbab   :  { %21182 = vst [vmem:[#allocation109_spill] sm:$0xff] %v19423_v24  ;;  %v19437_v45 = vpop.permute.xlu2 %12836 }
 0xbac   :  { %21184 = vst [vmem:[#allocation97_spill] sm:$0xff] %v19430_v54  ;;  %12916 = vrot.lane.b32.xlu1 %v19158_v60, %s13129_s28  ;;  %12871 = vrot.lane.b32.xlu0 %v19392_v33, %s13125_s25  ;;  %v21193_v54 = vunpack.i.l.bf16 %v19394_v41 }
 0xbad   :  { %21186 = vst [vmem:[#allocation83_spill] sm:$0xff] %v19435_v22 }
 0xbae   :  { %v19446_v40 = vpop.permute.xlu1 %12696  ;;  %v19448_v30 = vpop.permute.xlu0 %12636 }
 0xbaf   :  { %21187 = vst [vmem:[#allocation67_spill] sm:$0xff] %v19446_v40  ;;  %v20591_v59 = vunpack.i.h.bf16 %v19446_v40  ;;  %v20593_v19 = vunpack.i.l.bf16 %v19446_v40  ;;  %v12639_v22 = vunpack.i.h.bf16 %v19448_v30  ;;  %v21194_v3 = vunpack.i.l.bf16 %v19448_v30 }
 0xbb0   :  { %21188 = vst [vmem:[#allocation82_spill] sm:$0xff] %v19448_v30  ;;  %v12673_v30 = vunpack.i.l.bf16 %v19265_v25 }
 0xbb1   :  { %12986 = vrot.lane.b32.xlu2 %v19300_v52, %s13126_s26  ;;  %v19461_v4 = vsel %vm1631_vm12, %v20592_v16, %v20591_v59  ;;  %v19466_v57 = vsel %vm1631_vm12, %v20593_v19, %v12639_v22  ;;  %v19471_v24 = vsel %vm1631_vm12, %v12639_v22, %v21191_v47  ;;  %v19478_v21 = vsel %vm1631_vm12, %v21194_v3, %v21193_v54 }
 0xbb2   :  { %21189 = vst [vmem:[#allocation71_spill] sm:$0xff] %v19461_v4  ;;  %v12643_v54 = vunpack.i.l.bf16 %v19186_v37  ;;  %v8491_v44 = vsel %vm230_vm5, %v12673_v30, %v21199_v27 }
 0xbb3   :  { %21190 = vst [vmem:[#allocation107_spill] sm:$0xff] %v19466_v57  ;;  %v19480_v48 = vpop.permute.xlu2 %12841 }
 0xbb4   :  { %21192 = vst [vmem:[#allocation89_spill] sm:$0xff] %v19471_v24  ;;  %12931 = vrot.lane.b32.xlu1 %v19075_v53, %s13129_s28  ;;  %12876 = vrot.lane.b32.xlu0 %v19392_v33, %s13126_s26  ;;  %v12644_v24 = vunpack.i.h.bf16 %v19186_v37 }
 0xbb5   :  { %21195 = vst [vmem:[#allocation80_spill] sm:$0xff] %v19478_v21 }
 0xbb6   :  { %21196 = vst [vmem:[#allocation43_spill] sm:$0xff] %v19480_v48  ;;  %v12702_v59 = vpop.permute.xlu1 %12701  ;;  %v19486_v16 = vpop.permute.xlu0 %12731 }
 0xbb7   :  { %v12704_v22 = vunpack.i.h.bf16 %v12702_v59  ;;  %v12703_v47 = vunpack.i.l.bf16 %v12702_v59  ;;  %v20595_v19 = vunpack.i.l.bf16 %v19486_v16  ;;  %v19500_v59 = vpack.i.bf16 %v19239_v10, %v19104_v26 }
 0xbb8   :  { %v12734_v37 = vunpack.i.h.bf16 %v19486_v16  ;;  %v8495_v26 = vsel %vm230_vm5, %v12643_v54, %v12644_v24 }
 0xbb9   :  { %13001 = vrot.lane.b32.xlu2 %v19300_v52, %s13127_s27  ;;  %v8500_v21 = vsel %vm230_vm5, %v12703_v47, %v12704_v22  ;;  %v8501_v57 = vsel %vm230_vm5, %v12704_v22, %v20595_v19  ;;  %v12609_v47 = vunpack.i.h.bf16 %v19169_v49  ;;  %v21198_v22 = vunpack.i.h.bf16 %v19265_v25 }
 0xbba   :  { %8544 = vmatpush.msra.mxu2 %v8500_v21  ;;  %8564 = vmatpush.msrb.mxu3 %v8501_v57  ;;  %v20602_v21 = vunpack.i.h.bf16 %v19267_v13  ;;  %v8490_v49 = vsel %vm230_vm5, %v12734_v37, %v12673_v30 }
 0xbbb   :  { %v19505_v3 = vpop.permute.xlu2 %12846  ;;  %v8496_v19 = vsel %vm230_vm5, %v12644_v24, %v21198_v22  ;;  %v12649_v24 = vunpack.i.h.bf16 %v19194_v32  ;;  %v8485_v22 = vsel %vm230_vm5, %v12608_v17, %v12609_v47 }
 0xbbc   :  { %21197 = vst [vmem:[#allocation106_spill] sm:$0xff] %v19505_v3  ;;  %12956 = vrot.lane.b32.xlu1 %v19500_v59, %s13124_s24  ;;  %12881 = vrot.lane.b32.xlu0 %v19392_v33, %s13127_s27  ;;  %v8486_v30 = vsel %vm230_vm5, %v12609_v47, %v20602_v21  ;;  %v20599_v47 = vunpack.i.l.bf16 %v19259_v50 }
 0xbbd   :  { %8545 = vmatpush.msra.mxu2 %v8495_v26  ;;  %8565 = vmatpush.msrb.mxu3 %v8496_v19  ;;  %v12648_v26 = vunpack.i.l.bf16 %v19194_v32  ;;  %v20600_v19 = vunpack.i.h.bf16 %v19277_v39  ;;  %v12678_v32 = vunpack.i.l.bf16 %v19277_v39 }
 0xbbe   :  { %v12707_v57 = vpop.permute.xlu1 %12706  ;;  %v19518_v4 = vpop.permute.xlu0 %12736 }
 0xbbf   :  { %v12709_v63 = vunpack.i.h.bf16 %v12707_v57  ;;  %v12708_v20 = vunpack.i.l.bf16 %v12707_v57  ;;  %v20601_v54 = vunpack.i.l.bf16 %v19518_v4  ;;  %8546 = vmatpush.msra.mxu2 %v8490_v49  ;;  %8566 = vmatpush.msrb.mxu3 %v8491_v44  ;;  %v12739_v37 = vunpack.i.h.bf16 %v19518_v4 }
 0xbc1   :  { %13006 = vrot.lane.b32.xlu2 %v19025_v34, %s13130_s29  ;;  %8547 = vmatpush.msra.mxu2 %v8485_v22  ;;  %v8840_v27 = vsel %vm651_vm8, %v12708_v20, %v12709_v63  ;;  %v8841_v44 = vsel %vm651_vm8, %v12709_v63, %v20601_v54  ;;  %v20605_v34 = vunpack.i.l.bf16 %v19279_v23  ;;  %v8835_v20 = vsel %vm651_vm8, %v12648_v26, %v12649_v24 }
 0xbc2   :  { %8567 = vmatpush.msrb.mxu3 %v8486_v30  ;;  %8884 = vmatpush.msra.mxu0 %v8840_v27  ;;  %v8836_v63 = vsel %vm651_vm8, %v12649_v24, %v20600_v19  ;;  %v8830_v22 = vsel %vm651_vm8, %v12739_v37, %v12678_v32  ;;  %v21201_v30 = vunpack.i.h.bf16 %v19279_v23  ;;  %v21202_v37 = vunpack.i.l.bf16 %v19310_v28 }
 0xbc3   :  { %v19540_v17 = vpop.permute.xlu2 %12851  ;;  %8904 = vmatpush.msrb.mxu1 %v8841_v44 }
 0xbc4   :  { %21200 = vst [vmem:[#allocation98_spill] sm:$0xff] %v19540_v17  ;;  %12961 = vrot.lane.b32.xlu1 %v19249_v38, %s13129_s28  ;;  %12886 = vrot.lane.b32.xlu0 %v19392_v33, %s13128_s19  ;;  %v8831_v27 = vsel %vm651_vm8, %v12678_v32, %v21201_v30 }
 0xbc5   :  { %8885 = vmatpush.msra.mxu0 %v8835_v20  ;;  %8905 = vmatpush.msrb.mxu1 %v8836_v63  ;;  %v8826_v20 = vsel %vm651_vm8, %v20605_v34, %v20599_v47 }
 0xbc6   :  { %v19552_v57 = vpop.permute.xlu1 %12711  ;;  %v19554_v49 = vpop.permute.xlu0 %12741 }
 0xbc7   :  { %v20598_v26 = vunpack.i.h.bf16 %v19552_v57  ;;  %v12744_v44 = vunpack.i.h.bf16 %v19554_v49  ;;  %v20597_v24 = vunpack.i.l.bf16 %v19554_v49  ;;  %8886 = vmatpush.msra.mxu0 %v8830_v22  ;;  %8906 = vmatpush.msrb.mxu1 %v8831_v27 }
 0xbc9   :  { %13021 = vrot.lane.b32.xlu2 %v19300_v52, %s13128_s19  ;;  %8907 = vmatpush.msrb.mxu1 %v8826_v20  ;;  %v19575_v32 = vsel %vm896_vm9, %v20598_v26, %v20597_v24  ;;  %v19580_v63 = vsel %vm896_vm9, %v12744_v44, %v21202_v37  ;;  %v21207_v37 = vunpack.i.l.bf16 %v19356_v5 }
 0xbca   :  { %21203 = vst [vmem:[#allocation96_spill] sm:$0xff] %v19580_v63  ;;  %v19732_v63 = vld [vmem:[%s20519_s13] sm:$0xff] }
 0xbcb   :  { %v19582_v22 = vpop.permute.xlu2 %12861  ;;  %11476 = vmatmul.msk.f32.vlgmr.msra.gmra.mxu1 %vm2738_vm15, %v19732_v63  ;;  %11475 = vmatmul.msk.f32.vlgmr.msrb.gmra.mxu0 %vm2738_vm15, %v19732_v63 }
 0xbcc   :  { %12981 = vrot.lane.b32.xlu1 %v19500_v59, %s13125_s25  ;;  %12911 = vrot.lane.b32.xlu0 %v19099_v29, %s13128_s19 }
 0xbce   :  { %v19588_v30 = vpop.permute.xlu1 %12716  ;;  %v19590_v27 = vpop.permute.xlu0 %12746 }
 0xbcf   :  { %21204 = vst [vmem:[#allocation99_spill] sm:$0xff] %v19588_v30  ;;  %v20604_v20 = vunpack.i.h.bf16 %v19588_v30  ;;  %v12749_v24 = vunpack.i.h.bf16 %v19590_v27  ;;  %v20603_v26 = vunpack.i.l.bf16 %v19590_v27 }
 0xbd0   :  { %21205 = vst [vmem:[#allocation68_spill] sm:$0xff] %v19590_v27 }
 0xbd1   :  { %13041 = vrot.lane.b32.xlu2 %v19300_v52, %s13129_s28  ;;  %v19602_v44 = vsel %vm1141_vm10, %v20604_v20, %v20603_v26  ;;  %v19607_v47 = vsel %vm1141_vm10, %v12749_v24, %v21207_v37  ;;  %v21212_v37 = vunpack.i.l.bf16 %v19403_v7 }
 0xbd2   :  { %21206 = vst [vmem:[#allocation110_spill] sm:$0xff] %v19602_v44 }
 0xbd3   :  { %21208 = vst [vmem:[#allocation15_spill] sm:$0xff] %v19607_v47  ;;  %v19609_v19 = vpop.permute.xlu2 %12901 }
 0xbd4   :  { %12991 = vrot.lane.b32.xlu1 %v19500_v59, %s13126_s26  ;;  %12926 = vrot.lane.b32.xlu0 %v19060_v12, %s13129_s28 }
 0xbd6   :  { %v19615_v54 = vpop.permute.xlu1 %12721  ;;  %v19617_v21 = vpop.permute.xlu0 %12751 }
 0xbd7   :  { %21209 = vst [vmem:[#allocation47_spill] sm:$0xff] %v19615_v54  ;;  %v20609_v26 = vunpack.i.h.bf16 %v19615_v54  ;;  %v12754_v20 = vunpack.i.h.bf16 %v19617_v21  ;;  %v20608_v34 = vunpack.i.l.bf16 %v19617_v21 }
 0xbd8   :  { %21210 = vst [vmem:[#allocation8_spill] sm:$0xff] %v19617_v21 }
 0xbd9   :  { %13046 = vrot.lane.b32.xlu2 %v19052_v9, %s13130_s29  ;;  %v19629_v24 = vsel %vm1386_vm11, %v20609_v26, %v20608_v34  ;;  %v19634_v47 = vsel %vm1386_vm11, %v12754_v20, %v21212_v37  ;;  %v21217_v20 = vunpack.i.l.bf16 %v19446_v40 }
 0xbda   :  { %21211 = vst [vmem:[#allocation103_spill] sm:$0xff] %v19629_v24 }
 0xbdb   :  { %21213 = vst [vmem:[#allocation28_spill] sm:$0xff] %v19634_v47  ;;  %v19636_v5 = vpop.permute.xlu2 %12906 }
 0xbdc   :  { %12996 = vrot.lane.b32.xlu1 %v19158_v60, %s13130_s29  ;;  %12936 = vrot.lane.b32.xlu0 %v19097_v56, %s13129_s28 }
 0xbde   :  { %v19642_v9 = vpop.permute.xlu1 %12726  ;;  %v19644_v21 = vpop.permute.xlu0 %12756 }
 0xbdf   :  { %21214 = vst [vmem:[#allocation70_spill] sm:$0xff] %v19642_v9  ;;  %v20613_v34 = vunpack.i.h.bf16 %v19642_v9  ;;  %v12759_v26 = vunpack.i.h.bf16 %v19644_v21  ;;  %v20612_v7 = vunpack.i.l.bf16 %v19644_v21 }
 0xbe0   :  { %21215 = vst [vmem:[#allocation84_spill] sm:$0xff] %v19644_v21 }
 0xbe1   :  { %13061 = vrot.lane.b32.xlu2 %v19300_v52, %s13130_s29  ;;  %v19656_v60 = vsel %vm1631_vm12, %v20613_v34, %v20612_v7  ;;  %v19661_v37 = vsel %vm1631_vm12, %v12759_v26, %v21217_v20  ;;  %v10348_v34 = vld [vmem:[%s20521_s15] sm:$0xff] }
 0xbe2   :  { %21216 = vst [vmem:[#allocation49_spill] sm:$0xff] %v19656_v60  ;;  %v21219_v60 = vunpack.i.h.bf16 %v19259_v50 }
 0xbe3   :  { %21218 = vst [vmem:[#allocation86_spill] sm:$0xff] %v19661_v37  ;;  %v19663_v47 = vpop.permute.xlu2 %12921  ;;  %v20620_v37 = vunpack.i.h.bf16 %v19437_v45 }
 0xbe4   :  { %13016 = vrot.lane.b32.xlu1 %v19500_v59, %s13127_s27  ;;  %12946 = vrot.lane.b32.xlu0 %v19392_v33, %s13129_s28 }
 0xbe6   :  { %v19669_v52 = vpop.permute.xlu1 %12786  ;;  %v19671_v21 = vpop.permute.xlu0 %12761 }
 0xbe9   :  { %13076 = vrot.lane.b32.xlu2 %v19182_v55, %s13130_s29 }
 0xbeb   :  { %v19675_v7 = vpop.permute.xlu2 %12941 }
 0xbec   :  { %13026 = vrot.lane.b32.xlu1 %v19500_v59, %s13128_s19  ;;  %12976 = vrot.lane.b32.xlu0 %v19099_v29, %s13129_s28 }
 0xbee   :  { %v19681_v26 = vpop.permute.xlu1 %12796  ;;  %v19683_v20 = vpop.permute.xlu0 %12766 }
 0xbef   :  { %v20622_v55 = vunpack.i.h.bf16 %v19681_v26  ;;  %v20621_v40 = vunpack.i.l.bf16 %v19681_v26 }
 0xbf1   :  { %10351 = vperm.xlu2 %11554, %v10348_v34   ;;  %v19696_v9 = vsel %vm651_vm8, %v21219_v60, %v20622_v55  ;;  %v19703_v24 = vsel %vm651_vm8, %v20621_v40, %v20620_v37  ;;  %v19715_v34 = vld [vmem:[%s20519_s13 + $0x8] sm:$0xff]  ;;  %v12844_v60 = vunpack.i.h.bf16 %v19480_v48  ;;  %v21220_v37 = vunpack.i.l.bf16 %v19279_v23 }
 0xbf2   :  { %11459 = vmatmul.msk.f32.vlgmr.msra.gmra.mxu2 %vm2738_vm15, %v19715_v34  ;;  %11460 = vmatmul.msk.f32.vlgmr.msrb.gmra.mxu3 %vm2738_vm15, %v19715_v34  ;;  %v21221_v48 = vunpack.i.l.bf16 %v19271_v8 }
 0xbf3   :  { %v19705_v54 = vpop.permute.xlu2 %12951 }
 0xbf4   :  { %v12954_v27 = vunpack.i.h.bf16 %v19705_v54  ;;  %13031 = vrot.lane.b32.xlu1 %v19075_v53, %s13130_s29  ;;  %13011 = vrot.lane.b32.xlu0 %v19060_v12, %s13130_s29 }
 0xbf6   :  { %v8825_v53 = vsel %vm651_vm8, %v12954_v27, %v21220_v37  ;;  %v12807_v40 = vpop.permute.xlu1 %12806  ;;  %v19725_v55 = vpop.permute.xlu0 %12771  ;;  %v21222_v27 = vunpack.i.h.bf16 %v19271_v8  ;;  %v12849_v8 = vunpack.i.h.bf16 %v19505_v3 }
 0xbf7   :  { %8887 = vmatpush.msra.mxu0 %v8825_v53  ;;  %v12809_v12 = vunpack.i.h.bf16 %v12807_v40  ;;  %v12808_v44 = vunpack.i.l.bf16 %v12807_v40  ;;  %v20628_v30 = vunpack.i.h.bf16 %v19725_v55  ;;  %v20627_v28 = vunpack.i.l.bf16 %v19725_v55 }
 0xbf9   :  { %v19737_v23 = vsel %vm896_vm9, %v21221_v48, %v12808_v44  ;;  %v19742_v37 = vsel %vm896_vm9, %v21222_v27, %v12809_v12  ;;  %v19747_v40 = vsel %vm896_vm9, %v12809_v12, %v20627_v28  ;;  %v19750_v53 = vsel %vm896_vm9, %v12808_v44, %v12844_v60 }
 0xbfa   :  { %21223 = vst [vmem:[#allocation102_spill] sm:$0xff] %v19742_v37  ;;  %v19759_v48 = vsel %vm896_vm9, %v12844_v60, %v20628_v30  ;;  %v21228_v60 = vunpack.i.h.bf16 %v19292_v18 }
 0xbfb   :  { %21224 = vst [vmem:[#allocation105_spill] sm:$0xff] %v19747_v40 }
 0xbfc   :  { %21225 = vst [vmem:[#allocation112_spill] sm:$0xff] %v19750_v53  ;;  %13056 = vrot.lane.b32.xlu1 %v19500_v59, %s13129_s28  ;;  %13036 = vrot.lane.b32.xlu0 %v19097_v56, %s13130_s29 }
 0xbfd   :  { %21226 = vst [vmem:[#allocation34_spill] sm:$0xff] %v19759_v48  ;;  %v21229_v48 = vunpack.i.l.bf16 %v19292_v18  ;;  %v12854_v18 = vunpack.i.h.bf16 %v19540_v17 }
 0xbfe   :  { %v12817_v44 = vpop.permute.xlu1 %12816  ;;  %v19766_v12 = vpop.permute.xlu0 %12776 }
 0xbff   :  { %21227 = vst [vmem:[#allocation45_spill] sm:$0xff] %v19766_v12  ;;  %v12819_v27 = vunpack.i.h.bf16 %v12817_v44  ;;  %v12818_v28 = vunpack.i.l.bf16 %v12817_v44  ;;  %v20631_v53 = vunpack.i.h.bf16 %v19766_v12  ;;  %v20630_v40 = vunpack.i.l.bf16 %v19766_v12 }
 0xc01   :  { %v19773_v30 = vsel %vm1141_vm10, %v21228_v60, %v12819_v27  ;;  %v19778_v56 = vsel %vm1141_vm10, %v21229_v48, %v12818_v28  ;;  %v19781_v3 = vsel %vm1141_vm10, %v12818_v28, %v12849_v8  ;;  %v19786_v44 = vsel %vm1141_vm10, %v12819_v27, %v20630_v40 }
 0xc02   :  { %21230 = vst [vmem:[#allocation87_spill] sm:$0xff] %v19781_v3  ;;  %v19791_v37 = vsel %vm1141_vm10, %v12849_v8, %v20631_v53  ;;  %v21232_v8 = vunpack.i.l.bf16 %v19346_v1 }
 0xc04   :  { %13066 = vrot.lane.b32.xlu1 %v19500_v59, %s13130_s29  ;;  %13051 = vrot.lane.b32.xlu0 %v19392_v33, %s13130_s29  ;;  %v21234_v59 = vunpack.i.h.bf16 %v19346_v1 }
 0xc06   :  { %v12827_v28 = vpop.permute.xlu1 %12826  ;;  %v19798_v48 = vpop.permute.xlu0 %12781 }
 0xc07   :  { %21231 = vst [vmem:[#allocation108_spill] sm:$0xff] %v19798_v48  ;;  %v12829_v60 = vunpack.i.h.bf16 %v12827_v28  ;;  %v12828_v3 = vunpack.i.l.bf16 %v12827_v28  ;;  %v20636_v27 = vunpack.i.h.bf16 %v19798_v48  ;;  %v20635_v40 = vunpack.i.l.bf16 %v19798_v48 }
 0xc09   :  { %v19805_v53 = vsel %vm1386_vm11, %v21232_v8, %v12828_v3  ;;  %v19810_v33 = vsel %vm1386_vm11, %v21234_v59, %v12829_v60  ;;  %v19815_v17 = vsel %vm1386_vm11, %v12829_v60, %v20635_v40  ;;  %v19818_v28 = vsel %vm1386_vm11, %v12828_v3, %v12854_v18 }
 0xc0a   :  { %21233 = vst [vmem:[#allocation23_spill] sm:$0xff] %v19805_v53  ;;  %v19823_v12 = vsel %vm1386_vm11, %v12854_v18, %v20636_v27  ;;  %v12903_v59 = vunpack.i.l.bf16 %v19609_v19  ;;  %v21239_v3 = vunpack.i.l.bf16 %v19486_v16  ;;  %v12904_v27 = vunpack.i.h.bf16 %v19609_v19 }
 0xc0b   :  { %21235 = vst [vmem:[#allocation39_spill] sm:$0xff] %v19810_v33  ;;  %v21240_v16 = vunpack.i.h.bf16 %v19265_v25  ;;  %v19849_v33 = vld [vmem:[%s20519_s13 + $0x10] sm:$0xff]  ;;  %v12789_v19 = vunpack.i.h.bf16 %v19669_v52  ;;  %v21243_v53 = vunpack.i.h.bf16 %v19394_v41 }
 0xc0c   :  { %21236 = vst [vmem:[#allocation31_spill] sm:$0xff] %v19815_v17  ;;  %13071 = vrot.lane.b32.xlu1 %v19249_v38, %s13130_s29  ;;  %13081 = vrot.lane.b32.xlu0 %v19099_v29, %s13130_s29  ;;  %v10336_v38 = vld [vmem:[%s20520_s14] sm:$0xff] }
 0xc0d   :  { %21237 = vst [vmem:[#allocation65_spill] sm:$0xff] %v19818_v28  ;;  %v10578_v29 = vld [vmem:[%s20523_s17] sm:$0xff]  ;;  %11484 = vmatmul.msk.f32.vlgmr.msra.gmra.mxu0 %vm2738_vm15, %v19849_v33  ;;  %11485 = vmatmul.msk.f32.vlgmr.msrb.gmra.mxu1 %vm2738_vm15, %v19849_v33 }
 0xc0e   :  { %21238 = vst [vmem:[#allocation76_spill] sm:$0xff] %v19823_v12  ;;  %v12892_v1 = vpop.permute.xlu1 %12891  ;;  %v12857_v8 = vpop.permute.xlu0 %12856  ;;  %v12788_v12 = vunpack.i.l.bf16 %v19669_v52 }
 0xc0f   :  { %v12893_v60 = vunpack.i.l.bf16 %v12892_v1  ;;  %v12894_v40 = vunpack.i.h.bf16 %v12892_v1  ;;  %v12858_v17 = vunpack.i.l.bf16 %v12857_v8  ;;  %v12859_v1 = vunpack.i.h.bf16 %v12857_v8 }
 0xc11   :  { %v8502_v28 = vsel %vm230_vm5, %v21239_v3, %v12893_v60  ;;  %v8503_v18 = vsel %vm230_vm5, %v12893_v60, %v12903_v59  ;;  %v8497_v60 = vsel %vm230_vm5, %v21240_v16, %v12894_v40  ;;  %v8498_v3 = vsel %vm230_vm5, %v12894_v40, %v12858_v17 }
 0xc12   :  { %8584 = vmatpush.msrb.mxu2 %v8502_v28  ;;  %8604 = vmatpush.msra.mxu3 %v8503_v18  ;;  %v21241_v18 = vunpack.i.l.bf16 %v19267_v13  ;;  %v12863_v40 = vunpack.i.l.bf16 %v19582_v22  ;;  %v12909_v16 = vunpack.i.h.bf16 %v19636_v5 }
 0xc14   :  { %10339 = vperm.xlu1 %11553, %v10336_v38   ;;  %10581 = vperm.xlu0 %11552, %v10578_v29   ;;  %v8492_v25 = vsel %vm230_vm5, %v21241_v18, %v12904_v27  ;;  %v8493_v38 = vsel %vm230_vm5, %v12904_v27, %v12788_v12  ;;  %v21242_v27 = vunpack.i.h.bf16 %v19267_v13  ;;  %v8488_v18 = vsel %vm230_vm5, %v12859_v1, %v12789_v19 }
 0xc15   :  { %8585 = vmatpush.msrb.mxu2 %v8497_v60  ;;  %8605 = vmatpush.msra.mxu3 %v8498_v3  ;;  %v12864_v13 = vunpack.i.h.bf16 %v19582_v22  ;;  %v12764_v22 = vunpack.i.h.bf16 %v19671_v21 }
 0xc16   :  { %v19852_v28 = vpop.permute.xlu1 %12896  ;;  %v19854_v8 = vpop.permute.xlu0 %12866  ;;  %v8487_v3 = vsel %vm230_vm5, %v21242_v27, %v12859_v1  ;;  %v12763_v27 = vunpack.i.l.bf16 %v19671_v21  ;;  %v8504_v1 = vsel %vm230_vm5, %v12903_v59, %v12863_v40  ;;  %v12768_v59 = vunpack.i.l.bf16 %v19683_v20 }
 0xc17   :  { %v12899_v52 = vunpack.i.h.bf16 %v19852_v28  ;;  %v12898_v29 = vunpack.i.l.bf16 %v19852_v28  ;;  %8586 = vmatpush.msrb.mxu2 %v8492_v25  ;;  %8606 = vmatpush.msra.mxu3 %v8493_v38  ;;  %v12869_v60 = vunpack.i.h.bf16 %v19854_v8  ;;  %v21244_v25 = vunpack.i.l.bf16 %v19394_v41 }
 0xc18   :  { %v12838_v41 = vunpack.i.l.bf16 %v19437_v45  ;;  %v12769_v21 = vunpack.i.h.bf16 %v19683_v20 }
 0xc19   :  { %8587 = vmatpush.msrb.mxu2 %v8487_v3  ;;  %8607 = vmatpush.msra.mxu3 %v8488_v18  ;;  %v19878_v48 = vsel %vm1631_vm12, %v21243_v53, %v12899_v52  ;;  %v19883_v38 = vsel %vm1631_vm12, %v21244_v25, %v12898_v29  ;;  %v19895_v53 = vsel %vm1631_vm12, %v12898_v29, %v12909_v16 }
 0xc1a   :  { %11461 = vmatmul.msk.f32.vlgmr.msrb.gmra.mxu2 %vm2738_vm15, %v19715_v34  ;;  %11462 = vmatmul.msk.f32.vlgmr.msra.gmra.mxu3 %vm2738_vm15, %v19715_v34  ;;  %v8499_v3 = vsel %vm230_vm5, %v12858_v17, %v12864_v13  ;;  %v8494_v29 = vsel %vm230_vm5, %v12788_v12, %v12763_v27  ;;  %v8489_v17 = vsel %vm230_vm5, %v12789_v19, %v12764_v22  ;;  %v12924_v19 = vunpack.i.h.bf16 %v19663_v47 }
 0xc1b   :  { %8624 = vmatpush.msra.mxu2 %v8504_v1  ;;  %8644 = vmatpush.msrb.mxu3 %v12863_v40  ;;  %v21250_v12 = vunpack.i.l.bf16 %v19681_v26  ;;  %vm10626_vm5 = vcmask 15360  }
 0xc1c   :  { %8984 = vmatpush.msra.mxu1 %v12869_v60 }
 0xc1d   :  { %8625 = vmatpush.msra.mxu2 %v8499_v3  ;;  %8645 = vmatpush.msrb.mxu3 %v12864_v13  ;;  %v12943_v3 = vunpack.i.l.bf16 %v19675_v7 }
 0xc1e   :  { %8985 = vmatpush.msra.mxu1 %v12838_v41  ;;  %v19906_v18 = vpop.permute.xlu1 %12916  ;;  %v19908_v40 = vpop.permute.xlu0 %12871 }
 0xc1f   :  { %8626 = vmatpush.msra.mxu2 %v8494_v29  ;;  %8646 = vmatpush.msrb.mxu3 %v12763_v27  ;;  %v21248_v27 = vld [vmem:[#allocation111_spill] sm:$0xff] }
 0xc20   :  { %8986 = vmatpush.msra.mxu1 %v12768_v59 }
 0xc21   :  { %8627 = vmatpush.msra.mxu2 %v8489_v17  ;;  %8647 = vmatpush.msrb.mxu3 %v12764_v22 }
 0xc22   :  { %8987 = vmatpush.msra.mxu1 %v12769_v21  ;;  %11463 = vmatmul.msk.f32.vlgmr.msra.gmra.mxu2 %vm2738_vm15, %v19715_v34 }
 0xc23   :  { %11466 = vmatpush.msk.msrb.mxu2 %vm15114_vm0, %v19035_v14  ;;  %8687 = vmatpush.msra.mxu3 %v19151_v46 }
 0xc24   :  { %11464 = vmatmul.msk.f32.vlgmr.msrb.gmra.mxu3 %vm2738_vm15, %v19715_v34  ;;  %11489 = vmatmul.msk.f32.vlgmr.msra.gmra.mxu1 %vm2738_vm15, %v19849_v33 }
 0xc25   :  { %11468 = vmatpush.msk.msrb.mxu2 %vm15114_vm0, %v19011_v2  ;;  %8688 = vmatpush.msra.mxu3 %v19022_v51 }
 0xc26   :  { %v19933_v14 = vpop.permute.xlu1 %12931  ;;  %v19935_v46 = vpop.permute.xlu0 %12876 }
 0xc27   :  { %11470 = vmatpush.msk.msrb.mxu2 %vm15114_vm0, %v19018_v43  ;;  %8689 = vmatpush.msra.mxu3 %v19067_v61  ;;  %v12934_v34 = vunpack.i.h.bf16 %v19933_v14  ;;  %v19954_v43 = vpop.permute.xlu2 %12966 }
 0xc28   :  { %v12968_v13 = vunpack.i.l.bf16 %v19954_v43 }
 0xc29   :  { %11472 = vmatpush.msk.msrb.mxu2 %vm15114_vm0, %v18998_v11  ;;  %8690 = vmatpush.msra.mxu3 %v19002_v35  ;;  %v19950_v2 = vsel %vm1876_vm13, %v12924_v19, %v12934_v34  ;;  %v12953_v11 = vunpack.i.l.bf16 %v19705_v54  ;;  %v21246_v54 = vunpack.i.l.bf16 %v19518_v4 }
 0xc2a   :  { %11473 = vmatmul.msk.f32.vlgmr.msrb.gmra.mxu2 %vm2738_vm15, %v19732_v63 }
 0xc2b   :  { %8747 = vmatpush.msra.mxu2 %v19239_v10  ;;  %11478 = vmatpush.msk.msrb.mxu3 %vm205_vm4, %v19212_v6  ;;  %v12868_v10 = vunpack.i.l.bf16 %v19854_v8  ;;  %v12653_v8 = vunpack.i.l.bf16 %v19202_v62 }
 0xc2c   :  { %11474 = vmatmul.msk.f32.vlgmr.msra.gmra.mxu3 %vm2738_vm15, %v19732_v63 }
 0xc2d   :  { %8748 = vmatpush.msra.mxu2 %v19305_v15  ;;  %11479 = vmatpush.msk.msrb.mxu3 %vm205_vm4, %v19165_v58  ;;  %v8842_v15 = vsel %vm651_vm8, %v21246_v54, %v12953_v11  ;;  %v21247_v58 = vunpack.i.h.bf16 %v19277_v39  ;;  %v8839_v39 = vsel %vm651_vm8, %v12868_v10, %v12838_v41  ;;  %v21249_v41 = vunpack.i.h.bf16 %v19681_v26 }
 0xc2e   :  { %v12957_v35 = vpop.permute.xlu1 %12956  ;;  %v19965_v51 = vpop.permute.xlu0 %12881  ;;  %v21253_v26 = vunpack.i.h.bf16 %v19437_v45 }
 0xc2f   :  { %8749 = vmatpush.msra.mxu2 %v19229_v36  ;;  %11480 = vmatpush.msk.msrb.mxu3 %vm205_vm4, %v19084_v0  ;;  %v12959_v61 = vunpack.i.h.bf16 %v12957_v35  ;;  %v12958_v6 = vunpack.i.l.bf16 %v12957_v35  ;;  %v19992_v4 = vpop.permute.xlu2 %12971  ;;  %v8834_v22 = vsel %vm651_vm8, %v21249_v41, %v12768_v59  ;;  %v21252_v59 = vunpack.i.h.bf16 %v19552_v57 }
 0xc31   :  { %8750 = vmatpush.msra.mxu2 %v19179_v42  ;;  %11481 = vmatpush.msk.msrb.mxu3 %vm205_vm4, %v19033_v31  ;;  %v8837_v36 = vsel %vm651_vm8, %v21247_v58, %v12958_v6  ;;  %v8843_v0 = vsel %vm651_vm8, %v12953_v11, %v12959_v61  ;;  %v8844_v25 = vsel %vm651_vm8, %v12959_v61, %v12869_v60  ;;  %v12713_v42 = vunpack.i.l.bf16 %v19552_v57 }
 0xc32   :  { %8964 = vmatpush.msrb.mxu0 %v8844_v25  ;;  %11477 = vmatmul.msk.f32.vlgmr.msra.gmra.mxu2 %vm2738_vm15, %v19732_v63  ;;  %v8838_v31 = vsel %vm651_vm8, %v12958_v6, %v12868_v10  ;;  %v12944_v60 = vunpack.i.h.bf16 %v19675_v7  ;;  %v21251_v11 = vunpack.i.l.bf16 %v19259_v50  ;;  %v12974_v61 = vunpack.i.h.bf16 %v19992_v4  ;;  %v21260_v25 = vld [vmem:[#allocation88_spill] sm:$0xff] }
 0xc33   :  { %8924 = vmatpush.msrb.mxu2 %v8842_v15  ;;  %8944 = vmatpush.msra.mxu3 %v8843_v0  ;;  %v9063_v6 = vsel %vm896_vm9, %v12713_v42, %v21252_v59  ;;  %v8829_v50 = vsel %vm651_vm8, %v21253_v26, %v12769_v21  ;;  %v12969_v21 = vunpack.i.h.bf16 %v19954_v43  ;;  %v21255_v10 = vunpack.i.h.bf16 %v19202_v62  ;;  %v21258_v62 = vld [vmem:[#allocation91_spill] sm:$0xff]  ;;  %v21266_v26 = vld [vmem:[#allocation26_spill] sm:$0xff] }
 0xc34   :  { %11482 = vmatmul.msk.f32.vlgmr.msrb.gmra.mxu3 %vm2738_vm15, %v19732_v63  ;;  %8965 = vmatpush.msrb.mxu0 %v8839_v39  ;;  %v8827_v35 = vsel %vm651_vm8, %v21251_v11, %v21250_v12  ;;  %v12874_v58 = vunpack.i.h.bf16 %v19908_v40  ;;  %v12873_v39 = vunpack.i.l.bf16 %v19908_v40  ;;  %v21264_v11 = vld [vmem:[#allocation43_spill] sm:$0xff] }
 0xc35   :  { %8925 = vmatpush.msrb.mxu2 %v8837_v36  ;;  %8945 = vmatpush.msra.mxu3 %v8838_v31  ;;  %v9058_v54 = vsel %vm896_vm9, %v12653_v8, %v21255_v10  ;;  %v21259_v36 = vunpack.i.l.bf16 %v21258_v62  ;;  %v21261_v8 = vld [vmem:[#allocation93_spill] sm:$0xff]  ;;  %v21265_v40 = vld [vmem:[#allocation99_spill] sm:$0xff] }
 0xc36   :  { %v19998_v63 = vpop.permute.xlu1 %12961  ;;  %v20000_v1 = vpop.permute.xlu0 %12886  ;;  %8966 = vmatpush.msrb.mxu0 %v8834_v22 }
 0xc37   :  { %8926 = vmatpush.msrb.mxu2 %v21248_v27  ;;  %v12964_v29 = vunpack.i.h.bf16 %v19998_v63  ;;  %v12963_v17 = vunpack.i.l.bf16 %v19998_v63  ;;  %8946 = vmatpush.msra.mxu3 %v19696_v9  ;;  %v9048_v0 = vsel %vm896_vm9, %v12969_v21, %v21259_v36  ;;  %v21262_v27 = vld [vmem:[#allocation10_spill] sm:$0xff]  ;;  %v12987_v59 = vpop.permute.xlu2 %12986  ;;  %v21267_v21 = vunpack.i.l.bf16 %v19725_v55 }
 0xc38   :  { %8967 = vmatpush.msrb.mxu0 %v8829_v50  ;;  %v21263_v41 = vunpack.i.h.bf16 %v21262_v27  ;;  %v21271_v36 = vunpack.i.h.bf16 %v19725_v55 }
 0xc39   :  { %8927 = vmatpush.msrb.mxu2 %v8827_v35  ;;  %8947 = vmatpush.msra.mxu3 %v19703_v24  ;;  %v20029_v9 = vsel %vm1876_vm13, %v12943_v3, %v12963_v17  ;;  %v20036_v57 = vsel %vm1876_vm13, %v12944_v60, %v12964_v29  ;;  %v21254_v24 = vunpack.i.l.bf16 %v19554_v49  ;;  %v20045_v20 = vsel %vm1876_vm13, %v12963_v17, %v12974_v61  ;;  %v21256_v49 = vld [vmem:[#allocation13_spill] sm:$0xff] }
 0xc3a   :  { %11486 = vmatmul.msk.f32.vlgmr.msrb.gmra.mxu2 %vm2738_vm15, %v19849_v33  ;;  %11488 = vmatmul.msk.f32.vlgmr.msrb.gmra.mxu0 %vm2738_vm15, %v19849_v33  ;;  %v12843_v35 = vunpack.i.l.bf16 %v21264_v11 }
 0xc3b   :  { %9107 = vmatpush.msra.mxu2 %v9063_v6  ;;  %9127 = vmatpush.msrb.mxu3 %v19575_v32  ;;  %v9065_v45 = vsel %vm896_vm9, %v21254_v24, %v12968_v13  ;;  %v21257_v32 = vld [vmem:[#allocation96_spill] sm:$0xff]  ;;  %v12718_v6 = vunpack.i.l.bf16 %v21265_v40 }
 0xc3c   :  { %9147 = vmatpush.msra.mxu0 %v9065_v45  ;;  %11487 = vmatmul.msk.f32.vlgmr.msra.gmra.mxu3 %vm2738_vm15, %v19849_v33  ;;  %v11490_v33 = vld [vmem:[%s20519_s13 + $0x18] sm:$0xff]  ;;  %v9062_v50 = vsel %vm896_vm9, %v12873_v39, %v12843_v35 }
 0xc3d   :  { %9108 = vmatpush.msra.mxu2 %v9058_v54  ;;  %9128 = vmatpush.msrb.mxu3 %v21256_v49  ;;  %v21268_v54 = vld [vmem:[#allocation53_spill] sm:$0xff] }
 0xc3e   :  { %v12982_v43 = vpop.permute.xlu1 %12981  ;;  %v20059_v15 = vpop.permute.xlu0 %12911  ;;  %v12658_v49 = vunpack.i.l.bf16 %v21268_v54  ;;  %v21275_v55 = vunpack.i.h.bf16 %v21268_v54 }
 0xc3f   :  { %9109 = vmatpush.msra.mxu2 %v21257_v32  ;;  %9129 = vmatpush.msrb.mxu3 %v21260_v25  ;;  %v12984_v42 = vunpack.i.h.bf16 %v12982_v43  ;;  %v12983_v31 = vunpack.i.l.bf16 %v12982_v43  ;;  %v21269_v32 = vld [vmem:[#allocation102_spill] sm:$0xff]  ;;  %v21270_v43 = vld [vmem:[#allocation105_spill] sm:$0xff]  ;;  %v20106_v27 = vpop.permute.xlu2 %13001 }
 0xc41   :  { %9110 = vmatpush.msra.mxu2 %v9048_v0  ;;  %9130 = vmatpush.msrb.mxu3 %v21261_v8  ;;  %v9060_v22 = vsel %vm896_vm9, %v21263_v41, %v12983_v31  ;;  %v9066_v17 = vsel %vm896_vm9, %v12968_v13, %v12984_v42  ;;  %v9067_v12 = vsel %vm896_vm9, %v12984_v42, %v12874_v58  ;;  %v21272_v0 = vunpack.i.h.bf16 %v21265_v40  ;;  %v21273_v42 = vld [vmem:[#allocation112_spill] sm:$0xff] }
 0xc42   :  { %9148 = vmatpush.msra.mxu0 %v9060_v22  ;;  %11491 = vmatmul.msk.f32.vlgmr.msra.gmra.mxu2 %vm2738_vm15, %v11490_v33  ;;  %v9061_v13 = vsel %vm896_vm9, %v12983_v31, %v12873_v39  ;;  %v12989_v39 = vunpack.i.h.bf16 %v12987_v59  ;;  %v9281_v8 = vsel %vm1141_vm10, %v12658_v49, %v21275_v55  ;;  %v12878_v41 = vunpack.i.l.bf16 %v19935_v46  ;;  %v21276_v22 = vld [vmem:[#allocation110_spill] sm:$0xff]  ;;  %v21291_v55 = vld [vmem:[#allocation87_spill] sm:$0xff] }
 0xc43   :  { %9207 = vmatpush.msra.mxu3 %v12874_v58  ;;  %9167 = vmatpush.msrb.mxu1 %v9066_v17  ;;  %v12988_v58 = vunpack.i.l.bf16 %v12987_v59  ;;  %v9286_v25 = vsel %vm1141_vm10, %v12718_v6, %v21272_v0  ;;  %v21277_v17 = vld [vmem:[#allocation68_spill] sm:$0xff]  ;;  %v21287_v0 = vld [vmem:[#allocation106_spill] sm:$0xff] }
 0xc44   :  { %11492 = vmatmul.msk.f32.vlgmr.msrb.gmra.mxu3 %vm2738_vm15, %v11490_v33  ;;  %9187 = vmatpush.msrb.mxu2 %v9067_v12  ;;  %v21278_v12 = vunpack.i.l.bf16 %v21277_v17  ;;  %v13003_v17 = vunpack.i.l.bf16 %v20106_v27 }
 0xc45   :  { %9208 = vmatpush.msra.mxu3 %v12843_v35  ;;  %9149 = vmatpush.msra.mxu0 %v21266_v26  ;;  %v21279_v35 = vld [vmem:[#allocation94_spill] sm:$0xff]  ;;  %v21281_v26 = vld [vmem:[#allocation15_spill] sm:$0xff] }
 0xc46   :  { %9168 = vmatpush.msrb.mxu1 %v9061_v13  ;;  %9188 = vmatpush.msrb.mxu2 %v9062_v50  ;;  %v12992_v24 = vpop.permute.xlu1 %12991  ;;  %v20083_v45 = vpop.permute.xlu0 %12926  ;;  %v9288_v11 = vsel %vm1141_vm10, %v21278_v12, %v12988_v58  ;;  %v21280_v59 = vunpack.i.h.bf16 %v21279_v35  ;;  %v21282_v13 = vld [vmem:[#allocation92_spill] sm:$0xff]  ;;  %v21293_v12 = vld [vmem:[#allocation103_spill] sm:$0xff] }
 0xc47   :  { %9209 = vmatpush.msra.mxu3 %v21267_v21  ;;  %v12994_v10 = vunpack.i.h.bf16 %v12992_v24  ;;  %9150 = vmatpush.msra.mxu0 %v19737_v23  ;;  %v12993_v62 = vunpack.i.l.bf16 %v12992_v24  ;;  %v21274_v23 = vld [vmem:[#allocation34_spill] sm:$0xff]  ;;  %v12879_v24 = vunpack.i.h.bf16 %v19935_v46  ;;  %v21283_v21 = vld [vmem:[#allocation104_spill] sm:$0xff] }
 0xc48   :  { %9169 = vmatpush.msrb.mxu1 %v21269_v32  ;;  %9189 = vmatpush.msrb.mxu2 %v21270_v43  ;;  %v21284_v54 = vunpack.i.l.bf16 %v21283_v21  ;;  %v21285_v32 = vld [vmem:[#allocation47_spill] sm:$0xff]  ;;  %v21300_v21 = vld [vmem:[#allocation28_spill] sm:$0xff] }
 0xc49   :  { %9210 = vmatpush.msra.mxu3 %v21271_v36  ;;  %11493 = vmatmul.msk.f32.vlgmr.msra.gmra.mxu0 %vm2738_vm15, %v11490_v33  ;;  %v9289_v31 = vsel %vm1141_vm10, %v12988_v58, %v12994_v10  ;;  %v9283_v40 = vsel %vm1141_vm10, %v21280_v59, %v12993_v62  ;;  %v9284_v50 = vsel %vm1141_vm10, %v12993_v62, %v12878_v41  ;;  %v12723_v43 = vunpack.i.l.bf16 %v21285_v32  ;;  %v21286_v58 = vld [vmem:[#allocation95_spill] sm:$0xff]  ;;  %v21288_v62 = vld [vmem:[#allocation21_spill] sm:$0xff] }
 0xc4a   :  { %9330 = vmatpush.msrb.mxu0 %v9286_v25  ;;  %9170 = vmatpush.msrb.mxu1 %v21273_v42  ;;  %v9271_v49 = vsel %vm1141_vm10, %v12989_v39, %v21284_v54  ;;  %v11497_v36 = vld [vmem:[%s20519_s13 + $0x20] sm:$0xff]  ;;  %v12848_v25 = vunpack.i.l.bf16 %v21287_v0  ;;  %v9290_v46 = vsel %vm1141_vm10, %v12994_v10, %v12879_v24  ;;  %v21289_v42 = vld [vmem:[#allocation78_spill] sm:$0xff]  ;;  %v12884_v54 = vunpack.i.h.bf16 %v19965_v51  ;;  %v11504_v0 = vld [vmem:[%s20519_s13 + $0x28] sm:$0xff] }
 0xc4b   :  { %9190 = vmatpush.msrb.mxu2 %v21274_v23  ;;  %11494 = vmatmul.msk.f32.vlgmr.msrb.gmra.mxu1 %vm2738_vm15, %v11490_v33 }
 0xc4c   :  { %11495 = vmatmul.msk.f32.vlgmr.msrb.gmra.mxu2 %vm2738_vm15, %v11490_v33  ;;  %11496 = vmatmul.msk.f32.vlgmr.msra.gmra.mxu3 %vm2738_vm15, %v11490_v33  ;;  %v9285_v23 = vsel %vm1141_vm10, %v12878_v41, %v12848_v25  ;;  %v13004_v41 = vunpack.i.h.bf16 %v20106_v27 }
 0xc4d   :  { %9331 = vmatpush.msrb.mxu0 %v9281_v8  ;;  %9350 = vmatpush.msra.mxu1 %v21276_v22  ;;  %v21292_v8 = vunpack.i.h.bf16 %v21285_v32  ;;  %v21303_v32 = vld [vmem:[#allocation81_spill] sm:$0xff] }
 0xc4e   :  { %9370 = vmatpush.msra.mxu2 %v9288_v11  ;;  %9390 = vmatpush.msrb.mxu3 %v9289_v31  ;;  %v20116_v33 = vpop.permute.xlu1 %12996  ;;  %v20118_v6 = vpop.permute.xlu0 %12936  ;;  %v21290_v31 = vld [vmem:[#allocation85_spill] sm:$0xff] }
 0xc4f   :  { %9332 = vmatpush.msrb.mxu0 %v21281_v26  ;;  %9351 = vmatpush.msra.mxu1 %v21282_v13  ;;  %v12663_v39 = vunpack.i.l.bf16 %v21290_v31  ;;  %v21294_v11 = vunpack.i.h.bf16 %v21290_v31  ;;  %v21296_v26 = vld [vmem:[#allocation45_spill] sm:$0xff]  ;;  %v12938_v28 = vunpack.i.l.bf16 %v20118_v6 }
 0xc50   :  { %9371 = vmatpush.msra.mxu2 %v9283_v40  ;;  %9391 = vmatpush.msrb.mxu3 %v9284_v50  ;;  %v21295_v40 = vld [vmem:[#allocation55_spill] sm:$0xff]  ;;  %v21297_v13 = vunpack.i.l.bf16 %v21296_v26  ;;  %v21298_v50 = vld [vmem:[#allocation8_spill] sm:$0xff] }
 0xc51   :  { %9333 = vmatpush.msrb.mxu0 %v9271_v49  ;;  %9352 = vmatpush.msra.mxu1 %v21286_v58  ;;  %v9504_v35 = vsel %vm1386_vm11, %v12663_v39, %v21294_v11  ;;  %v21301_v49 = vld [vmem:[#allocation109_spill] sm:$0xff] }
 0xc52   :  { %9372 = vmatpush.msra.mxu2 %v21288_v62  ;;  %9392 = vmatpush.msrb.mxu3 %v19773_v30  ;;  %v9509_v30 = vsel %vm1386_vm11, %v12723_v43, %v21292_v8  ;;  %v21304_v43 = vunpack.i.l.bf16 %v21303_v32  ;;  %v21319_v32 = vld [vmem:[#allocation65_spill] sm:$0xff] }
 0xc53   :  { %9410 = vmatpush.msra.mxu0 %v9290_v46  ;;  %9353 = vmatpush.msra.mxu1 %v21289_v42  ;;  %v12883_v42 = vunpack.i.l.bf16 %v19965_v51 }
 0xc54   :  { %11498 = vmatmul.msk.f32.vlgmr.msrb.gmra.mxu0 %vm2738_vm15, %v11497_v36  ;;  %9373 = vmatpush.msra.mxu2 %v19778_v56  ;;  %v20150_v56 = vpop.permute.xlu2 %13006  ;;  %v9494_v58 = vsel %vm1386_vm11, %v13004_v41, %v21304_v43  ;;  %v21320_v43 = vld [vmem:[#allocation76_spill] sm:$0xff] }
 0xc55   :  { %9393 = vmatpush.msrb.mxu3 %v21291_v55  ;;  %9411 = vmatpush.msra.mxu0 %v9285_v23  ;;  %v21307_v23 = vld [vmem:[#allocation97_spill] sm:$0xff] }
 0xc56   :  { %9430 = vmatpush.msrb.mxu1 %v12879_v24  ;;  %9553 = vmatpush.msrb.mxu2 %v9509_v30  ;;  %v13017_v10 = vpop.permute.xlu1 %13016  ;;  %v20145_v22 = vpop.permute.xlu0 %12946  ;;  %v21308_v30 = vld [vmem:[#allocation98_spill] sm:$0xff] }
 0xc57   :  { %11499 = vmatmul.msk.f32.vlgmr.msra.gmra.mxu1 %vm2738_vm15, %v11497_v36  ;;  %11500 = vmatmul.msk.f32.vlgmr.msra.gmra.mxu2 %vm2738_vm15, %v11497_v36  ;;  %v13018_v59 = vunpack.i.l.bf16 %v13017_v10  ;;  %v13019_v24 = vunpack.i.h.bf16 %v13017_v10  ;;  %v12853_v10 = vunpack.i.l.bf16 %v21308_v30 }
 0xc58   :  { %11501 = vmatmul.msk.f32.vlgmr.msrb.gmra.mxu3 %vm2738_vm15, %v11497_v36  ;;  %9412 = vmatpush.msra.mxu0 %v19786_v44  ;;  %v21299_v44 = vunpack.i.l.bf16 %v21298_v50  ;;  %v21314_v50 = vld [vmem:[#allocation100_spill] sm:$0xff] }
 0xc59   :  { %9573 = vmatpush.msra.mxu3 %v21293_v12  ;;  %9431 = vmatpush.msrb.mxu1 %v12848_v25  ;;  %v21305_v25 = vld [vmem:[#allocation64_spill] sm:$0xff]  ;;  %v9512_v31 = vsel %vm1386_vm11, %v13003_v17, %v13019_v24  ;;  %v9513_v39 = vsel %vm1386_vm11, %v13019_v24, %v12884_v54  ;;  %v9507_v12 = vsel %vm1386_vm11, %v13018_v59, %v12883_v42  ;;  %v21316_v24 = vld [vmem:[#allocation31_spill] sm:$0xff] }
 0xc5a   :  { %9554 = vmatpush.msrb.mxu2 %v9504_v35  ;;  %9413 = vmatpush.msra.mxu0 %v19791_v37  ;;  %v9511_v27 = vsel %vm1386_vm11, %v21299_v44, %v13003_v17  ;;  %v21302_v37 = vunpack.i.h.bf16 %v21296_v26  ;;  %v21306_v62 = vunpack.i.h.bf16 %v21305_v25  ;;  %v21310_v17 = vld [vmem:[#allocation83_spill] sm:$0xff]  ;;  %v9508_v11 = vsel %vm1386_vm11, %v12883_v42, %v12853_v10  ;;  %v21311_v35 = vld [vmem:[#allocation108_spill] sm:$0xff] }
 0xc5b   :  { %9574 = vmatpush.msra.mxu3 %v21295_v40  ;;  %9432 = vmatpush.msrb.mxu1 %v21297_v13  ;;  %v21312_v40 = vunpack.i.l.bf16 %v21311_v35  ;;  %v21313_v13 = vld [vmem:[#allocation23_spill] sm:$0xff]  ;;  %v12668_v44 = vunpack.i.l.bf16 %v21314_v50 }
 0xc5c   :  { %9555 = vmatpush.msrb.mxu2 %v21300_v21  ;;  %9593 = vmatpush.msrb.mxu0 %v9511_v27  ;;  %v9506_v46 = vsel %vm1386_vm11, %v21306_v62, %v13018_v59  ;;  %v13022_v51 = vpop.permute.xlu2 %13021  ;;  %v21315_v27 = vld [vmem:[#allocation39_spill] sm:$0xff] }
 0xc5d   :  { %9575 = vmatpush.msra.mxu3 %v21301_v49  ;;  %9433 = vmatpush.msrb.mxu1 %v21302_v37  ;;  %v13023_v21 = vunpack.i.l.bf16 %v13022_v51  ;;  %v13024_v62 = vunpack.i.h.bf16 %v13022_v51  ;;  %v21325_v51 = vld [vmem:[#allocation67_spill] sm:$0xff] }
 0xc5e   :  { %9556 = vmatpush.msrb.mxu2 %v9494_v58  ;;  %11502 = vmatmul.msk.f32.vlgmr.msra.gmra.mxu0 %vm2738_vm15, %v11497_v36  ;;  %v20186_v55 = vpop.permute.xlu1 %13026  ;;  %v20189_v8 = vpop.permute.xlu0 %12976 }
 0xc5f   :  { %9576 = vmatpush.msra.mxu3 %v21307_v23  ;;  %11503 = vmatmul.msk.f32.vlgmr.msrb.gmra.mxu1 %vm2738_vm15, %v11497_v36  ;;  %v21309_v36 = vld [vmem:[#allocation70_spill] sm:$0xff]  ;;  %v13029_v26 = vunpack.i.h.bf16 %v20186_v55  ;;  %v13028_v59 = vunpack.i.l.bf16 %v20186_v55  ;;  %v21323_v55 = vld [vmem:[#allocation84_spill] sm:$0xff] }
 0xc60   :  { %11505 = vmatmul.msk.f32.vlgmr.msrb.gmra.mxu2 %vm2738_vm15, %v11504_v0  ;;  %11506 = vmatmul.msk.f32.vlgmr.msra.gmra.mxu3 %vm2738_vm15, %v11504_v0  ;;  %v12728_v41 = vunpack.i.l.bf16 %v21309_v36  ;;  %v21318_v49 = vunpack.i.h.bf16 %v21309_v36  ;;  %v21324_v30 = vunpack.i.l.bf16 %v21323_v55  ;;  %v21326_v36 = vunpack.i.h.bf16 %v21325_v51 }
 0xc61   :  { %9653 = vmatpush.msrb.mxu3 %v12884_v54  ;;  %9594 = vmatpush.msrb.mxu0 %v9506_v46  ;;  %v21317_v54 = vunpack.i.h.bf16 %v21311_v35  ;;  %v9735_v58 = vsel %vm1631_vm12, %v13023_v21, %v13029_v26  ;;  %v21321_v46 = vunpack.i.h.bf16 %v21314_v50  ;;  %v12889_v35 = vunpack.i.h.bf16 %v20000_v1 }
 0xc62   :  { %9613 = vmatpush.msra.mxu1 %v9512_v31  ;;  %9633 = vmatpush.msra.mxu2 %v9513_v39  ;;  %v9732_v37 = vsel %vm1631_vm12, %v12728_v41, %v21318_v49  ;;  %v12888_v31 = vunpack.i.l.bf16 %v20000_v1  ;;  %v21322_v39 = vld [vmem:[#allocation49_spill] sm:$0xff]  ;;  %v9729_v41 = vsel %vm1631_vm12, %v21326_v36, %v13028_v59  ;;  %v12913_v49 = vunpack.i.l.bf16 %v20059_v15 }
 0xc63   :  { %9654 = vmatpush.msrb.mxu3 %v12853_v10  ;;  %9595 = vmatpush.msrb.mxu0 %v21310_v17  ;;  %v9727_v42 = vsel %vm1631_vm12, %v12668_v44, %v21321_v46  ;;  %v9734_v10 = vsel %vm1631_vm12, %v21324_v30, %v13023_v21  ;;  %v21327_v17 = vld [vmem:[#allocation86_spill] sm:$0xff]  ;;  %v12919_v44 = vunpack.i.h.bf16 %v19906_v18  ;;  %v11511_v21 = vld [vmem:[%s20519_s13 + $0x30] sm:$0xff]  ;;  %v12929_v46 = vunpack.i.h.bf16 %v20083_v45 }
 0xc64   :  { %9614 = vmatpush.msra.mxu1 %v9507_v12  ;;  %9634 = vmatpush.msra.mxu2 %v9508_v11  ;;  %v21328_v12 = vld [vmem:[#allocation71_spill] sm:$0xff]  ;;  %v9730_v11 = vsel %vm1631_vm12, %v13028_v59, %v12888_v31  ;;  %v12908_v59 = vunpack.i.l.bf16 %v19636_v5  ;;  %v21332_v1 = vld [vmem:[#allocation89_spill] sm:$0xff]  ;;  %v9941_v51 = vsel %vm1876_vm13, %v12938_v28, %v12943_v3 }
 0xc65   :  { %9655 = vmatpush.msrb.mxu3 %v21312_v40  ;;  %9596 = vmatpush.msrb.mxu0 %v21313_v13  ;;  %v21329_v40 = vld [vmem:[#allocation82_spill] sm:$0xff] }
 0xc66   :  { %9615 = vmatpush.msra.mxu1 %v21315_v27  ;;  %9635 = vmatpush.msra.mxu2 %v21316_v24  ;;  %v20215_v25 = vpop.permute.xlu1 %13031  ;;  %v20222_v23 = vpop.permute.xlu0 %13011  ;;  %v21330_v13 = vunpack.i.l.bf16 %v21329_v40  ;;  %v12918_v27 = vunpack.i.l.bf16 %v19906_v18  ;;  %v21331_v24 = vld [vmem:[#allocation107_spill] sm:$0xff]  ;;  %v12923_v18 = vunpack.i.l.bf16 %v19663_v47  ;;  %v12998_v40 = vunpack.i.l.bf16 %v20116_v33 }
 0xc67   :  { %9656 = vmatpush.msrb.mxu3 %v21317_v54  ;;  %11507 = vmatmul.msk.f32.vlgmr.msrb.gmra.mxu0 %vm2738_vm15, %v11504_v0  ;;  %v9736_v54 = vsel %vm1631_vm12, %v13029_v26, %v12889_v35 }
 0xc68   :  { %9776 = vmatpush.msra.mxu0 %v9732_v37  ;;  %9616 = vmatpush.msra.mxu1 %v21319_v32  ;;  %v9717_v50 = vsel %vm1631_vm12, %v13024_v62, %v21330_v13  ;;  %v21333_v37 = vld [vmem:[#allocation80_spill] sm:$0xff]  ;;  %v12928_v32 = vunpack.i.l.bf16 %v20083_v45  ;;  %v9950_v45 = vsel %vm1876_vm13, %v12923_v18, %v12924_v19 }
 0xc69   :  { %9636 = vmatpush.msra.mxu2 %v21320_v43  ;;  %11508 = vmatmul.msk.f32.vlgmr.msra.gmra.mxu1 %vm2738_vm15, %v11504_v0  ;;  %v9731_v43 = vsel %vm1631_vm12, %v12888_v31, %v12908_v59  ;;  %v12933_v31 = vunpack.i.l.bf16 %v19933_v14  ;;  %v12973_v14 = vunpack.i.l.bf16 %v19992_v4 }
 0xc6a   :  { %11509 = vmatmul.msk.f32.vlgmr.msra.gmra.mxu2 %vm2738_vm15, %v11504_v0  ;;  %11510 = vmatmul.msk.f32.vlgmr.msrb.gmra.mxu3 %vm2738_vm15, %v11504_v0  ;;  %v20232_v0 = vpop.permute.xlu2 %13041 }
 0xc6b   :  { %9777 = vmatpush.msra.mxu0 %v9727_v42  ;;  %9796 = vmatpush.msrb.mxu1 %v21322_v39  ;;  %v9956_v42 = vsel %vm1876_vm13, %v12919_v44, %v12928_v32  ;;  %v13043_v39 = vunpack.i.l.bf16 %v20232_v0  ;;  %v13044_v47 = vunpack.i.h.bf16 %v20232_v0  ;;  %v9945_v19 = vsel %vm1876_vm13, %v12929_v46, %v12933_v31 }
 0xc6c   :  { %9816 = vmatpush.msrb.mxu2 %v9734_v10  ;;  %9836 = vmatpush.msra.mxu3 %v9735_v58  ;;  %v12914_v58 = vunpack.i.h.bf16 %v20059_v15  ;;  %v12939_v15 = vunpack.i.h.bf16 %v20118_v6 }
 0xc6d   :  { %9778 = vmatpush.msra.mxu0 %v21327_v17  ;;  %9797 = vmatpush.msrb.mxu1 %v21328_v12  ;;  %v9957_v30 = vsel %vm1876_vm13, %v12928_v32, %v13043_v39  ;;  %v9940_v10 = vsel %vm1876_vm13, %v13044_v47, %v12938_v28 }
 0xc6e   :  { %9817 = vmatpush.msrb.mxu2 %v9729_v41  ;;  %9837 = vmatpush.msra.mxu3 %v9730_v11  ;;  %v20261_v26 = vpop.permute.xlu1 %13056  ;;  %v20263_v62 = vpop.permute.xlu0 %13036  ;;  %v9946_v5 = vsel %vm1876_vm13, %v12933_v31, %v12939_v15  ;;  %v12948_v41 = vunpack.i.l.bf16 %v20145_v22 }
 0xc6f   :  { %9779 = vmatpush.msra.mxu0 %v9717_v50  ;;  %9798 = vmatpush.msrb.mxu1 %v21331_v24  ;;  %v13058_v55 = vunpack.i.l.bf16 %v20261_v26  ;;  %v13059_v6 = vunpack.i.h.bf16 %v20261_v26  ;;  %v13013_v24 = vunpack.i.l.bf16 %v20222_v23 }
 0xc70   :  { %9818 = vmatpush.msrb.mxu2 %v21332_v1  ;;  %9838 = vmatpush.msra.mxu3 %v19878_v48  ;;  %v9955_v48 = vsel %vm1876_vm13, %v12918_v27, %v12919_v44  ;;  %v9954_v50 = vsel %vm1876_vm13, %v12948_v41, %v12973_v14  ;;  %v12979_v44 = vunpack.i.h.bf16 %v20189_v8 }
 0xc71   :  { %9856 = vmatpush.msrb.mxu0 %v9736_v54  ;;  %9799 = vmatpush.msrb.mxu1 %v21333_v37  ;;  %v9952_v36 = vsel %vm1876_vm13, %v12934_v34, %v13058_v55  ;;  %v9958_v0 = vsel %vm1876_vm13, %v13043_v39, %v13059_v6  ;;  %v12978_v34 = vunpack.i.l.bf16 %v20189_v8  ;;  %v9953_v13 = vsel %vm1876_vm13, %v13058_v55, %v12948_v41  ;;  %v11525_v39 = vld [vmem:[%s20519_s13 + $0x40] sm:$0xff]  ;;  %v8712_v41 = vpop.f32.mrf.mxu0 }
 0xc72   :  { %11512 = vmatmul.msk.f32.vlgmr.msra.gmra.mxu0 %vm2738_vm15, %v11511_v21  ;;  %9819 = vmatpush.msrb.mxu2 %v19883_v38  ;;  %v9726_v38 = vsel %vm1631_vm12, %v12899_v52, %v12913_v49  ;;  %v9721_v52 = vsel %vm1631_vm12, %v12909_v16, %v12914_v58  ;;  %v12949_v16 = vunpack.i.h.bf16 %v20145_v22  ;;  %v9947_v22 = vsel %vm1876_vm13, %v12939_v15, %v12944_v60 }
 0xc73   :  { %9839 = vmatpush.msra.mxu3 %v19895_v53  ;;  %9857 = vmatpush.msrb.mxu0 %v9731_v43  ;;  %v20271_v53 = vpop.permute.xlu2 %13046  ;;  %v9949_v7 = vsel %vm1876_vm13, %v12964_v29, %v12978_v34  ;;  %v13009_v60 = vunpack.i.h.bf16 %v20150_v56  ;;  %v13034_v29 = vunpack.i.h.bf16 %v20215_v25 }
 0xc74   :  { %9876 = vmatpush.msra.mxu1 %v12889_v35  ;;  %9999 = vmatpush.msra.mxu2 %v9955_v48  ;;  %v9959_v17 = vsel %vm1876_vm13, %v13059_v6, %v12949_v16  ;;  %v12999_v35 = vunpack.i.h.bf16 %v20116_v33  ;;  %v13008_v33 = vunpack.i.l.bf16 %v20150_v56  ;;  %v13014_v56 = vunpack.i.h.bf16 %v20222_v23 }
 0xc75   :  { %11513 = vmatmul.msk.f32.vlgmr.msrb.gmra.mxu1 %vm2738_vm15, %v11511_v21  ;;  %11514 = vmatmul.msk.f32.vlgmr.msrb.gmra.mxu2 %vm2738_vm15, %v11511_v21  ;;  %v10174_v48 = vsel %vm2121_vm14, %v13009_v60, %v13034_v29 }
 0xc76   :  { %11515 = vmatmul.msk.f32.vlgmr.msra.gmra.mxu3 %vm2738_vm15, %v11511_v21  ;;  %9858 = vmatpush.msrb.mxu0 %v9726_v38  ;;  %v20308_v12 = vpop.permute.xlu1 %13066  ;;  %v20311_v11 = vpop.permute.xlu0 %13051  ;;  %v10178_v63 = vsel %vm2121_vm14, %v12998_v40, %v12999_v35  ;;  %v10173_v4 = vsel %vm2121_vm14, %v13008_v33, %v13009_v60 }
 0xc77   :  { %10019 = vmatpush.msrb.mxu3 %v9956_v42  ;;  %9877 = vmatpush.msra.mxu1 %v12908_v59  ;;  %v13069_v27 = vunpack.i.h.bf16 %v20308_v12  ;;  %v13053_v59 = vunpack.i.l.bf16 %v20311_v11  ;;  %v13054_v23 = vunpack.i.h.bf16 %v20311_v11  ;;  %v13048_v42 = vunpack.i.l.bf16 %v20271_v53 }
 0xc78   :  { %10000 = vmatpush.msra.mxu2 %v9950_v45  ;;  %9859 = vmatpush.msrb.mxu0 %v9721_v52 }
 0xc79   :  { %10020 = vmatpush.msrb.mxu3 %v19950_v2  ;;  %9878 = vmatpush.msra.mxu1 %v12913_v49  ;;  %v11518_v2 = vld [vmem:[%s20519_s13 + $0x38] sm:$0xff]  ;;  %v13039_v49 = vunpack.i.h.bf16 %v20263_v62  ;;  %v10182_v55 = vsel %vm2121_vm14, %v13069_v27, %v13054_v23 }
 0xc7a   :  { %10001 = vmatpush.msra.mxu2 %v9945_v19  ;;  %10039 = vmatpush.msra.mxu0 %v9957_v30 }
 0xc7b   :  { %10021 = vmatpush.msrb.mxu3 %v9946_v5  ;;  %9879 = vmatpush.msra.mxu1 %v12914_v58  ;;  %v20316_v3 = vpop.permute.xlu2 %13061 }
 0xc7c   :  { %10002 = vmatpush.msra.mxu2 %v9940_v10  ;;  %11516 = vmatmul.msk.f32.vlgmr.msrb.gmra.mxu0 %vm2738_vm15, %v11511_v21  ;;  %v13063_v8 = vunpack.i.l.bf16 %v20316_v3  ;;  %v13064_v32 = vunpack.i.h.bf16 %v20316_v3 }
 0xc7d   :  { %10022 = vmatpush.msrb.mxu3 %v9941_v51  ;;  %11517 = vmatmul.msk.f32.vlgmr.msra.gmra.mxu1 %vm2738_vm15, %v11511_v21  ;;  %v13068_v21 = vunpack.i.l.bf16 %v20308_v12  ;;  %v8549_v51 = vpop.f32.mrf.mxu2 }
 0xc7e   :  { %11519 = vmatmul.msk.f32.vlgmr.msra.gmra.mxu2 %vm2738_vm15, %v11518_v2  ;;  %11520 = vmatmul.msk.f32.vlgmr.msrb.gmra.mxu3 %vm2738_vm15, %v11518_v2  ;;  %v10181_v1 = vsel %vm2121_vm14, %v13063_v8, %v13069_v27  ;;  %v13072_v54 = vpop.permute.xlu1 %13071  ;;  %v10180_v37 = vsel %vm2121_vm14, %v13013_v24, %v13063_v8  ;;  %v10386_v27 = vld [vmem:[#allocation2 + $0x70] sm:$0xff] }
 0xc7f   :  { %10099 = vmatpush.msra.mxu3 %v12949_v16  ;;  %10040 = vmatpush.msra.mxu0 %v9952_v36  ;;  %v10175_v18 = vsel %vm2121_vm14, %v13034_v29, %v13068_v21  ;;  %v13073_v26 = vunpack.i.l.bf16 %v13072_v54  ;;  %v10176_v46 = vsel %vm2121_vm14, %v13068_v21, %v13053_v59  ;;  %v13074_v38 = vunpack.i.h.bf16 %v13072_v54  ;;  %v8569_v36 = vpop.f32.mrf.mxu3  ;;  %v10385_v21 = vld [vmem:[#allocation2 + $0x68] sm:$0xff] }
 0xc80   :  { %10059 = vmatpush.msrb.mxu1 %v9958_v0  ;;  %10079 = vmatpush.msrb.mxu2 %v9959_v17  ;;  %v8732_v0 = vpop.f32.mrf.mxu1  ;;  %v10381_v54 = vld [vmem:[#allocation2 + $0x48] sm:$0xff] }
 0xc81   :  { %10100 = vmatpush.msra.mxu3 %v12973_v14  ;;  %10041 = vmatpush.msra.mxu0 %v9947_v22  ;;  %v10165_v47 = vsel %vm2121_vm14, %v13048_v42, %v13073_v26 }
 0xc82   :  { %10060 = vmatpush.msrb.mxu1 %v9953_v13  ;;  %10080 = vmatpush.msrb.mxu2 %v9954_v50 }
 0xc83   :  { %10101 = vmatpush.msra.mxu3 %v12978_v34  ;;  %10042 = vmatpush.msra.mxu0 %v20029_v9  ;;  %v13033_v9 = vunpack.i.l.bf16 %v20215_v25  ;;  %v13038_v25 = vunpack.i.l.bf16 %v20263_v62  ;;  %v13077_v43 = vpop.permute.xlu2 %13076  ;;  %v13049_v62 = vunpack.i.h.bf16 %v20271_v53 }
 0xc84   :  { %10061 = vmatpush.msrb.mxu1 %v20036_v57  ;;  %10081 = vmatpush.msrb.mxu2 %v9949_v7  ;;  %v9944_v57 = vsel %vm1876_vm13, %v12974_v61, %v12979_v44  ;;  %v10179_v61 = vsel %vm2121_vm14, %v12999_v35, %v13013_v24  ;;  %v13078_v28 = vunpack.i.l.bf16 %v13077_v43  ;;  %v13079_v16 = vunpack.i.h.bf16 %v13077_v43 }
 0xc85   :  { %10102 = vmatpush.msra.mxu3 %v12979_v44  ;;  %11521 = vmatmul.msk.f32.vlgmr.msra.gmra.mxu0 %vm2738_vm15, %v11518_v2  ;;  %v10168_v58 = vsel %vm2121_vm14, %v13014_v56, %v13033_v9  ;;  %v10163_v45 = vsel %vm2121_vm14, %v13064_v32, %v13038_v25  ;;  %v10169_v31 = vsel %vm2121_vm14, %v13033_v9, %v13039_v49  ;;  %v10387_v44 = vld [vmem:[#allocation2 + $0x78] sm:$0xff] }
 0xc86   :  { %10222 = vmatpush.msrb.mxu0 %v10178_v63  ;;  %10062 = vmatpush.msrb.mxu1 %v20045_v20  ;;  %v13082_v20 = vpop.permute.xlu0 %13081  ;;  %v10170_v52 = vsel %vm2121_vm14, %v13039_v49, %v13049_v62  ;;  %v10164_v53 = vsel %vm2121_vm14, %v13038_v25, %v13048_v42  ;;  %v10177_v30 = vsel %vm2121_vm14, %v13053_v59, %v13078_v28  ;;  %v10384_v63 = vld [vmem:[#allocation2 + $0x60] sm:$0xff]  ;;  %v10383_v9 = vld [vmem:[#allocation2 + $0x58] sm:$0xff]  ;;  %v10382_v59 = vld [vmem:[#allocation2 + $0x50] sm:$0xff] }
 0xc87   :  { %10082 = vmatpush.msrb.mxu2 %v9944_v57  ;;  %11522 = vmatmul.msk.f32.vlgmr.msrb.gmra.mxu1 %vm2738_vm15, %v11518_v2  ;;  %v13083_v15 = vunpack.i.l.bf16 %v13082_v20  ;;  %v13084_v19 = vunpack.i.h.bf16 %v13082_v20  ;;  %v10171_v6 = vsel %vm2121_vm14, %v13049_v62, %v13074_v38  ;;  %v10166_v10 = vsel %vm2121_vm14, %v13073_v26, %v13079_v16  ;;  %v10380_v25 = vld [vmem:[#allocation2 + $0x40] sm:$0xff]  ;;  %v10378_v20 = vld [vmem:[#allocation2 + $0x30] sm:$0xff]  ;;  %v10403_v26 = vld [vmem:[#allocation2 + $0xf8] sm:$0xff] }
 0xc88   :  { %11523 = vmatmul.msk.f32.vlgmr.msrb.gmra.mxu2 %vm2738_vm15, %v11518_v2  ;;  %11524 = vmatmul.msk.f32.vlgmr.msra.gmra.mxu3 %vm2738_vm15, %v11518_v2  ;;  %v10373_v42 = vld [vmem:[#allocation2 + $0x8] sm:$0xff] }
 0xc89   :  { %10223 = vmatpush.msrb.mxu0 %v10173_v4  ;;  %10242 = vmatpush.msra.mxu1 %v10179_v61  ;;  %v10172_v5 = vsel %vm2121_vm14, %v13074_v38, %v13083_v15  ;;  %v10167_v2 = vsel %vm2121_vm14, %v13079_v16, %v13084_v19  ;;  %v10379_v4 = vld [vmem:[#allocation2 + $0x38] sm:$0xff]  ;;  %v10374_v38 = vld [vmem:[#allocation2 + $0x10] sm:$0xff] }
 0xc8a   :  { %10262 = vmatpush.msra.mxu2 %v10180_v37  ;;  %10282 = vmatpush.msrb.mxu3 %v10181_v1  ;;  %v20392_v50 = vpop.f32.mrf.mxu0  ;;  %v20396_v24 = vpop.f32.mrf.mxu1  ;;  %v10418_v16 = vld [vmem:[#allocation2 + $0x170] sm:$0xff] }
 0xc8b   :  { %10224 = vmatpush.msrb.mxu0 %v10168_v58  ;;  %10243 = vmatpush.msra.mxu1 %v10174_v48  ;;  %v10376_v58 = vld [vmem:[#allocation2 + $0x20] sm:$0xff]  ;;  %v10375_v48 = vld [vmem:[#allocation2 + $0x18] sm:$0xff] }
 0xc8c   :  { %10263 = vmatpush.msra.mxu2 %v10175_v18  ;;  %10283 = vmatpush.msrb.mxu3 %v10176_v46  ;;  %v10377_v18 = vld [vmem:[#allocation2 + $0x28] sm:$0xff] }
 0xc8d   :  { %10225 = vmatpush.msrb.mxu0 %v10163_v45  ;;  %10244 = vmatpush.msra.mxu1 %v10169_v31  ;;  %v10401_v31 = vld [vmem:[#allocation2 + $0xe8] sm:$0xff] }
 0xc8e   :  { %10264 = vmatpush.msra.mxu2 %v10170_v52  ;;  %11526 = vmatmul.msk.f32.vlgmr.msrb.gmra.mxu0 %vm2738_vm15, %v11525_v39  ;;  %v10400_v52 = vld [vmem:[#allocation2 + $0xe0] sm:$0xff] }
 0xc8f   :  { %10302 = vmatpush.msra.mxu0 %v10182_v55  ;;  %10245 = vmatpush.msra.mxu1 %v10164_v53  ;;  %v10451_v55 = vld [vmem:[#allocation2 + $0x278] sm:$0xff] }
 0xc90   :  { %11527 = vmatmul.msk.f32.vlgmr.msra.gmra.mxu1 %vm2738_vm15, %v11525_v39  ;;  %10265 = vmatpush.msra.mxu2 %v10165_v47  ;;  %v10419_v53 = vld [vmem:[#allocation2 + $0x178] sm:$0xff]  ;;  %v10450_v47 = vld [vmem:[#allocation2 + $0x270] sm:$0xff] }
 0xc91   :  { %10303 = vmatpush.msra.mxu0 %v10177_v30  ;;  %10322 = vmatpush.msrb.mxu1 %v13054_v23 }
 0xc92   :  { %10284 = vmatpush.msrb.mxu3 %v10171_v6  ;;  %11528 = vmatmul.msk.f32.vlgmr.msra.gmra.mxu2 %vm2738_vm15, %v11525_v39  ;;  %v10399_v6 = vld [vmem:[#allocation2 + $0xd8] sm:$0xff] }
 0xc93   :  { %10304 = vmatpush.msra.mxu0 %v10172_v5  ;;  %10323 = vmatpush.msrb.mxu1 %v13078_v28  ;;  %v10398_v5 = vld [vmem:[#allocation2 + $0xd0] sm:$0xff] }
 0xc94   :  { %10285 = vmatpush.msrb.mxu3 %v10166_v10  ;;  %10457 = vmatpush.msrb.mxu2 %v10387_v44  ;;  %v10435_v10 = vld [vmem:[#allocation2 + $0x1f8] sm:$0xff] }
 0xc95   :  { %10305 = vmatpush.msra.mxu0 %v10167_v2  ;;  %10324 = vmatpush.msrb.mxu1 %v13083_v15  ;;  %v10402_v15 = vld [vmem:[#allocation2 + $0xf0] sm:$0xff]  ;;  %v10449_v2 = vld [vmem:[#allocation2 + $0x268] sm:$0xff]  ;;  %v10395_v44 = vld [vmem:[#allocation2 + $0xb8] sm:$0xff] }
 0xc96   :  { %11529 = vmatmul.msk.f32.vlgmr.msrb.gmra.mxu3 %vm2738_vm15, %v11525_v39  ;;  %11530 = vmatmul.msk.f32.vlgmr.msra.gmra.mxu0 %vm2738_vm15, %v11525_v39 }
 0xc97   :  { %10325 = vmatpush.msrb.mxu1 %v13084_v19  ;;  %10458 = vmatpush.msrb.mxu2 %v10386_v27 }
 0xc98   :  { %11531 = vmatmul.msk.f32.vlgmr.msrb.gmra.mxu1 %vm2738_vm15, %v11525_v39  ;;  %10477 = vmatpush.msra.mxu3 %v10403_v26  ;;  %v10372_v39 = vld [vmem:[#allocation2] sm:$0xff] }
 0xc99   :  { %10459 = vmatpush.msrb.mxu2 %v10385_v21  ;;  %10497 = vmatpush.msrb.mxu0 %v10419_v53  ;;  %v10432_v21 = vld [vmem:[#allocation2 + $0x1e0] sm:$0xff]  ;;  %v10411_v53 = vld [vmem:[#allocation2 + $0x138] sm:$0xff] }
 0xc9a   :  { %10478 = vmatpush.msra.mxu3 %v10402_v15  ;;  %10517 = vmatpush.msra.mxu1 %v10435_v10  ;;  %v10412_v15 = vld [vmem:[#allocation2 + $0x140] sm:$0xff]  ;;  %v10427_v10 = vld [vmem:[#allocation2 + $0x1b8] sm:$0xff] }
 0xc9b   :  { %10460 = vmatpush.msrb.mxu2 %v10384_v63  ;;  %10498 = vmatpush.msrb.mxu0 %v10418_v16  ;;  %v10446_v63 = vld [vmem:[#allocation2 + $0x250] sm:$0xff] }
 0xc9c   :  { %10479 = vmatpush.msra.mxu3 %v10401_v31  ;;  %v10443_v31 = vld [vmem:[#allocation2 + $0x238] sm:$0xff]  ;;  %v10410_v16 = vld [vmem:[#allocation2 + $0x130] sm:$0xff] }
 0xc9d   :  { %v8589_v17 = vpop.f32.mrf.mxu2  ;;  %v8609_v12 = vpop.f32.mrf.mxu3  ;;  %10461 = vmatpush.msrb.mxu2 %v10383_v9  ;;  %v10394_v9 = vld [vmem:[#allocation2 + $0xb0] sm:$0xff] }
 0xc9e   :  { %v20384_v11 = vadd.f32 %v8712_v41, %v8589_v17  ;;  %v20386_v14 = vadd.f32 %v8732_v0, %v8609_v12  ;;  %10480 = vmatpush.msra.mxu3 %v10400_v52  ;;  %v10417_v41 = vld [vmem:[#allocation2 + $0x168] sm:$0xff]  ;;  %v10434_v0 = vld [vmem:[#allocation2 + $0x1f0] sm:$0xff]  ;;  %v10448_v12 = vld [vmem:[#allocation2 + $0x260] sm:$0xff] }
 0xc9f   :  { %10462 = vmatpush.msrb.mxu2 %v10382_v59  ;;  %10499 = vmatpush.msrb.mxu0 %v10417_v41  ;;  %v10414_v59 = vld [vmem:[#allocation2 + $0x150] sm:$0xff]  ;;  %v10409_v41 = vld [vmem:[#allocation2 + $0x128] sm:$0xff] }
 0xca0   :  { %10481 = vmatpush.msra.mxu3 %v10399_v6  ;;  %10518 = vmatpush.msra.mxu1 %v10434_v0  ;;  %v10442_v6 = vld [vmem:[#allocation2 + $0x230] sm:$0xff] }
 0xca1   :  { %v20406_v1 = vpop.f32.mrf.mxu1  ;;  %10463 = vmatpush.msrb.mxu2 %v10381_v54  ;;  %v10431_v54 = vld [vmem:[#allocation2 + $0x1d8] sm:$0xff]  ;;  %v10426_v0 = vld [vmem:[#allocation2 + $0x1b0] sm:$0xff] }
 0xca2   :  { %10482 = vmatpush.msra.mxu3 %v10398_v5  ;;  %v10390_v5 = vld [vmem:[#allocation2 + $0x90] sm:$0xff] }
 0xca3   :  { %10464 = vmatpush.msrb.mxu2 %v10380_v25  ;;  %v10445_v25 = vld [vmem:[#allocation2 + $0x248] sm:$0xff] }
 0xca5   :  { %v8629_v34 = vpop.f32.mrf.mxu2  ;;  %10465 = vmatpush.msrb.mxu2 %v10379_v4  ;;  %v10393_v4 = vld [vmem:[#allocation2 + $0xa8] sm:$0xff] }
 0xca7   :  { %v8649_v3 = vpop.f32.mrf.mxu3  ;;  %10466 = vmatpush.msrb.mxu2 %v10378_v20  ;;  %v10413_v20 = vld [vmem:[#allocation2 + $0x148] sm:$0xff] }
 0xca9   :  { %10467 = vmatpush.msrb.mxu2 %v10377_v18  ;;  %v10430_v18 = vld [vmem:[#allocation2 + $0x1d0] sm:$0xff] }
 0xcab   :  { %10468 = vmatpush.msrb.mxu2 %v10376_v58 }
 0xcad   :  { %v8672_v22 = vpop.f32.mrf.mxu2  ;;  %10469 = vmatpush.msrb.mxu2 %v10375_v48  ;;  %v10444_v48 = vld [vmem:[#allocation2 + $0x240] sm:$0xff] }
 0xcae   :  { %v20388_v35 = vadd.f32 %v8672_v22, %v8549_v51  ;;  %v10433_v22 = vld [vmem:[#allocation2 + $0x1e8] sm:$0xff] }
 0xcaf   :  { %v8692_v40 = vpop.f32.mrf.mxu3  ;;  %10470 = vmatpush.msrb.mxu2 %v10374_v38  ;;  %10519 = vmatpush.msra.mxu1 %v10433_v22  ;;  %v10392_v38 = vld [vmem:[#allocation2 + $0xa0] sm:$0xff]  ;;  %v10425_v22 = vld [vmem:[#allocation2 + $0x1a8] sm:$0xff] }
 0xcb0   :  { %v20390_v13 = vadd.f32 %v8692_v40, %v8569_v36  ;;  %v10397_v36 = vld [vmem:[#allocation2 + $0xc8] sm:$0xff]  ;;  %v10447_v40 = vld [vmem:[#allocation2 + $0x258] sm:$0xff] }
 0xcb1   :  { %10471 = vmatpush.msrb.mxu2 %v10373_v42  ;;  %10483 = vmatpush.msra.mxu3 %v10397_v36  ;;  %v10429_v42 = vld [vmem:[#allocation2 + $0x1c8] sm:$0xff] }
 0xcb2   :  { %10520 = vmatpush.msra.mxu1 %v10432_v21  ;;  %v10389_v36 = vld [vmem:[#allocation2 + $0x88] sm:$0xff] }
 0xcb3   :  { %10472 = vmatpush.msrb.mxu2 %v10372_v39 }
 0xcb4   :  { %10521 = vmatpush.msra.mxu1 %v10431_v54 }
 0xcb5   :  { %v8752_v7 = vpop.f32.mrf.mxu2  ;;  %10537 = vmatpush.msra.mxu2 %v10451_v55  ;;  %v10391_v55 = vld [vmem:[#allocation2 + $0x98] sm:$0xff] }
 0xcb6   :  { %v20394_v60 = vadd.f32 %v8752_v7, %v8629_v34  ;;  %v10396_v34 = vld [vmem:[#allocation2 + $0xc0] sm:$0xff]  ;;  %10522 = vmatpush.msra.mxu1 %v10430_v18  ;;  %v10405_v18 = vld [vmem:[#allocation2 + $0x108] sm:$0xff] }
 0xcb7   :  { %v8772_v33 = vpop.f32.mrf.mxu3  ;;  %v20402_v56 = vpop.f32.mrf.mxu0  ;;  %10538 = vmatpush.msra.mxu2 %v10450_v47  ;;  %10484 = vmatpush.msra.mxu3 %v10396_v34  ;;  %v10428_v47 = vld [vmem:[#allocation2 + $0x1c0] sm:$0xff] }
 0xcb8   :  { %v20398_v8 = vadd.f32 %v8772_v33, %v8649_v3  ;;  %v10416_v3 = vld [vmem:[#allocation2 + $0x160] sm:$0xff]  ;;  %v10415_v33 = vld [vmem:[#allocation2 + $0x158] sm:$0xff]  ;;  %10523 = vmatpush.msra.mxu1 %v10429_v42  ;;  %v10421_v42 = vld [vmem:[#allocation2 + $0x188] sm:$0xff] }
 0xcb9   :  { %10539 = vmatpush.msra.mxu2 %v10449_v2  ;;  %10500 = vmatpush.msrb.mxu0 %v10416_v3  ;;  %v10441_v2 = vld [vmem:[#allocation2 + $0x228] sm:$0xff]  ;;  %v10388_v34 = vld [vmem:[#allocation2 + $0x80] sm:$0xff] }
 0xcba   :  { %10485 = vmatpush.msra.mxu3 %v10395_v44  ;;  %10524 = vmatpush.msra.mxu1 %v10428_v47  ;;  %v10408_v3 = vld [vmem:[#allocation2 + $0x120] sm:$0xff]  ;;  %v10439_v44 = vld [vmem:[#allocation2 + $0x218] sm:$0xff] }
 0xcbb   :  { %10540 = vmatpush.msra.mxu2 %v10448_v12  ;;  %10501 = vmatpush.msrb.mxu0 %v10415_v33  ;;  %v10440_v12 = vld [vmem:[#allocation2 + $0x220] sm:$0xff] }
 0xcbc   :  { %10486 = vmatpush.msra.mxu3 %v10394_v9  ;;  %10525 = vmatpush.msra.mxu1 %v10427_v10  ;;  %v10424_v9 = vld [vmem:[#allocation2 + $0x1a0] sm:$0xff] }
 0xcbd   :  { %v20400_v29 = vpop.f32.mrf.mxu2  ;;  %10541 = vmatpush.msra.mxu2 %v10447_v40  ;;  %10502 = vmatpush.msrb.mxu0 %v10414_v59  ;;  %v10438_v59 = vld [vmem:[#allocation2 + $0x210] sm:$0xff] }
 0xcbe   :  { %10487 = vmatpush.msra.mxu3 %v10393_v4  ;;  %10526 = vmatpush.msra.mxu1 %v10426_v0  ;;  %v10423_v4 = vld [vmem:[#allocation2 + $0x198] sm:$0xff]  ;;  %v8996_v0 = vadd.f32 %v20402_v56, %v20394_v60 }
 0xcbf   :  { %v20404_v57 = vpop.f32.mrf.mxu3  ;;  %10542 = vmatpush.msra.mxu2 %v10446_v63  ;;  %10503 = vmatpush.msrb.mxu0 %v10413_v20  ;;  %v10407_v63 = vld [vmem:[#allocation2 + $0x118] sm:$0xff]  ;;  %v10437_v20 = vld [vmem:[#allocation2 + $0x208] sm:$0xff] }
 0xcc0   :  { %10488 = vmatpush.msra.mxu3 %v10392_v38  ;;  %10527 = vmatpush.msra.mxu1 %v10425_v22  ;;  %v10436_v38 = vld [vmem:[#allocation2 + $0x200] sm:$0xff]  ;;  %v10352_v22 = vpop.permute.xlu2 %10351 }
 0xcc1   :  { %10543 = vmatpush.msra.mxu2 %v10445_v25  ;;  %10504 = vmatpush.msrb.mxu0 %v10412_v15  ;;  %v10406_v25 = vld [vmem:[#allocation2 + $0x110] sm:$0xff]  ;;  %v10404_v15 = vld [vmem:[#allocation2 + $0x100] sm:$0xff] }
 0xcc2   :  { %10489 = vmatpush.msra.mxu3 %v10391_v55  ;;  %10528 = vmatpush.msra.mxu1 %v10424_v9  ;;  %v8992_v55 = vadd.f32 %v20392_v50, %v20388_v35 }
 0xcc3   :  { %10544 = vmatpush.msra.mxu2 %v10444_v48  ;;  %10505 = vmatpush.msrb.mxu0 %v10411_v53  ;;  %v10422_v48 = vld [vmem:[#allocation2 + $0x190] sm:$0xff]  ;;  %v10420_v53 = vld [vmem:[#allocation2 + $0x180] sm:$0xff] }
 0xcc4   :  { %10490 = vmatpush.msra.mxu3 %v10390_v5  ;;  %10529 = vmatpush.msra.mxu1 %v10423_v4 }
 0xcc5   :  { %v20410_v61 = vpop.f32.mrf.mxu2  ;;  %10545 = vmatpush.msra.mxu2 %v10443_v31  ;;  %10506 = vmatpush.msrb.mxu0 %v10410_v16  ;;  %v10452_v31 = vld [vmem:[#allocation2 + $0x280] sm:$0xff] }
 0xcc6   :  { %v20408_v49 = vpop.f32.mrf.mxu0  ;;  %10491 = vmatpush.msra.mxu3 %v10389_v36  ;;  %10530 = vmatpush.msra.mxu1 %v10422_v48  ;;  %v9215_v5 = vadd.f32 %v20410_v61, %v8992_v55  ;;  %v8997_v61 = vadd.f32 %v20406_v1, %v20398_v8 }
 0xcc7   :  { %v20412_v23 = vpop.f32.mrf.mxu3  ;;  %10546 = vmatpush.msra.mxu2 %v10442_v6  ;;  %10507 = vmatpush.msrb.mxu0 %v10409_v41  ;;  %v8993_v6 = vadd.f32 %v20396_v24, %v20390_v13  ;;  %v8994_v24 = vadd.f32 %v20400_v29, %v20384_v11 }
 0xcc8   :  { %v20414_v37 = vpop.f32.mrf.mxu1  ;;  %10492 = vmatpush.msra.mxu3 %v10388_v34  ;;  %10531 = vmatpush.msra.mxu1 %v10421_v42 }
 0xcc9   :  { %10547 = vmatpush.msra.mxu2 %v10441_v2  ;;  %10508 = vmatpush.msrb.mxu0 %v10408_v3  ;;  %v9216_v2 = vadd.f32 %v20412_v23, %v8993_v6  ;;  %v9217_v60 = vadd.f32 %v20408_v49, %v8994_v24 }
 0xcca   :  { %10572 = vmatpush.msrb.mxu3 %v10452_v31  ;;  %10532 = vmatpush.msra.mxu1 %v10420_v53 }
 0xccb   :  { %10548 = vmatpush.msra.mxu2 %v10440_v12  ;;  %10509 = vmatpush.msrb.mxu0 %v10407_v63 }
 0xccd   :  { %10549 = vmatpush.msra.mxu2 %v10439_v44  ;;  %10510 = vmatpush.msrb.mxu0 %v10406_v25 }
 0xccf   :  { %v20418_v43 = vpop.f32.mrf.mxu2  ;;  %v20420_v62 = vpop.f32.mrf.mxu3  ;;  %10550 = vmatpush.msra.mxu2 %v10438_v59  ;;  %10511 = vmatpush.msrb.mxu0 %v10405_v18 }
 0xcd0   :  { %v9219_v23 = vadd.f32 %v20418_v43, %v8996_v0  ;;  %v21336_v0 = vld [vmem:[#allocation63_spill] sm:$0xff] }
 0xcd1   :  { %v20416_v32 = vpop.f32.mrf.mxu0  ;;  %10551 = vmatpush.msra.mxu2 %v10437_v20  ;;  %10512 = vmatpush.msrb.mxu0 %v10404_v15 }
 0xcd2   :  { %v9438_v36 = vadd.f32 %v20416_v32, %v9215_v5 }
 0xcd3   :  { %10552 = vmatpush.msra.mxu2 %v10436_v38  ;;  %v21334_v38 = vld [vmem:[#allocation59_spill] sm:$0xff] }
 0xcd4   :  { %v20422_v46 = vpop.f32.mrf.mxu1 }
 0xcd5   :  { %v9439_v35 = vadd.f32 %v20422_v46, %v9216_v2 }
 0xcda   :  { %v20426_v28 = vpop.f32.mrf.mxu2 }
 0xcdb   :  { %v20424_v45 = vpop.f32.mrf.mxu0  ;;  %v20428_v19 = vpop.f32.mrf.mxu3  ;;  %v9440_v1 = vadd.f32 %v20426_v28, %v9217_v60  ;;  %v21339_v60 = vld [vmem:[#allocation62_spill] sm:$0xff] }
 0xcdc   :  { %v20430_v30 = vpop.f32.mrf.mxu1  ;;  %v9442_v34 = vadd.f32 %v20424_v45, %v9219_v23 }
 0xce3   :  { %v20434_v17 = vpop.f32.mrf.mxu2  ;;  %v20436_v27 = vpop.f32.mrf.mxu3 }
 0xce4   :  { %v20432_v51 = vpop.f32.mrf.mxu0  ;;  %v9661_v50 = vadd.f32 %v20434_v17, %v9438_v36  ;;  %v9662_v12 = vadd.f32 %v20436_v27, %v9439_v35  ;;  %v8995_v17 = vadd.f32 %v20404_v57, %v20386_v14  ;;  %v10340_v27 = vpop.permute.xlu1 %10339 }
 0xce6   :  { %v20438_v7 = vpop.f32.mrf.mxu1  ;;  %v9218_v8 = vadd.f32 %v20414_v37, %v8995_v17 }
 0xce8   :  { %v9441_v44 = vadd.f32 %v20428_v19, %v9218_v8 }
 0xcea   :  { %v9664_v59 = vadd.f32 %v20438_v7, %v9441_v44  ;;  %v21335_v7 = vld [vmem:[#allocation60_spill] sm:$0xff] }
 0xced   :  { %v20442_v26 = vpop.f32.mrf.mxu2  ;;  %v20444_v39 = vpop.f32.mrf.mxu3 }
 0xcee   :  { %v9665_v14 = vadd.f32 %v20442_v26, %v9442_v34 }
 0xcef   :  { %v20440_v58 = vpop.f32.mrf.mxu0 }
 0xcf0   :  { %v9884_v13 = vadd.f32 %v20440_v58, %v9661_v50  ;;  %v9220_v58 = vadd.f32 %v20420_v62, %v8997_v61  ;;  %v9663_v62 = vadd.f32 %v20432_v51, %v9440_v1  ;;  %v21337_v61 = vld [vmem:[#allocation61_spill] sm:$0xff] }
 0xcf2   :  { %v20446_v52 = vpop.f32.mrf.mxu1  ;;  %v9443_v3 = vadd.f32 %v20430_v30, %v9220_v58 }
 0xcf3   :  { %v9885_v32 = vadd.f32 %v20446_v52, %v9662_v12 }
 0xcf4   :  { %v9666_v63 = vadd.f32 %v20444_v39, %v9443_v3 }
 0xcf8   :  { %v20450_v33 = vpop.f32.mrf.mxu2 }
 0xcf9   :  { %v20448_v40 = vpop.f32.mrf.mxu0  ;;  %v20454_v54 = vpop.f32.mrf.mxu3  ;;  %v9886_v30 = vadd.f32 %v20450_v33, %v9663_v62 }
 0xcfa   :  { %v20452_v21 = vpop.f32.mrf.mxu1  ;;  %v9888_v37 = vadd.f32 %v20448_v40, %v9665_v14  ;;  %v9887_v19 = vadd.f32 %v20454_v54, %v9664_v59 }
 0xcfb   :  { %v9889_v26 = vadd.f32 %v20452_v21, %v9666_v63 }
 0xd01   :  { %v10004_v16 = vpop.f32.mrf.mxu2  ;;  %v10024_v41 = vpop.f32.mrf.mxu3 }
 0xd02   :  { %v10044_v47 = vpop.f32.mrf.mxu0  ;;  %v10107_v46 = vadd.f32 %v10004_v16, %v9884_v13  ;;  %v10108_v11 = vadd.f32 %v10024_v41, %v9885_v32  ;;  %v21338_v32 = vld [vmem:[#allocation50_spill] sm:$0xff] }
 0xd03   :  { %v10109_v18 = vadd.f32 %v10044_v47, %v9886_v30 }
 0xd04   :  { %v10064_v10 = vpop.f32.mrf.mxu1 }
 0xd05   :  { %v10110_v42 = vadd.f32 %v10064_v10, %v9887_v19 }
 0xd0b   :  { %v10227_v56 = vpop.f32.mrf.mxu0  ;;  %v10084_v43 = vpop.f32.mrf.mxu2 }
 0xd0c   :  { %v10330_v29 = vadd.f32 %v10227_v56, %v10107_v46  ;;  %v10104_v45 = vpop.f32.mrf.mxu3  ;;  %v10111_v25 = vadd.f32 %v10084_v43, %v9888_v37 }
 0xd0d   :  { %v10247_v52 = vpop.f32.mrf.mxu1  ;;  %v10112_v48 = vadd.f32 %v10104_v45, %v9889_v26 }
 0xd0e   :  { %v10342_v57 = vmul.f32 %v10340_v27, %v10330_v29  ;;  %v10331_v49 = vadd.f32 %v10247_v52, %v10108_v11 }
 0xd10   :  { %v10354_v9 = vadd.f32 %v10352_v22, %v10342_v57  ;;  %v10343_v28 = vmul.f32 %v10340_v27, %v10331_v49  ;;  %v10577_v57 = vld [vmem:[%s20522_s16] sm:$0xff]  ;;  %v10582_v49 = vpop.permute.xlu0 %10581 }
 0xd12   :  { %v10360_v4 = vmax.f32 %v10354_v9, 0.0  ;;  %v10355_v20 = vadd.f32 %v10352_v22, %v10343_v28 }
 0xd13   :  { %v10307_v51 = vpop.f32.mrf.mxu0 }
 0xd14   :  { %v10366_v39 = vmul.f32 %v10360_v4, %v21334_v38  ;;  %v10361_v15 = vmax.f32 %v10355_v20, 0.0  ;;  %v10334_v40 = vadd.f32 %v10307_v51, %v10111_v25 }
 0xd15   :  { %v10267_v31 = vpop.f32.mrf.mxu2  ;;  %v10327_v55 = vpop.f32.mrf.mxu1 }
 0xd16   :  { %v10367_v53 = vmul.f32 %v10361_v15, %v21335_v7  ;;  %v10346_v33 = vmul.f32 %v10340_v27, %v10334_v40  ;;  %v10332_v6 = vadd.f32 %v10267_v31, %v10109_v18  ;;  %v10335_v21 = vadd.f32 %v10327_v55, %v10112_v48  ;;  %10473 = vmatmul.f32.vlgmr.msrb.gmra.mxu2 %v10366_v39 }
 0xd18   :  { %v10358_v16 = vadd.f32 %v10352_v22, %v10346_v33  ;;  %v10344_v2 = vmul.f32 %v10340_v27, %v10332_v6  ;;  %v10347_v54 = vmul.f32 %v10340_v27, %v10335_v21  ;;  %10493 = vmatmul.f32.vlgmr.msra.gmra.mxu3 %v10367_v53 }
 0xd19   :  { %v10287_v5 = vpop.f32.mrf.mxu3 }
 0xd1a   :  { %v10333_v47 = vadd.f32 %v10287_v5, %v10110_v42  ;;  %v10364_v36 = vmax.f32 %v10358_v16, 0.0  ;;  %v10356_v41 = vadd.f32 %v10352_v22, %v10344_v2  ;;  %v10359_v35 = vadd.f32 %v10352_v22, %v10347_v54 }
 0xd1c   :  { %v10345_v50 = vmul.f32 %v10340_v27, %v10333_v47  ;;  %v10370_v10 = vmul.f32 %v10364_v36, %v21336_v0  ;;  %v10362_v12 = vmax.f32 %v10356_v41, 0.0  ;;  %v10365_v13 = vmax.f32 %v10359_v35, 0.0 }
 0xd1e   :  { %v10357_v24 = vadd.f32 %v10352_v22, %v10345_v50  ;;  %v10368_v23 = vmul.f32 %v10362_v12, %v21337_v61  ;;  %v10371_v46 = vmul.f32 %v10365_v13, %v21338_v32  ;;  %10553 = vmatmul.f32.vlgmr.msra.gmra.mxu2 %v10370_v10 }
 0xd20   :  { %v10363_v17 = vmax.f32 %v10357_v24, 0.0  ;;  %10513 = vmatmul.f32.vlgmr.msrb.gmra.mxu0 %v10368_v23  ;;  %11532 = vmatmul.msk.f32.vlgmr.msrb.gmra.mxu3 %vm10453_vm1, %v10371_v46 }
 0xd22   :  { %v10369_v56 = vmul.f32 %v10363_v17, %v21339_v60 }
 0xd24   :  { %10533 = vmatmul.f32.vlgmr.msra.gmra.mxu1 %v10369_v56 }
 0xd99   :  { %v10474_v58 = vpop.f32.mrf.mxu2 }
 0xd9b   :  { %v10494_v27 = vpop.f32.mrf.mxu3 }
 0xd9c   :  { %v10495_v34 = vadd.f32 %v10494_v27, %v10474_v58 }
 0xd9d   :  { %v10514_v11 = vpop.f32.mrf.mxu0 }
 0xd9e   :  { %v10515_v29 = vadd.f32 %v10514_v11, %v10495_v34 }
 0xda1   :  { %v10534_v8 = vpop.f32.mrf.mxu1  ;;  %v10554_v43 = vpop.f32.mrf.mxu2 }
 0xda2   :  { %v10535_v1 = vadd.f32 %v10534_v8, %v10515_v29 }
 0xda3   :  { %v10574_v3 = vpop.f32.mrf.mxu3 }
 0xda4   :  { %v10555_v52 = vadd.f32 %v10554_v43, %v10535_v1 }
 0xda6   :  { %v10575_v14 = vadd.f32 %v10574_v3, %v10555_v52 }
 0xda8   :  { %10602 = vmatpush.msra.mxu0 %v10575_v14 }
 0xda9   :  { %11533 = vmatmul.msk.f32.vlgmr.msra.gmra.mxu0 %vm10453_vm1, %v10577_v57 }
 0xe26   :  { %v10604_v22 = vpop.f32.mrf.mxu0 }
 0xe27   :  { %v10605_v44 = vadd.f32 %v10604_v22, %v10582_v49 }
 0xe29   :  { %v11534_v62 = vmul.f32 -1.442695, %v10605_v44 }
 0xe2b   :  { %13085 = vpow2.f32 %v11534_v62 }
 0xe31   :  { %v13086_v45 = vpop.eup %13085 }
 0xe32   :  { %v10610_v63 = vadd.f32 1.0, %v13086_v45 }
 0xe34   :  { %13087 = vrcp.f32 %v10610_v63  ;;  %v10622_v59 = vand.u32 2147483648, %v10610_v63  ;;  %v10620_v26 = vand.u32 2147483647, %v10610_v63  ;;  %vm10616_vm3 = vweird.f32 %v10610_v63 }
 0xe36   :  { %v10623_v4 = vor.u32 1.1754944e-38, %v10622_v59  ;;  %vm10621_vm6 = vcmp.eq.f32.partialorder %v10620_v26, 8.507059e+37 }
 0xe3a   :  { %v13088_v37 = vpop.eup %13087 }
 0xe3b   :  { %v10612_v9 = vmul.f32 %v13088_v37, %v10610_v63  ;;  %vm10617_vm2 = vweird.f32 %v13088_v37 }
 0xe3c   :  { %vm10618_vm4 = vmor %vm10616_vm3, %vm10617_vm2 }
 0xe3d   :  { %v10613_v28 = vsub.f32 1.0, %v10612_v9 }
 0xe3f   :  { %v10614_v30 = vmul.f32 %v13088_v37, %v10613_v28 }
 0xe41   :  { %v10615_v25 = vadd.f32 %v13088_v37, %v10614_v30 }
 0xe43   :  { %v10619_v20 = vsel %vm10618_vm4, %v13088_v37, %v10615_v25 }
 0xe44   :  { %v10624_v19 = vsel %vm10621_vm6, %v10623_v4, %v10619_v20 }
 0xe45   :  { %10627 = vst.msk [vmem:[%s20524_s18] sm:$0xff] %vm10626_vm5, %v10624_v19 }
 0xe46   :  { %10632 = vsyncpa [#allocation3], 1 }

</bundles_post_ra>
